<compile_context>
chip_gen: v7x
topology: tpu7x:2x2x1
jax: 0.10.0
libtpu: 0.0.40
codegen_flags: <defaults>
</compile_context>

<pallas_src>
import functools

import numpy as np
import jax
import jax.numpy as jnp
from jax.experimental import pallas as pl
from jax.experimental.pallas import tpu as pltpu

# ----------------------- hyperparameters (stand-ins for hp.*) ----------------
BATCH_SIZE = 2            # hp.batch_size
SEQ_SIZE = 8              # hp.wave_sequence_length  (LSTM input feature size)
SEQ_AMOUNT = 16           # hp.wave_seq_amount       (LSTM sequence length)
HIDDEN_SIZE = 32          # hp.hidden_size
N_LAYERS = 2              # hp.num_layers_spectra
WAVE_AMOUNT = 64          # hp.observation_amount
OUTPUT_AMOUNT = 16        # hp.wave_output
HIDDEN_LAYER_SIZE = WAVE_AMOUNT // 2
CONV_FC_HIDDEN = 128      # stands in for the hard-coded 8000 of the reference

BP = 8                    # padded batch rows (one sublane tile)
GATES = 4 * HIDDEN_SIZE   # 128 packed gate columns (i, f, g, o) -> one vreg

# derived conv-path shapes (mirror of the reference arithmetic at small dims)
_ROWS = (BATCH_SIZE * SEQ_AMOUNT * 2 * HIDDEN_SIZE) // WAVE_AMOUNT   # 32
_OH1 = (_ROWS - 5) // 2 + 1          # 14
_OW1 = (WAVE_AMOUNT - 5) // 2 + 1    # 30
_OH2 = (_OH1 - 5) // 2 + 1           # 5
_OW2 = (_OW1 - 5) // 2 + 1           # 13
_POOL_W = _OW2 // 4                  # 3   (AvgPool2d((1,4)) floor mode)
_NPIX2 = _OH2 * _OW2                 # 65  conv2 spatial positions
_BLK = 128                           # lane-padded conv2 spatial block width
FLAT_DIM = 8 * _OH2 * _POOL_W        # 120 (stands in for the hard-coded 14976)

VMEM_SPEC = pl.BlockSpec(memory_space=pltpu.MemorySpace.VMEM)


# ------------------------------- Pallas kernels -------------------------------
def lstm_layer_kernel(x_ref, wih_ref, whh_ref, b_ref, h0_ref, c0_ref,
                      ys_ref, hf_ref, cf_ref, gx_ref):
    """One direction (grid dim 0) of a bidirectional LSTM layer.

    x_ref   (T*BP, IN)  time-major rows, shared by both directions
    wih_ref (IN, 128)   packed gate columns [i|f|g|o] (32 lanes each)
    whh_ref (32, 128)
    b_ref   (1, 128)    b_ih + b_hh
    h0/c0   (8, 32)
    ys_ref  (T*BP, 32)  hidden sequence, already in forward-time order
    gx_ref  (T*BP, 128) scratch: hoisted input projection
    """
    d = pl.program_id(0)
    H = HIDDEN_SIZE
    # Hoisted input projection for all timesteps: a single matmul.
    gx_ref[...] = (jnp.dot(x_ref[...], wih_ref[...],
                           preferred_element_type=jnp.float32) + b_ref[...])
    whh = whh_ref[...]
    n_steps = ys_ref.shape[0] // BP

    def step(s, carry):
        h, c = carry
        # Backward direction walks time in reverse but stores at the original
        # time row, so ys is in forward-time order for both directions.
        t = jnp.where(d == 0, s, n_steps - 1 - s)
        row = pl.multiple_of(t * BP, BP)
        gates = gx_ref[pl.ds(row, BP), :] + jnp.dot(
            h, whh, preferred_element_type=jnp.float32)          # (8, 128)
        i = jax.nn.sigmoid(gates[:, 0 * H:1 * H])
        f = jax.nn.sigmoid(gates[:, 1 * H:2 * H])
        g = jnp.tanh(gates[:, 2 * H:3 * H])
        o = jax.nn.sigmoid(gates[:, 3 * H:4 * H])
        c_new = f * c + i * g
        h_new = o * jnp.tanh(c_new)
        ys_ref[pl.ds(row, BP), :] = h_new
        return (h_new, c_new)

    h_fin, c_fin = jax.lax.fori_loop(0, n_steps, step,
                                     (h0_ref[...], c0_ref[...]), unroll=True)
    hf_ref[...] = h_fin
    cf_ref[...] = c_fin


def conv_head_kernel(p_ref, w1k_ref, b1s_ref, w2c_ref, b2_ref, wfc_ref,
                     bfc_ref, wc1_ref, bc1_ref, wc2a_ref, wc2b_ref, bc2_ref,
                     out_ref):
    """Entire method-3 conv path in one kernel.

    p_ref   (625, 128)    duplicated conv1 patches: row r*25+k (r = conv2 tap
                          (kh,kw), k = conv1 tap (dh,dw)); 65 valid lanes per
                          block, zero-padded to 128 for vreg-aligned slices.
    w1k_ref (100, 625)    kron(I_25, conv1 weight (4,25))
    b1s_ref (100, 1)      conv1 bias repeated per tap
    w2c_ref (8, 100)      conv2 weight permuted to (cout, (kh,kw,cin))
    wfc_ref (8, 128, 128) convfc weight with AvgPool + NCHW flatten folded in;
                          rows 65..127 are zero so lane-pad garbage is inert.
    """
    # conv1 (+ReLU) on the duplicated patch columns: one lane-dense matmul.
    y1 = jnp.maximum(
        jnp.dot(w1k_ref[...], p_ref[...], preferred_element_type=jnp.float32)
        + b1s_ref[...], 0.0)                                      # (100, 128)
    # conv2 (+ReLU): one matmul contracting the (tap, cin) axis.
    y2 = jnp.maximum(
        jnp.dot(w2c_ref[...], y1, preferred_element_type=jnp.float32)
        + b2_ref[...], 0.0)                                       # (8, 128)
    # convfc (+ReLU): AvgPool and flatten already folded into the weights.
    acc = bfc_ref[...]                                            # (1, 128)
    for c in range(y2.shape[0]):
        acc = acc + jnp.dot(y2[c:c + 1, :], wfc_ref[c],
                            preferred_element_type=jnp.float32)
    hfc = jnp.maximum(acc, 0.0)
    # TODO(synk): convfc Dropout treated as identity (eval mode).
    s1 = (jnp.dot(hfc, wc1_ref[...], preferred_element_type=jnp.float32)
          + bc1_ref[...])
    # convfc2 on concat(hfc, s1): split weight -> two matmuls, no in-kernel cat.
    s2 = (jnp.dot(hfc, wc2a_ref[...], preferred_element_type=jnp.float32)
          + jnp.dot(s1, wc2b_ref[...], preferred_element_type=jnp.float32)
          + bc2_ref[...])
    out_ref[0:1, :] = s1
    out_ref[1:2, :] = s2


def linear_kernel(x_ref, w_ref, b_ref, o_ref, *, relu: bool):
    y = (jnp.dot(x_ref[...], w_ref[...], preferred_element_type=jnp.float32)
         + b_ref[...])
    if relu:
        y = jnp.maximum(y, 0.0)
    o_ref[...] = y.astype(o_ref.dtype)


# ------------------------------- Pallas wrappers ------------------------------
def pallas_lstm_layer(x, wih, whh, b, h0p, c0p):
    TB, IN = x.shape
    H, G = HIDDEN_SIZE, GATES
    return pl.pallas_call(
        lstm_layer_kernel,
        grid=(2,),
        out_shape=(jax.ShapeDtypeStruct((2, TB, H), jnp.float32),
                   jax.ShapeDtypeStruct((2, BP, H), jnp.float32),
                   jax.ShapeDtypeStruct((2, BP, H), jnp.float32)),
        in_specs=[
            pl.BlockSpec((TB, IN), lambda d: (0, 0)),      # x shared by dirs
            pl.BlockSpec((None, IN, G), lambda d: (d, 0, 0)),
            pl.BlockSpec((None, H, G), lambda d: (d, 0, 0)),
            pl.BlockSpec((None, 1, G), lambda d: (d, 0, 0)),
            pl.BlockSpec((None, BP, H), lambda d: (d, 0, 0)),
            pl.BlockSpec((None, BP, H), lambda d: (d, 0, 0)),
        ],
        out_specs=(
            pl.BlockSpec((None, TB, H), lambda d: (d, 0, 0)),
            pl.BlockSpec((None, BP, H), lambda d: (d, 0, 0)),
            pl.BlockSpec((None, BP, H), lambda d: (d, 0, 0)),
        ),
        scratch_shapes=[pltpu.VMEM((TB, G), jnp.float32)],
        compiler_params=pltpu.CompilerParams(
            dimension_semantics=("parallel",)),
    )(x, wih, whh, b, h0p, c0p)


def pallas_conv_head(patches, c):
    out = pl.pallas_call(
        conv_head_kernel,
        out_shape=jax.ShapeDtypeStruct((2, OUTPUT_AMOUNT), jnp.float32),
        in_specs=[VMEM_SPEC] * 12,
        out_specs=VMEM_SPEC,
    )(patches, c["w1k"], c["b1s"], c["w2c"], c["b2"], c["wfc"], c["bfc"],
      c["wc1"], c["bc1"], c["wc2a"], c["wc2b"], c["bc2"])
    return out[0:1], out[1:2]


def pallas_linear(x, w, b, relu=False):
    M, N = x.shape[0], w.shape[1]
    return pl.pallas_call(
        functools.partial(linear_kernel, relu=relu),
        out_shape=jax.ShapeDtypeStruct((M, N), jnp.float32),
        in_specs=[VMEM_SPEC, VMEM_SPEC, VMEM_SPEC],
        out_specs=VMEM_SPEC,
    )(x, w, b)


# --------------------------------- XLA glue -----------------------------------
def _conv_patches(spec):
    # spec (32, 64) -> (625, 128): row r*25+k, one 128-lane block per conv2
    # tap r = (kh,kw); lanes 0..64 hold conv1 patch element k=(dh,dw) at conv1
    # output position (2*oh+kh, 2*ow+kw) for (oh,ow) in (5,13); lanes 65..127
    # are zero padding.
    p1 = []
    for dh in range(5):
        for dw in range(5):
            p1.append(spec[dh:dh + 2 * _OH1:2, dw:dw + 2 * _OW1:2])  # (14, 30)
    P1 = jnp.stack(p1, axis=0)                                       # (25,14,30)
    blocks = []
    for kh in range(5):
        for kw in range(5):
            blocks.append(P1[:, kh:kh + 2 * _OH2:2, kw:kw + 2 * _OW2:2]
                          .reshape(25, _NPIX2))                      # (25, 65)
    P2 = jnp.stack(blocks, axis=0)                                   # (25,25,65)
    P2 = jnp.pad(P2, ((0, 0), (0, 0), (0, _BLK - _NPIX2)))           # (25,25,128)
    return P2.reshape(25 * 25, _BLK)


def _make_pool_matrix():
    # AvgPool2d((1,4)) on a (C, OH2, OW2) map flattened to (C, OH2*OW2):
    # column q = oh*OW2 + ow maps to pooled column oh*POOL_W + ow//4 (ow < 12,
    # column 12 dropped — PyTorch floor mode).
    pm = np.zeros((_NPIX2, _OH2 * _POOL_W), np.float32)
    for oh in range(_OH2):
        for ow in range(_POOL_W * 4):
            pm[oh * _OW2 + ow, oh * _POOL_W + ow // 4] = 0.25
    return jnp.asarray(pm)


# ---------------------------------- LSTM ---------------------------------------
def lstm_forward(params, spectra, hidden):
    # TODO(synk): input nn.Dropout and inter-layer LSTM dropout treated as
    # identity (eval mode).
    h0, c0 = hidden                               # (2*N_LAYERS, B, H)
    B, T, IN = spectra.shape
    x = jnp.zeros((T, BP, IN), jnp.float32).at[:, :B, :].set(
        jnp.swapaxes(spectra, 0, 1)).reshape(T * BP, IN)
    h_fin, c_fin = [], []
    for layer in range(N_LAYERS):
        wih, whh, b = params["lstm"][layer]
        h0p = jnp.zeros((2, BP, HIDDEN_SIZE), jnp.float32).at[:, :B, :].set(
            h0[2 * layer:2 * layer + 2])
        c0p = jnp.zeros((2, BP, HIDDEN_SIZE), jnp.float32).at[:, :B, :].set(
            c0[2 * layer:2 * layer + 2])
        ys, hf, cf = pallas_lstm_layer(x, wih, whh, b, h0p, c0p)
        # Next-layer input: fwd/bwd hidden concatenated on the feature axis
        # (already in forward-time order).  Padded batch rows carry garbage
        # but never mix with the real rows.
        x = jnp.concatenate([ys[0], ys[1]], axis=-1)             # (T*BP, 2H)
        h_fin.append(hf[:, :B, :])
        c_fin.append(cf[:, :B, :])
    out = jnp.swapaxes(x.reshape(T, BP, 2 * HIDDEN_SIZE)[:, :B, :], 0, 1)
    return out, (jnp.concatenate(h_fin, 0), jnp.concatenate(c_fin, 0))


# -------------------------------- forward --------------------------------------
def spectranet_forward(params, spectra, hidden, method=3):
    # TODO(synk): nn.Dropout / MultiheadAttention treated as identity / unused
    # in forward (eval mode; attention is never called in the reference).
    out, hidden = lstm_forward(params, spectra, hidden)
    # combine_seqs_to_vector (undefined in source): flatten LSTM output into
    # rows of length WAVE_AMOUNT.
    spec = out.reshape(-1, WAVE_AMOUNT)                           # (32, 64)

    if method == 1:
        s1 = pallas_linear(spec, *params["fc1a"], relu=True)
        s1 = pallas_linear(s1, *params["fc1b"])
        s2 = pallas_linear(jax.lax.stop_gradient(s1), *params["fc2"])
        return jnp.mean(s1, axis=0), jnp.mean(s2, axis=0), hidden
    elif method == 2:
        s1 = pallas_linear(spec, *params["fc1a"], relu=True)
        s1 = pallas_linear(s1, *params["fc1b"])
        return jnp.mean(s1, axis=0), hidden
    else:  # method == 3 (default): one fused conv-head kernel.
        patches = _conv_patches(spec)                             # (625, 128)
        s1, s2 = pallas_conv_head(patches, params["conv_head"])
        return s1, s2, hidden


# ------------------------------ parameter init ---------------------------------
def init_params(key):
    keys = iter(jax.random.split(key, 64))

    def unif(shape, bound):
        return jax.random.uniform(next(keys), shape, jnp.float32, -bound, bound)

    def lin(in_dim, out_dim):
        k = 1.0 / np.sqrt(in_dim)
        return unif((in_dim, out_dim), k), unif((1, out_dim), k)

    # ---- LSTM: packed gate layout, columns [i|f|g|o] of HIDDEN_SIZE each ----
    def lstm_layer(in_dim):
        k = 1.0 / np.sqrt(HIDDEN_SIZE)
        wih = unif((2, in_dim, GATES), k)
        whh = unif((2, HIDDEN_SIZE, GATES), k)
        b = unif((2, 1, GATES), k) + unif((2, 1, GATES), k)      # b_ih + b_hh
        return wih, whh, b

    lstm = [lstm_layer(SEQ_SIZE)] + [lstm_layer(2 * HIDDEN_SIZE)
                                     for _ in range(N_LAYERS - 1)]

    # ---- fused conv head ----------------------------------------------------
    s1b = 1.0 / np.sqrt(1 * 5 * 5)
    w1 = unif((4, 25), s1b)                       # conv1 weight (cout, dh*5+dw)
    b1 = unif((4, 1), s1b)
    w1k = jnp.kron(jnp.eye(25, dtype=jnp.float32), w1)            # (100, 625)
    b1s = jnp.tile(b1, (25, 1))                                   # (100, 1)

    s2b = 1.0 / np.sqrt(4 * 5 * 5)
    w2 = unif((8, 4, 5, 5), s2b)
    b2 = unif((8, 1), s2b)
    w2c = jnp.transpose(w2, (0, 2, 3, 1)).reshape(8, 100)   # (cout,(kh,kw,cin))

    kfc = 1.0 / np.sqrt(FLAT_DIM)
    wfc = unif((FLAT_DIM, CONV_FC_HIDDEN), kfc)                   # (120, 128)
    bfc = unif((1, CONV_FC_HIDDEN), kfc)
    wfc3 = wfc.reshape(8, _OH2 * _POOL_W, CONV_FC_HIDDEN)         # (8, 15, 128)
    # Fold AvgPool2d((1,4)) + NCHW flatten into the convfc weights; pad the
    # conv2-spatial axis 65 -> 128 with zeros so lane-pad garbage is inert.
    wfc_big = jnp.einsum('qm,cmn->cqn', _make_pool_matrix(), wfc3)  # (8,65,128)
    wfc_big = jnp.pad(wfc_big, ((0, 0), (0, _BLK - _NPIX2), (0, 0)))

    wc1, bc1 = lin(CONV_FC_HIDDEN, OUTPUT_AMOUNT)
    wc2, bc2 = lin(CONV_FC_HIDDEN + OUTPUT_AMOUNT, OUTPUT_AMOUNT)
    conv_head = dict(w1k=w1k, b1s=b1s, w2c=w2c, b2=b2, wfc=wfc_big, bfc=bfc,
                     wc1=wc1, bc1=bc1, wc2a=wc2[:CONV_FC_HIDDEN],
                     wc2b=wc2[CONV_FC_HIDDEN:], bc2=bc2)

    return {
        "lstm": lstm,
        "conv_head": conv_head,
        "fc1a": lin(WAVE_AMOUNT, HIDDEN_LAYER_SIZE),
        "fc1b": lin(HIDDEN_LAYER_SIZE, OUTPUT_AMOUNT),
        "fc2": lin(OUTPUT_AMOUNT, OUTPUT_AMOUNT),
    }


# ----------------------------------- main ---------------------------------------
if __name__ == "__main__":
    root = jax.random.PRNGKey(0)
    pkey, xkey = jax.random.split(root)
    params = init_params(pkey)

    spectra = jax.random.normal(xkey, (BATCH_SIZE, SEQ_AMOUNT, SEQ_SIZE),
                                jnp.float32)
    hidden = (jnp.zeros((2 * N_LAYERS, BATCH_SIZE, HIDDEN_SIZE), jnp.float32),
              jnp.zeros((2 * N_LAYERS, BATCH_SIZE, HIDDEN_SIZE), jnp.float32))

    fwd = jax.jit(spectranet_forward, static_argnames=("method",))
    s1, s2, (hn, cn) = fwd(params, spectra, hidden, method=3)
    jax.block_until_ready((s1, s2, hn, cn))

    assert s1.shape == (1, OUTPUT_AMOUNT)
    assert s2.shape == (1, OUTPUT_AMOUNT)
    assert hn.shape == (2 * N_LAYERS, BATCH_SIZE, HIDDEN_SIZE)
    assert cn.shape == (2 * N_LAYERS, BATCH_SIZE, HIDDEN_SIZE)
    print("KERNEL_OK")
</pallas_src>

<mosaic_0001>
module attributes {stable_mosaic.version = 11 : i64} {
  func.func @lstm_layer_kernel(%arg0: i32, %arg1: memref<128x8xf32, #tpu.memory_space<vmem>>, %arg2: memref<1x8x128xf32, #tpu.memory_space<vmem>>, %arg3: memref<1x32x128xf32, #tpu.memory_space<vmem>>, %arg4: memref<1x1x128xf32, #tpu.memory_space<vmem>>, %arg5: memref<1x8x32xf32, #tpu.memory_space<vmem>>, %arg6: memref<1x8x32xf32, #tpu.memory_space<vmem>>, %arg7: memref<1x128x32xf32, #tpu.memory_space<vmem>>, %arg8: memref<1x8x32xf32, #tpu.memory_space<vmem>>, %arg9: memref<1x8x32xf32, #tpu.memory_space<vmem>>, %arg10: memref<128x128xf32, #tpu.memory_space<vmem>>) attributes {dimension_semantics = [#tpu.dimension_semantics<parallel>], iteration_bounds = array<i64: 2>, scalar_prefetch = 0 : i64, scratch_operands = 1 : i64, tpu.core_type = #tpu.core_type<tc>, window_params = [{pipeline_mode = #tpu.pipeline_mode<synchronous>, transform_indices = @transform_0, window_bounds = array<i64: 128, 8>}, {transform_indices = @transform_1, window_bounds = array<i64: 1, 8, 128>}, {transform_indices = @transform_2, window_bounds = array<i64: 1, 32, 128>}, {transform_indices = @transform_3, window_bounds = array<i64: 1, 1, 128>}, {transform_indices = @transform_4, window_bounds = array<i64: 1, 8, 32>}, {transform_indices = @transform_5, window_bounds = array<i64: 1, 8, 32>}, {transform_indices = @transform_6, window_bounds = array<i64: 1, 128, 32>}, {transform_indices = @transform_7, window_bounds = array<i64: 1, 8, 32>}, {transform_indices = @transform_8, window_bounds = array<i64: 1, 8, 32>}]} {
    %c0 = arith.constant 0 : index
    %c0_0 = arith.constant 0 : index
    %0 = vector.load %arg1[%c0, %c0_0] : memref<128x8xf32, #tpu.memory_space<vmem>>, vector<128x8xf32>
    %c0_1 = arith.constant 0 : index
    %c0_2 = arith.constant 0 : index
    %c0_3 = arith.constant 0 : index
    %1 = vector.load %arg2[%c0_1, %c0_2, %c0_3] : memref<1x8x128xf32, #tpu.memory_space<vmem>>, vector<1x8x128xf32>
    %2 = vector.shape_cast %1 : vector<1x8x128xf32> to vector<8x128xf32>
    %cst = arith.constant dense<0.000000e+00> : vector<128x128xf32>
    %3 = tpu.matmul %0, %2, %cst {dimension_numbers = #tpu.dot_dimension_numbers<[1], [0], [0], [1], [0, 0, 1, 1], [], []>} : vector<128x8xf32>, vector<8x128xf32>, vector<128x128xf32> -> vector<128x128xf32>
    %c0_4 = arith.constant 0 : index
    %c0_5 = arith.constant 0 : index
    %c0_6 = arith.constant 0 : index
    %4 = vector.load %arg4[%c0_4, %c0_5, %c0_6] : memref<1x1x128xf32, #tpu.memory_space<vmem>>, vector<1x1x128xf32>
    %5 = vector.shape_cast %4 : vector<1x1x128xf32> to vector<1x128xf32>
    %6 = vector.broadcast %5 : vector<1x128xf32> to vector<128x128xf32>
    %7 = arith.addf %3, %6 : vector<128x128xf32>
    %c0_7 = arith.constant 0 : index
    %c0_8 = arith.constant 0 : index
    %8 = vector.load %arg10[%c0_7, %c0_8] : memref<128x128xf32, #tpu.memory_space<vmem>>, vector<128x128xf32>
    tpu.vector_store %arg10[%c0_7, %c0_8], %7 {strides = array<i32>} : memref<128x128xf32, #tpu.memory_space<vmem>>, vector<128x128xf32>,
    %c0_9 = arith.constant 0 : index
    %c0_10 = arith.constant 0 : index
    %c0_11 = arith.constant 0 : index
    %9 = vector.load %arg3[%c0_9, %c0_10, %c0_11] : memref<1x32x128xf32, #tpu.memory_space<vmem>>, vector<1x32x128xf32>
    %10 = vector.shape_cast %9 : vector<1x32x128xf32> to vector<32x128xf32>
    %c0_12 = arith.constant 0 : index
    %c0_13 = arith.constant 0 : index
    %c0_14 = arith.constant 0 : index
    %11 = vector.load %arg5[%c0_12, %c0_13, %c0_14] : memref<1x8x32xf32, #tpu.memory_space<vmem>>, vector<1x8x32xf32>
    %12 = vector.shape_cast %11 : vector<1x8x32xf32> to vector<8x32xf32>
    %c0_15 = arith.constant 0 : index
    %c0_16 = arith.constant 0 : index
    %c0_17 = arith.constant 0 : index
    %13 = vector.load %arg6[%c0_15, %c0_16, %c0_17] : memref<1x8x32xf32, #tpu.memory_space<vmem>>, vector<1x8x32xf32>
    %14 = vector.shape_cast %13 : vector<1x8x32xf32> to vector<8x32xf32>
    %c0_i32 = arith.constant 0 : i32
    %c0_i32_18 = arith.constant 0 : i32
    %15 = arith.cmpi eq, %arg0, %c0_i32_18 : i32
    %c15_i32 = arith.constant 15 : i32
    %16 = arith.subi %c15_i32, %c0_i32 : i32
    %17 = arith.select %15, %c0_i32, %16 : i32
    %c8_i32 = arith.constant 8 : i32
    %18 = arith.muli %17, %c8_i32 : i32
    %19 = tpu.assume_multiple %18, 8 : i32
    %20 = arith.index_cast %19 : i32 to index
    %c0_19 = arith.constant 0 : index
    %21 = vector.load %arg10[%20, %c0_19] : memref<128x128xf32, #tpu.memory_space<vmem>>, vector<8x128xf32>
    %cst_20 = arith.constant dense<0.000000e+00> : vector<8x128xf32>
    %22 = tpu.matmul %12, %10, %cst_20 {dimension_numbers = #tpu.dot_dimension_numbers<[1], [0], [0], [1], [0, 0, 1, 1], [], []>} : vector<8x32xf32>, vector<32x128xf32>, vector<8x128xf32> -> vector<8x128xf32>
    %23 = arith.addf %21, %22 : vector<8x128xf32>
    %24 = vector.extract_strided_slice %23 {offsets = [0, 0], sizes = [8, 32], strides = [1, 1]} : vector<8x128xf32> to vector<8x32xf32>
    %25 = arith.negf %24 : vector<8x32xf32>
    %26 = math.exp %25 : vector<8x32xf32>
    %cst_21 = arith.constant 1.000000e+00 : f32
    %27 = vector.broadcast %cst_21 : f32 to vector<8x32xf32>
    %28 = arith.addf %27, %26 : vector<8x32xf32>
    %29 = arith.divf %27, %28 : vector<8x32xf32>
    %30 = vector.extract_strided_slice %23 {offsets = [0, 32], sizes = [8, 32], strides = [1, 1]} : vector<8x128xf32> to vector<8x32xf32>
    %31 = arith.negf %30 : vector<8x32xf32>
    %32 = math.exp %31 : vector<8x32xf32>
    %cst_22 = arith.constant 1.000000e+00 : f32
    %33 = vector.broadcast %cst_22 : f32 to vector<8x32xf32>
    %34 = arith.addf %33, %32 : vector<8x32xf32>
    %35 = arith.divf %33, %34 : vector<8x32xf32>
    %36 = vector.extract_strided_slice %23 {offsets = [0, 64], sizes = [8, 32], strides = [1, 1]} : vector<8x128xf32> to vector<8x32xf32>
    %37 = math.tanh %36 : vector<8x32xf32>
    %38 = vector.extract_strided_slice %23 {offsets = [0, 96], sizes = [8, 32], strides = [1, 1]} : vector<8x128xf32> to vector<8x32xf32>
    %39 = arith.negf %38 : vector<8x32xf32>
    %40 = math.exp %39 : vector<8x32xf32>
    %cst_23 = arith.constant 1.000000e+00 : f32
    %41 = vector.broadcast %cst_23 : f32 to vector<8x32xf32>
    %42 = arith.addf %41, %40 : vector<8x32xf32>
    %43 = arith.divf %41, %42 : vector<8x32xf32>
    %44 = arith.mulf %35, %14 : vector<8x32xf32>
    %45 = arith.mulf %29, %37 : vector<8x32xf32>
    %46 = arith.addf %44, %45 : vector<8x32xf32>
    %47 = math.tanh %46 : vector<8x32xf32>
    %48 = arith.mulf %43, %47 : vector<8x32xf32>
    %c0_24 = arith.constant 0 : index
    %49 = arith.index_cast %19 : i32 to index
    %c0_25 = arith.constant 0 : index
    %50 = vector.load %arg7[%c0_24, %49, %c0_25] : memref<1x128x32xf32, #tpu.memory_space<vmem>>, vector<1x8x32xf32>
    %51 = vector.shape_cast %50 : vector<1x8x32xf32> to vector<8x32xf32>
    %52 = vector.shape_cast %48 : vector<8x32xf32> to vector<1x8x32xf32>
    tpu.vector_store %arg7[%c0_24, %49, %c0_25], %52 {strides = array<i32>} : memref<1x128x32xf32, #tpu.memory_space<vmem>>, vector<1x8x32xf32>,
    %c1_i32 = arith.constant 1 : i32
    %c0_i32_26 = arith.constant 0 : i32
    %53 = arith.cmpi eq, %arg0, %c0_i32_26 : i32
    %c15_i32_27 = arith.constant 15 : i32
    %54 = arith.subi %c15_i32_27, %c1_i32 : i32
    %55 = arith.select %53, %c1_i32, %54 : i32
    %c8_i32_28 = arith.constant 8 : i32
    %56 = arith.muli %55, %c8_i32_28 : i32
    %57 = tpu.assume_multiple %56, 8 : i32
    %58 = arith.index_cast %57 : i32 to index
    %c0_29 = arith.constant 0 : index
    %59 = vector.load %arg10[%58, %c0_29] : memref<128x128xf32, #tpu.memory_space<vmem>>, vector<8x128xf32>
    %cst_30 = arith.constant dense<0.000000e+00> : vector<8x128xf32>
    %60 = tpu.matmul %48, %10, %cst_30 {dimension_numbers = #tpu.dot_dimension_numbers<[1], [0], [0], [1], [0, 0, 1, 1], [], []>} : vector<8x32xf32>, vector<32x128xf32>, vector<8x128xf32> -> vector<8x128xf32>
    %61 = arith.addf %59, %60 : vector<8x128xf32>
    %62 = vector.extract_strided_slice %61 {offsets = [0, 0], sizes = [8, 32], strides = [1, 1]} : vector<8x128xf32> to vector<8x32xf32>
    %63 = arith.negf %62 : vector<8x32xf32>
    %64 = math.exp %63 : vector<8x32xf32>
    %cst_31 = arith.constant 1.000000e+00 : f32
    %65 = vector.broadcast %cst_31 : f32 to vector<8x32xf32>
    %66 = arith.addf %65, %64 : vector<8x32xf32>
    %67 = arith.divf %65, %66 : vector<8x32xf32>
    %68 = vector.extract_strided_slice %61 {offsets = [0, 32], sizes = [8, 32], strides = [1, 1]} : vector<8x128xf32> to vector<8x32xf32>
    %69 = arith.negf %68 : vector<8x32xf32>
    %70 = math.exp %69 : vector<8x32xf32>
    %cst_32 = arith.constant 1.000000e+00 : f32
    %71 = vector.broadcast %cst_32 : f32 to vector<8x32xf32>
    %72 = arith.addf %71, %70 : vector<8x32xf32>
    %73 = arith.divf %71, %72 : vector<8x32xf32>
    %74 = vector.extract_strided_slice %61 {offsets = [0, 64], sizes = [8, 32], strides = [1, 1]} : vector<8x128xf32> to vector<8x32xf32>
    %75 = math.tanh %74 : vector<8x32xf32>
    %76 = vector.extract_strided_slice %61 {offsets = [0, 96], sizes = [8, 32], strides = [1, 1]} : vector<8x128xf32> to vector<8x32xf32>
    %77 = arith.negf %76 : vector<8x32xf32>
    %78 = math.exp %77 : vector<8x32xf32>
    %cst_33 = arith.constant 1.000000e+00 : f32
    %79 = vector.broadcast %cst_33 : f32 to vector<8x32xf32>
    %80 = arith.addf %79, %78 : vector<8x32xf32>
    %81 = arith.divf %79, %80 : vector<8x32xf32>
    %82 = arith.mulf %73, %46 : vector<8x32xf32>
    %83 = arith.mulf %67, %75 : vector<8x32xf32>
    %84 = arith.addf %82, %83 : vector<8x32xf32>
    %85 = math.tanh %84 : vector<8x32xf32>
    %86 = arith.mulf %81, %85 : vector<8x32xf32>
    %c0_34 = arith.constant 0 : index
    %87 = arith.index_cast %57 : i32 to index
    %c0_35 = arith.constant 0 : index
    %88 = vector.load %arg7[%c0_34, %87, %c0_35] : memref<1x128x32xf32, #tpu.memory_space<vmem>>, vector<1x8x32xf32>
    %89 = vector.shape_cast %88 : vector<1x8x32xf32> to vector<8x32xf32>
    %90 = vector.shape_cast %86 : vector<8x32xf32> to vector<1x8x32xf32>
    tpu.vector_store %arg7[%c0_34, %87, %c0_35], %90 {strides = array<i32>} : memref<1x128x32xf32, #tpu.memory_space<vmem>>, vector<1x8x32xf32>,
    %c2_i32 = arith.constant 2 : i32
    %c0_i32_36 = arith.constant 0 : i32
    %91 = arith.cmpi eq, %arg0, %c0_i32_36 : i32
    %c15_i32_37 = arith.constant 15 : i32
    %92 = arith.subi %c15_i32_37, %c2_i32 : i32
    %93 = arith.select %91, %c2_i32, %92 : i32
    %c8_i32_38 = arith.constant 8 : i32
    %94 = arith.muli %93, %c8_i32_38 : i32
    %95 = tpu.assume_multiple %94, 8 : i32
    %96 = arith.index_cast %95 : i32 to index
    %c0_39 = arith.constant 0 : index
    %97 = vector.load %arg10[%96, %c0_39] : memref<128x128xf32, #tpu.memory_space<vmem>>, vector<8x128xf32>
    %cst_40 = arith.constant dense<0.000000e+00> : vector<8x128xf32>
    %98 = tpu.matmul %86, %10, %cst_40 {dimension_numbers = #tpu.dot_dimension_numbers<[1], [0], [0], [1], [0, 0, 1, 1], [], []>} : vector<8x32xf32>, vector<32x128xf32>, vector<8x128xf32> -> vector<8x128xf32>
    %99 = arith.addf %97, %98 : vector<8x128xf32>
    %100 = vector.extract_strided_slice %99 {offsets = [0, 0], sizes = [8, 32], strides = [1, 1]} : vector<8x128xf32> to vector<8x32xf32>
    %101 = arith.negf %100 : vector<8x32xf32>
    %102 = math.exp %101 : vector<8x32xf32>
    %cst_41 = arith.constant 1.000000e+00 : f32
    %103 = vector.broadcast %cst_41 : f32 to vector<8x32xf32>
    %104 = arith.addf %103, %102 : vector<8x32xf32>
    %105 = arith.divf %103, %104 : vector<8x32xf32>
    %106 = vector.extract_strided_slice %99 {offsets = [0, 32], sizes = [8, 32], strides = [1, 1]} : vector<8x128xf32> to vector<8x32xf32>
    %107 = arith.negf %106 : vector<8x32xf32>
    %108 = math.exp %107 : vector<8x32xf32>
    %cst_42 = arith.constant 1.000000e+00 : f32
    %109 = vector.broadcast %cst_42 : f32 to vector<8x32xf32>
    %110 = arith.addf %109, %108 : vector<8x32xf32>
    %111 = arith.divf %109, %110 : vector<8x32xf32>
    %112 = vector.extract_strided_slice %99 {offsets = [0, 64], sizes = [8, 32], strides = [1, 1]} : vector<8x128xf32> to vector<8x32xf32>
    %113 = math.tanh %112 : vector<8x32xf32>
    %114 = vector.extract_strided_slice %99 {offsets = [0, 96], sizes = [8, 32], strides = [1, 1]} : vector<8x128xf32> to vector<8x32xf32>
    %115 = arith.negf %114 : vector<8x32xf32>
    %116 = math.exp %115 : vector<8x32xf32>
    %cst_43 = arith.constant 1.000000e+00 : f32
    %117 = vector.broadcast %cst_43 : f32 to vector<8x32xf32>
    %118 = arith.addf %117, %116 : vector<8x32xf32>
    %119 = arith.divf %117, %118 : vector<8x32xf32>
    %120 = arith.mulf %111, %84 : vector<8x32xf32>
    %121 = arith.mulf %105, %113 : vector<8x32xf32>
    %122 = arith.addf %120, %121 : vector<8x32xf32>
    %123 = math.tanh %122 : vector<8x32xf32>
    %124 = arith.mulf %119, %123 : vector<8x32xf32>
    %c0_44 = arith.constant 0 : index
    %125 = arith.index_cast %95 : i32 to index
    %c0_45 = arith.constant 0 : index
    %126 = vector.load %arg7[%c0_44, %125, %c0_45] : memref<1x128x32xf32, #tpu.memory_space<vmem>>, vector<1x8x32xf32>
    %127 = vector.shape_cast %126 : vector<1x8x32xf32> to vector<8x32xf32>
    %128 = vector.shape_cast %124 : vector<8x32xf32> to vector<1x8x32xf32>
    tpu.vector_store %arg7[%c0_44, %125, %c0_45], %128 {strides = array<i32>} : memref<1x128x32xf32, #tpu.memory_space<vmem>>, vector<1x8x32xf32>,
    %c3_i32 = arith.constant 3 : i32
    %c0_i32_46 = arith.constant 0 : i32
    %129 = arith.cmpi eq, %arg0, %c0_i32_46 : i32
    %c15_i32_47 = arith.constant 15 : i32
    %130 = arith.subi %c15_i32_47, %c3_i32 : i32
    %131 = arith.select %129, %c3_i32, %130 : i32
    %c8_i32_48 = arith.constant 8 : i32
    %132 = arith.muli %131, %c8_i32_48 : i32
    %133 = tpu.assume_multiple %132, 8 : i32
    %134 = arith.index_cast %133 : i32 to index
    %c0_49 = arith.constant 0 : index
    %135 = vector.load %arg10[%134, %c0_49] : memref<128x128xf32, #tpu.memory_space<vmem>>, vector<8x128xf32>
    %cst_50 = arith.constant dense<0.000000e+00> : vector<8x128xf32>
    %136 = tpu.matmul %124, %10, %cst_50 {dimension_numbers = #tpu.dot_dimension_numbers<[1], [0], [0], [1], [0, 0, 1, 1], [], []>} : vector<8x32xf32>, vector<32x128xf32>, vector<8x128xf32> -> vector<8x128xf32>
    %137 = arith.addf %135, %136 : vector<8x128xf32>
    %138 = vector.extract_strided_slice %137 {offsets = [0, 0], sizes = [8, 32], strides = [1, 1]} : vector<8x128xf32> to vector<8x32xf32>
    %139 = arith.negf %138 : vector<8x32xf32>
    %140 = math.exp %139 : vector<8x32xf32>
    %cst_51 = arith.constant 1.000000e+00 : f32
    %141 = vector.broadcast %cst_51 : f32 to vector<8x32xf32>
    %142 = arith.addf %141, %140 : vector<8x32xf32>
    %143 = arith.divf %141, %142 : vector<8x32xf32>
    %144 = vector.extract_strided_slice %137 {offsets = [0, 32], sizes = [8, 32], strides = [1, 1]} : vector<8x128xf32> to vector<8x32xf32>
    %145 = arith.negf %144 : vector<8x32xf32>
    %146 = math.exp %145 : vector<8x32xf32>
    %cst_52 = arith.constant 1.000000e+00 : f32
    %147 = vector.broadcast %cst_52 : f32 to vector<8x32xf32>
    %148 = arith.addf %147, %146 : vector<8x32xf32>
    %149 = arith.divf %147, %148 : vector<8x32xf32>
    %150 = vector.extract_strided_slice %137 {offsets = [0, 64], sizes = [8, 32], strides = [1, 1]} : vector<8x128xf32> to vector<8x32xf32>
    %151 = math.tanh %150 : vector<8x32xf32>
    %152 = vector.extract_strided_slice %137 {offsets = [0, 96], sizes = [8, 32], strides = [1, 1]} : vector<8x128xf32> to vector<8x32xf32>
    %153 = arith.negf %152 : vector<8x32xf32>
    %154 = math.exp %153 : vector<8x32xf32>
    %cst_53 = arith.constant 1.000000e+00 : f32
    %155 = vector.broadcast %cst_53 : f32 to vector<8x32xf32>
    %156 = arith.addf %155, %154 : vector<8x32xf32>
    %157 = arith.divf %155, %156 : vector<8x32xf32>
    %158 = arith.mulf %149, %122 : vector<8x32xf32>
    %159 = arith.mulf %143, %151 : vector<8x32xf32>
    %160 = arith.addf %158, %159 : vector<8x32xf32>
    %161 = math.tanh %160 : vector<8x32xf32>
    %162 = arith.mulf %157, %161 : vector<8x32xf32>
    %c0_54 = arith.constant 0 : index
    %163 = arith.index_cast %133 : i32 to index
    %c0_55 = arith.constant 0 : index
    %164 = vector.load %arg7[%c0_54, %163, %c0_55] : memref<1x128x32xf32, #tpu.memory_space<vmem>>, vector<1x8x32xf32>
    %165 = vector.shape_cast %164 : vector<1x8x32xf32> to vector<8x32xf32>
    %166 = vector.shape_cast %162 : vector<8x32xf32> to vector<1x8x32xf32>
    tpu.vector_store %arg7[%c0_54, %163, %c0_55], %166 {strides = array<i32>} : memref<1x128x32xf32, #tpu.memory_space<vmem>>, vector<1x8x32xf32>,
    %c4_i32 = arith.constant 4 : i32
    %c0_i32_56 = arith.constant 0 : i32
    %167 = arith.cmpi eq, %arg0, %c0_i32_56 : i32
    %c15_i32_57 = arith.constant 15 : i32
    %168 = arith.subi %c15_i32_57, %c4_i32 : i32
    %169 = arith.select %167, %c4_i32, %168 : i32
    %c8_i32_58 = arith.constant 8 : i32
    %170 = arith.muli %169, %c8_i32_58 : i32
    %171 = tpu.assume_multiple %170, 8 : i32
    %172 = arith.index_cast %171 : i32 to index
    %c0_59 = arith.constant 0 : index
    %173 = vector.load %arg10[%172, %c0_59] : memref<128x128xf32, #tpu.memory_space<vmem>>, vector<8x128xf32>
    %cst_60 = arith.constant dense<0.000000e+00> : vector<8x128xf32>
    %174 = tpu.matmul %162, %10, %cst_60 {dimension_numbers = #tpu.dot_dimension_numbers<[1], [0], [0], [1], [0, 0, 1, 1], [], []>} : vector<8x32xf32>, vector<32x128xf32>, vector<8x128xf32> -> vector<8x128xf32>
    %175 = arith.addf %173, %174 : vector<8x128xf32>
    %176 = vector.extract_strided_slice %175 {offsets = [0, 0], sizes = [8, 32], strides = [1, 1]} : vector<8x128xf32> to vector<8x32xf32>
    %177 = arith.negf %176 : vector<8x32xf32>
    %178 = math.exp %177 : vector<8x32xf32>
    %cst_61 = arith.constant 1.000000e+00 : f32
    %179 = vector.broadcast %cst_61 : f32 to vector<8x32xf32>
    %180 = arith.addf %179, %178 : vector<8x32xf32>
    %181 = arith.divf %179, %180 : vector<8x32xf32>
    %182 = vector.extract_strided_slice %175 {offsets = [0, 32], sizes = [8, 32], strides = [1, 1]} : vector<8x128xf32> to vector<8x32xf32>
    %183 = arith.negf %182 : vector<8x32xf32>
    %184 = math.exp %183 : vector<8x32xf32>
    %cst_62 = arith.constant 1.000000e+00 : f32
    %185 = vector.broadcast %cst_62 : f32 to vector<8x32xf32>
    %186 = arith.addf %185, %184 : vector<8x32xf32>
    %187 = arith.divf %185, %186 : vector<8x32xf32>
    %188 = vector.extract_strided_slice %175 {offsets = [0, 64], sizes = [8, 32], strides = [1, 1]} : vector<8x128xf32> to vector<8x32xf32>
    %189 = math.tanh %188 : vector<8x32xf32>
    %190 = vector.extract_strided_slice %175 {offsets = [0, 96], sizes = [8, 32], strides = [1, 1]} : vector<8x128xf32> to vector<8x32xf32>
    %191 = arith.negf %190 : vector<8x32xf32>
    %192 = math.exp %191 : vector<8x32xf32>
    %cst_63 = arith.constant 1.000000e+00 : f32
    %193 = vector.broadcast %cst_63 : f32 to vector<8x32xf32>
    %194 = arith.addf %193, %192 : vector<8x32xf32>
    %195 = arith.divf %193, %194 : vector<8x32xf32>
    %196 = arith.mulf %187, %160 : vector<8x32xf32>
    %197 = arith.mulf %181, %189 : vector<8x32xf32>
    %198 = arith.addf %196, %197 : vector<8x32xf32>
    %199 = math.tanh %198 : vector<8x32xf32>
    %200 = arith.mulf %195, %199 : vector<8x32xf32>
    %c0_64 = arith.constant 0 : index
    %201 = arith.index_cast %171 : i32 to index
    %c0_65 = arith.constant 0 : index
    %202 = vector.load %arg7[%c0_64, %201, %c0_65] : memref<1x128x32xf32, #tpu.memory_space<vmem>>, vector<1x8x32xf32>
    %203 = vector.shape_cast %202 : vector<1x8x32xf32> to vector<8x32xf32>
    %204 = vector.shape_cast %200 : vector<8x32xf32> to vector<1x8x32xf32>
    tpu.vector_store %arg7[%c0_64, %201, %c0_65], %204 {strides = array<i32>} : memref<1x128x32xf32, #tpu.memory_space<vmem>>, vector<1x8x32xf32>,
    %c5_i32 = arith.constant 5 : i32
    %c0_i32_66 = arith.constant 0 : i32
    %205 = arith.cmpi eq, %arg0, %c0_i32_66 : i32
    %c15_i32_67 = arith.constant 15 : i32
    %206 = arith.subi %c15_i32_67, %c5_i32 : i32
    %207 = arith.select %205, %c5_i32, %206 : i32
    %c8_i32_68 = arith.constant 8 : i32
    %208 = arith.muli %207, %c8_i32_68 : i32
    %209 = tpu.assume_multiple %208, 8 : i32
    %210 = arith.index_cast %209 : i32 to index
    %c0_69 = arith.constant 0 : index
    %211 = vector.load %arg10[%210, %c0_69] : memref<128x128xf32, #tpu.memory_space<vmem>>, vector<8x128xf32>
    %cst_70 = arith.constant dense<0.000000e+00> : vector<8x128xf32>
    %212 = tpu.matmul %200, %10, %cst_70 {dimension_numbers = #tpu.dot_dimension_numbers<[1], [0], [0], [1], [0, 0, 1, 1], [], []>} : vector<8x32xf32>, vector<32x128xf32>, vector<8x128xf32> -> vector<8x128xf32>
    %213 = arith.addf %211, %212 : vector<8x128xf32>
    %214 = vector.extract_strided_slice %213 {offsets = [0, 0], sizes = [8, 32], strides = [1, 1]} : vector<8x128xf32> to vector<8x32xf32>
    %215 = arith.negf %214 : vector<8x32xf32>
    %216 = math.exp %215 : vector<8x32xf32>
    %cst_71 = arith.constant 1.000000e+00 : f32
    %217 = vector.broadcast %cst_71 : f32 to vector<8x32xf32>
    %218 = arith.addf %217, %216 : vector<8x32xf32>
    %219 = arith.divf %217, %218 : vector<8x32xf32>
    %220 = vector.extract_strided_slice %213 {offsets = [0, 32], sizes = [8, 32], strides = [1, 1]} : vector<8x128xf32> to vector<8x32xf32>
    %221 = arith.negf %220 : vector<8x32xf32>
    %222 = math.exp %221 : vector<8x32xf32>
    %cst_72 = arith.constant 1.000000e+00 : f32
    %223 = vector.broadcast %cst_72 : f32 to vector<8x32xf32>
    %224 = arith.addf %223, %222 : vector<8x32xf32>
    %225 = arith.divf %223, %224 : vector<8x32xf32>
    %226 = vector.extract_strided_slice %213 {offsets = [0, 64], sizes = [8, 32], strides = [1, 1]} : vector<8x128xf32> to vector<8x32xf32>
    %227 = math.tanh %226 : vector<8x32xf32>
    %228 = vector.extract_strided_slice %213 {offsets = [0, 96], sizes = [8, 32], strides = [1, 1]} : vector<8x128xf32> to vector<8x32xf32>
    %229 = arith.negf %228 : vector<8x32xf32>
    %230 = math.exp %229 : vector<8x32xf32>
    %cst_73 = arith.constant 1.000000e+00 : f32
    %231 = vector.broadcast %cst_73 : f32 to vector<8x32xf32>
    %232 = arith.addf %231, %230 : vector<8x32xf32>
    %233 = arith.divf %231, %232 : vector<8x32xf32>
    %234 = arith.mulf %225, %198 : vector<8x32xf32>
    %235 = arith.mulf %219, %227 : vector<8x32xf32>
    %236 = arith.addf %234, %235 : vector<8x32xf32>
    %237 = math.tanh %236 : vector<8x32xf32>
    %238 = arith.mulf %233, %237 : vector<8x32xf32>
    %c0_74 = arith.constant 0 : index
    %239 = arith.index_cast %209 : i32 to index
    %c0_75 = arith.constant 0 : index
    %240 = vector.load %arg7[%c0_74, %239, %c0_75] : memref<1x128x32xf32, #tpu.memory_space<vmem>>, vector<1x8x32xf32>
    %241 = vector.shape_cast %240 : vector<1x8x32xf32> to vector<8x32xf32>
    %242 = vector.shape_cast %238 : vector<8x32xf32> to vector<1x8x32xf32>
    tpu.vector_store %arg7[%c0_74, %239, %c0_75], %242 {strides = array<i32>} : memref<1x128x32xf32, #tpu.memory_space<vmem>>, vector<1x8x32xf32>,
    %c6_i32 = arith.constant 6 : i32
    %c0_i32_76 = arith.constant 0 : i32
    %243 = arith.cmpi eq, %arg0, %c0_i32_76 : i32
    %c15_i32_77 = arith.constant 15 : i32
    %244 = arith.subi %c15_i32_77, %c6_i32 : i32
    %245 = arith.select %243, %c6_i32, %244 : i32
    %c8_i32_78 = arith.constant 8 : i32
    %246 = arith.muli %245, %c8_i32_78 : i32
    %247 = tpu.assume_multiple %246, 8 : i32
    %248 = arith.index_cast %247 : i32 to index
    %c0_79 = arith.constant 0 : index
    %249 = vector.load %arg10[%248, %c0_79] : memref<128x128xf32, #tpu.memory_space<vmem>>, vector<8x128xf32>
    %cst_80 = arith.constant dense<0.000000e+00> : vector<8x128xf32>
    %250 = tpu.matmul %238, %10, %cst_80 {dimension_numbers = #tpu.dot_dimension_numbers<[1], [0], [0], [1], [0, 0, 1, 1], [], []>} : vector<8x32xf32>, vector<32x128xf32>, vector<8x128xf32> -> vector<8x128xf32>
    %251 = arith.addf %249, %250 : vector<8x128xf32>
    %252 = vector.extract_strided_slice %251 {offsets = [0, 0], sizes = [8, 32], strides = [1, 1]} : vector<8x128xf32> to vector<8x32xf32>
    %253 = arith.negf %252 : vector<8x32xf32>
    %254 = math.exp %253 : vector<8x32xf32>
    %cst_81 = arith.constant 1.000000e+00 : f32
    %255 = vector.broadcast %cst_81 : f32 to vector<8x32xf32>
    %256 = arith.addf %255, %254 : vector<8x32xf32>
    %257 = arith.divf %255, %256 : vector<8x32xf32>
    %258 = vector.extract_strided_slice %251 {offsets = [0, 32], sizes = [8, 32], strides = [1, 1]} : vector<8x128xf32> to vector<8x32xf32>
    %259 = arith.negf %258 : vector<8x32xf32>
    %260 = math.exp %259 : vector<8x32xf32>
    %cst_82 = arith.constant 1.000000e+00 : f32
    %261 = vector.broadcast %cst_82 : f32 to vector<8x32xf32>
    %262 = arith.addf %261, %260 : vector<8x32xf32>
    %263 = arith.divf %261, %262 : vector<8x32xf32>
    %264 = vector.extract_strided_slice %251 {offsets = [0, 64], sizes = [8, 32], strides = [1, 1]} : vector<8x128xf32> to vector<8x32xf32>
    %265 = math.tanh %264 : vector<8x32xf32>
    %266 = vector.extract_strided_slice %251 {offsets = [0, 96], sizes = [8, 32], strides = [1, 1]} : vector<8x128xf32> to vector<8x32xf32>
    %267 = arith.negf %266 : vector<8x32xf32>
    %268 = math.exp %267 : vector<8x32xf32>
    %cst_83 = arith.constant 1.000000e+00 : f32
    %269 = vector.broadcast %cst_83 : f32 to vector<8x32xf32>
    %270 = arith.addf %269, %268 : vector<8x32xf32>
    %271 = arith.divf %269, %270 : vector<8x32xf32>
    %272 = arith.mulf %263, %236 : vector<8x32xf32>
    %273 = arith.mulf %257, %265 : vector<8x32xf32>
    %274 = arith.addf %272, %273 : vector<8x32xf32>
    %275 = math.tanh %274 : vector<8x32xf32>
    %276 = arith.mulf %271, %275 : vector<8x32xf32>
    %c0_84 = arith.constant 0 : index
    %277 = arith.index_cast %247 : i32 to index
    %c0_85 = arith.constant 0 : index
    %278 = vector.load %arg7[%c0_84, %277, %c0_85] : memref<1x128x32xf32, #tpu.memory_space<vmem>>, vector<1x8x32xf32>
    %279 = vector.shape_cast %278 : vector<1x8x32xf32> to vector<8x32xf32>
    %280 = vector.shape_cast %276 : vector<8x32xf32> to vector<1x8x32xf32>
    tpu.vector_store %arg7[%c0_84, %277, %c0_85], %280 {strides = array<i32>} : memref<1x128x32xf32, #tpu.memory_space<vmem>>, vector<1x8x32xf32>,
    %c7_i32 = arith.constant 7 : i32
    %c0_i32_86 = arith.constant 0 : i32
    %281 = arith.cmpi eq, %arg0, %c0_i32_86 : i32
    %c15_i32_87 = arith.constant 15 : i32
    %282 = arith.subi %c15_i32_87, %c7_i32 : i32
    %283 = arith.select %281, %c7_i32, %282 : i32
    %c8_i32_88 = arith.constant 8 : i32
    %284 = arith.muli %283, %c8_i32_88 : i32
    %285 = tpu.assume_multiple %284, 8 : i32
    %286 = arith.index_cast %285 : i32 to index
    %c0_89 = arith.constant 0 : index
    %287 = vector.load %arg10[%286, %c0_89] : memref<128x128xf32, #tpu.memory_space<vmem>>, vector<8x128xf32>
    %cst_90 = arith.constant dense<0.000000e+00> : vector<8x128xf32>
    %288 = tpu.matmul %276, %10, %cst_90 {dimension_numbers = #tpu.dot_dimension_numbers<[1], [0], [0], [1], [0, 0, 1, 1], [], []>} : vector<8x32xf32>, vector<32x128xf32>, vector<8x128xf32> -> vector<8x128xf32>
    %289 = arith.addf %287, %288 : vector<8x128xf32>
    %290 = vector.extract_strided_slice %289 {offsets = [0, 0], sizes = [8, 32], strides = [1, 1]} : vector<8x128xf32> to vector<8x32xf32>
    %291 = arith.negf %290 : vector<8x32xf32>
    %292 = math.exp %291 : vector<8x32xf32>
    %cst_91 = arith.constant 1.000000e+00 : f32
    %293 = vector.broadcast %cst_91 : f32 to vector<8x32xf32>
    %294 = arith.addf %293, %292 : vector<8x32xf32>
    %295 = arith.divf %293, %294 : vector<8x32xf32>
    %296 = vector.extract_strided_slice %289 {offsets = [0, 32], sizes = [8, 32], strides = [1, 1]} : vector<8x128xf32> to vector<8x32xf32>
    %297 = arith.negf %296 : vector<8x32xf32>
    %298 = math.exp %297 : vector<8x32xf32>
    %cst_92 = arith.constant 1.000000e+00 : f32
    %299 = vector.broadcast %cst_92 : f32 to vector<8x32xf32>
    %300 = arith.addf %299, %298 : vector<8x32xf32>
    %301 = arith.divf %299, %300 : vector<8x32xf32>
    %302 = vector.extract_strided_slice %289 {offsets = [0, 64], sizes = [8, 32], strides = [1, 1]} : vector<8x128xf32> to vector<8x32xf32>
    %303 = math.tanh %302 : vector<8x32xf32>
    %304 = vector.extract_strided_slice %289 {offsets = [0, 96], sizes = [8, 32], strides = [1, 1]} : vector<8x128xf32> to vector<8x32xf32>
    %305 = arith.negf %304 : vector<8x32xf32>
    %306 = math.exp %305 : vector<8x32xf32>
    %cst_93 = arith.constant 1.000000e+00 : f32
    %307 = vector.broadcast %cst_93 : f32 to vector<8x32xf32>
    %308 = arith.addf %307, %306 : vector<8x32xf32>
    %309 = arith.divf %307, %308 : vector<8x32xf32>
    %310 = arith.mulf %301, %274 : vector<8x32xf32>
    %311 = arith.mulf %295, %303 : vector<8x32xf32>
    %312 = arith.addf %310, %311 : vector<8x32xf32>
    %313 = math.tanh %312 : vector<8x32xf32>
    %314 = arith.mulf %309, %313 : vector<8x32xf32>
    %c0_94 = arith.constant 0 : index
    %315 = arith.index_cast %285 : i32 to index
    %c0_95 = arith.constant 0 : index
    %316 = vector.load %arg7[%c0_94, %315, %c0_95] : memref<1x128x32xf32, #tpu.memory_space<vmem>>, vector<1x8x32xf32>
    %317 = vector.shape_cast %316 : vector<1x8x32xf32> to vector<8x32xf32>
    %318 = vector.shape_cast %314 : vector<8x32xf32> to vector<1x8x32xf32>
    tpu.vector_store %arg7[%c0_94, %315, %c0_95], %318 {strides = array<i32>} : memref<1x128x32xf32, #tpu.memory_space<vmem>>, vector<1x8x32xf32>,
    %c8_i32_96 = arith.constant 8 : i32
    %c0_i32_97 = arith.constant 0 : i32
    %319 = arith.cmpi eq, %arg0, %c0_i32_97 : i32
    %c15_i32_98 = arith.constant 15 : i32
    %320 = arith.subi %c15_i32_98, %c8_i32_96 : i32
    %321 = arith.select %319, %c8_i32_96, %320 : i32
    %c8_i32_99 = arith.constant 8 : i32
    %322 = arith.muli %321, %c8_i32_99 : i32
    %323 = tpu.assume_multiple %322, 8 : i32
    %324 = arith.index_cast %323 : i32 to index
    %c0_100 = arith.constant 0 : index
    %325 = vector.load %arg10[%324, %c0_100] : memref<128x128xf32, #tpu.memory_space<vmem>>, vector<8x128xf32>
    %cst_101 = arith.constant dense<0.000000e+00> : vector<8x128xf32>
    %326 = tpu.matmul %314, %10, %cst_101 {dimension_numbers = #tpu.dot_dimension_numbers<[1], [0], [0], [1], [0, 0, 1, 1], [], []>} : vector<8x32xf32>, vector<32x128xf32>, vector<8x128xf32> -> vector<8x128xf32>
    %327 = arith.addf %325, %326 : vector<8x128xf32>
    %328 = vector.extract_strided_slice %327 {offsets = [0, 0], sizes = [8, 32], strides = [1, 1]} : vector<8x128xf32> to vector<8x32xf32>
    %329 = arith.negf %328 : vector<8x32xf32>
    %330 = math.exp %329 : vector<8x32xf32>
    %cst_102 = arith.constant 1.000000e+00 : f32
    %331 = vector.broadcast %cst_102 : f32 to vector<8x32xf32>
    %332 = arith.addf %331, %330 : vector<8x32xf32>
    %333 = arith.divf %331, %332 : vector<8x32xf32>
    %334 = vector.extract_strided_slice %327 {offsets = [0, 32], sizes = [8, 32], strides = [1, 1]} : vector<8x128xf32> to vector<8x32xf32>
    %335 = arith.negf %334 : vector<8x32xf32>
    %336 = math.exp %335 : vector<8x32xf32>
    %cst_103 = arith.constant 1.000000e+00 : f32
    %337 = vector.broadcast %cst_103 : f32 to vector<8x32xf32>
    %338 = arith.addf %337, %336 : vector<8x32xf32>
    %339 = arith.divf %337, %338 : vector<8x32xf32>
    %340 = vector.extract_strided_slice %327 {offsets = [0, 64], sizes = [8, 32], strides = [1, 1]} : vector<8x128xf32> to vector<8x32xf32>
    %341 = math.tanh %340 : vector<8x32xf32>
    %342 = vector.extract_strided_slice %327 {offsets = [0, 96], sizes = [8, 32], strides = [1, 1]} : vector<8x128xf32> to vector<8x32xf32>
    %343 = arith.negf %342 : vector<8x32xf32>
    %344 = math.exp %343 : vector<8x32xf32>
    %cst_104 = arith.constant 1.000000e+00 : f32
    %345 = vector.broadcast %cst_104 : f32 to vector<8x32xf32>
    %346 = arith.addf %345, %344 : vector<8x32xf32>
    %347 = arith.divf %345, %346 : vector<8x32xf32>
    %348 = arith.mulf %339, %312 : vector<8x32xf32>
    %349 = arith.mulf %333, %341 : vector<8x32xf32>
    %350 = arith.addf %348, %349 : vector<8x32xf32>
    %351 = math.tanh %350 : vector<8x32xf32>
    %352 = arith.mulf %347, %351 : vector<8x32xf32>
    %c0_105 = arith.constant 0 : index
    %353 = arith.index_cast %323 : i32 to index
    %c0_106 = arith.constant 0 : index
    %354 = vector.load %arg7[%c0_105, %353, %c0_106] : memref<1x128x32xf32, #tpu.memory_space<vmem>>, vector<1x8x32xf32>
    %355 = vector.shape_cast %354 : vector<1x8x32xf32> to vector<8x32xf32>
    %356 = vector.shape_cast %352 : vector<8x32xf32> to vector<1x8x32xf32>
    tpu.vector_store %arg7[%c0_105, %353, %c0_106], %356 {strides = array<i32>} : memref<1x128x32xf32, #tpu.memory_space<vmem>>, vector<1x8x32xf32>,
    %c9_i32 = arith.constant 9 : i32
    %c0_i32_107 = arith.constant 0 : i32
    %357 = arith.cmpi eq, %arg0, %c0_i32_107 : i32
    %c15_i32_108 = arith.constant 15 : i32
    %358 = arith.subi %c15_i32_108, %c9_i32 : i32
    %359 = arith.select %357, %c9_i32, %358 : i32
    %c8_i32_109 = arith.constant 8 : i32
    %360 = arith.muli %359, %c8_i32_109 : i32
    %361 = tpu.assume_multiple %360, 8 : i32
    %362 = arith.index_cast %361 : i32 to index
    %c0_110 = arith.constant 0 : index
    %363 = vector.load %arg10[%362, %c0_110] : memref<128x128xf32, #tpu.memory_space<vmem>>, vector<8x128xf32>
    %cst_111 = arith.constant dense<0.000000e+00> : vector<8x128xf32>
    %364 = tpu.matmul %352, %10, %cst_111 {dimension_numbers = #tpu.dot_dimension_numbers<[1], [0], [0], [1], [0, 0, 1, 1], [], []>} : vector<8x32xf32>, vector<32x128xf32>, vector<8x128xf32> -> vector<8x128xf32>
    %365 = arith.addf %363, %364 : vector<8x128xf32>
    %366 = vector.extract_strided_slice %365 {offsets = [0, 0], sizes = [8, 32], strides = [1, 1]} : vector<8x128xf32> to vector<8x32xf32>
    %367 = arith.negf %366 : vector<8x32xf32>
    %368 = math.exp %367 : vector<8x32xf32>
    %cst_112 = arith.constant 1.000000e+00 : f32
    %369 = vector.broadcast %cst_112 : f32 to vector<8x32xf32>
    %370 = arith.addf %369, %368 : vector<8x32xf32>
    %371 = arith.divf %369, %370 : vector<8x32xf32>
    %372 = vector.extract_strided_slice %365 {offsets = [0, 32], sizes = [8, 32], strides = [1, 1]} : vector<8x128xf32> to vector<8x32xf32>
    %373 = arith.negf %372 : vector<8x32xf32>
    %374 = math.exp %373 : vector<8x32xf32>
    %cst_113 = arith.constant 1.000000e+00 : f32
    %375 = vector.broadcast %cst_113 : f32 to vector<8x32xf32>
    %376 = arith.addf %375, %374 : vector<8x32xf32>
    %377 = arith.divf %375, %376 : vector<8x32xf32>
    %378 = vector.extract_strided_slice %365 {offsets = [0, 64], sizes = [8, 32], strides = [1, 1]} : vector<8x128xf32> to vector<8x32xf32>
    %379 = math.tanh %378 : vector<8x32xf32>
    %380 = vector.extract_strided_slice %365 {offsets = [0, 96], sizes = [8, 32], strides = [1, 1]} : vector<8x128xf32> to vector<8x32xf32>
    %381 = arith.negf %380 : vector<8x32xf32>
    %382 = math.exp %381 : vector<8x32xf32>
    %cst_114 = arith.constant 1.000000e+00 : f32
    %383 = vector.broadcast %cst_114 : f32 to vector<8x32xf32>
    %384 = arith.addf %383, %382 : vector<8x32xf32>
    %385 = arith.divf %383, %384 : vector<8x32xf32>
    %386 = arith.mulf %377, %350 : vector<8x32xf32>
    %387 = arith.mulf %371, %379 : vector<8x32xf32>
    %388 = arith.addf %386, %387 : vector<8x32xf32>
    %389 = math.tanh %388 : vector<8x32xf32>
    %390 = arith.mulf %385, %389 : vector<8x32xf32>
    %c0_115 = arith.constant 0 : index
    %391 = arith.index_cast %361 : i32 to index
    %c0_116 = arith.constant 0 : index
    %392 = vector.load %arg7[%c0_115, %391, %c0_116] : memref<1x128x32xf32, #tpu.memory_space<vmem>>, vector<1x8x32xf32>
    %393 = vector.shape_cast %392 : vector<1x8x32xf32> to vector<8x32xf32>
    %394 = vector.shape_cast %390 : vector<8x32xf32> to vector<1x8x32xf32>
    tpu.vector_store %arg7[%c0_115, %391, %c0_116], %394 {strides = array<i32>} : memref<1x128x32xf32, #tpu.memory_space<vmem>>, vector<1x8x32xf32>,
    %c10_i32 = arith.constant 10 : i32
    %c0_i32_117 = arith.constant 0 : i32
    %395 = arith.cmpi eq, %arg0, %c0_i32_117 : i32
    %c15_i32_118 = arith.constant 15 : i32
    %396 = arith.subi %c15_i32_118, %c10_i32 : i32
    %397 = arith.select %395, %c10_i32, %396 : i32
    %c8_i32_119 = arith.constant 8 : i32
    %398 = arith.muli %397, %c8_i32_119 : i32
    %399 = tpu.assume_multiple %398, 8 : i32
    %400 = arith.index_cast %399 : i32 to index
    %c0_120 = arith.constant 0 : index
    %401 = vector.load %arg10[%400, %c0_120] : memref<128x128xf32, #tpu.memory_space<vmem>>, vector<8x128xf32>
    %cst_121 = arith.constant dense<0.000000e+00> : vector<8x128xf32>
    %402 = tpu.matmul %390, %10, %cst_121 {dimension_numbers = #tpu.dot_dimension_numbers<[1], [0], [0], [1], [0, 0, 1, 1], [], []>} : vector<8x32xf32>, vector<32x128xf32>, vector<8x128xf32> -> vector<8x128xf32>
    %403 = arith.addf %401, %402 : vector<8x128xf32>
    %404 = vector.extract_strided_slice %403 {offsets = [0, 0], sizes = [8, 32], strides = [1, 1]} : vector<8x128xf32> to vector<8x32xf32>
    %405 = arith.negf %404 : vector<8x32xf32>
    %406 = math.exp %405 : vector<8x32xf32>
    %cst_122 = arith.constant 1.000000e+00 : f32
    %407 = vector.broadcast %cst_122 : f32 to vector<8x32xf32>
    %408 = arith.addf %407, %406 : vector<8x32xf32>
    %409 = arith.divf %407, %408 : vector<8x32xf32>
    %410 = vector.extract_strided_slice %403 {offsets = [0, 32], sizes = [8, 32], strides = [1, 1]} : vector<8x128xf32> to vector<8x32xf32>
    %411 = arith.negf %410 : vector<8x32xf32>
    %412 = math.exp %411 : vector<8x32xf32>
    %cst_123 = arith.constant 1.000000e+00 : f32
    %413 = vector.broadcast %cst_123 : f32 to vector<8x32xf32>
    %414 = arith.addf %413, %412 : vector<8x32xf32>
    %415 = arith.divf %413, %414 : vector<8x32xf32>
    %416 = vector.extract_strided_slice %403 {offsets = [0, 64], sizes = [8, 32], strides = [1, 1]} : vector<8x128xf32> to vector<8x32xf32>
    %417 = math.tanh %416 : vector<8x32xf32>
    %418 = vector.extract_strided_slice %403 {offsets = [0, 96], sizes = [8, 32], strides = [1, 1]} : vector<8x128xf32> to vector<8x32xf32>
    %419 = arith.negf %418 : vector<8x32xf32>
    %420 = math.exp %419 : vector<8x32xf32>
    %cst_124 = arith.constant 1.000000e+00 : f32
    %421 = vector.broadcast %cst_124 : f32 to vector<8x32xf32>
    %422 = arith.addf %421, %420 : vector<8x32xf32>
    %423 = arith.divf %421, %422 : vector<8x32xf32>
    %424 = arith.mulf %415, %388 : vector<8x32xf32>
    %425 = arith.mulf %409, %417 : vector<8x32xf32>
    %426 = arith.addf %424, %425 : vector<8x32xf32>
    %427 = math.tanh %426 : vector<8x32xf32>
    %428 = arith.mulf %423, %427 : vector<8x32xf32>
    %c0_125 = arith.constant 0 : index
    %429 = arith.index_cast %399 : i32 to index
    %c0_126 = arith.constant 0 : index
    %430 = vector.load %arg7[%c0_125, %429, %c0_126] : memref<1x128x32xf32, #tpu.memory_space<vmem>>, vector<1x8x32xf32>
    %431 = vector.shape_cast %430 : vector<1x8x32xf32> to vector<8x32xf32>
    %432 = vector.shape_cast %428 : vector<8x32xf32> to vector<1x8x32xf32>
    tpu.vector_store %arg7[%c0_125, %429, %c0_126], %432 {strides = array<i32>} : memref<1x128x32xf32, #tpu.memory_space<vmem>>, vector<1x8x32xf32>,
    %c11_i32 = arith.constant 11 : i32
    %c0_i32_127 = arith.constant 0 : i32
    %433 = arith.cmpi eq, %arg0, %c0_i32_127 : i32
    %c15_i32_128 = arith.constant 15 : i32
    %434 = arith.subi %c15_i32_128, %c11_i32 : i32
    %435 = arith.select %433, %c11_i32, %434 : i32
    %c8_i32_129 = arith.constant 8 : i32
    %436 = arith.muli %435, %c8_i32_129 : i32
    %437 = tpu.assume_multiple %436, 8 : i32
    %438 = arith.index_cast %437 : i32 to index
    %c0_130 = arith.constant 0 : index
    %439 = vector.load %arg10[%438, %c0_130] : memref<128x128xf32, #tpu.memory_space<vmem>>, vector<8x128xf32>
    %cst_131 = arith.constant dense<0.000000e+00> : vector<8x128xf32>
    %440 = tpu.matmul %428, %10, %cst_131 {dimension_numbers = #tpu.dot_dimension_numbers<[1], [0], [0], [1], [0, 0, 1, 1], [], []>} : vector<8x32xf32>, vector<32x128xf32>, vector<8x128xf32> -> vector<8x128xf32>
    %441 = arith.addf %439, %440 : vector<8x128xf32>
    %442 = vector.extract_strided_slice %441 {offsets = [0, 0], sizes = [8, 32], strides = [1, 1]} : vector<8x128xf32> to vector<8x32xf32>
    %443 = arith.negf %442 : vector<8x32xf32>
    %444 = math.exp %443 : vector<8x32xf32>
    %cst_132 = arith.constant 1.000000e+00 : f32
    %445 = vector.broadcast %cst_132 : f32 to vector<8x32xf32>
    %446 = arith.addf %445, %444 : vector<8x32xf32>
    %447 = arith.divf %445, %446 : vector<8x32xf32>
    %448 = vector.extract_strided_slice %441 {offsets = [0, 32], sizes = [8, 32], strides = [1, 1]} : vector<8x128xf32> to vector<8x32xf32>
    %449 = arith.negf %448 : vector<8x32xf32>
    %450 = math.exp %449 : vector<8x32xf32>
    %cst_133 = arith.constant 1.000000e+00 : f32
    %451 = vector.broadcast %cst_133 : f32 to vector<8x32xf32>
    %452 = arith.addf %451, %450 : vector<8x32xf32>
    %453 = arith.divf %451, %452 : vector<8x32xf32>
    %454 = vector.extract_strided_slice %441 {offsets = [0, 64], sizes = [8, 32], strides = [1, 1]} : vector<8x128xf32> to vector<8x32xf32>
    %455 = math.tanh %454 : vector<8x32xf32>
    %456 = vector.extract_strided_slice %441 {offsets = [0, 96], sizes = [8, 32], strides = [1, 1]} : vector<8x128xf32> to vector<8x32xf32>
    %457 = arith.negf %456 : vector<8x32xf32>
    %458 = math.exp %457 : vector<8x32xf32>
    %cst_134 = arith.constant 1.000000e+00 : f32
    %459 = vector.broadcast %cst_134 : f32 to vector<8x32xf32>
    %460 = arith.addf %459, %458 : vector<8x32xf32>
    %461 = arith.divf %459, %460 : vector<8x32xf32>
    %462 = arith.mulf %453, %426 : vector<8x32xf32>
    %463 = arith.mulf %447, %455 : vector<8x32xf32>
    %464 = arith.addf %462, %463 : vector<8x32xf32>
    %465 = math.tanh %464 : vector<8x32xf32>
    %466 = arith.mulf %461, %465 : vector<8x32xf32>
    %c0_135 = arith.constant 0 : index
    %467 = arith.index_cast %437 : i32 to index
    %c0_136 = arith.constant 0 : index
    %468 = vector.load %arg7[%c0_135, %467, %c0_136] : memref<1x128x32xf32, #tpu.memory_space<vmem>>, vector<1x8x32xf32>
    %469 = vector.shape_cast %468 : vector<1x8x32xf32> to vector<8x32xf32>
    %470 = vector.shape_cast %466 : vector<8x32xf32> to vector<1x8x32xf32>
    tpu.vector_store %arg7[%c0_135, %467, %c0_136], %470 {strides = array<i32>} : memref<1x128x32xf32, #tpu.memory_space<vmem>>, vector<1x8x32xf32>,
    %c12_i32 = arith.constant 12 : i32
    %c0_i32_137 = arith.constant 0 : i32
    %471 = arith.cmpi eq, %arg0, %c0_i32_137 : i32
    %c15_i32_138 = arith.constant 15 : i32
    %472 = arith.subi %c15_i32_138, %c12_i32 : i32
    %473 = arith.select %471, %c12_i32, %472 : i32
    %c8_i32_139 = arith.constant 8 : i32
    %474 = arith.muli %473, %c8_i32_139 : i32
    %475 = tpu.assume_multiple %474, 8 : i32
    %476 = arith.index_cast %475 : i32 to index
    %c0_140 = arith.constant 0 : index
    %477 = vector.load %arg10[%476, %c0_140] : memref<128x128xf32, #tpu.memory_space<vmem>>, vector<8x128xf32>
    %cst_141 = arith.constant dense<0.000000e+00> : vector<8x128xf32>
    %478 = tpu.matmul %466, %10, %cst_141 {dimension_numbers = #tpu.dot_dimension_numbers<[1], [0], [0], [1], [0, 0, 1, 1], [], []>} : vector<8x32xf32>, vector<32x128xf32>, vector<8x128xf32> -> vector<8x128xf32>
    %479 = arith.addf %477, %478 : vector<8x128xf32>
    %480 = vector.extract_strided_slice %479 {offsets = [0, 0], sizes = [8, 32], strides = [1, 1]} : vector<8x128xf32> to vector<8x32xf32>
    %481 = arith.negf %480 : vector<8x32xf32>
    %482 = math.exp %481 : vector<8x32xf32>
    %cst_142 = arith.constant 1.000000e+00 : f32
    %483 = vector.broadcast %cst_142 : f32 to vector<8x32xf32>
    %484 = arith.addf %483, %482 : vector<8x32xf32>
    %485 = arith.divf %483, %484 : vector<8x32xf32>
    %486 = vector.extract_strided_slice %479 {offsets = [0, 32], sizes = [8, 32], strides = [1, 1]} : vector<8x128xf32> to vector<8x32xf32>
    %487 = arith.negf %486 : vector<8x32xf32>
    %488 = math.exp %487 : vector<8x32xf32>
    %cst_143 = arith.constant 1.000000e+00 : f32
    %489 = vector.broadcast %cst_143 : f32 to vector<8x32xf32>
    %490 = arith.addf %489, %488 : vector<8x32xf32>
    %491 = arith.divf %489, %490 : vector<8x32xf32>
    %492 = vector.extract_strided_slice %479 {offsets = [0, 64], sizes = [8, 32], strides = [1, 1]} : vector<8x128xf32> to vector<8x32xf32>
    %493 = math.tanh %492 : vector<8x32xf32>
    %494 = vector.extract_strided_slice %479 {offsets = [0, 96], sizes = [8, 32], strides = [1, 1]} : vector<8x128xf32> to vector<8x32xf32>
    %495 = arith.negf %494 : vector<8x32xf32>
    %496 = math.exp %495 : vector<8x32xf32>
    %cst_144 = arith.constant 1.000000e+00 : f32
    %497 = vector.broadcast %cst_144 : f32 to vector<8x32xf32>
    %498 = arith.addf %497, %496 : vector<8x32xf32>
    %499 = arith.divf %497, %498 : vector<8x32xf32>
    %500 = arith.mulf %491, %464 : vector<8x32xf32>
    %501 = arith.mulf %485, %493 : vector<8x32xf32>
    %502 = arith.addf %500, %501 : vector<8x32xf32>
    %503 = math.tanh %502 : vector<8x32xf32>
    %504 = arith.mulf %499, %503 : vector<8x32xf32>
    %c0_145 = arith.constant 0 : index
    %505 = arith.index_cast %475 : i32 to index
    %c0_146 = arith.constant 0 : index
    %506 = vector.load %arg7[%c0_145, %505, %c0_146] : memref<1x128x32xf32, #tpu.memory_space<vmem>>, vector<1x8x32xf32>
    %507 = vector.shape_cast %506 : vector<1x8x32xf32> to vector<8x32xf32>
    %508 = vector.shape_cast %504 : vector<8x32xf32> to vector<1x8x32xf32>
    tpu.vector_store %arg7[%c0_145, %505, %c0_146], %508 {strides = array<i32>} : memref<1x128x32xf32, #tpu.memory_space<vmem>>, vector<1x8x32xf32>,
    %c13_i32 = arith.constant 13 : i32
    %c0_i32_147 = arith.constant 0 : i32
    %509 = arith.cmpi eq, %arg0, %c0_i32_147 : i32
    %c15_i32_148 = arith.constant 15 : i32
    %510 = arith.subi %c15_i32_148, %c13_i32 : i32
    %511 = arith.select %509, %c13_i32, %510 : i32
    %c8_i32_149 = arith.constant 8 : i32
    %512 = arith.muli %511, %c8_i32_149 : i32
    %513 = tpu.assume_multiple %512, 8 : i32
    %514 = arith.index_cast %513 : i32 to index
    %c0_150 = arith.constant 0 : index
    %515 = vector.load %arg10[%514, %c0_150] : memref<128x128xf32, #tpu.memory_space<vmem>>, vector<8x128xf32>
    %cst_151 = arith.constant dense<0.000000e+00> : vector<8x128xf32>
    %516 = tpu.matmul %504, %10, %cst_151 {dimension_numbers = #tpu.dot_dimension_numbers<[1], [0], [0], [1], [0, 0, 1, 1], [], []>} : vector<8x32xf32>, vector<32x128xf32>, vector<8x128xf32> -> vector<8x128xf32>
    %517 = arith.addf %515, %516 : vector<8x128xf32>
    %518 = vector.extract_strided_slice %517 {offsets = [0, 0], sizes = [8, 32], strides = [1, 1]} : vector<8x128xf32> to vector<8x32xf32>
    %519 = arith.negf %518 : vector<8x32xf32>
    %520 = math.exp %519 : vector<8x32xf32>
    %cst_152 = arith.constant 1.000000e+00 : f32
    %521 = vector.broadcast %cst_152 : f32 to vector<8x32xf32>
    %522 = arith.addf %521, %520 : vector<8x32xf32>
    %523 = arith.divf %521, %522 : vector<8x32xf32>
    %524 = vector.extract_strided_slice %517 {offsets = [0, 32], sizes = [8, 32], strides = [1, 1]} : vector<8x128xf32> to vector<8x32xf32>
    %525 = arith.negf %524 : vector<8x32xf32>
    %526 = math.exp %525 : vector<8x32xf32>
    %cst_153 = arith.constant 1.000000e+00 : f32
    %527 = vector.broadcast %cst_153 : f32 to vector<8x32xf32>
    %528 = arith.addf %527, %526 : vector<8x32xf32>
    %529 = arith.divf %527, %528 : vector<8x32xf32>
    %530 = vector.extract_strided_slice %517 {offsets = [0, 64], sizes = [8, 32], strides = [1, 1]} : vector<8x128xf32> to vector<8x32xf32>
    %531 = math.tanh %530 : vector<8x32xf32>
    %532 = vector.extract_strided_slice %517 {offsets = [0, 96], sizes = [8, 32], strides = [1, 1]} : vector<8x128xf32> to vector<8x32xf32>
    %533 = arith.negf %532 : vector<8x32xf32>
    %534 = math.exp %533 : vector<8x32xf32>
    %cst_154 = arith.constant 1.000000e+00 : f32
    %535 = vector.broadcast %cst_154 : f32 to vector<8x32xf32>
    %536 = arith.addf %535, %534 : vector<8x32xf32>
    %537 = arith.divf %535, %536 : vector<8x32xf32>
    %538 = arith.mulf %529, %502 : vector<8x32xf32>
    %539 = arith.mulf %523, %531 : vector<8x32xf32>
    %540 = arith.addf %538, %539 : vector<8x32xf32>
    %541 = math.tanh %540 : vector<8x32xf32>
    %542 = arith.mulf %537, %541 : vector<8x32xf32>
    %c0_155 = arith.constant 0 : index
    %543 = arith.index_cast %513 : i32 to index
    %c0_156 = arith.constant 0 : index
    %544 = vector.load %arg7[%c0_155, %543, %c0_156] : memref<1x128x32xf32, #tpu.memory_space<vmem>>, vector<1x8x32xf32>
    %545 = vector.shape_cast %544 : vector<1x8x32xf32> to vector<8x32xf32>
    %546 = vector.shape_cast %542 : vector<8x32xf32> to vector<1x8x32xf32>
    tpu.vector_store %arg7[%c0_155, %543, %c0_156], %546 {strides = array<i32>} : memref<1x128x32xf32, #tpu.memory_space<vmem>>, vector<1x8x32xf32>,
    %c14_i32 = arith.constant 14 : i32
    %c0_i32_157 = arith.constant 0 : i32
    %547 = arith.cmpi eq, %arg0, %c0_i32_157 : i32
    %c15_i32_158 = arith.constant 15 : i32
    %548 = arith.subi %c15_i32_158, %c14_i32 : i32
    %549 = arith.select %547, %c14_i32, %548 : i32
    %c8_i32_159 = arith.constant 8 : i32
    %550 = arith.muli %549, %c8_i32_159 : i32
    %551 = tpu.assume_multiple %550, 8 : i32
    %552 = arith.index_cast %551 : i32 to index
    %c0_160 = arith.constant 0 : index
    %553 = vector.load %arg10[%552, %c0_160] : memref<128x128xf32, #tpu.memory_space<vmem>>, vector<8x128xf32>
    %cst_161 = arith.constant dense<0.000000e+00> : vector<8x128xf32>
    %554 = tpu.matmul %542, %10, %cst_161 {dimension_numbers = #tpu.dot_dimension_numbers<[1], [0], [0], [1], [0, 0, 1, 1], [], []>} : vector<8x32xf32>, vector<32x128xf32>, vector<8x128xf32> -> vector<8x128xf32>
    %555 = arith.addf %553, %554 : vector<8x128xf32>
    %556 = vector.extract_strided_slice %555 {offsets = [0, 0], sizes = [8, 32], strides = [1, 1]} : vector<8x128xf32> to vector<8x32xf32>
    %557 = arith.negf %556 : vector<8x32xf32>
    %558 = math.exp %557 : vector<8x32xf32>
    %cst_162 = arith.constant 1.000000e+00 : f32
    %559 = vector.broadcast %cst_162 : f32 to vector<8x32xf32>
    %560 = arith.addf %559, %558 : vector<8x32xf32>
    %561 = arith.divf %559, %560 : vector<8x32xf32>
    %562 = vector.extract_strided_slice %555 {offsets = [0, 32], sizes = [8, 32], strides = [1, 1]} : vector<8x128xf32> to vector<8x32xf32>
    %563 = arith.negf %562 : vector<8x32xf32>
    %564 = math.exp %563 : vector<8x32xf32>
    %cst_163 = arith.constant 1.000000e+00 : f32
    %565 = vector.broadcast %cst_163 : f32 to vector<8x32xf32>
    %566 = arith.addf %565, %564 : vector<8x32xf32>
    %567 = arith.divf %565, %566 : vector<8x32xf32>
    %568 = vector.extract_strided_slice %555 {offsets = [0, 64], sizes = [8, 32], strides = [1, 1]} : vector<8x128xf32> to vector<8x32xf32>
    %569 = math.tanh %568 : vector<8x32xf32>
    %570 = vector.extract_strided_slice %555 {offsets = [0, 96], sizes = [8, 32], strides = [1, 1]} : vector<8x128xf32> to vector<8x32xf32>
    %571 = arith.negf %570 : vector<8x32xf32>
    %572 = math.exp %571 : vector<8x32xf32>
    %cst_164 = arith.constant 1.000000e+00 : f32
    %573 = vector.broadcast %cst_164 : f32 to vector<8x32xf32>
    %574 = arith.addf %573, %572 : vector<8x32xf32>
    %575 = arith.divf %573, %574 : vector<8x32xf32>
    %576 = arith.mulf %567, %540 : vector<8x32xf32>
    %577 = arith.mulf %561, %569 : vector<8x32xf32>
    %578 = arith.addf %576, %577 : vector<8x32xf32>
    %579 = math.tanh %578 : vector<8x32xf32>
    %580 = arith.mulf %575, %579 : vector<8x32xf32>
    %c0_165 = arith.constant 0 : index
    %581 = arith.index_cast %551 : i32 to index
    %c0_166 = arith.constant 0 : index
    %582 = vector.load %arg7[%c0_165, %581, %c0_166] : memref<1x128x32xf32, #tpu.memory_space<vmem>>, vector<1x8x32xf32>
    %583 = vector.shape_cast %582 : vector<1x8x32xf32> to vector<8x32xf32>
    %584 = vector.shape_cast %580 : vector<8x32xf32> to vector<1x8x32xf32>
    tpu.vector_store %arg7[%c0_165, %581, %c0_166], %584 {strides = array<i32>} : memref<1x128x32xf32, #tpu.memory_space<vmem>>, vector<1x8x32xf32>,
    %c15_i32_167 = arith.constant 15 : i32
    %c0_i32_168 = arith.constant 0 : i32
    %585 = arith.cmpi eq, %arg0, %c0_i32_168 : i32
    %c15_i32_169 = arith.constant 15 : i32
    %586 = arith.subi %c15_i32_169, %c15_i32_167 : i32
    %587 = arith.select %585, %c15_i32_167, %586 : i32
    %c8_i32_170 = arith.constant 8 : i32
    %588 = arith.muli %587, %c8_i32_170 : i32
    %589 = tpu.assume_multiple %588, 8 : i32
    %590 = arith.index_cast %589 : i32 to index
    %c0_171 = arith.constant 0 : index
    %591 = vector.load %arg10[%590, %c0_171] : memref<128x128xf32, #tpu.memory_space<vmem>>, vector<8x128xf32>
    %cst_172 = arith.constant dense<0.000000e+00> : vector<8x128xf32>
    %592 = tpu.matmul %580, %10, %cst_172 {dimension_numbers = #tpu.dot_dimension_numbers<[1], [0], [0], [1], [0, 0, 1, 1], [], []>} : vector<8x32xf32>, vector<32x128xf32>, vector<8x128xf32> -> vector<8x128xf32>
    %593 = arith.addf %591, %592 : vector<8x128xf32>
    %594 = vector.extract_strided_slice %593 {offsets = [0, 0], sizes = [8, 32], strides = [1, 1]} : vector<8x128xf32> to vector<8x32xf32>
    %595 = arith.negf %594 : vector<8x32xf32>
    %596 = math.exp %595 : vector<8x32xf32>
    %cst_173 = arith.constant 1.000000e+00 : f32
    %597 = vector.broadcast %cst_173 : f32 to vector<8x32xf32>
    %598 = arith.addf %597, %596 : vector<8x32xf32>
    %599 = arith.divf %597, %598 : vector<8x32xf32>
    %600 = vector.extract_strided_slice %593 {offsets = [0, 32], sizes = [8, 32], strides = [1, 1]} : vector<8x128xf32> to vector<8x32xf32>
    %601 = arith.negf %600 : vector<8x32xf32>
    %602 = math.exp %601 : vector<8x32xf32>
    %cst_174 = arith.constant 1.000000e+00 : f32
    %603 = vector.broadcast %cst_174 : f32 to vector<8x32xf32>
    %604 = arith.addf %603, %602 : vector<8x32xf32>
    %605 = arith.divf %603, %604 : vector<8x32xf32>
    %606 = vector.extract_strided_slice %593 {offsets = [0, 64], sizes = [8, 32], strides = [1, 1]} : vector<8x128xf32> to vector<8x32xf32>
    %607 = math.tanh %606 : vector<8x32xf32>
    %608 = vector.extract_strided_slice %593 {offsets = [0, 96], sizes = [8, 32], strides = [1, 1]} : vector<8x128xf32> to vector<8x32xf32>
    %609 = arith.negf %608 : vector<8x32xf32>
    %610 = math.exp %609 : vector<8x32xf32>
    %cst_175 = arith.constant 1.000000e+00 : f32
    %611 = vector.broadcast %cst_175 : f32 to vector<8x32xf32>
    %612 = arith.addf %611, %610 : vector<8x32xf32>
    %613 = arith.divf %611, %612 : vector<8x32xf32>
    %614 = arith.mulf %605, %578 : vector<8x32xf32>
    %615 = arith.mulf %599, %607 : vector<8x32xf32>
    %616 = arith.addf %614, %615 : vector<8x32xf32>
    %617 = math.tanh %616 : vector<8x32xf32>
    %618 = arith.mulf %613, %617 : vector<8x32xf32>
    %c0_176 = arith.constant 0 : index
    %619 = arith.index_cast %589 : i32 to index
    %c0_177 = arith.constant 0 : index
    %620 = vector.load %arg7[%c0_176, %619, %c0_177] : memref<1x128x32xf32, #tpu.memory_space<vmem>>, vector<1x8x32xf32>
    %621 = vector.shape_cast %620 : vector<1x8x32xf32> to vector<8x32xf32>
    %622 = vector.shape_cast %618 : vector<8x32xf32> to vector<1x8x32xf32>
    tpu.vector_store %arg7[%c0_176, %619, %c0_177], %622 {strides = array<i32>} : memref<1x128x32xf32, #tpu.memory_space<vmem>>, vector<1x8x32xf32>,
    %c16_i32 = arith.constant 16 : i32
    %c0_178 = arith.constant 0 : index
    %c0_179 = arith.constant 0 : index
    %c0_180 = arith.constant 0 : index
    %623 = vector.load %arg8[%c0_178, %c0_179, %c0_180] : memref<1x8x32xf32, #tpu.memory_space<vmem>>, vector<1x8x32xf32>
    %624 = vector.shape_cast %623 : vector<1x8x32xf32> to vector<8x32xf32>
    %625 = vector.shape_cast %618 : vector<8x32xf32> to vector<1x8x32xf32>
    tpu.vector_store %arg8[%c0_178, %c0_179, %c0_180], %625 {strides = array<i32>} : memref<1x8x32xf32, #tpu.memory_space<vmem>>, vector<1x8x32xf32>,
    %c0_181 = arith.constant 0 : index
    %c0_182 = arith.constant 0 : index
    %c0_183 = arith.constant 0 : index
    %626 = vector.load %arg9[%c0_181, %c0_182, %c0_183] : memref<1x8x32xf32, #tpu.memory_space<vmem>>, vector<1x8x32xf32>
    %627 = vector.shape_cast %626 : vector<1x8x32xf32> to vector<8x32xf32>
    %628 = vector.shape_cast %616 : vector<8x32xf32> to vector<1x8x32xf32>
    tpu.vector_store %arg9[%c0_181, %c0_182, %c0_183], %628 {strides = array<i32>} : memref<1x8x32xf32, #tpu.memory_space<vmem>>, vector<1x8x32xf32>,
    return
  }
  func.func @transform_0(%arg0: i32) -> (i32, i32) {
    %c0_i32 = arith.constant 0 : i32
    %c0_i32_0 = arith.constant 0 : i32
    %c0_i32_1 = arith.constant 0 : i32
    return %c0_i32, %c0_i32_0 : i32, i32
  }
  func.func @transform_1(%arg0: i32) -> (i32, i32, i32) {
    %c0_i32 = arith.constant 0 : i32
    %c0_i32_0 = arith.constant 0 : i32
    %c0_i32_1 = arith.constant 0 : i32
    return %arg0, %c0_i32, %c0_i32_0 : i32, i32, i32
  }
  func.func @transform_2(%arg0: i32) -> (i32, i32, i32) {
    %c0_i32 = arith.constant 0 : i32
    %c0_i32_0 = arith.constant 0 : i32
    %c0_i32_1 = arith.constant 0 : i32
    return %arg0, %c0_i32, %c0_i32_0 : i32, i32, i32
  }
  func.func @transform_3(%arg0: i32) -> (i32, i32, i32) {
    %c0_i32 = arith.constant 0 : i32
    %c0_i32_0 = arith.constant 0 : i32
    %c0_i32_1 = arith.constant 0 : i32
    return %arg0, %c0_i32, %c0_i32_0 : i32, i32, i32
  }
  func.func @transform_4(%arg0: i32) -> (i32, i32, i32) {
    %c0_i32 = arith.constant 0 : i32
    %c0_i32_0 = arith.constant 0 : i32
    %c0_i32_1 = arith.constant 0 : i32
    return %arg0, %c0_i32, %c0_i32_0 : i32, i32, i32
  }
  func.func @transform_5(%arg0: i32) -> (i32, i32, i32) {
    %c0_i32 = arith.constant 0 : i32
    %c0_i32_0 = arith.constant 0 : i32
    %c0_i32_1 = arith.constant 0 : i32
    return %arg0, %c0_i32, %c0_i32_0 : i32, i32, i32
  }
  func.func @transform_6(%arg0: i32) -> (i32, i32, i32) {
    %c0_i32 = arith.constant 0 : i32
    %c0_i32_0 = arith.constant 0 : i32
    %c0_i32_1 = arith.constant 0 : i32
    return %arg0, %c0_i32, %c0_i32_0 : i32, i32, i32
  }
  func.func @transform_7(%arg0: i32) -> (i32, i32, i32) {
    %c0_i32 = arith.constant 0 : i32
    %c0_i32_0 = arith.constant 0 : i32
    %c0_i32_1 = arith.constant 0 : i32
    return %arg0, %c0_i32, %c0_i32_0 : i32, i32, i32
  }
  func.func @transform_8(%arg0: i32) -> (i32, i32, i32) {
    %c0_i32 = arith.constant 0 : i32
    %c0_i32_0 = arith.constant 0 : i32
    %c0_i32_1 = arith.constant 0 : i32
    return %arg0, %c0_i32, %c0_i32_0 : i32, i32, i32
  }
}

module attributes {stable_mosaic.version = 11 : i64} {
  func.func @lstm_layer_kernel(%arg0: i32, %arg1: memref<128x64xf32, #tpu.memory_space<vmem>>, %arg2: memref<1x64x128xf32, #tpu.memory_space<vmem>>, %arg3: memref<1x32x128xf32, #tpu.memory_space<vmem>>, %arg4: memref<1x1x128xf32, #tpu.memory_space<vmem>>, %arg5: memref<1x8x32xf32, #tpu.memory_space<vmem>>, %arg6: memref<1x8x32xf32, #tpu.memory_space<vmem>>, %arg7: memref<1x128x32xf32, #tpu.memory_space<vmem>>, %arg8: memref<1x8x32xf32, #tpu.memory_space<vmem>>, %arg9: memref<1x8x32xf32, #tpu.memory_space<vmem>>, %arg10: memref<128x128xf32, #tpu.memory_space<vmem>>) attributes {dimension_semantics = [#tpu.dimension_semantics<parallel>], iteration_bounds = array<i64: 2>, scalar_prefetch = 0 : i64, scratch_operands = 1 : i64, tpu.core_type = #tpu.core_type<tc>, window_params = [{pipeline_mode = #tpu.pipeline_mode<synchronous>, transform_indices = @transform_0, window_bounds = array<i64: 128, 64>}, {transform_indices = @transform_1, window_bounds = array<i64: 1, 64, 128>}, {transform_indices = @transform_2, window_bounds = array<i64: 1, 32, 128>}, {transform_indices = @transform_3, window_bounds = array<i64: 1, 1, 128>}, {transform_indices = @transform_4, window_bounds = array<i64: 1, 8, 32>}, {transform_indices = @transform_5, window_bounds = array<i64: 1, 8, 32>}, {transform_indices = @transform_6, window_bounds = array<i64: 1, 128, 32>}, {transform_indices = @transform_7, window_bounds = array<i64: 1, 8, 32>}, {transform_indices = @transform_8, window_bounds = array<i64: 1, 8, 32>}]} {
    %c0 = arith.constant 0 : index
    %c0_0 = arith.constant 0 : index
    %0 = vector.load %arg1[%c0, %c0_0] : memref<128x64xf32, #tpu.memory_space<vmem>>, vector<128x64xf32>
    %c0_1 = arith.constant 0 : index
    %c0_2 = arith.constant 0 : index
    %c0_3 = arith.constant 0 : index
    %1 = vector.load %arg2[%c0_1, %c0_2, %c0_3] : memref<1x64x128xf32, #tpu.memory_space<vmem>>, vector<1x64x128xf32>
    %2 = vector.shape_cast %1 : vector<1x64x128xf32> to vector<64x128xf32>
    %cst = arith.constant dense<0.000000e+00> : vector<128x128xf32>
    %3 = tpu.matmul %0, %2, %cst {dimension_numbers = #tpu.dot_dimension_numbers<[1], [0], [0], [1], [0, 0, 1, 1], [], []>} : vector<128x64xf32>, vector<64x128xf32>, vector<128x128xf32> -> vector<128x128xf32>
    %c0_4 = arith.constant 0 : index
    %c0_5 = arith.constant 0 : index
    %c0_6 = arith.constant 0 : index
    %4 = vector.load %arg4[%c0_4, %c0_5, %c0_6] : memref<1x1x128xf32, #tpu.memory_space<vmem>>, vector<1x1x128xf32>
    %5 = vector.shape_cast %4 : vector<1x1x128xf32> to vector<1x128xf32>
    %6 = vector.broadcast %5 : vector<1x128xf32> to vector<128x128xf32>
    %7 = arith.addf %3, %6 : vector<128x128xf32>
    %c0_7 = arith.constant 0 : index
    %c0_8 = arith.constant 0 : index
    %8 = vector.load %arg10[%c0_7, %c0_8] : memref<128x128xf32, #tpu.memory_space<vmem>>, vector<128x128xf32>
    tpu.vector_store %arg10[%c0_7, %c0_8], %7 {strides = array<i32>} : memref<128x128xf32, #tpu.memory_space<vmem>>, vector<128x128xf32>,
    %c0_9 = arith.constant 0 : index
    %c0_10 = arith.constant 0 : index
    %c0_11 = arith.constant 0 : index
    %9 = vector.load %arg3[%c0_9, %c0_10, %c0_11] : memref<1x32x128xf32, #tpu.memory_space<vmem>>, vector<1x32x128xf32>
    %10 = vector.shape_cast %9 : vector<1x32x128xf32> to vector<32x128xf32>
    %c0_12 = arith.constant 0 : index
    %c0_13 = arith.constant 0 : index
    %c0_14 = arith.constant 0 : index
    %11 = vector.load %arg5[%c0_12, %c0_13, %c0_14] : memref<1x8x32xf32, #tpu.memory_space<vmem>>, vector<1x8x32xf32>
    %12 = vector.shape_cast %11 : vector<1x8x32xf32> to vector<8x32xf32>
    %c0_15 = arith.constant 0 : index
    %c0_16 = arith.constant 0 : index
    %c0_17 = arith.constant 0 : index
    %13 = vector.load %arg6[%c0_15, %c0_16, %c0_17] : memref<1x8x32xf32, #tpu.memory_space<vmem>>, vector<1x8x32xf32>
    %14 = vector.shape_cast %13 : vector<1x8x32xf32> to vector<8x32xf32>
    %c0_i32 = arith.constant 0 : i32
    %c0_i32_18 = arith.constant 0 : i32
    %15 = arith.cmpi eq, %arg0, %c0_i32_18 : i32
    %c15_i32 = arith.constant 15 : i32
    %16 = arith.subi %c15_i32, %c0_i32 : i32
    %17 = arith.select %15, %c0_i32, %16 : i32
    %c8_i32 = arith.constant 8 : i32
    %18 = arith.muli %17, %c8_i32 : i32
    %19 = tpu.assume_multiple %18, 8 : i32
    %20 = arith.index_cast %19 : i32 to index
    %c0_19 = arith.constant 0 : index
    %21 = vector.load %arg10[%20, %c0_19] : memref<128x128xf32, #tpu.memory_space<vmem>>, vector<8x128xf32>
    %cst_20 = arith.constant dense<0.000000e+00> : vector<8x128xf32>
    %22 = tpu.matmul %12, %10, %cst_20 {dimension_numbers = #tpu.dot_dimension_numbers<[1], [0], [0], [1], [0, 0, 1, 1], [], []>} : vector<8x32xf32>, vector<32x128xf32>, vector<8x128xf32> -> vector<8x128xf32>
    %23 = arith.addf %21, %22 : vector<8x128xf32>
    %24 = vector.extract_strided_slice %23 {offsets = [0, 0], sizes = [8, 32], strides = [1, 1]} : vector<8x128xf32> to vector<8x32xf32>
    %25 = arith.negf %24 : vector<8x32xf32>
    %26 = math.exp %25 : vector<8x32xf32>
    %cst_21 = arith.constant 1.000000e+00 : f32
    %27 = vector.broadcast %cst_21 : f32 to vector<8x32xf32>
    %28 = arith.addf %27, %26 : vector<8x32xf32>
    %29 = arith.divf %27, %28 : vector<8x32xf32>
    %30 = vector.extract_strided_slice %23 {offsets = [0, 32], sizes = [8, 32], strides = [1, 1]} : vector<8x128xf32> to vector<8x32xf32>
    %31 = arith.negf %30 : vector<8x32xf32>
    %32 = math.exp %31 : vector<8x32xf32>
    %cst_22 = arith.constant 1.000000e+00 : f32
    %33 = vector.broadcast %cst_22 : f32 to vector<8x32xf32>
    %34 = arith.addf %33, %32 : vector<8x32xf32>
    %35 = arith.divf %33, %34 : vector<8x32xf32>
    %36 = vector.extract_strided_slice %23 {offsets = [0, 64], sizes = [8, 32], strides = [1, 1]} : vector<8x128xf32> to vector<8x32xf32>
    %37 = math.tanh %36 : vector<8x32xf32>
    %38 = vector.extract_strided_slice %23 {offsets = [0, 96], sizes = [8, 32], strides = [1, 1]} : vector<8x128xf32> to vector<8x32xf32>
    %39 = arith.negf %38 : vector<8x32xf32>
    %40 = math.exp %39 : vector<8x32xf32>
    %cst_23 = arith.constant 1.000000e+00 : f32
    %41 = vector.broadcast %cst_23 : f32 to vector<8x32xf32>
    %42 = arith.addf %41, %40 : vector<8x32xf32>
    %43 = arith.divf %41, %42 : vector<8x32xf32>
    %44 = arith.mulf %35, %14 : vector<8x32xf32>
    %45 = arith.mulf %29, %37 : vector<8x32xf32>
    %46 = arith.addf %44, %45 : vector<8x32xf32>
    %47 = math.tanh %46 : vector<8x32xf32>
    %48 = arith.mulf %43, %47 : vector<8x32xf32>
    %c0_24 = arith.constant 0 : index
    %49 = arith.index_cast %19 : i32 to index
    %c0_25 = arith.constant 0 : index
    %50 = vector.load %arg7[%c0_24, %49, %c0_25] : memref<1x128x32xf32, #tpu.memory_space<vmem>>, vector<1x8x32xf32>
    %51 = vector.shape_cast %50 : vector<1x8x32xf32> to vector<8x32xf32>
    %52 = vector.shape_cast %48 : vector<8x32xf32> to vector<1x8x32xf32>
    tpu.vector_store %arg7[%c0_24, %49, %c0_25], %52 {strides = array<i32>} : memref<1x128x32xf32, #tpu.memory_space<vmem>>, vector<1x8x32xf32>,
    %c1_i32 = arith.constant 1 : i32
    %c0_i32_26 = arith.constant 0 : i32
    %53 = arith.cmpi eq, %arg0, %c0_i32_26 : i32
    %c15_i32_27 = arith.constant 15 : i32
    %54 = arith.subi %c15_i32_27, %c1_i32 : i32
    %55 = arith.select %53, %c1_i32, %54 : i32
    %c8_i32_28 = arith.constant 8 : i32
    %56 = arith.muli %55, %c8_i32_28 : i32
    %57 = tpu.assume_multiple %56, 8 : i32
    %58 = arith.index_cast %57 : i32 to index
    %c0_29 = arith.constant 0 : index
    %59 = vector.load %arg10[%58, %c0_29] : memref<128x128xf32, #tpu.memory_space<vmem>>, vector<8x128xf32>
    %cst_30 = arith.constant dense<0.000000e+00> : vector<8x128xf32>
    %60 = tpu.matmul %48, %10, %cst_30 {dimension_numbers = #tpu.dot_dimension_numbers<[1], [0], [0], [1], [0, 0, 1, 1], [], []>} : vector<8x32xf32>, vector<32x128xf32>, vector<8x128xf32> -> vector<8x128xf32>
    %61 = arith.addf %59, %60 : vector<8x128xf32>
    %62 = vector.extract_strided_slice %61 {offsets = [0, 0], sizes = [8, 32], strides = [1, 1]} : vector<8x128xf32> to vector<8x32xf32>
    %63 = arith.negf %62 : vector<8x32xf32>
    %64 = math.exp %63 : vector<8x32xf32>
    %cst_31 = arith.constant 1.000000e+00 : f32
    %65 = vector.broadcast %cst_31 : f32 to vector<8x32xf32>
    %66 = arith.addf %65, %64 : vector<8x32xf32>
    %67 = arith.divf %65, %66 : vector<8x32xf32>
    %68 = vector.extract_strided_slice %61 {offsets = [0, 32], sizes = [8, 32], strides = [1, 1]} : vector<8x128xf32> to vector<8x32xf32>
    %69 = arith.negf %68 : vector<8x32xf32>
    %70 = math.exp %69 : vector<8x32xf32>
    %cst_32 = arith.constant 1.000000e+00 : f32
    %71 = vector.broadcast %cst_32 : f32 to vector<8x32xf32>
    %72 = arith.addf %71, %70 : vector<8x32xf32>
    %73 = arith.divf %71, %72 : vector<8x32xf32>
    %74 = vector.extract_strided_slice %61 {offsets = [0, 64], sizes = [8, 32], strides = [1, 1]} : vector<8x128xf32> to vector<8x32xf32>
    %75 = math.tanh %74 : vector<8x32xf32>
    %76 = vector.extract_strided_slice %61 {offsets = [0, 96], sizes = [8, 32], strides = [1, 1]} : vector<8x128xf32> to vector<8x32xf32>
    %77 = arith.negf %76 : vector<8x32xf32>
    %78 = math.exp %77 : vector<8x32xf32>
    %cst_33 = arith.constant 1.000000e+00 : f32
    %79 = vector.broadcast %cst_33 : f32 to vector<8x32xf32>
    %80 = arith.addf %79, %78 : vector<8x32xf32>
    %81 = arith.divf %79, %80 : vector<8x32xf32>
    %82 = arith.mulf %73, %46 : vector<8x32xf32>
    %83 = arith.mulf %67, %75 : vector<8x32xf32>
    %84 = arith.addf %82, %83 : vector<8x32xf32>
    %85 = math.tanh %84 : vector<8x32xf32>
    %86 = arith.mulf %81, %85 : vector<8x32xf32>
    %c0_34 = arith.constant 0 : index
    %87 = arith.index_cast %57 : i32 to index
    %c0_35 = arith.constant 0 : index
    %88 = vector.load %arg7[%c0_34, %87, %c0_35] : memref<1x128x32xf32, #tpu.memory_space<vmem>>, vector<1x8x32xf32>
    %89 = vector.shape_cast %88 : vector<1x8x32xf32> to vector<8x32xf32>
    %90 = vector.shape_cast %86 : vector<8x32xf32> to vector<1x8x32xf32>
    tpu.vector_store %arg7[%c0_34, %87, %c0_35], %90 {strides = array<i32>} : memref<1x128x32xf32, #tpu.memory_space<vmem>>, vector<1x8x32xf32>,
    %c2_i32 = arith.constant 2 : i32
    %c0_i32_36 = arith.constant 0 : i32
    %91 = arith.cmpi eq, %arg0, %c0_i32_36 : i32
    %c15_i32_37 = arith.constant 15 : i32
    %92 = arith.subi %c15_i32_37, %c2_i32 : i32
    %93 = arith.select %91, %c2_i32, %92 : i32
    %c8_i32_38 = arith.constant 8 : i32
    %94 = arith.muli %93, %c8_i32_38 : i32
    %95 = tpu.assume_multiple %94, 8 : i32
    %96 = arith.index_cast %95 : i32 to index
    %c0_39 = arith.constant 0 : index
    %97 = vector.load %arg10[%96, %c0_39] : memref<128x128xf32, #tpu.memory_space<vmem>>, vector<8x128xf32>
    %cst_40 = arith.constant dense<0.000000e+00> : vector<8x128xf32>
    %98 = tpu.matmul %86, %10, %cst_40 {dimension_numbers = #tpu.dot_dimension_numbers<[1], [0], [0], [1], [0, 0, 1, 1], [], []>} : vector<8x32xf32>, vector<32x128xf32>, vector<8x128xf32> -> vector<8x128xf32>
    %99 = arith.addf %97, %98 : vector<8x128xf32>
    %100 = vector.extract_strided_slice %99 {offsets = [0, 0], sizes = [8, 32], strides = [1, 1]} : vector<8x128xf32> to vector<8x32xf32>
    %101 = arith.negf %100 : vector<8x32xf32>
    %102 = math.exp %101 : vector<8x32xf32>
    %cst_41 = arith.constant 1.000000e+00 : f32
    %103 = vector.broadcast %cst_41 : f32 to vector<8x32xf32>
    %104 = arith.addf %103, %102 : vector<8x32xf32>
    %105 = arith.divf %103, %104 : vector<8x32xf32>
    %106 = vector.extract_strided_slice %99 {offsets = [0, 32], sizes = [8, 32], strides = [1, 1]} : vector<8x128xf32> to vector<8x32xf32>
    %107 = arith.negf %106 : vector<8x32xf32>
    %108 = math.exp %107 : vector<8x32xf32>
    %cst_42 = arith.constant 1.000000e+00 : f32
    %109 = vector.broadcast %cst_42 : f32 to vector<8x32xf32>
    %110 = arith.addf %109, %108 : vector<8x32xf32>
    %111 = arith.divf %109, %110 : vector<8x32xf32>
    %112 = vector.extract_strided_slice %99 {offsets = [0, 64], sizes = [8, 32], strides = [1, 1]} : vector<8x128xf32> to vector<8x32xf32>
    %113 = math.tanh %112 : vector<8x32xf32>
    %114 = vector.extract_strided_slice %99 {offsets = [0, 96], sizes = [8, 32], strides = [1, 1]} : vector<8x128xf32> to vector<8x32xf32>
    %115 = arith.negf %114 : vector<8x32xf32>
    %116 = math.exp %115 : vector<8x32xf32>
    %cst_43 = arith.constant 1.000000e+00 : f32
    %117 = vector.broadcast %cst_43 : f32 to vector<8x32xf32>
    %118 = arith.addf %117, %116 : vector<8x32xf32>
    %119 = arith.divf %117, %118 : vector<8x32xf32>
    %120 = arith.mulf %111, %84 : vector<8x32xf32>
    %121 = arith.mulf %105, %113 : vector<8x32xf32>
    %122 = arith.addf %120, %121 : vector<8x32xf32>
    %123 = math.tanh %122 : vector<8x32xf32>
    %124 = arith.mulf %119, %123 : vector<8x32xf32>
    %c0_44 = arith.constant 0 : index
    %125 = arith.index_cast %95 : i32 to index
    %c0_45 = arith.constant 0 : index
    %126 = vector.load %arg7[%c0_44, %125, %c0_45] : memref<1x128x32xf32, #tpu.memory_space<vmem>>, vector<1x8x32xf32>
    %127 = vector.shape_cast %126 : vector<1x8x32xf32> to vector<8x32xf32>
    %128 = vector.shape_cast %124 : vector<8x32xf32> to vector<1x8x32xf32>
    tpu.vector_store %arg7[%c0_44, %125, %c0_45], %128 {strides = array<i32>} : memref<1x128x32xf32, #tpu.memory_space<vmem>>, vector<1x8x32xf32>,
    %c3_i32 = arith.constant 3 : i32
    %c0_i32_46 = arith.constant 0 : i32
    %129 = arith.cmpi eq, %arg0, %c0_i32_46 : i32
    %c15_i32_47 = arith.constant 15 : i32
    %130 = arith.subi %c15_i32_47, %c3_i32 : i32
    %131 = arith.select %129, %c3_i32, %130 : i32
    %c8_i32_48 = arith.constant 8 : i32
    %132 = arith.muli %131, %c8_i32_48 : i32
    %133 = tpu.assume_multiple %132, 8 : i32
    %134 = arith.index_cast %133 : i32 to index
    %c0_49 = arith.constant 0 : index
    %135 = vector.load %arg10[%134, %c0_49] : memref<128x128xf32, #tpu.memory_space<vmem>>, vector<8x128xf32>
    %cst_50 = arith.constant dense<0.000000e+00> : vector<8x128xf32>
    %136 = tpu.matmul %124, %10, %cst_50 {dimension_numbers = #tpu.dot_dimension_numbers<[1], [0], [0], [1], [0, 0, 1, 1], [], []>} : vector<8x32xf32>, vector<32x128xf32>, vector<8x128xf32> -> vector<8x128xf32>
    %137 = arith.addf %135, %136 : vector<8x128xf32>
    %138 = vector.extract_strided_slice %137 {offsets = [0, 0], sizes = [8, 32], strides = [1, 1]} : vector<8x128xf32> to vector<8x32xf32>
    %139 = arith.negf %138 : vector<8x32xf32>
    %140 = math.exp %139 : vector<8x32xf32>
    %cst_51 = arith.constant 1.000000e+00 : f32
    %141 = vector.broadcast %cst_51 : f32 to vector<8x32xf32>
    %142 = arith.addf %141, %140 : vector<8x32xf32>
    %143 = arith.divf %141, %142 : vector<8x32xf32>
    %144 = vector.extract_strided_slice %137 {offsets = [0, 32], sizes = [8, 32], strides = [1, 1]} : vector<8x128xf32> to vector<8x32xf32>
    %145 = arith.negf %144 : vector<8x32xf32>
    %146 = math.exp %145 : vector<8x32xf32>
    %cst_52 = arith.constant 1.000000e+00 : f32
    %147 = vector.broadcast %cst_52 : f32 to vector<8x32xf32>
    %148 = arith.addf %147, %146 : vector<8x32xf32>
    %149 = arith.divf %147, %148 : vector<8x32xf32>
    %150 = vector.extract_strided_slice %137 {offsets = [0, 64], sizes = [8, 32], strides = [1, 1]} : vector<8x128xf32> to vector<8x32xf32>
    %151 = math.tanh %150 : vector<8x32xf32>
    %152 = vector.extract_strided_slice %137 {offsets = [0, 96], sizes = [8, 32], strides = [1, 1]} : vector<8x128xf32> to vector<8x32xf32>
    %153 = arith.negf %152 : vector<8x32xf32>
    %154 = math.exp %153 : vector<8x32xf32>
    %cst_53 = arith.constant 1.000000e+00 : f32
    %155 = vector.broadcast %cst_53 : f32 to vector<8x32xf32>
    %156 = arith.addf %155, %154 : vector<8x32xf32>
    %157 = arith.divf %155, %156 : vector<8x32xf32>
    %158 = arith.mulf %149, %122 : vector<8x32xf32>
    %159 = arith.mulf %143, %151 : vector<8x32xf32>
    %160 = arith.addf %158, %159 : vector<8x32xf32>
    %161 = math.tanh %160 : vector<8x32xf32>
    %162 = arith.mulf %157, %161 : vector<8x32xf32>
    %c0_54 = arith.constant 0 : index
    %163 = arith.index_cast %133 : i32 to index
    %c0_55 = arith.constant 0 : index
    %164 = vector.load %arg7[%c0_54, %163, %c0_55] : memref<1x128x32xf32, #tpu.memory_space<vmem>>, vector<1x8x32xf32>
    %165 = vector.shape_cast %164 : vector<1x8x32xf32> to vector<8x32xf32>
    %166 = vector.shape_cast %162 : vector<8x32xf32> to vector<1x8x32xf32>
    tpu.vector_store %arg7[%c0_54, %163, %c0_55], %166 {strides = array<i32>} : memref<1x128x32xf32, #tpu.memory_space<vmem>>, vector<1x8x32xf32>,
    %c4_i32 = arith.constant 4 : i32
    %c0_i32_56 = arith.constant 0 : i32
    %167 = arith.cmpi eq, %arg0, %c0_i32_56 : i32
    %c15_i32_57 = arith.constant 15 : i32
    %168 = arith.subi %c15_i32_57, %c4_i32 : i32
    %169 = arith.select %167, %c4_i32, %168 : i32
    %c8_i32_58 = arith.constant 8 : i32
    %170 = arith.muli %169, %c8_i32_58 : i32
    %171 = tpu.assume_multiple %170, 8 : i32
    %172 = arith.index_cast %171 : i32 to index
    %c0_59 = arith.constant 0 : index
    %173 = vector.load %arg10[%172, %c0_59] : memref<128x128xf32, #tpu.memory_space<vmem>>, vector<8x128xf32>
    %cst_60 = arith.constant dense<0.000000e+00> : vector<8x128xf32>
    %174 = tpu.matmul %162, %10, %cst_60 {dimension_numbers = #tpu.dot_dimension_numbers<[1], [0], [0], [1], [0, 0, 1, 1], [], []>} : vector<8x32xf32>, vector<32x128xf32>, vector<8x128xf32> -> vector<8x128xf32>
    %175 = arith.addf %173, %174 : vector<8x128xf32>
    %176 = vector.extract_strided_slice %175 {offsets = [0, 0], sizes = [8, 32], strides = [1, 1]} : vector<8x128xf32> to vector<8x32xf32>
    %177 = arith.negf %176 : vector<8x32xf32>
    %178 = math.exp %177 : vector<8x32xf32>
    %cst_61 = arith.constant 1.000000e+00 : f32
    %179 = vector.broadcast %cst_61 : f32 to vector<8x32xf32>
    %180 = arith.addf %179, %178 : vector<8x32xf32>
    %181 = arith.divf %179, %180 : vector<8x32xf32>
    %182 = vector.extract_strided_slice %175 {offsets = [0, 32], sizes = [8, 32], strides = [1, 1]} : vector<8x128xf32> to vector<8x32xf32>
    %183 = arith.negf %182 : vector<8x32xf32>
    %184 = math.exp %183 : vector<8x32xf32>
    %cst_62 = arith.constant 1.000000e+00 : f32
    %185 = vector.broadcast %cst_62 : f32 to vector<8x32xf32>
    %186 = arith.addf %185, %184 : vector<8x32xf32>
    %187 = arith.divf %185, %186 : vector<8x32xf32>
    %188 = vector.extract_strided_slice %175 {offsets = [0, 64], sizes = [8, 32], strides = [1, 1]} : vector<8x128xf32> to vector<8x32xf32>
    %189 = math.tanh %188 : vector<8x32xf32>
    %190 = vector.extract_strided_slice %175 {offsets = [0, 96], sizes = [8, 32], strides = [1, 1]} : vector<8x128xf32> to vector<8x32xf32>
    %191 = arith.negf %190 : vector<8x32xf32>
    %192 = math.exp %191 : vector<8x32xf32>
    %cst_63 = arith.constant 1.000000e+00 : f32
    %193 = vector.broadcast %cst_63 : f32 to vector<8x32xf32>
    %194 = arith.addf %193, %192 : vector<8x32xf32>
    %195 = arith.divf %193, %194 : vector<8x32xf32>
    %196 = arith.mulf %187, %160 : vector<8x32xf32>
    %197 = arith.mulf %181, %189 : vector<8x32xf32>
    %198 = arith.addf %196, %197 : vector<8x32xf32>
    %199 = math.tanh %198 : vector<8x32xf32>
    %200 = arith.mulf %195, %199 : vector<8x32xf32>
    %c0_64 = arith.constant 0 : index
    %201 = arith.index_cast %171 : i32 to index
    %c0_65 = arith.constant 0 : index
    %202 = vector.load %arg7[%c0_64, %201, %c0_65] : memref<1x128x32xf32, #tpu.memory_space<vmem>>, vector<1x8x32xf32>
    %203 = vector.shape_cast %202 : vector<1x8x32xf32> to vector<8x32xf32>
    %204 = vector.shape_cast %200 : vector<8x32xf32> to vector<1x8x32xf32>
    tpu.vector_store %arg7[%c0_64, %201, %c0_65], %204 {strides = array<i32>} : memref<1x128x32xf32, #tpu.memory_space<vmem>>, vector<1x8x32xf32>,
    %c5_i32 = arith.constant 5 : i32
    %c0_i32_66 = arith.constant 0 : i32
    %205 = arith.cmpi eq, %arg0, %c0_i32_66 : i32
    %c15_i32_67 = arith.constant 15 : i32
    %206 = arith.subi %c15_i32_67, %c5_i32 : i32
    %207 = arith.select %205, %c5_i32, %206 : i32
    %c8_i32_68 = arith.constant 8 : i32
    %208 = arith.muli %207, %c8_i32_68 : i32
    %209 = tpu.assume_multiple %208, 8 : i32
    %210 = arith.index_cast %209 : i32 to index
    %c0_69 = arith.constant 0 : index
    %211 = vector.load %arg10[%210, %c0_69] : memref<128x128xf32, #tpu.memory_space<vmem>>, vector<8x128xf32>
    %cst_70 = arith.constant dense<0.000000e+00> : vector<8x128xf32>
    %212 = tpu.matmul %200, %10, %cst_70 {dimension_numbers = #tpu.dot_dimension_numbers<[1], [0], [0], [1], [0, 0, 1, 1], [], []>} : vector<8x32xf32>, vector<32x128xf32>, vector<8x128xf32> -> vector<8x128xf32>
    %213 = arith.addf %211, %212 : vector<8x128xf32>
    %214 = vector.extract_strided_slice %213 {offsets = [0, 0], sizes = [8, 32], strides = [1, 1]} : vector<8x128xf32> to vector<8x32xf32>
    %215 = arith.negf %214 : vector<8x32xf32>
    %216 = math.exp %215 : vector<8x32xf32>
    %cst_71 = arith.constant 1.000000e+00 : f32
    %217 = vector.broadcast %cst_71 : f32 to vector<8x32xf32>
    %218 = arith.addf %217, %216 : vector<8x32xf32>
    %219 = arith.divf %217, %218 : vector<8x32xf32>
    %220 = vector.extract_strided_slice %213 {offsets = [0, 32], sizes = [8, 32], strides = [1, 1]} : vector<8x128xf32> to vector<8x32xf32>
    %221 = arith.negf %220 : vector<8x32xf32>
    %222 = math.exp %221 : vector<8x32xf32>
    %cst_72 = arith.constant 1.000000e+00 : f32
    %223 = vector.broadcast %cst_72 : f32 to vector<8x32xf32>
    %224 = arith.addf %223, %222 : vector<8x32xf32>
    %225 = arith.divf %223, %224 : vector<8x32xf32>
    %226 = vector.extract_strided_slice %213 {offsets = [0, 64], sizes = [8, 32], strides = [1, 1]} : vector<8x128xf32> to vector<8x32xf32>
    %227 = math.tanh %226 : vector<8x32xf32>
    %228 = vector.extract_strided_slice %213 {offsets = [0, 96], sizes = [8, 32], strides = [1, 1]} : vector<8x128xf32> to vector<8x32xf32>
    %229 = arith.negf %228 : vector<8x32xf32>
    %230 = math.exp %229 : vector<8x32xf32>
    %cst_73 = arith.constant 1.000000e+00 : f32
    %231 = vector.broadcast %cst_73 : f32 to vector<8x32xf32>
    %232 = arith.addf %231, %230 : vector<8x32xf32>
    %233 = arith.divf %231, %232 : vector<8x32xf32>
    %234 = arith.mulf %225, %198 : vector<8x32xf32>
    %235 = arith.mulf %219, %227 : vector<8x32xf32>
    %236 = arith.addf %234, %235 : vector<8x32xf32>
    %237 = math.tanh %236 : vector<8x32xf32>
    %238 = arith.mulf %233, %237 : vector<8x32xf32>
    %c0_74 = arith.constant 0 : index
    %239 = arith.index_cast %209 : i32 to index
    %c0_75 = arith.constant 0 : index
    %240 = vector.load %arg7[%c0_74, %239, %c0_75] : memref<1x128x32xf32, #tpu.memory_space<vmem>>, vector<1x8x32xf32>
    %241 = vector.shape_cast %240 : vector<1x8x32xf32> to vector<8x32xf32>
    %242 = vector.shape_cast %238 : vector<8x32xf32> to vector<1x8x32xf32>
    tpu.vector_store %arg7[%c0_74, %239, %c0_75], %242 {strides = array<i32>} : memref<1x128x32xf32, #tpu.memory_space<vmem>>, vector<1x8x32xf32>,
    %c6_i32 = arith.constant 6 : i32
    %c0_i32_76 = arith.constant 0 : i32
    %243 = arith.cmpi eq, %arg0, %c0_i32_76 : i32
    %c15_i32_77 = arith.constant 15 : i32
    %244 = arith.subi %c15_i32_77, %c6_i32 : i32
    %245 = arith.select %243, %c6_i32, %244 : i32
    %c8_i32_78 = arith.constant 8 : i32
    %246 = arith.muli %245, %c8_i32_78 : i32
    %247 = tpu.assume_multiple %246, 8 : i32
    %248 = arith.index_cast %247 : i32 to index
    %c0_79 = arith.constant 0 : index
    %249 = vector.load %arg10[%248, %c0_79] : memref<128x128xf32, #tpu.memory_space<vmem>>, vector<8x128xf32>
    %cst_80 = arith.constant dense<0.000000e+00> : vector<8x128xf32>
    %250 = tpu.matmul %238, %10, %cst_80 {dimension_numbers = #tpu.dot_dimension_numbers<[1], [0], [0], [1], [0, 0, 1, 1], [], []>} : vector<8x32xf32>, vector<32x128xf32>, vector<8x128xf32> -> vector<8x128xf32>
    %251 = arith.addf %249, %250 : vector<8x128xf32>
    %252 = vector.extract_strided_slice %251 {offsets = [0, 0], sizes = [8, 32], strides = [1, 1]} : vector<8x128xf32> to vector<8x32xf32>
    %253 = arith.negf %252 : vector<8x32xf32>
    %254 = math.exp %253 : vector<8x32xf32>
    %cst_81 = arith.constant 1.000000e+00 : f32
    %255 = vector.broadcast %cst_81 : f32 to vector<8x32xf32>
    %256 = arith.addf %255, %254 : vector<8x32xf32>
    %257 = arith.divf %255, %256 : vector<8x32xf32>
    %258 = vector.extract_strided_slice %251 {offsets = [0, 32], sizes = [8, 32], strides = [1, 1]} : vector<8x128xf32> to vector<8x32xf32>
    %259 = arith.negf %258 : vector<8x32xf32>
    %260 = math.exp %259 : vector<8x32xf32>
    %cst_82 = arith.constant 1.000000e+00 : f32
    %261 = vector.broadcast %cst_82 : f32 to vector<8x32xf32>
    %262 = arith.addf %261, %260 : vector<8x32xf32>
    %263 = arith.divf %261, %262 : vector<8x32xf32>
    %264 = vector.extract_strided_slice %251 {offsets = [0, 64], sizes = [8, 32], strides = [1, 1]} : vector<8x128xf32> to vector<8x32xf32>
    %265 = math.tanh %264 : vector<8x32xf32>
    %266 = vector.extract_strided_slice %251 {offsets = [0, 96], sizes = [8, 32], strides = [1, 1]} : vector<8x128xf32> to vector<8x32xf32>
    %267 = arith.negf %266 : vector<8x32xf32>
    %268 = math.exp %267 : vector<8x32xf32>
    %cst_83 = arith.constant 1.000000e+00 : f32
    %269 = vector.broadcast %cst_83 : f32 to vector<8x32xf32>
    %270 = arith.addf %269, %268 : vector<8x32xf32>
    %271 = arith.divf %269, %270 : vector<8x32xf32>
    %272 = arith.mulf %263, %236 : vector<8x32xf32>
    %273 = arith.mulf %257, %265 : vector<8x32xf32>
    %274 = arith.addf %272, %273 : vector<8x32xf32>
    %275 = math.tanh %274 : vector<8x32xf32>
    %276 = arith.mulf %271, %275 : vector<8x32xf32>
    %c0_84 = arith.constant 0 : index
    %277 = arith.index_cast %247 : i32 to index
    %c0_85 = arith.constant 0 : index
    %278 = vector.load %arg7[%c0_84, %277, %c0_85] : memref<1x128x32xf32, #tpu.memory_space<vmem>>, vector<1x8x32xf32>
    %279 = vector.shape_cast %278 : vector<1x8x32xf32> to vector<8x32xf32>
    %280 = vector.shape_cast %276 : vector<8x32xf32> to vector<1x8x32xf32>
    tpu.vector_store %arg7[%c0_84, %277, %c0_85], %280 {strides = array<i32>} : memref<1x128x32xf32, #tpu.memory_space<vmem>>, vector<1x8x32xf32>,
    %c7_i32 = arith.constant 7 : i32
    %c0_i32_86 = arith.constant 0 : i32
    %281 = arith.cmpi eq, %arg0, %c0_i32_86 : i32
    %c15_i32_87 = arith.constant 15 : i32
    %282 = arith.subi %c15_i32_87, %c7_i32 : i32
    %283 = arith.select %281, %c7_i32, %282 : i32
    %c8_i32_88 = arith.constant 8 : i32
    %284 = arith.muli %283, %c8_i32_88 : i32
    %285 = tpu.assume_multiple %284, 8 : i32
    %286 = arith.index_cast %285 : i32 to index
    %c0_89 = arith.constant 0 : index
    %287 = vector.load %arg10[%286, %c0_89] : memref<128x128xf32, #tpu.memory_space<vmem>>, vector<8x128xf32>
    %cst_90 = arith.constant dense<0.000000e+00> : vector<8x128xf32>
    %288 = tpu.matmul %276, %10, %cst_90 {dimension_numbers = #tpu.dot_dimension_numbers<[1], [0], [0], [1], [0, 0, 1, 1], [], []>} : vector<8x32xf32>, vector<32x128xf32>, vector<8x128xf32> -> vector<8x128xf32>
    %289 = arith.addf %287, %288 : vector<8x128xf32>
    %290 = vector.extract_strided_slice %289 {offsets = [0, 0], sizes = [8, 32], strides = [1, 1]} : vector<8x128xf32> to vector<8x32xf32>
    %291 = arith.negf %290 : vector<8x32xf32>
    %292 = math.exp %291 : vector<8x32xf32>
    %cst_91 = arith.constant 1.000000e+00 : f32
    %293 = vector.broadcast %cst_91 : f32 to vector<8x32xf32>
    %294 = arith.addf %293, %292 : vector<8x32xf32>
    %295 = arith.divf %293, %294 : vector<8x32xf32>
    %296 = vector.extract_strided_slice %289 {offsets = [0, 32], sizes = [8, 32], strides = [1, 1]} : vector<8x128xf32> to vector<8x32xf32>
    %297 = arith.negf %296 : vector<8x32xf32>
    %298 = math.exp %297 : vector<8x32xf32>
    %cst_92 = arith.constant 1.000000e+00 : f32
    %299 = vector.broadcast %cst_92 : f32 to vector<8x32xf32>
    %300 = arith.addf %299, %298 : vector<8x32xf32>
    %301 = arith.divf %299, %300 : vector<8x32xf32>
    %302 = vector.extract_strided_slice %289 {offsets = [0, 64], sizes = [8, 32], strides = [1, 1]} : vector<8x128xf32> to vector<8x32xf32>
    %303 = math.tanh %302 : vector<8x32xf32>
    %304 = vector.extract_strided_slice %289 {offsets = [0, 96], sizes = [8, 32], strides = [1, 1]} : vector<8x128xf32> to vector<8x32xf32>
    %305 = arith.negf %304 : vector<8x32xf32>
    %306 = math.exp %305 : vector<8x32xf32>
    %cst_93 = arith.constant 1.000000e+00 : f32
    %307 = vector.broadcast %cst_93 : f32 to vector<8x32xf32>
    %308 = arith.addf %307, %306 : vector<8x32xf32>
    %309 = arith.divf %307, %308 : vector<8x32xf32>
    %310 = arith.mulf %301, %274 : vector<8x32xf32>
    %311 = arith.mulf %295, %303 : vector<8x32xf32>
    %312 = arith.addf %310, %311 : vector<8x32xf32>
    %313 = math.tanh %312 : vector<8x32xf32>
    %314 = arith.mulf %309, %313 : vector<8x32xf32>
    %c0_94 = arith.constant 0 : index
    %315 = arith.index_cast %285 : i32 to index
    %c0_95 = arith.constant 0 : index
    %316 = vector.load %arg7[%c0_94, %315, %c0_95] : memref<1x128x32xf32, #tpu.memory_space<vmem>>, vector<1x8x32xf32>
    %317 = vector.shape_cast %316 : vector<1x8x32xf32> to vector<8x32xf32>
    %318 = vector.shape_cast %314 : vector<8x32xf32> to vector<1x8x32xf32>
    tpu.vector_store %arg7[%c0_94, %315, %c0_95], %318 {strides = array<i32>} : memref<1x128x32xf32, #tpu.memory_space<vmem>>, vector<1x8x32xf32>,
    %c8_i32_96 = arith.constant 8 : i32
    %c0_i32_97 = arith.constant 0 : i32
    %319 = arith.cmpi eq, %arg0, %c0_i32_97 : i32
    %c15_i32_98 = arith.constant 15 : i32
    %320 = arith.subi %c15_i32_98, %c8_i32_96 : i32
    %321 = arith.select %319, %c8_i32_96, %320 : i32
    %c8_i32_99 = arith.constant 8 : i32
    %322 = arith.muli %321, %c8_i32_99 : i32
    %323 = tpu.assume_multiple %322, 8 : i32
    %324 = arith.index_cast %323 : i32 to index
    %c0_100 = arith.constant 0 : index
    %325 = vector.load %arg10[%324, %c0_100] : memref<128x128xf32, #tpu.memory_space<vmem>>, vector<8x128xf32>
    %cst_101 = arith.constant dense<0.000000e+00> : vector<8x128xf32>
    %326 = tpu.matmul %314, %10, %cst_101 {dimension_numbers = #tpu.dot_dimension_numbers<[1], [0], [0], [1], [0, 0, 1, 1], [], []>} : vector<8x32xf32>, vector<32x128xf32>, vector<8x128xf32> -> vector<8x128xf32>
    %327 = arith.addf %325, %326 : vector<8x128xf32>
    %328 = vector.extract_strided_slice %327 {offsets = [0, 0], sizes = [8, 32], strides = [1, 1]} : vector<8x128xf32> to vector<8x32xf32>
    %329 = arith.negf %328 : vector<8x32xf32>
    %330 = math.exp %329 : vector<8x32xf32>
    %cst_102 = arith.constant 1.000000e+00 : f32
    %331 = vector.broadcast %cst_102 : f32 to vector<8x32xf32>
    %332 = arith.addf %331, %330 : vector<8x32xf32>
    %333 = arith.divf %331, %332 : vector<8x32xf32>
    %334 = vector.extract_strided_slice %327 {offsets = [0, 32], sizes = [8, 32], strides = [1, 1]} : vector<8x128xf32> to vector<8x32xf32>
    %335 = arith.negf %334 : vector<8x32xf32>
    %336 = math.exp %335 : vector<8x32xf32>
    %cst_103 = arith.constant 1.000000e+00 : f32
    %337 = vector.broadcast %cst_103 : f32 to vector<8x32xf32>
    %338 = arith.addf %337, %336 : vector<8x32xf32>
    %339 = arith.divf %337, %338 : vector<8x32xf32>
    %340 = vector.extract_strided_slice %327 {offsets = [0, 64], sizes = [8, 32], strides = [1, 1]} : vector<8x128xf32> to vector<8x32xf32>
    %341 = math.tanh %340 : vector<8x32xf32>
    %342 = vector.extract_strided_slice %327 {offsets = [0, 96], sizes = [8, 32], strides = [1, 1]} : vector<8x128xf32> to vector<8x32xf32>
    %343 = arith.negf %342 : vector<8x32xf32>
    %344 = math.exp %343 : vector<8x32xf32>
    %cst_104 = arith.constant 1.000000e+00 : f32
    %345 = vector.broadcast %cst_104 : f32 to vector<8x32xf32>
    %346 = arith.addf %345, %344 : vector<8x32xf32>
    %347 = arith.divf %345, %346 : vector<8x32xf32>
    %348 = arith.mulf %339, %312 : vector<8x32xf32>
    %349 = arith.mulf %333, %341 : vector<8x32xf32>
    %350 = arith.addf %348, %349 : vector<8x32xf32>
    %351 = math.tanh %350 : vector<8x32xf32>
    %352 = arith.mulf %347, %351 : vector<8x32xf32>
    %c0_105 = arith.constant 0 : index
    %353 = arith.index_cast %323 : i32 to index
    %c0_106 = arith.constant 0 : index
    %354 = vector.load %arg7[%c0_105, %353, %c0_106] : memref<1x128x32xf32, #tpu.memory_space<vmem>>, vector<1x8x32xf32>
    %355 = vector.shape_cast %354 : vector<1x8x32xf32> to vector<8x32xf32>
    %356 = vector.shape_cast %352 : vector<8x32xf32> to vector<1x8x32xf32>
    tpu.vector_store %arg7[%c0_105, %353, %c0_106], %356 {strides = array<i32>} : memref<1x128x32xf32, #tpu.memory_space<vmem>>, vector<1x8x32xf32>,
    %c9_i32 = arith.constant 9 : i32
    %c0_i32_107 = arith.constant 0 : i32
    %357 = arith.cmpi eq, %arg0, %c0_i32_107 : i32
    %c15_i32_108 = arith.constant 15 : i32
    %358 = arith.subi %c15_i32_108, %c9_i32 : i32
    %359 = arith.select %357, %c9_i32, %358 : i32
    %c8_i32_109 = arith.constant 8 : i32
    %360 = arith.muli %359, %c8_i32_109 : i32
    %361 = tpu.assume_multiple %360, 8 : i32
    %362 = arith.index_cast %361 : i32 to index
    %c0_110 = arith.constant 0 : index
    %363 = vector.load %arg10[%362, %c0_110] : memref<128x128xf32, #tpu.memory_space<vmem>>, vector<8x128xf32>
    %cst_111 = arith.constant dense<0.000000e+00> : vector<8x128xf32>
    %364 = tpu.matmul %352, %10, %cst_111 {dimension_numbers = #tpu.dot_dimension_numbers<[1], [0], [0], [1], [0, 0, 1, 1], [], []>} : vector<8x32xf32>, vector<32x128xf32>, vector<8x128xf32> -> vector<8x128xf32>
    %365 = arith.addf %363, %364 : vector<8x128xf32>
    %366 = vector.extract_strided_slice %365 {offsets = [0, 0], sizes = [8, 32], strides = [1, 1]} : vector<8x128xf32> to vector<8x32xf32>
    %367 = arith.negf %366 : vector<8x32xf32>
    %368 = math.exp %367 : vector<8x32xf32>
    %cst_112 = arith.constant 1.000000e+00 : f32
    %369 = vector.broadcast %cst_112 : f32 to vector<8x32xf32>
    %370 = arith.addf %369, %368 : vector<8x32xf32>
    %371 = arith.divf %369, %370 : vector<8x32xf32>
    %372 = vector.extract_strided_slice %365 {offsets = [0, 32], sizes = [8, 32], strides = [1, 1]} : vector<8x128xf32> to vector<8x32xf32>
    %373 = arith.negf %372 : vector<8x32xf32>
    %374 = math.exp %373 : vector<8x32xf32>
    %cst_113 = arith.constant 1.000000e+00 : f32
    %375 = vector.broadcast %cst_113 : f32 to vector<8x32xf32>
    %376 = arith.addf %375, %374 : vector<8x32xf32>
    %377 = arith.divf %375, %376 : vector<8x32xf32>
    %378 = vector.extract_strided_slice %365 {offsets = [0, 64], sizes = [8, 32], strides = [1, 1]} : vector<8x128xf32> to vector<8x32xf32>
    %379 = math.tanh %378 : vector<8x32xf32>
    %380 = vector.extract_strided_slice %365 {offsets = [0, 96], sizes = [8, 32], strides = [1, 1]} : vector<8x128xf32> to vector<8x32xf32>
    %381 = arith.negf %380 : vector<8x32xf32>
    %382 = math.exp %381 : vector<8x32xf32>
    %cst_114 = arith.constant 1.000000e+00 : f32
    %383 = vector.broadcast %cst_114 : f32 to vector<8x32xf32>
    %384 = arith.addf %383, %382 : vector<8x32xf32>
    %385 = arith.divf %383, %384 : vector<8x32xf32>
    %386 = arith.mulf %377, %350 : vector<8x32xf32>
    %387 = arith.mulf %371, %379 : vector<8x32xf32>
    %388 = arith.addf %386, %387 : vector<8x32xf32>
    %389 = math.tanh %388 : vector<8x32xf32>
    %390 = arith.mulf %385, %389 : vector<8x32xf32>
    %c0_115 = arith.constant 0 : index
    %391 = arith.index_cast %361 : i32 to index
    %c0_116 = arith.constant 0 : index
    %392 = vector.load %arg7[%c0_115, %391, %c0_116] : memref<1x128x32xf32, #tpu.memory_space<vmem>>, vector<1x8x32xf32>
    %393 = vector.shape_cast %392 : vector<1x8x32xf32> to vector<8x32xf32>
    %394 = vector.shape_cast %390 : vector<8x32xf32> to vector<1x8x32xf32>
    tpu.vector_store %arg7[%c0_115, %391, %c0_116], %394 {strides = array<i32>} : memref<1x128x32xf32, #tpu.memory_space<vmem>>, vector<1x8x32xf32>,
    %c10_i32 = arith.constant 10 : i32
    %c0_i32_117 = arith.constant 0 : i32
    %395 = arith.cmpi eq, %arg0, %c0_i32_117 : i32
    %c15_i32_118 = arith.constant 15 : i32
    %396 = arith.subi %c15_i32_118, %c10_i32 : i32
    %397 = arith.select %395, %c10_i32, %396 : i32
    %c8_i32_119 = arith.constant 8 : i32
    %398 = arith.muli %397, %c8_i32_119 : i32
    %399 = tpu.assume_multiple %398, 8 : i32
    %400 = arith.index_cast %399 : i32 to index
    %c0_120 = arith.constant 0 : index
    %401 = vector.load %arg10[%400, %c0_120] : memref<128x128xf32, #tpu.memory_space<vmem>>, vector<8x128xf32>
    %cst_121 = arith.constant dense<0.000000e+00> : vector<8x128xf32>
    %402 = tpu.matmul %390, %10, %cst_121 {dimension_numbers = #tpu.dot_dimension_numbers<[1], [0], [0], [1], [0, 0, 1, 1], [], []>} : vector<8x32xf32>, vector<32x128xf32>, vector<8x128xf32> -> vector<8x128xf32>
    %403 = arith.addf %401, %402 : vector<8x128xf32>
    %404 = vector.extract_strided_slice %403 {offsets = [0, 0], sizes = [8, 32], strides = [1, 1]} : vector<8x128xf32> to vector<8x32xf32>
    %405 = arith.negf %404 : vector<8x32xf32>
    %406 = math.exp %405 : vector<8x32xf32>
    %cst_122 = arith.constant 1.000000e+00 : f32
    %407 = vector.broadcast %cst_122 : f32 to vector<8x32xf32>
    %408 = arith.addf %407, %406 : vector<8x32xf32>
    %409 = arith.divf %407, %408 : vector<8x32xf32>
    %410 = vector.extract_strided_slice %403 {offsets = [0, 32], sizes = [8, 32], strides = [1, 1]} : vector<8x128xf32> to vector<8x32xf32>
    %411 = arith.negf %410 : vector<8x32xf32>
    %412 = math.exp %411 : vector<8x32xf32>
    %cst_123 = arith.constant 1.000000e+00 : f32
    %413 = vector.broadcast %cst_123 : f32 to vector<8x32xf32>
    %414 = arith.addf %413, %412 : vector<8x32xf32>
    %415 = arith.divf %413, %414 : vector<8x32xf32>
    %416 = vector.extract_strided_slice %403 {offsets = [0, 64], sizes = [8, 32], strides = [1, 1]} : vector<8x128xf32> to vector<8x32xf32>
    %417 = math.tanh %416 : vector<8x32xf32>
    %418 = vector.extract_strided_slice %403 {offsets = [0, 96], sizes = [8, 32], strides = [1, 1]} : vector<8x128xf32> to vector<8x32xf32>
    %419 = arith.negf %418 : vector<8x32xf32>
    %420 = math.exp %419 : vector<8x32xf32>
    %cst_124 = arith.constant 1.000000e+00 : f32
    %421 = vector.broadcast %cst_124 : f32 to vector<8x32xf32>
    %422 = arith.addf %421, %420 : vector<8x32xf32>
    %423 = arith.divf %421, %422 : vector<8x32xf32>
    %424 = arith.mulf %415, %388 : vector<8x32xf32>
    %425 = arith.mulf %409, %417 : vector<8x32xf32>
    %426 = arith.addf %424, %425 : vector<8x32xf32>
    %427 = math.tanh %426 : vector<8x32xf32>
    %428 = arith.mulf %423, %427 : vector<8x32xf32>
    %c0_125 = arith.constant 0 : index
    %429 = arith.index_cast %399 : i32 to index
    %c0_126 = arith.constant 0 : index
    %430 = vector.load %arg7[%c0_125, %429, %c0_126] : memref<1x128x32xf32, #tpu.memory_space<vmem>>, vector<1x8x32xf32>
    %431 = vector.shape_cast %430 : vector<1x8x32xf32> to vector<8x32xf32>
    %432 = vector.shape_cast %428 : vector<8x32xf32> to vector<1x8x32xf32>
    tpu.vector_store %arg7[%c0_125, %429, %c0_126], %432 {strides = array<i32>} : memref<1x128x32xf32, #tpu.memory_space<vmem>>, vector<1x8x32xf32>,
    %c11_i32 = arith.constant 11 : i32
    %c0_i32_127 = arith.constant 0 : i32
    %433 = arith.cmpi eq, %arg0, %c0_i32_127 : i32
    %c15_i32_128 = arith.constant 15 : i32
    %434 = arith.subi %c15_i32_128, %c11_i32 : i32
    %435 = arith.select %433, %c11_i32, %434 : i32
    %c8_i32_129 = arith.constant 8 : i32
    %436 = arith.muli %435, %c8_i32_129 : i32
    %437 = tpu.assume_multiple %436, 8 : i32
    %438 = arith.index_cast %437 : i32 to index
    %c0_130 = arith.constant 0 : index
    %439 = vector.load %arg10[%438, %c0_130] : memref<128x128xf32, #tpu.memory_space<vmem>>, vector<8x128xf32>
    %cst_131 = arith.constant dense<0.000000e+00> : vector<8x128xf32>
    %440 = tpu.matmul %428, %10, %cst_131 {dimension_numbers = #tpu.dot_dimension_numbers<[1], [0], [0], [1], [0, 0, 1, 1], [], []>} : vector<8x32xf32>, vector<32x128xf32>, vector<8x128xf32> -> vector<8x128xf32>
    %441 = arith.addf %439, %440 : vector<8x128xf32>
    %442 = vector.extract_strided_slice %441 {offsets = [0, 0], sizes = [8, 32], strides = [1, 1]} : vector<8x128xf32> to vector<8x32xf32>
    %443 = arith.negf %442 : vector<8x32xf32>
    %444 = math.exp %443 : vector<8x32xf32>
    %cst_132 = arith.constant 1.000000e+00 : f32
    %445 = vector.broadcast %cst_132 : f32 to vector<8x32xf32>
    %446 = arith.addf %445, %444 : vector<8x32xf32>
    %447 = arith.divf %445, %446 : vector<8x32xf32>
    %448 = vector.extract_strided_slice %441 {offsets = [0, 32], sizes = [8, 32], strides = [1, 1]} : vector<8x128xf32> to vector<8x32xf32>
    %449 = arith.negf %448 : vector<8x32xf32>
    %450 = math.exp %449 : vector<8x32xf32>
    %cst_133 = arith.constant 1.000000e+00 : f32
    %451 = vector.broadcast %cst_133 : f32 to vector<8x32xf32>
    %452 = arith.addf %451, %450 : vector<8x32xf32>
    %453 = arith.divf %451, %452 : vector<8x32xf32>
    %454 = vector.extract_strided_slice %441 {offsets = [0, 64], sizes = [8, 32], strides = [1, 1]} : vector<8x128xf32> to vector<8x32xf32>
    %455 = math.tanh %454 : vector<8x32xf32>
    %456 = vector.extract_strided_slice %441 {offsets = [0, 96], sizes = [8, 32], strides = [1, 1]} : vector<8x128xf32> to vector<8x32xf32>
    %457 = arith.negf %456 : vector<8x32xf32>
    %458 = math.exp %457 : vector<8x32xf32>
    %cst_134 = arith.constant 1.000000e+00 : f32
    %459 = vector.broadcast %cst_134 : f32 to vector<8x32xf32>
    %460 = arith.addf %459, %458 : vector<8x32xf32>
    %461 = arith.divf %459, %460 : vector<8x32xf32>
    %462 = arith.mulf %453, %426 : vector<8x32xf32>
    %463 = arith.mulf %447, %455 : vector<8x32xf32>
    %464 = arith.addf %462, %463 : vector<8x32xf32>
    %465 = math.tanh %464 : vector<8x32xf32>
    %466 = arith.mulf %461, %465 : vector<8x32xf32>
    %c0_135 = arith.constant 0 : index
    %467 = arith.index_cast %437 : i32 to index
    %c0_136 = arith.constant 0 : index
    %468 = vector.load %arg7[%c0_135, %467, %c0_136] : memref<1x128x32xf32, #tpu.memory_space<vmem>>, vector<1x8x32xf32>
    %469 = vector.shape_cast %468 : vector<1x8x32xf32> to vector<8x32xf32>
    %470 = vector.shape_cast %466 : vector<8x32xf32> to vector<1x8x32xf32>
    tpu.vector_store %arg7[%c0_135, %467, %c0_136], %470 {strides = array<i32>} : memref<1x128x32xf32, #tpu.memory_space<vmem>>, vector<1x8x32xf32>,
    %c12_i32 = arith.constant 12 : i32
    %c0_i32_137 = arith.constant 0 : i32
    %471 = arith.cmpi eq, %arg0, %c0_i32_137 : i32
    %c15_i32_138 = arith.constant 15 : i32
    %472 = arith.subi %c15_i32_138, %c12_i32 : i32
    %473 = arith.select %471, %c12_i32, %472 : i32
    %c8_i32_139 = arith.constant 8 : i32
    %474 = arith.muli %473, %c8_i32_139 : i32
    %475 = tpu.assume_multiple %474, 8 : i32
    %476 = arith.index_cast %475 : i32 to index
    %c0_140 = arith.constant 0 : index
    %477 = vector.load %arg10[%476, %c0_140] : memref<128x128xf32, #tpu.memory_space<vmem>>, vector<8x128xf32>
    %cst_141 = arith.constant dense<0.000000e+00> : vector<8x128xf32>
    %478 = tpu.matmul %466, %10, %cst_141 {dimension_numbers = #tpu.dot_dimension_numbers<[1], [0], [0], [1], [0, 0, 1, 1], [], []>} : vector<8x32xf32>, vector<32x128xf32>, vector<8x128xf32> -> vector<8x128xf32>
    %479 = arith.addf %477, %478 : vector<8x128xf32>
    %480 = vector.extract_strided_slice %479 {offsets = [0, 0], sizes = [8, 32], strides = [1, 1]} : vector<8x128xf32> to vector<8x32xf32>
    %481 = arith.negf %480 : vector<8x32xf32>
    %482 = math.exp %481 : vector<8x32xf32>
    %cst_142 = arith.constant 1.000000e+00 : f32
    %483 = vector.broadcast %cst_142 : f32 to vector<8x32xf32>
    %484 = arith.addf %483, %482 : vector<8x32xf32>
    %485 = arith.divf %483, %484 : vector<8x32xf32>
    %486 = vector.extract_strided_slice %479 {offsets = [0, 32], sizes = [8, 32], strides = [1, 1]} : vector<8x128xf32> to vector<8x32xf32>
    %487 = arith.negf %486 : vector<8x32xf32>
    %488 = math.exp %487 : vector<8x32xf32>
    %cst_143 = arith.constant 1.000000e+00 : f32
    %489 = vector.broadcast %cst_143 : f32 to vector<8x32xf32>
    %490 = arith.addf %489, %488 : vector<8x32xf32>
    %491 = arith.divf %489, %490 : vector<8x32xf32>
    %492 = vector.extract_strided_slice %479 {offsets = [0, 64], sizes = [8, 32], strides = [1, 1]} : vector<8x128xf32> to vector<8x32xf32>
    %493 = math.tanh %492 : vector<8x32xf32>
    %494 = vector.extract_strided_slice %479 {offsets = [0, 96], sizes = [8, 32], strides = [1, 1]} : vector<8x128xf32> to vector<8x32xf32>
    %495 = arith.negf %494 : vector<8x32xf32>
    %496 = math.exp %495 : vector<8x32xf32>
    %cst_144 = arith.constant 1.000000e+00 : f32
    %497 = vector.broadcast %cst_144 : f32 to vector<8x32xf32>
    %498 = arith.addf %497, %496 : vector<8x32xf32>
    %499 = arith.divf %497, %498 : vector<8x32xf32>
    %500 = arith.mulf %491, %464 : vector<8x32xf32>
    %501 = arith.mulf %485, %493 : vector<8x32xf32>
    %502 = arith.addf %500, %501 : vector<8x32xf32>
    %503 = math.tanh %502 : vector<8x32xf32>
    %504 = arith.mulf %499, %503 : vector<8x32xf32>
    %c0_145 = arith.constant 0 : index
    %505 = arith.index_cast %475 : i32 to index
    %c0_146 = arith.constant 0 : index
    %506 = vector.load %arg7[%c0_145, %505, %c0_146] : memref<1x128x32xf32, #tpu.memory_space<vmem>>, vector<1x8x32xf32>
    %507 = vector.shape_cast %506 : vector<1x8x32xf32> to vector<8x32xf32>
    %508 = vector.shape_cast %504 : vector<8x32xf32> to vector<1x8x32xf32>
    tpu.vector_store %arg7[%c0_145, %505, %c0_146], %508 {strides = array<i32>} : memref<1x128x32xf32, #tpu.memory_space<vmem>>, vector<1x8x32xf32>,
    %c13_i32 = arith.constant 13 : i32
    %c0_i32_147 = arith.constant 0 : i32
    %509 = arith.cmpi eq, %arg0, %c0_i32_147 : i32
    %c15_i32_148 = arith.constant 15 : i32
    %510 = arith.subi %c15_i32_148, %c13_i32 : i32
    %511 = arith.select %509, %c13_i32, %510 : i32
    %c8_i32_149 = arith.constant 8 : i32
    %512 = arith.muli %511, %c8_i32_149 : i32
    %513 = tpu.assume_multiple %512, 8 : i32
    %514 = arith.index_cast %513 : i32 to index
    %c0_150 = arith.constant 0 : index
    %515 = vector.load %arg10[%514, %c0_150] : memref<128x128xf32, #tpu.memory_space<vmem>>, vector<8x128xf32>
    %cst_151 = arith.constant dense<0.000000e+00> : vector<8x128xf32>
    %516 = tpu.matmul %504, %10, %cst_151 {dimension_numbers = #tpu.dot_dimension_numbers<[1], [0], [0], [1], [0, 0, 1, 1], [], []>} : vector<8x32xf32>, vector<32x128xf32>, vector<8x128xf32> -> vector<8x128xf32>
    %517 = arith.addf %515, %516 : vector<8x128xf32>
    %518 = vector.extract_strided_slice %517 {offsets = [0, 0], sizes = [8, 32], strides = [1, 1]} : vector<8x128xf32> to vector<8x32xf32>
    %519 = arith.negf %518 : vector<8x32xf32>
    %520 = math.exp %519 : vector<8x32xf32>
    %cst_152 = arith.constant 1.000000e+00 : f32
    %521 = vector.broadcast %cst_152 : f32 to vector<8x32xf32>
    %522 = arith.addf %521, %520 : vector<8x32xf32>
    %523 = arith.divf %521, %522 : vector<8x32xf32>
    %524 = vector.extract_strided_slice %517 {offsets = [0, 32], sizes = [8, 32], strides = [1, 1]} : vector<8x128xf32> to vector<8x32xf32>
    %525 = arith.negf %524 : vector<8x32xf32>
    %526 = math.exp %525 : vector<8x32xf32>
    %cst_153 = arith.constant 1.000000e+00 : f32
    %527 = vector.broadcast %cst_153 : f32 to vector<8x32xf32>
    %528 = arith.addf %527, %526 : vector<8x32xf32>
    %529 = arith.divf %527, %528 : vector<8x32xf32>
    %530 = vector.extract_strided_slice %517 {offsets = [0, 64], sizes = [8, 32], strides = [1, 1]} : vector<8x128xf32> to vector<8x32xf32>
    %531 = math.tanh %530 : vector<8x32xf32>
    %532 = vector.extract_strided_slice %517 {offsets = [0, 96], sizes = [8, 32], strides = [1, 1]} : vector<8x128xf32> to vector<8x32xf32>
    %533 = arith.negf %532 : vector<8x32xf32>
    %534 = math.exp %533 : vector<8x32xf32>
    %cst_154 = arith.constant 1.000000e+00 : f32
    %535 = vector.broadcast %cst_154 : f32 to vector<8x32xf32>
    %536 = arith.addf %535, %534 : vector<8x32xf32>
    %537 = arith.divf %535, %536 : vector<8x32xf32>
    %538 = arith.mulf %529, %502 : vector<8x32xf32>
    %539 = arith.mulf %523, %531 : vector<8x32xf32>
    %540 = arith.addf %538, %539 : vector<8x32xf32>
    %541 = math.tanh %540 : vector<8x32xf32>
    %542 = arith.mulf %537, %541 : vector<8x32xf32>
    %c0_155 = arith.constant 0 : index
    %543 = arith.index_cast %513 : i32 to index
    %c0_156 = arith.constant 0 : index
    %544 = vector.load %arg7[%c0_155, %543, %c0_156] : memref<1x128x32xf32, #tpu.memory_space<vmem>>, vector<1x8x32xf32>
    %545 = vector.shape_cast %544 : vector<1x8x32xf32> to vector<8x32xf32>
    %546 = vector.shape_cast %542 : vector<8x32xf32> to vector<1x8x32xf32>
    tpu.vector_store %arg7[%c0_155, %543, %c0_156], %546 {strides = array<i32>} : memref<1x128x32xf32, #tpu.memory_space<vmem>>, vector<1x8x32xf32>,
    %c14_i32 = arith.constant 14 : i32
    %c0_i32_157 = arith.constant 0 : i32
    %547 = arith.cmpi eq, %arg0, %c0_i32_157 : i32
    %c15_i32_158 = arith.constant 15 : i32
    %548 = arith.subi %c15_i32_158, %c14_i32 : i32
    %549 = arith.select %547, %c14_i32, %548 : i32
    %c8_i32_159 = arith.constant 8 : i32
    %550 = arith.muli %549, %c8_i32_159 : i32
    %551 = tpu.assume_multiple %550, 8 : i32
    %552 = arith.index_cast %551 : i32 to index
    %c0_160 = arith.constant 0 : index
    %553 = vector.load %arg10[%552, %c0_160] : memref<128x128xf32, #tpu.memory_space<vmem>>, vector<8x128xf32>
    %cst_161 = arith.constant dense<0.000000e+00> : vector<8x128xf32>
    %554 = tpu.matmul %542, %10, %cst_161 {dimension_numbers = #tpu.dot_dimension_numbers<[1], [0], [0], [1], [0, 0, 1, 1], [], []>} : vector<8x32xf32>, vector<32x128xf32>, vector<8x128xf32> -> vector<8x128xf32>
    %555 = arith.addf %553, %554 : vector<8x128xf32>
    %556 = vector.extract_strided_slice %555 {offsets = [0, 0], sizes = [8, 32], strides = [1, 1]} : vector<8x128xf32> to vector<8x32xf32>
    %557 = arith.negf %556 : vector<8x32xf32>
    %558 = math.exp %557 : vector<8x32xf32>
    %cst_162 = arith.constant 1.000000e+00 : f32
    %559 = vector.broadcast %cst_162 : f32 to vector<8x32xf32>
    %560 = arith.addf %559, %558 : vector<8x32xf32>
    %561 = arith.divf %559, %560 : vector<8x32xf32>
    %562 = vector.extract_strided_slice %555 {offsets = [0, 32], sizes = [8, 32], strides = [1, 1]} : vector<8x128xf32> to vector<8x32xf32>
    %563 = arith.negf %562 : vector<8x32xf32>
    %564 = math.exp %563 : vector<8x32xf32>
    %cst_163 = arith.constant 1.000000e+00 : f32
    %565 = vector.broadcast %cst_163 : f32 to vector<8x32xf32>
    %566 = arith.addf %565, %564 : vector<8x32xf32>
    %567 = arith.divf %565, %566 : vector<8x32xf32>
    %568 = vector.extract_strided_slice %555 {offsets = [0, 64], sizes = [8, 32], strides = [1, 1]} : vector<8x128xf32> to vector<8x32xf32>
    %569 = math.tanh %568 : vector<8x32xf32>
    %570 = vector.extract_strided_slice %555 {offsets = [0, 96], sizes = [8, 32], strides = [1, 1]} : vector<8x128xf32> to vector<8x32xf32>
    %571 = arith.negf %570 : vector<8x32xf32>
    %572 = math.exp %571 : vector<8x32xf32>
    %cst_164 = arith.constant 1.000000e+00 : f32
    %573 = vector.broadcast %cst_164 : f32 to vector<8x32xf32>
    %574 = arith.addf %573, %572 : vector<8x32xf32>
    %575 = arith.divf %573, %574 : vector<8x32xf32>
    %576 = arith.mulf %567, %540 : vector<8x32xf32>
    %577 = arith.mulf %561, %569 : vector<8x32xf32>
    %578 = arith.addf %576, %577 : vector<8x32xf32>
    %579 = math.tanh %578 : vector<8x32xf32>
    %580 = arith.mulf %575, %579 : vector<8x32xf32>
    %c0_165 = arith.constant 0 : index
    %581 = arith.index_cast %551 : i32 to index
    %c0_166 = arith.constant 0 : index
    %582 = vector.load %arg7[%c0_165, %581, %c0_166] : memref<1x128x32xf32, #tpu.memory_space<vmem>>, vector<1x8x32xf32>
    %583 = vector.shape_cast %582 : vector<1x8x32xf32> to vector<8x32xf32>
    %584 = vector.shape_cast %580 : vector<8x32xf32> to vector<1x8x32xf32>
    tpu.vector_store %arg7[%c0_165, %581, %c0_166], %584 {strides = array<i32>} : memref<1x128x32xf32, #tpu.memory_space<vmem>>, vector<1x8x32xf32>,
    %c15_i32_167 = arith.constant 15 : i32
    %c0_i32_168 = arith.constant 0 : i32
    %585 = arith.cmpi eq, %arg0, %c0_i32_168 : i32
    %c15_i32_169 = arith.constant 15 : i32
    %586 = arith.subi %c15_i32_169, %c15_i32_167 : i32
    %587 = arith.select %585, %c15_i32_167, %586 : i32
    %c8_i32_170 = arith.constant 8 : i32
    %588 = arith.muli %587, %c8_i32_170 : i32
    %589 = tpu.assume_multiple %588, 8 : i32
    %590 = arith.index_cast %589 : i32 to index
    %c0_171 = arith.constant 0 : index
    %591 = vector.load %arg10[%590, %c0_171] : memref<128x128xf32, #tpu.memory_space<vmem>>, vector<8x128xf32>
    %cst_172 = arith.constant dense<0.000000e+00> : vector<8x128xf32>
    %592 = tpu.matmul %580, %10, %cst_172 {dimension_numbers = #tpu.dot_dimension_numbers<[1], [0], [0], [1], [0, 0, 1, 1], [], []>} : vector<8x32xf32>, vector<32x128xf32>, vector<8x128xf32> -> vector<8x128xf32>
    %593 = arith.addf %591, %592 : vector<8x128xf32>
    %594 = vector.extract_strided_slice %593 {offsets = [0, 0], sizes = [8, 32], strides = [1, 1]} : vector<8x128xf32> to vector<8x32xf32>
    %595 = arith.negf %594 : vector<8x32xf32>
    %596 = math.exp %595 : vector<8x32xf32>
    %cst_173 = arith.constant 1.000000e+00 : f32
    %597 = vector.broadcast %cst_173 : f32 to vector<8x32xf32>
    %598 = arith.addf %597, %596 : vector<8x32xf32>
    %599 = arith.divf %597, %598 : vector<8x32xf32>
    %600 = vector.extract_strided_slice %593 {offsets = [0, 32], sizes = [8, 32], strides = [1, 1]} : vector<8x128xf32> to vector<8x32xf32>
    %601 = arith.negf %600 : vector<8x32xf32>
    %602 = math.exp %601 : vector<8x32xf32>
    %cst_174 = arith.constant 1.000000e+00 : f32
    %603 = vector.broadcast %cst_174 : f32 to vector<8x32xf32>
    %604 = arith.addf %603, %602 : vector<8x32xf32>
    %605 = arith.divf %603, %604 : vector<8x32xf32>
    %606 = vector.extract_strided_slice %593 {offsets = [0, 64], sizes = [8, 32], strides = [1, 1]} : vector<8x128xf32> to vector<8x32xf32>
    %607 = math.tanh %606 : vector<8x32xf32>
    %608 = vector.extract_strided_slice %593 {offsets = [0, 96], sizes = [8, 32], strides = [1, 1]} : vector<8x128xf32> to vector<8x32xf32>
    %609 = arith.negf %608 : vector<8x32xf32>
    %610 = math.exp %609 : vector<8x32xf32>
    %cst_175 = arith.constant 1.000000e+00 : f32
    %611 = vector.broadcast %cst_175 : f32 to vector<8x32xf32>
    %612 = arith.addf %611, %610 : vector<8x32xf32>
    %613 = arith.divf %611, %612 : vector<8x32xf32>
    %614 = arith.mulf %605, %578 : vector<8x32xf32>
    %615 = arith.mulf %599, %607 : vector<8x32xf32>
    %616 = arith.addf %614, %615 : vector<8x32xf32>
    %617 = math.tanh %616 : vector<8x32xf32>
    %618 = arith.mulf %613, %617 : vector<8x32xf32>
    %c0_176 = arith.constant 0 : index
    %619 = arith.index_cast %589 : i32 to index
    %c0_177 = arith.constant 0 : index
    %620 = vector.load %arg7[%c0_176, %619, %c0_177] : memref<1x128x32xf32, #tpu.memory_space<vmem>>, vector<1x8x32xf32>
    %621 = vector.shape_cast %620 : vector<1x8x32xf32> to vector<8x32xf32>
    %622 = vector.shape_cast %618 : vector<8x32xf32> to vector<1x8x32xf32>
    tpu.vector_store %arg7[%c0_176, %619, %c0_177], %622 {strides = array<i32>} : memref<1x128x32xf32, #tpu.memory_space<vmem>>, vector<1x8x32xf32>,
    %c16_i32 = arith.constant 16 : i32
    %c0_178 = arith.constant 0 : index
    %c0_179 = arith.constant 0 : index
    %c0_180 = arith.constant 0 : index
    %623 = vector.load %arg8[%c0_178, %c0_179, %c0_180] : memref<1x8x32xf32, #tpu.memory_space<vmem>>, vector<1x8x32xf32>
    %624 = vector.shape_cast %623 : vector<1x8x32xf32> to vector<8x32xf32>
    %625 = vector.shape_cast %618 : vector<8x32xf32> to vector<1x8x32xf32>
    tpu.vector_store %arg8[%c0_178, %c0_179, %c0_180], %625 {strides = array<i32>} : memref<1x8x32xf32, #tpu.memory_space<vmem>>, vector<1x8x32xf32>,
    %c0_181 = arith.constant 0 : index
    %c0_182 = arith.constant 0 : index
    %c0_183 = arith.constant 0 : index
    %626 = vector.load %arg9[%c0_181, %c0_182, %c0_183] : memref<1x8x32xf32, #tpu.memory_space<vmem>>, vector<1x8x32xf32>
    %627 = vector.shape_cast %626 : vector<1x8x32xf32> to vector<8x32xf32>
    %628 = vector.shape_cast %616 : vector<8x32xf32> to vector<1x8x32xf32>
    tpu.vector_store %arg9[%c0_181, %c0_182, %c0_183], %628 {strides = array<i32>} : memref<1x8x32xf32, #tpu.memory_space<vmem>>, vector<1x8x32xf32>,
    return
  }
  func.func @transform_0(%arg0: i32) -> (i32, i32) {
    %c0_i32 = arith.constant 0 : i32
    %c0_i32_0 = arith.constant 0 : i32
    %c0_i32_1 = arith.constant 0 : i32
    return %c0_i32, %c0_i32_0 : i32, i32
  }
  func.func @transform_1(%arg0: i32) -> (i32, i32, i32) {
    %c0_i32 = arith.constant 0 : i32
    %c0_i32_0 = arith.constant 0 : i32
    %c0_i32_1 = arith.constant 0 : i32
    return %arg0, %c0_i32, %c0_i32_0 : i32, i32, i32
  }
  func.func @transform_2(%arg0: i32) -> (i32, i32, i32) {
    %c0_i32 = arith.constant 0 : i32
    %c0_i32_0 = arith.constant 0 : i32
    %c0_i32_1 = arith.constant 0 : i32
    return %arg0, %c0_i32, %c0_i32_0 : i32, i32, i32
  }
  func.func @transform_3(%arg0: i32) -> (i32, i32, i32) {
    %c0_i32 = arith.constant 0 : i32
    %c0_i32_0 = arith.constant 0 : i32
    %c0_i32_1 = arith.constant 0 : i32
    return %arg0, %c0_i32, %c0_i32_0 : i32, i32, i32
  }
  func.func @transform_4(%arg0: i32) -> (i32, i32, i32) {
    %c0_i32 = arith.constant 0 : i32
    %c0_i32_0 = arith.constant 0 : i32
    %c0_i32_1 = arith.constant 0 : i32
    return %arg0, %c0_i32, %c0_i32_0 : i32, i32, i32
  }
  func.func @transform_5(%arg0: i32) -> (i32, i32, i32) {
    %c0_i32 = arith.constant 0 : i32
    %c0_i32_0 = arith.constant 0 : i32
    %c0_i32_1 = arith.constant 0 : i32
    return %arg0, %c0_i32, %c0_i32_0 : i32, i32, i32
  }
  func.func @transform_6(%arg0: i32) -> (i32, i32, i32) {
    %c0_i32 = arith.constant 0 : i32
    %c0_i32_0 = arith.constant 0 : i32
    %c0_i32_1 = arith.constant 0 : i32
    return %arg0, %c0_i32, %c0_i32_0 : i32, i32, i32
  }
  func.func @transform_7(%arg0: i32) -> (i32, i32, i32) {
    %c0_i32 = arith.constant 0 : i32
    %c0_i32_0 = arith.constant 0 : i32
    %c0_i32_1 = arith.constant 0 : i32
    return %arg0, %c0_i32, %c0_i32_0 : i32, i32, i32
  }
  func.func @transform_8(%arg0: i32) -> (i32, i32, i32) {
    %c0_i32 = arith.constant 0 : i32
    %c0_i32_0 = arith.constant 0 : i32
    %c0_i32_1 = arith.constant 0 : i32
    return %arg0, %c0_i32, %c0_i32_0 : i32, i32, i32
  }
}

module attributes {stable_mosaic.version = 11 : i64} {
  func.func @conv_head_kernel(%arg0: memref<625x128xf32, #tpu.memory_space<vmem>>, %arg1: memref<100x625xf32, #tpu.memory_space<vmem>>, %arg2: memref<100x1xf32, #tpu.memory_space<vmem>>, %arg3: memref<8x100xf32, #tpu.memory_space<vmem>>, %arg4: memref<8x1xf32, #tpu.memory_space<vmem>>, %arg5: memref<8x128x128xf32, #tpu.memory_space<vmem>>, %arg6: memref<1x128xf32, #tpu.memory_space<vmem>>, %arg7: memref<128x16xf32, #tpu.memory_space<vmem>>, %arg8: memref<1x16xf32, #tpu.memory_space<vmem>>, %arg9: memref<128x16xf32, #tpu.memory_space<vmem>>, %arg10: memref<16x16xf32, #tpu.memory_space<vmem>>, %arg11: memref<1x16xf32, #tpu.memory_space<vmem>>, %arg12: memref<2x16xf32, #tpu.memory_space<vmem>>) attributes {dimension_semantics = [], scalar_prefetch = 0 : i64, scratch_operands = 0 : i64, tpu.core_type = #tpu.core_type<tc>} {
    %c0 = arith.constant 0 : index
    %c0_0 = arith.constant 0 : index
    %0 = vector.load %arg1[%c0, %c0_0] : memref<100x625xf32, #tpu.memory_space<vmem>>, vector<100x625xf32>
    %c0_1 = arith.constant 0 : index
    %c0_2 = arith.constant 0 : index
    %1 = vector.load %arg0[%c0_1, %c0_2] : memref<625x128xf32, #tpu.memory_space<vmem>>, vector<625x128xf32>
    %cst = arith.constant dense<0.000000e+00> : vector<100x128xf32>
    %2 = tpu.matmul %0, %1, %cst {dimension_numbers = #tpu.dot_dimension_numbers<[1], [0], [0], [1], [0, 0, 1, 1], [], []>} : vector<100x625xf32>, vector<625x128xf32>, vector<100x128xf32> -> vector<100x128xf32>
    %c0_3 = arith.constant 0 : index
    %c0_4 = arith.constant 0 : index
    %3 = vector.load %arg2[%c0_3, %c0_4] : memref<100x1xf32, #tpu.memory_space<vmem>>, vector<100x1xf32>
    %4 = vector.broadcast %3 : vector<100x1xf32> to vector<100x128xf32>
    %5 = arith.addf %2, %4 : vector<100x128xf32>
    %cst_5 = arith.constant 0.000000e+00 : f32
    %6 = vector.broadcast %cst_5 : f32 to vector<100x128xf32>
    %7 = arith.maximumf %5, %6 : vector<100x128xf32>
    %c0_6 = arith.constant 0 : index
    %c0_7 = arith.constant 0 : index
    %8 = vector.load %arg3[%c0_6, %c0_7] : memref<8x100xf32, #tpu.memory_space<vmem>>, vector<8x100xf32>
    %cst_8 = arith.constant dense<0.000000e+00> : vector<8x128xf32>
    %9 = tpu.matmul %8, %7, %cst_8 {dimension_numbers = #tpu.dot_dimension_numbers<[1], [0], [0], [1], [0, 0, 1, 1], [], []>} : vector<8x100xf32>, vector<100x128xf32>, vector<8x128xf32> -> vector<8x128xf32>
    %c0_9 = arith.constant 0 : index
    %c0_10 = arith.constant 0 : index
    %10 = vector.load %arg4[%c0_9, %c0_10] : memref<8x1xf32, #tpu.memory_space<vmem>>, vector<8x1xf32>
    %11 = vector.broadcast %10 : vector<8x1xf32> to vector<8x128xf32>
    %12 = arith.addf %9, %11 : vector<8x128xf32>
    %cst_11 = arith.constant 0.000000e+00 : f32
    %13 = vector.broadcast %cst_11 : f32 to vector<8x128xf32>
    %14 = arith.maximumf %12, %13 : vector<8x128xf32>
    %c0_12 = arith.constant 0 : index
    %c0_13 = arith.constant 0 : index
    %15 = vector.load %arg6[%c0_12, %c0_13] : memref<1x128xf32, #tpu.memory_space<vmem>>, vector<1x128xf32>
    %16 = vector.extract_strided_slice %14 {offsets = [0, 0], sizes = [1, 128], strides = [1, 1]} : vector<8x128xf32> to vector<1x128xf32>
    %c0_14 = arith.constant 0 : index
    %c0_15 = arith.constant 0 : index
    %c0_16 = arith.constant 0 : index
    %17 = vector.load %arg5[%c0_14, %c0_15, %c0_16] : memref<8x128x128xf32, #tpu.memory_space<vmem>>, vector<1x128x128xf32>
    %18 = vector.shape_cast %17 : vector<1x128x128xf32> to vector<128x128xf32>
    %cst_17 = arith.constant dense<0.000000e+00> : vector<1x128xf32>
    %19 = tpu.matmul %16, %18, %cst_17 {dimension_numbers = #tpu.dot_dimension_numbers<[1], [0], [0], [1], [0, 0, 1, 1], [], []>} : vector<1x128xf32>, vector<128x128xf32>, vector<1x128xf32> -> vector<1x128xf32>
    %20 = arith.addf %15, %19 : vector<1x128xf32>
    %21 = vector.extract_strided_slice %14 {offsets = [1, 0], sizes = [1, 128], strides = [1, 1]} : vector<8x128xf32> to vector<1x128xf32>
    %c1 = arith.constant 1 : index
    %c0_18 = arith.constant 0 : index
    %c0_19 = arith.constant 0 : index
    %22 = vector.load %arg5[%c1, %c0_18, %c0_19] : memref<8x128x128xf32, #tpu.memory_space<vmem>>, vector<1x128x128xf32>
    %23 = vector.shape_cast %22 : vector<1x128x128xf32> to vector<128x128xf32>
    %cst_20 = arith.constant dense<0.000000e+00> : vector<1x128xf32>
    %24 = tpu.matmul %21, %23, %cst_20 {dimension_numbers = #tpu.dot_dimension_numbers<[1], [0], [0], [1], [0, 0, 1, 1], [], []>} : vector<1x128xf32>, vector<128x128xf32>, vector<1x128xf32> -> vector<1x128xf32>
    %25 = arith.addf %20, %24 : vector<1x128xf32>
    %26 = vector.extract_strided_slice %14 {offsets = [2, 0], sizes = [1, 128], strides = [1, 1]} : vector<8x128xf32> to vector<1x128xf32>
    %c2 = arith.constant 2 : index
    %c0_21 = arith.constant 0 : index
    %c0_22 = arith.constant 0 : index
    %27 = vector.load %arg5[%c2, %c0_21, %c0_22] : memref<8x128x128xf32, #tpu.memory_space<vmem>>, vector<1x128x128xf32>
    %28 = vector.shape_cast %27 : vector<1x128x128xf32> to vector<128x128xf32>
    %cst_23 = arith.constant dense<0.000000e+00> : vector<1x128xf32>
    %29 = tpu.matmul %26, %28, %cst_23 {dimension_numbers = #tpu.dot_dimension_numbers<[1], [0], [0], [1], [0, 0, 1, 1], [], []>} : vector<1x128xf32>, vector<128x128xf32>, vector<1x128xf32> -> vector<1x128xf32>
    %30 = arith.addf %25, %29 : vector<1x128xf32>
    %31 = vector.extract_strided_slice %14 {offsets = [3, 0], sizes = [1, 128], strides = [1, 1]} : vector<8x128xf32> to vector<1x128xf32>
    %c3 = arith.constant 3 : index
    %c0_24 = arith.constant 0 : index
    %c0_25 = arith.constant 0 : index
    %32 = vector.load %arg5[%c3, %c0_24, %c0_25] : memref<8x128x128xf32, #tpu.memory_space<vmem>>, vector<1x128x128xf32>
    %33 = vector.shape_cast %32 : vector<1x128x128xf32> to vector<128x128xf32>
    %cst_26 = arith.constant dense<0.000000e+00> : vector<1x128xf32>
    %34 = tpu.matmul %31, %33, %cst_26 {dimension_numbers = #tpu.dot_dimension_numbers<[1], [0], [0], [1], [0, 0, 1, 1], [], []>} : vector<1x128xf32>, vector<128x128xf32>, vector<1x128xf32> -> vector<1x128xf32>
    %35 = arith.addf %30, %34 : vector<1x128xf32>
    %36 = vector.extract_strided_slice %14 {offsets = [4, 0], sizes = [1, 128], strides = [1, 1]} : vector<8x128xf32> to vector<1x128xf32>
    %c4 = arith.constant 4 : index
    %c0_27 = arith.constant 0 : index
    %c0_28 = arith.constant 0 : index
    %37 = vector.load %arg5[%c4, %c0_27, %c0_28] : memref<8x128x128xf32, #tpu.memory_space<vmem>>, vector<1x128x128xf32>
    %38 = vector.shape_cast %37 : vector<1x128x128xf32> to vector<128x128xf32>
    %cst_29 = arith.constant dense<0.000000e+00> : vector<1x128xf32>
    %39 = tpu.matmul %36, %38, %cst_29 {dimension_numbers = #tpu.dot_dimension_numbers<[1], [0], [0], [1], [0, 0, 1, 1], [], []>} : vector<1x128xf32>, vector<128x128xf32>, vector<1x128xf32> -> vector<1x128xf32>
    %40 = arith.addf %35, %39 : vector<1x128xf32>
    %41 = vector.extract_strided_slice %14 {offsets = [5, 0], sizes = [1, 128], strides = [1, 1]} : vector<8x128xf32> to vector<1x128xf32>
    %c5 = arith.constant 5 : index
    %c0_30 = arith.constant 0 : index
    %c0_31 = arith.constant 0 : index
    %42 = vector.load %arg5[%c5, %c0_30, %c0_31] : memref<8x128x128xf32, #tpu.memory_space<vmem>>, vector<1x128x128xf32>
    %43 = vector.shape_cast %42 : vector<1x128x128xf32> to vector<128x128xf32>
    %cst_32 = arith.constant dense<0.000000e+00> : vector<1x128xf32>
    %44 = tpu.matmul %41, %43, %cst_32 {dimension_numbers = #tpu.dot_dimension_numbers<[1], [0], [0], [1], [0, 0, 1, 1], [], []>} : vector<1x128xf32>, vector<128x128xf32>, vector<1x128xf32> -> vector<1x128xf32>
    %45 = arith.addf %40, %44 : vector<1x128xf32>
    %46 = vector.extract_strided_slice %14 {offsets = [6, 0], sizes = [1, 128], strides = [1, 1]} : vector<8x128xf32> to vector<1x128xf32>
    %c6 = arith.constant 6 : index
    %c0_33 = arith.constant 0 : index
    %c0_34 = arith.constant 0 : index
    %47 = vector.load %arg5[%c6, %c0_33, %c0_34] : memref<8x128x128xf32, #tpu.memory_space<vmem>>, vector<1x128x128xf32>
    %48 = vector.shape_cast %47 : vector<1x128x128xf32> to vector<128x128xf32>
    %cst_35 = arith.constant dense<0.000000e+00> : vector<1x128xf32>
    %49 = tpu.matmul %46, %48, %cst_35 {dimension_numbers = #tpu.dot_dimension_numbers<[1], [0], [0], [1], [0, 0, 1, 1], [], []>} : vector<1x128xf32>, vector<128x128xf32>, vector<1x128xf32> -> vector<1x128xf32>
    %50 = arith.addf %45, %49 : vector<1x128xf32>
    %51 = vector.extract_strided_slice %14 {offsets = [7, 0], sizes = [1, 128], strides = [1, 1]} : vector<8x128xf32> to vector<1x128xf32>
    %c7 = arith.constant 7 : index
    %c0_36 = arith.constant 0 : index
    %c0_37 = arith.constant 0 : index
    %52 = vector.load %arg5[%c7, %c0_36, %c0_37] : memref<8x128x128xf32, #tpu.memory_space<vmem>>, vector<1x128x128xf32>
    %53 = vector.shape_cast %52 : vector<1x128x128xf32> to vector<128x128xf32>
    %cst_38 = arith.constant dense<0.000000e+00> : vector<1x128xf32>
    %54 = tpu.matmul %51, %53, %cst_38 {dimension_numbers = #tpu.dot_dimension_numbers<[1], [0], [0], [1], [0, 0, 1, 1], [], []>} : vector<1x128xf32>, vector<128x128xf32>, vector<1x128xf32> -> vector<1x128xf32>
    %55 = arith.addf %50, %54 : vector<1x128xf32>
    %cst_39 = arith.constant 0.000000e+00 : f32
    %56 = vector.broadcast %cst_39 : f32 to vector<1x128xf32>
    %57 = arith.maximumf %55, %56 : vector<1x128xf32>
    %c0_40 = arith.constant 0 : index
    %c0_41 = arith.constant 0 : index
    %58 = vector.load %arg7[%c0_40, %c0_41] : memref<128x16xf32, #tpu.memory_space<vmem>>, vector<128x16xf32>
    %cst_42 = arith.constant dense<0.000000e+00> : vector<1x16xf32>
    %59 = tpu.matmul %57, %58, %cst_42 {dimension_numbers = #tpu.dot_dimension_numbers<[1], [0], [0], [1], [0, 0, 1, 1], [], []>} : vector<1x128xf32>, vector<128x16xf32>, vector<1x16xf32> -> vector<1x16xf32>
    %c0_43 = arith.constant 0 : index
    %c0_44 = arith.constant 0 : index
    %60 = vector.load %arg8[%c0_43, %c0_44] : memref<1x16xf32, #tpu.memory_space<vmem>>, vector<1x16xf32>
    %61 = arith.addf %59, %60 : vector<1x16xf32>
    %c0_45 = arith.constant 0 : index
    %c0_46 = arith.constant 0 : index
    %62 = vector.load %arg9[%c0_45, %c0_46] : memref<128x16xf32, #tpu.memory_space<vmem>>, vector<128x16xf32>
    %cst_47 = arith.constant dense<0.000000e+00> : vector<1x16xf32>
    %63 = tpu.matmul %57, %62, %cst_47 {dimension_numbers = #tpu.dot_dimension_numbers<[1], [0], [0], [1], [0, 0, 1, 1], [], []>} : vector<1x128xf32>, vector<128x16xf32>, vector<1x16xf32> -> vector<1x16xf32>
    %c0_48 = arith.constant 0 : index
    %c0_49 = arith.constant 0 : index
    %64 = vector.load %arg10[%c0_48, %c0_49] : memref<16x16xf32, #tpu.memory_space<vmem>>, vector<16x16xf32>
    %cst_50 = arith.constant dense<0.000000e+00> : vector<1x16xf32>
    %65 = tpu.matmul %61, %64, %cst_50 {dimension_numbers = #tpu.dot_dimension_numbers<[1], [0], [0], [1], [0, 0, 1, 1], [], []>} : vector<1x16xf32>, vector<16x16xf32>, vector<1x16xf32> -> vector<1x16xf32>
    %66 = arith.addf %63, %65 : vector<1x16xf32>
    %c0_51 = arith.constant 0 : index
    %c0_52 = arith.constant 0 : index
    %67 = vector.load %arg11[%c0_51, %c0_52] : memref<1x16xf32, #tpu.memory_space<vmem>>, vector<1x16xf32>
    %68 = arith.addf %66, %67 : vector<1x16xf32>
    %c0_53 = arith.constant 0 : index
    %c0_54 = arith.constant 0 : index
    %69 = vector.load %arg12[%c0_53, %c0_54] : memref<2x16xf32, #tpu.memory_space<vmem>>, vector<1x16xf32>
    tpu.vector_store %arg12[%c0_53, %c0_54], %61 {strides = array<i32>} : memref<2x16xf32, #tpu.memory_space<vmem>>, vector<1x16xf32>,
    %c1_55 = arith.constant 1 : index
    %c0_56 = arith.constant 0 : index
    %70 = vector.load %arg12[%c1_55, %c0_56] : memref<2x16xf32, #tpu.memory_space<vmem>>, vector<1x16xf32>
    tpu.vector_store %arg12[%c1_55, %c0_56], %68 {strides = array<i32>} : memref<2x16xf32, #tpu.memory_space<vmem>>, vector<1x16xf32>,
    return
  }
}

</mosaic_0001>

<bundles_post_ra>
// kernel: spectranet_forward.3
= control target key start
LH: loop header
LB: loop body
LE: loop exit
PB: predicated region body
PF: predicated region fallthrough
CT: control target
= control target key end

     0   :  { %s3262_s27 = smov 0   ;;  %s3684_s0 = inlined_call_operand.vmem [shape: f32[128,8], index: 0, kind: input, shape index: {}]   ;;  %s3685_s1 = inlined_call_operand.vmem [shape: f32[2,8,128], index: 1, kind: input, shape index: {}]   ;;  %s3686_s2 = inlined_call_operand.vmem [shape: f32[2,32,128], index: 2, kind: input, shape index: {}]   ;;  %s3687_s3 = inlined_call_operand.vmem [shape: f32[2,1,128], index: 3, kind: input, shape index: {}]   ;;  %s3688_s4 = inlined_call_operand.vmem [shape: f32[2,8,32], index: 4, kind: input, shape index: {}]   ;;  %s3689_s5 = inlined_call_operand.vmem [shape: f32[2,8,32], index: 5, kind: input, shape index: {}]   ;;  %s3690_s6 = inlined_call_operand.vmem [shape: f32[2,128,32], index: 6, kind: output, shape index: {0}]   ;;  %s3691_s7 = inlined_call_operand.vmem [shape: f32[2,8,32], index: 7, kind: output, shape index: {1}]   ;;  %s3692_s8 = inlined_call_operand.vmem [shape: f32[2,8,32], index: 8, kind: output, shape index: {2}]  }
   0x1 LB: > { %s3268_s28 = sadd.s32 4294967295, %s3209_s27   ;;  %p2587_p0 = scmp.ge.s32.totalorder %s3209_s27, 1  ;;  %s3209_s27 = sphi %s3262_s27, %s19_s27  }
   0x2   : > { %p302_p1 = scmp.lt.s32.totalorder %s3209_s27, 3 }
   0x4   : > { %p303_p2 = pnand %p2587_p0, %p302_p1 }
   0x5   : > { %p359_p3 = scmp.lt.s32.totalorder (!%p303_p2), %s3268_s28, 1  ;;  %v392_v0 = vld [vmem:[%s3684_s0] sm:$0xff] (!%p303_p2)  ;;  %vm416_vm0 = vcmask (!%p303_p2), 64512   ;;  %v3211_v1 = vmov (!%p303_p2), 0.0|0.0   ;;  %vm3212_vm1 = vmmov (!%p303_p2), 0   ;;  %v3213_v2 = vmov (!%p303_p2), 0.0  }
   0x6   : > { %306 = sbr.rel (%p303_p2) target bundleno = 11292 (0x2c1c), region = 44  ;;  %2765 = vmatprep.mubr.msk.f32.mxu0 (!%p303_p2), %vm416_vm0, %v392_v0  ;;  %2965 = vmatprep.subr.bf16.mxu1 (!%p303_p2), %v3211_v1  ;;  %v393_v3 = vld [vmem:[%s3684_s0 + $0x8] sm:$0xff] (!%p303_p2)  ;;  %v394_v10 = vld [vmem:[%s3684_s0 + $0x10] sm:$0xff] (!%p303_p2)  ;;  %v395_v12 = vld [vmem:[%s3684_s0 + $0x18] sm:$0xff] (!%p303_p2)  ;;  %vm637_vm2 = vcmask (!%p303_p2), 261120   ;;  %p632_p4 = scmp.eq.s32.totalorder (!%p303_p2), %s3268_s28, 0 }
   0x7   : > { %2797 = vmatprep.mubr.msk.f32.mxu1 (!%p303_p2), %vm3212_vm1, %v3213_v2  ;;  %v396_v13 = vld [vmem:[%s3684_s0 + $0x20] sm:$0xff] (!%p303_p2)  ;;  %v397_v15 = vld [vmem:[%s3684_s0 + $0x28] sm:$0xff] (!%p303_p2)  ;;  %v398_v16 = vld [vmem:[%s3684_s0 + $0x30] sm:$0xff] (!%p303_p2)  ;;  %s3214_s24 = smov (!%p303_p2), 64   ;;  %s3215_s25 = smov (!%p303_p2), 32  }
   0x8   : > { %v399_v17 = vld [vmem:[%s3684_s0 + $0x38] sm:$0xff] (!%p303_p2)  ;;  %v400_v18 = vld [vmem:[%s3684_s0 + $0x40] sm:$0xff] (!%p303_p2)  ;;  %v401_v19 = vld [vmem:[%s3684_s0 + $0x48] sm:$0xff] (!%p303_p2) }
   0x9   : > { %v402_v20 = vld [vmem:[%s3684_s0 + $0x50] sm:$0xff] (!%p303_p2)  ;;  %v403_v21 = vld [vmem:[%s3684_s0 + $0x58] sm:$0xff] (!%p303_p2)  ;;  %v404_v22 = vld [vmem:[%s3684_s0 + $0x60] sm:$0xff] (!%p303_p2) }
   0xa   : > { %v405_v23 = vld [vmem:[%s3684_s0 + $0x68] sm:$0xff] (!%p303_p2)  ;;  %v406_v24 = vld [vmem:[%s3684_s0 + $0x70] sm:$0xff] (!%p303_p2)  ;;  %v407_v25 = vld [vmem:[%s3684_s0 + $0x78] sm:$0xff] (!%p303_p2) }
   0xd   : > { %s3279_s9 = scalar_select %p359_p3, %s3268_s28, 1 }
   0xe   : > { %s3387_s18 = scalar_select %p632_p4, 0, 15 }
   0xf   : > { %s3284_s10 = sshll.u32 %s3279_s9, 3  ;;  %s2664_s11 = sshll.u32 %s3279_s9, 5 }
  0x10   : > { %s362_s14 = scalar_lea.vmem %s3685_s1, %s3284_s10  ;;  %s367_s17 = scalar_lea.vmem %s3686_s2, %s2664_s11 }
  0x11   : > { %v408_v4 = vld [vmem:[%s362_s14] sm:$0xff]  ;;  %v627_v6 = vld [vmem:[%s367_s17 + $0x8] sm:$0xff]  ;;  %v628_v7 = vld [vmem:[%s367_s17 + $0x10] sm:$0xff]  ;;  %s374_s26 = scalar_lea.vmem %s3688_s4, %s3284_s10  ;;  %s2614_s19 = sshll.u32 %s3387_s18, 3 }
  0x12   : > { %v626_v5 = vld [vmem:[%s367_s17] sm:$0xff]  ;;  %2763 = vmatprep.subr.mxu0 %v408_v4  ;;  %v629_v8 = vld [vmem:[%s367_s17 + $0x18] sm:$0xff]  ;;  %s370_s17 = scalar_lea.vmem %s3687_s3, %s3279_s9  ;;  %s635_s20 = scalar_lea.vmem [#allocation2], %s2614_s19 }
  0x13   : > { %v3297_v9 = vpack.c.bf16 %v627_v6, %v626_v5  ;;  %2764 = vmatpush3.msra.mxu0 %v408_v4  ;;  %v3302_v11 = vpack.c.bf16 %v629_v8, %v628_v7  ;;  %v630_v14 = vld [vmem:[%s374_s26] sm:$0xff]  ;;  %s378_s23 = scalar_lea.vmem %s3689_s5, %s3284_s10  ;;  %s2665_s26 = sshll.u32 %s3279_s9, 7 }
  0x14   : > { %2766 = vmatmul.mubr.msk.f32.vlgmr.msra.gmra.mrb[0].mxu0 %vm416_vm0, %v393_v3  ;;  %2989 = vmatprep.subr.bf16.mxu0 %v3211_v1  ;;  %v2597_v26 = vld [vmem:[%s370_s17] ss:$0 sm:$0xff]  ;;  %s3405_s11 = scalar_lea.vmem %s3690_s6, %s2665_s26  ;;  %s3216_s28 = smov 96  }
  0x15   : > { %2967 = vmatpush3.bf16.msra.mxu1 %v3297_v9  ;;  %2768 = vmatprep.mubr.msk.f32.mxu0 %vm416_vm0, %v394_v10  ;;  %v631_v0 = vld [vmem:[%s378_s23] sm:$0xff]  ;;  %s744_s12 = scalar_lea.vmem %s3405_s11, %s2614_s19 }
  0x16   : > { %2968 = vmatprep.subr.bf16.mxu1 %v3211_v1  ;;  %2991 = vmatpush3.bf16.msra.mxu0 %v3297_v9  ;;  %s3420_s9 = scalar_select %p632_p4, 1, 14 }
  0x17   : > { %2992 = vmatprep.subr.bf16.mxu0 %v3211_v1  ;;  %s3438_s16 = scalar_select %p632_p4, 2, 13 }
  0x18   : > { %2769 = vmatmul.mubr.msk.f32.gmra.mrb[2].mxu0 %vm416_vm0, %v395_v12  ;;  %s2617_s13 = sshll.u32 %s3420_s9, 3 }
  0x19   : > { %2970 = vmatpush3.bf16.msra.mxu1 %v3302_v11  ;;  %2771 = vmatprep.mubr.msk.f32.mxu0 %vm416_vm0, %v396_v13  ;;  %s748_s14 = scalar_lea.vmem [#allocation2], %s2617_s13  ;;  %s851_s15 = scalar_lea.vmem %s3405_s11, %s2617_s13 }
  0x1a   : > { %2971 = vmatprep.subr.bf16.mxu1 %v3211_v1  ;;  %2994 = vmatpush3.bf16.msra.mxu0 %v3302_v11  ;;  %s2620_s17 = sshll.u32 %s3438_s16, 3 }
  0x1b   : > { %3001 = vmatprep.subr.bf16.mxu0 %v3211_v1  ;;  %s855_s18 = scalar_lea.vmem [#allocation2], %s2620_s17  ;;  %s958_s19 = scalar_lea.vmem %s3405_s11, %s2620_s17 }
  0x1c   : > { %2798 = vmatmul.mubr.msk.f32.vlgmr.msra.gmra.mrb[0].mxu1 %vm637_vm2, %v630_v14  ;;  %2772 = vmatmul.mubr.msk.f32.gmra.mrb[4].mxu0 %vm416_vm0, %v397_v15  ;;  %s3474_s26 = scalar_select %p632_p4, 4, 11 }
  0x1d   : > { %2973 = vmatpush3.bf16.msra.mxu1 %v3297_v9  ;;  %2774 = vmatprep.mubr.msk.f32.mxu0 %vm416_vm0, %v398_v16  ;;  %s3492_s9 = scalar_select %p632_p4, 5, 10 }
  0x1e   : > { %2974 = vmatprep.subr.bf16.mxu1 %v3211_v1  ;;  %2808 = vmatprep.mubr.msk.f32.mxu1 %vm3212_vm1, %v3213_v2  ;;  %s2626_s29 = sshll.u32 %s3474_s26, 3 }
  0x1f   : > { %s1069_s30 = scalar_lea.vmem [#allocation2], %s2626_s29  ;;  %s2629_s13 = sshll.u32 %s3492_s9, 3 }
  0x20   : > { %2775 = vmatmul.mubr.msk.f32.gmra.mrb[6].mxu0 %vm416_vm0, %v399_v17  ;;  %s3510_s16 = scalar_select %p632_p4, 6, 9 }
  0x21   : > { %2976 = vmatpush3.bf16.msra.mxu1 %v3302_v11  ;;  %2777 = vmatprep.mubr.msk.f32.mxu0 %vm416_vm0, %v400_v18  ;;  %s3546_s26 = scalar_select %p632_p4, 8, 7 }
  0x22   : > { %2977 = vmatprep.subr.bf16.mxu1 %v3211_v1  ;;  %s2632_s17 = sshll.u32 %s3510_s16, 3 }
  0x23   : > { %s3564_s9 = scalar_select %p632_p4, 9, 6 }
  0x24   : > { %2778 = vmatmul.mubr.msk.f32.gmra.mrb[8].mxu0 %vm416_vm0, %v401_v19  ;;  %s3582_s16 = scalar_select %p632_p4, 10, 5 }
  0x25   : > { %2780 = vmatprep.mubr.msk.f32.mxu0 %vm416_vm0, %v402_v20 }
  0x28   : > { %2781 = vmatmul.mubr.msk.f32.gmra.mrb[10].mxu0 %vm416_vm0, %v403_v21 }
  0x29   : > { %2783 = vmatprep.mubr.msk.f32.mxu0 %vm416_vm0, %v404_v22 }
  0x2c   : > { %2784 = vmatmul.mubr.msk.f32.gmra.mrb[12].mxu0 %vm416_vm0, %v405_v23 }
  0x2d   : > { %2786 = vmatprep.mubr.msk.f32.mxu0 %vm416_vm0, %v406_v24 }
  0x30   : > { %2787 = vmatmul.mubr.msk.f32.gmra.mrb[14].mxu0 %vm416_vm0, %v407_v25 }
  0x31   : > { %2841 = vmatprep.mubr.msk.f32.mxu0 %vm3212_vm1, %v3213_v2 }
  0xe7   : > { %v2767_v27 = vpop.f32.mrb[0].mxu0 }
  0xe8   : > { %v537_v28 = vadd.f32 %v2767_v27, %v2597_v26  ;;  %v531_v29 = vpop.f32.mrb[1].mxu0 }
  0xe9   : > { %v532_v30 = vadd.f32 %v2597_v26, %v531_v29 }
  0xea   : > { %611 = vst [vmem:[#allocation2 + $0x8] sm:$0xff] %v537_v28 }
  0xeb   : > { %610 = vst [vmem:[#allocation2] sm:$0xff] %v532_v30  ;;  %v2770_v31 = vpop.f32.mrb[2].mxu0 }
  0xec   : > { %v547_v32 = vadd.f32 %v2770_v31, %v2597_v26  ;;  %v541_v33 = vpop.f32.mrb[3].mxu0 }
  0xed   : > { %v542_v34 = vadd.f32 %v2597_v26, %v541_v33 }
  0xee   : > { %613 = vst [vmem:[#allocation2 + $0x18] sm:$0xff] %v547_v32 }
  0xef   : > { %v707_v35 = vpop.f32.mrb[0].mxu1  ;;  %612 = vst [vmem:[#allocation2 + $0x10] sm:$0xff] %v542_v34  ;;  %v2773_v36 = vpop.f32.mrb[4].mxu0 }
  0xf0   : > { %v2799_v37 = vpop.f32.mrb[1].mxu1  ;;  %v557_v38 = vadd.f32 %v2773_v36, %v2597_v26  ;;  %v551_v39 = vpop.f32.mrb[5].mxu0 }
  0xf1   : > { %v552_v40 = vadd.f32 %v2597_v26, %v551_v39 }
  0xf2   : > { %615 = vst [vmem:[#allocation2 + $0x28] sm:$0xff] %v557_v38 }
  0xf3   : > { %614 = vst [vmem:[#allocation2 + $0x20] sm:$0xff] %v552_v40  ;;  %v2776_v41 = vpop.f32.mrb[6].mxu0 }
  0xf4   : > { %v567_v42 = vadd.f32 %v2776_v41, %v2597_v26  ;;  %v561_v43 = vpop.f32.mrb[7].mxu0 }
  0xf5   : > { %v562_v44 = vadd.f32 %v2597_v26, %v561_v43 }
  0xf6   : > { %617 = vst [vmem:[#allocation2 + $0x38] sm:$0xff] %v567_v42 }
  0xf7   : > { %616 = vst [vmem:[#allocation2 + $0x30] sm:$0xff] %v562_v44  ;;  %v2779_v45 = vpop.f32.mrb[8].mxu0 }
  0xf8   : > { %v577_v46 = vadd.f32 %v2779_v45, %v2597_v26  ;;  %v571_v47 = vpop.f32.mrb[9].mxu0 }
  0xf9   : > { %v572_v48 = vadd.f32 %v2597_v26, %v571_v47 }
  0xfa   : > { %619 = vst [vmem:[#allocation2 + $0x48] sm:$0xff] %v577_v46 }
  0xfb   : > { %618 = vst [vmem:[#allocation2 + $0x40] sm:$0xff] %v572_v48  ;;  %v2782_v49 = vpop.f32.mrb[10].mxu0 }
  0xfc   : > { %v587_v50 = vadd.f32 %v2782_v49, %v2597_v26  ;;  %v581_v51 = vpop.f32.mrb[11].mxu0 }
  0xfd   : > { %v582_v52 = vadd.f32 %v2597_v26, %v581_v51 }
  0xfe   : > { %621 = vst [vmem:[#allocation2 + $0x58] sm:$0xff] %v587_v50 }
  0xff   : > { %620 = vst [vmem:[#allocation2 + $0x50] sm:$0xff] %v582_v52  ;;  %v2785_v53 = vpop.f32.mrb[12].mxu0 }
 0x100   : > { %v597_v54 = vadd.f32 %v2785_v53, %v2597_v26  ;;  %v591_v55 = vpop.f32.mrb[13].mxu0 }
 0x101   : > { %v592_v56 = vadd.f32 %v2597_v26, %v591_v55 }
 0x102   : > { %623 = vst [vmem:[#allocation2 + $0x68] sm:$0xff] %v597_v54 }
 0x103   : > { %622 = vst [vmem:[#allocation2 + $0x60] sm:$0xff] %v592_v56  ;;  %v2788_v57 = vpop.f32.mrb[14].mxu0 }
 0x104   : > { %v607_v58 = vadd.f32 %v2788_v57, %v2597_v26  ;;  %v601_v59 = vpop.f32.mrb[15].mxu0 }
 0x105   : > { %v602_v60 = vadd.f32 %v2597_v26, %v601_v59 }
 0x106   : > { %625 = vst [vmem:[#allocation2 + $0x78] sm:$0xff] %v607_v58 }
 0x107   : > { %624 = vst [vmem:[#allocation2 + $0x70] sm:$0xff] %v602_v60 }
 0x10e   : > { %v636_v61 = vld [vmem:[%s635_s20] sm:$0xff]  ;;  %s3456_s20 = scalar_select %p632_p4, 3, 12 }
 0x10f   : > { %v711_v62 = vadd.f32 %v707_v35, %v636_v61  ;;  %v749_v19 = vld [vmem:[%s748_s14] sm:$0xff]  ;;  %s1176_s14 = scalar_lea.vmem [#allocation2], %s2629_s13 }
 0x110   : > { %v856_v37 = vld [vmem:[%s855_s18] sm:$0xff]  ;;  %s2623_s21 = sshll.u32 %s3456_s20, 3  ;;  %s1283_s18 = scalar_lea.vmem [#allocation2], %s2632_s17 }
 0x111   : > { %3075 = vtanh.f32 %v711_v62  ;;  %v2616_v3 = vmul.f32 -1.442695, %v711_v62  ;;  %s962_s22 = scalar_lea.vmem [#allocation2], %s2623_s21  ;;  %s1065_s23 = scalar_lea.vmem %s3405_s11, %s2623_s21 }
 0x112   : > { %v963_v55 = vld [vmem:[%s962_s22] sm:$0xff]  ;;  %s3528_s20 = scalar_select %p632_p4, 7, 8 }
 0x113   : > { %3077 = vpow2.f32 %v2616_v3 }
 0x114   : > { %s2635_s21 = sshll.u32 %s3528_s20, 3 }
 0x115   : > { %s1390_s22 = scalar_lea.vmem [#allocation2], %s2635_s21 }
 0x116   : > { %s3600_s20 = scalar_select %p632_p4, 11, 4 }
 0x11b   : > { %v3076_v63 = vpop.eup %3075 }
 0x11c   : > { %725 = vrot.lane.b32.xlu0 %v3076_v63, %s3214_s24 }
 0x11d   : > { %v3078_v4 = vpop.eup %3077 }
 0x11e   : > { %v715_v5 = vadd.f32 1.0, %v3078_v4 }
 0x120   : > { %720 = vrot.lane.b32.xlu0 %v631_v0, %s3215_s25  ;;  %3079 = vrcp.f32 %v715_v5 }
 0x12a   : > { %v3080_v6 = vpop.eup %3079 }
 0x18e   : > { %v726_v7 = vpop.permute.xlu0 %725 }
 0x18f   : > { %v728_v8 = vmul.f32 %v3080_v6, %v726_v7 }
 0x191   : > { %730 = vrot.lane.b32.xlu1 %v728_v8, %s3215_s25 }
 0x192   : > { %v721_v10 = vpop.permute.xlu0 %720 }
 0x193   : > { %v723_v12 = vmul.f32 %v3080_v6, %v721_v10 }
 0x203   : > { %v731_v13 = vpop.permute.xlu1 %730 }
 0x204   : > { %v733_v14 = vadd.f32 %v731_v13, %v723_v12  ;;  %v1070_v13 = vld [vmem:[%s1069_s30] sm:$0xff] }
 0x206   : > { %3081 = vtanh.f32 %v733_v14 }
 0x210   : > { %v3082_v15 = vpop.eup %3081 }
 0x211   : > { %736 = vrot.lane.b32.xlu1 %v3082_v15, %s3214_s24 }
 0x283   : > { %v737_v16 = vpop.permute.xlu1 %736 }
 0x284   : > { %v739_v17 = vmul.f32 %v3080_v6, %v737_v16 }
 0x286   : > { %741 = vrot.lane.b32.xlu0 %v739_v17, %s3215_s25 }
 0x2f8   : > { %v742_v18 = vpop.permute.xlu0 %741 }
 0x2f9   : > { %745 = vst.msk [vmem:[%s744_s12] sm:$0xff] %vm637_vm2, %v742_v18  ;;  %2809 = vmatmul.mubr.msk.f32.vlgmr.msra.gmra.mrb[2].mxu1 %vm637_vm2, %v742_v18  ;;  %s1172_s12 = scalar_lea.vmem %s3405_s11, %s2626_s29  ;;  %s2638_s29 = sshll.u32 %s3546_s26, 3 }
 0x2fa   : > { %2979 = vmatpush3.bf16.msra.mxu1 %v3297_v9  ;;  %2819 = vmatprep.mubr.msk.f32.mxu1 %vm3212_vm1, %v3213_v2  ;;  %s1497_s30 = scalar_lea.vmem [#allocation2], %s2638_s29 }
 0x2fb   : > { %2980 = vmatprep.subr.bf16.mxu1 %v3211_v1  ;;  %s3617_s26 = scalar_select %p632_p4, 12, 3 }
 0x2fe   : > { %2982 = vmatpush3.bf16.msra.mxu1 %v3302_v11 }
 0x2ff   : > { %2983 = vmatprep.subr.bf16.mxu1 %v3211_v1 }
 0x3cc   : > { %v818_v20 = vpop.f32.mrb[2].mxu1 }
 0x3cd   : > { %v822_v21 = vadd.f32 %v818_v20, %v749_v19  ;;  %v2810_v22 = vpop.f32.mrb[3].mxu1 }
 0x3cf   : > { %3083 = vtanh.f32 %v822_v21  ;;  %v2619_v24 = vmul.f32 -1.442695, %v822_v21 }
 0x3d1   : > { %3085 = vpow2.f32 %v2619_v24 }
 0x3d9   : > { %v3084_v23 = vpop.eup %3083 }
 0x3da   : > { %832 = vrot.lane.b32.xlu1 %v3084_v23, %s3214_s24 }
 0x3db   : > { %v3086_v25 = vpop.eup %3085 }
 0x3dc   : > { %v826_v26 = vadd.f32 1.0, %v3086_v25 }
 0x3de   : > { %3087 = vrcp.f32 %v826_v26 }
 0x3e8   : > { %v3088_v27 = vpop.eup %3087 }
 0x3e9   : > { %v830_v30 = vmul.f32 %v3088_v27, %v733_v14 }
 0x44c   : > { %v833_v28 = vpop.permute.xlu1 %832 }
 0x44d   : > { %v835_v29 = vmul.f32 %v3088_v27, %v833_v28 }
 0x44f   : > { %837 = vrot.lane.b32.xlu0 %v835_v29, %s3215_s25 }
 0x4c1   : > { %v838_v31 = vpop.permute.xlu0 %837 }
 0x4c2   : > { %v840_v32 = vadd.f32 %v838_v31, %v830_v30  ;;  %v1177_v31 = vld [vmem:[%s1176_s14] sm:$0xff] }
 0x4c4   : > { %3089 = vtanh.f32 %v840_v32 }
 0x4ce   : > { %v3090_v33 = vpop.eup %3089 }
 0x4cf   : > { %843 = vrot.lane.b32.xlu1 %v3090_v33, %s3214_s24 }
 0x541   : > { %v844_v34 = vpop.permute.xlu1 %843 }
 0x542   : > { %v846_v35 = vmul.f32 %v3088_v27, %v844_v34 }
 0x544   : > { %848 = vrot.lane.b32.xlu0 %v846_v35, %s3215_s25 }
 0x5b6   : > { %v849_v36 = vpop.permute.xlu0 %848 }
 0x5b7   : > { %852 = vst.msk [vmem:[%s851_s15] sm:$0xff] %vm637_vm2, %v849_v36  ;;  %2820 = vmatmul.mubr.msk.f32.vlgmr.msra.gmra.mrb[4].mxu1 %vm637_vm2, %v849_v36  ;;  %s1279_s15 = scalar_lea.vmem %s3405_s11, %s2629_s13  ;;  %s2641_s13 = sshll.u32 %s3564_s9, 3 }
 0x5b8   : > { %2985 = vmatpush3.bf16.msra.mxu1 %v3297_v9  ;;  %2830 = vmatprep.mubr.msk.f32.mxu1 %vm3212_vm1, %v3213_v2  ;;  %s1604_s14 = scalar_lea.vmem [#allocation2], %s2641_s13 }
 0x5b9   : > { %2986 = vmatprep.subr.bf16.mxu1 %v3211_v1  ;;  %s3634_s9 = scalar_select %p632_p4, 13, 2 }
 0x5bc   : > { %2988 = vmatpush3.bf16.msra.mxu1 %v3302_v11 }
 0x5bd   : > { %2995 = vmatprep.subr.bf16.mxu1 %v3211_v1 }
 0x68a   : > { %v925_v38 = vpop.f32.mrb[4].mxu1 }
 0x68b   : > { %v929_v39 = vadd.f32 %v925_v38, %v856_v37  ;;  %v2821_v40 = vpop.f32.mrb[5].mxu1 }
 0x68d   : > { %3091 = vtanh.f32 %v929_v39  ;;  %v2622_v42 = vmul.f32 -1.442695, %v929_v39 }
 0x68f   : > { %3093 = vpow2.f32 %v2622_v42 }
 0x697   : > { %v3092_v41 = vpop.eup %3091 }
 0x698   : > { %939 = vrot.lane.b32.xlu1 %v3092_v41, %s3214_s24 }
 0x699   : > { %v3094_v43 = vpop.eup %3093 }
 0x69a   : > { %v933_v44 = vadd.f32 1.0, %v3094_v43 }
 0x69c   : > { %3095 = vrcp.f32 %v933_v44 }
 0x6a6   : > { %v3096_v45 = vpop.eup %3095 }
 0x6a7   : > { %v937_v48 = vmul.f32 %v3096_v45, %v840_v32 }
 0x70a   : > { %v940_v46 = vpop.permute.xlu1 %939 }
 0x70b   : > { %v942_v47 = vmul.f32 %v3096_v45, %v940_v46 }
 0x70d   : > { %944 = vrot.lane.b32.xlu0 %v942_v47, %s3215_s25 }
 0x77f   : > { %v945_v49 = vpop.permute.xlu0 %944 }
 0x780   : > { %v947_v50 = vadd.f32 %v945_v49, %v937_v48  ;;  %v1284_v49 = vld [vmem:[%s1283_s18] sm:$0xff] }
 0x782   : > { %3097 = vtanh.f32 %v947_v50 }
 0x78c   : > { %v3098_v51 = vpop.eup %3097 }
 0x78d   : > { %950 = vrot.lane.b32.xlu1 %v3098_v51, %s3214_s24 }
 0x7ff   : > { %v951_v52 = vpop.permute.xlu1 %950 }
 0x800   : > { %v953_v53 = vmul.f32 %v3096_v45, %v951_v52 }
 0x802   : > { %955 = vrot.lane.b32.xlu0 %v953_v53, %s3215_s25 }
 0x874   : > { %v956_v54 = vpop.permute.xlu0 %955 }
 0x875   : > { %959 = vst.msk [vmem:[%s958_s19] sm:$0xff] %vm637_vm2, %v956_v54  ;;  %2831 = vmatmul.mubr.msk.f32.vlgmr.msra.gmra.mrb[6].mxu1 %vm637_vm2, %v956_v54  ;;  %s1386_s19 = scalar_lea.vmem %s3405_s11, %s2632_s17  ;;  %s2644_s17 = sshll.u32 %s3582_s16, 3 }
 0x876   : > { %2997 = vmatpush3.bf16.msra.mxu1 %v3297_v9  ;;  %2852 = vmatprep.mubr.msk.f32.mxu1 %vm3212_vm1, %v3213_v2  ;;  %s1711_s18 = scalar_lea.vmem [#allocation2], %s2644_s17 }
 0x877   : > { %2998 = vmatprep.subr.bf16.mxu1 %v3211_v1  ;;  %s3646_s16 = scalar_select %p632_p4, 14, 1 }
 0x87a   : > { %3000 = vmatpush3.bf16.msra.mxu1 %v3302_v11 }
 0x87b   : > { %3007 = vmatprep.subr.bf16.mxu1 %v3211_v1 }
 0x948   : > { %v1032_v56 = vpop.f32.mrb[6].mxu1 }
 0x949   : > { %v1036_v57 = vadd.f32 %v1032_v56, %v963_v55  ;;  %v2832_v58 = vpop.f32.mrb[7].mxu1 }
 0x94b   : > { %3099 = vtanh.f32 %v1036_v57  ;;  %v2625_v60 = vmul.f32 -1.442695, %v1036_v57 }
 0x94d   : > { %3101 = vpow2.f32 %v2625_v60 }
 0x955   : > { %v3100_v59 = vpop.eup %3099 }
 0x956   : > { %1046 = vrot.lane.b32.xlu1 %v3100_v59, %s3214_s24 }
 0x957   : > { %v3102_v61 = vpop.eup %3101 }
 0x958   : > { %v1040_v62 = vadd.f32 1.0, %v3102_v61 }
 0x95a   : > { %3103 = vrcp.f32 %v1040_v62 }
 0x964   : > { %v3104_v63 = vpop.eup %3103 }
 0x965   : > { %v1044_v4 = vmul.f32 %v3104_v63, %v947_v50 }
 0x9c8   : > { %v1047_v0 = vpop.permute.xlu1 %1046 }
 0x9c9   : > { %v1049_v3 = vmul.f32 %v3104_v63, %v1047_v0 }
 0x9cb   : > { %1051 = vrot.lane.b32.xlu0 %v1049_v3, %s3215_s25 }
 0xa3d   : > { %v1052_v5 = vpop.permute.xlu0 %1051 }
 0xa3e   : > { %v1054_v6 = vadd.f32 %v1052_v5, %v1044_v4  ;;  %v1391_v5 = vld [vmem:[%s1390_s22] sm:$0xff] }
 0xa40   : > { %3105 = vtanh.f32 %v1054_v6 }
 0xa4a   : > { %v3106_v7 = vpop.eup %3105 }
 0xa4b   : > { %1057 = vrot.lane.b32.xlu1 %v3106_v7, %s3214_s24 }
 0xabd   : > { %v1058_v8 = vpop.permute.xlu1 %1057 }
 0xabe   : > { %v1060_v10 = vmul.f32 %v3104_v63, %v1058_v8 }
 0xac0   : > { %1062 = vrot.lane.b32.xlu0 %v1060_v10, %s3215_s25 }
 0xb32   : > { %v1063_v12 = vpop.permute.xlu0 %1062 }
 0xb33   : > { %1066 = vst.msk [vmem:[%s1065_s23] sm:$0xff] %vm637_vm2, %v1063_v12  ;;  %2842 = vmatmul.mubr.msk.f32.vlgmr.msra.gmra.mrb[16].mxu0 %vm637_vm2, %v1063_v12  ;;  %s1493_s23 = scalar_lea.vmem %s3405_s11, %s2635_s21  ;;  %s2647_s21 = sshll.u32 %s3600_s20, 3 }
 0xb34   : > { %3003 = vmatpush3.bf16.msra.mxu0 %v3297_v9  ;;  %2863 = vmatprep.mubr.msk.f32.mxu0 %vm3212_vm1, %v3213_v2  ;;  %s1818_s22 = scalar_lea.vmem [#allocation2], %s2647_s21 }
 0xb35   : > { %3004 = vmatprep.subr.bf16.mxu0 %v3211_v1  ;;  %s3658_s20 = scalar_select %p632_p4, 15, 0 }
 0xb38   : > { %3006 = vmatpush3.bf16.msra.mxu0 %v3302_v11 }
 0xb39   : > { %3013 = vmatprep.subr.bf16.mxu0 %v3211_v1 }
 0xc06   : > { %v1139_v14 = vpop.f32.mrb[16].mxu0 }
 0xc07   : > { %v1143_v15 = vadd.f32 %v1139_v14, %v1070_v13  ;;  %v2843_v16 = vpop.f32.mrb[17].mxu0 }
 0xc09   : > { %3107 = vtanh.f32 %v1143_v15  ;;  %v2628_v18 = vmul.f32 -1.442695, %v1143_v15 }
 0xc0b   : > { %3109 = vpow2.f32 %v2628_v18 }
 0xc13   : > { %v3108_v17 = vpop.eup %3107 }
 0xc14   : > { %1153 = vrot.lane.b32.xlu1 %v3108_v17, %s3214_s24 }
 0xc15   : > { %v3110_v19 = vpop.eup %3109 }
 0xc16   : > { %v1147_v20 = vadd.f32 1.0, %v3110_v19 }
 0xc18   : > { %3111 = vrcp.f32 %v1147_v20 }
 0xc22   : > { %v3112_v21 = vpop.eup %3111 }
 0xc23   : > { %v1151_v24 = vmul.f32 %v3112_v21, %v1054_v6 }
 0xc86   : > { %v1154_v22 = vpop.permute.xlu1 %1153 }
 0xc87   : > { %v1156_v23 = vmul.f32 %v3112_v21, %v1154_v22 }
 0xc89   : > { %1158 = vrot.lane.b32.xlu0 %v1156_v23, %s3215_s25 }
 0xcfb   : > { %v1159_v25 = vpop.permute.xlu0 %1158 }
 0xcfc   : > { %v1161_v26 = vadd.f32 %v1159_v25, %v1151_v24  ;;  %v1498_v25 = vld [vmem:[%s1497_s30] sm:$0xff] }
 0xcfe   : > { %3113 = vtanh.f32 %v1161_v26 }
 0xd08   : > { %v3114_v27 = vpop.eup %3113 }
 0xd09   : > { %1164 = vrot.lane.b32.xlu1 %v3114_v27, %s3214_s24 }
 0xd7b   : > { %v1165_v28 = vpop.permute.xlu1 %1164 }
 0xd7c   : > { %v1167_v29 = vmul.f32 %v3112_v21, %v1165_v28 }
 0xd7e   : > { %1169 = vrot.lane.b32.xlu0 %v1167_v29, %s3215_s25 }
 0xdf0   : > { %v1170_v30 = vpop.permute.xlu0 %1169 }
 0xdf1   : > { %1173 = vst.msk [vmem:[%s1172_s12] sm:$0xff] %vm637_vm2, %v1170_v30  ;;  %2853 = vmatmul.mubr.msk.f32.vlgmr.msra.gmra.mrb[8].mxu1 %vm637_vm2, %v1170_v30  ;;  %s1600_s12 = scalar_lea.vmem %s3405_s11, %s2638_s29  ;;  %s2650_s29 = sshll.u32 %s3617_s26, 3 }
 0xdf2   : > { %3009 = vmatpush3.bf16.msra.mxu1 %v3297_v9  ;;  %2874 = vmatprep.mubr.msk.f32.mxu1 %vm3212_vm1, %v3213_v2  ;;  %s1925_s30 = scalar_lea.vmem [#allocation2], %s2650_s29 }
 0xdf3   : > { %3010 = vmatprep.subr.bf16.mxu1 %v3211_v1 }
 0xdf6   : > { %3012 = vmatpush3.bf16.msra.mxu1 %v3302_v11 }
 0xdf7   : > { %3019 = vmatprep.subr.bf16.mxu1 %v3211_v1 }
 0xec4   : > { %v1246_v32 = vpop.f32.mrb[8].mxu1 }
 0xec5   : > { %v1250_v33 = vadd.f32 %v1246_v32, %v1177_v31  ;;  %v2854_v34 = vpop.f32.mrb[9].mxu1 }
 0xec7   : > { %3115 = vtanh.f32 %v1250_v33  ;;  %v2631_v36 = vmul.f32 -1.442695, %v1250_v33 }
 0xec9   : > { %3117 = vpow2.f32 %v2631_v36 }
 0xed1   : > { %v3116_v35 = vpop.eup %3115 }
 0xed2   : > { %1260 = vrot.lane.b32.xlu1 %v3116_v35, %s3214_s24 }
 0xed3   : > { %v3118_v37 = vpop.eup %3117 }
 0xed4   : > { %v1254_v38 = vadd.f32 1.0, %v3118_v37 }
 0xed6   : > { %3119 = vrcp.f32 %v1254_v38 }
 0xee0   : > { %v3120_v39 = vpop.eup %3119 }
 0xee1   : > { %v1258_v42 = vmul.f32 %v3120_v39, %v1161_v26 }
 0xf44   : > { %v1261_v40 = vpop.permute.xlu1 %1260 }
 0xf45   : > { %v1263_v41 = vmul.f32 %v3120_v39, %v1261_v40 }
 0xf47   : > { %1265 = vrot.lane.b32.xlu0 %v1263_v41, %s3215_s25 }
 0xfb9   : > { %v1266_v43 = vpop.permute.xlu0 %1265 }
 0xfba   : > { %v1268_v44 = vadd.f32 %v1266_v43, %v1258_v42  ;;  %v1605_v43 = vld [vmem:[%s1604_s14] sm:$0xff] }
 0xfbc   : > { %3121 = vtanh.f32 %v1268_v44 }
 0xfc6   : > { %v3122_v45 = vpop.eup %3121 }
 0xfc7   : > { %1271 = vrot.lane.b32.xlu1 %v3122_v45, %s3214_s24 }
0x1039   : > { %v1272_v46 = vpop.permute.xlu1 %1271 }
0x103a   : > { %v1274_v47 = vmul.f32 %v3120_v39, %v1272_v46 }
0x103c   : > { %1276 = vrot.lane.b32.xlu0 %v1274_v47, %s3215_s25 }
0x10ae   : > { %v1277_v48 = vpop.permute.xlu0 %1276 }
0x10af   : > { %1280 = vst.msk [vmem:[%s1279_s15] sm:$0xff] %vm637_vm2, %v1277_v48  ;;  %2864 = vmatmul.mubr.msk.f32.vlgmr.msra.gmra.mrb[18].mxu0 %vm637_vm2, %v1277_v48  ;;  %s1707_s15 = scalar_lea.vmem %s3405_s11, %s2641_s13  ;;  %s2653_s13 = sshll.u32 %s3634_s9, 3 }
0x10b0   : > { %3015 = vmatpush3.bf16.msra.mxu0 %v3297_v9  ;;  %2885 = vmatprep.mubr.msk.f32.mxu0 %vm3212_vm1, %v3213_v2  ;;  %s2032_s14 = scalar_lea.vmem [#allocation2], %s2653_s13 }
0x10b1   : > { %3016 = vmatprep.subr.bf16.mxu0 %v3211_v1 }
0x10b4   : > { %3018 = vmatpush3.bf16.msra.mxu0 %v3302_v11 }
0x10b5   : > { %3025 = vmatprep.subr.bf16.mxu0 %v3211_v1 }
0x1182   : > { %v1353_v50 = vpop.f32.mrb[18].mxu0 }
0x1183   : > { %v1357_v51 = vadd.f32 %v1353_v50, %v1284_v49  ;;  %v2865_v52 = vpop.f32.mrb[19].mxu0 }
0x1185   : > { %3123 = vtanh.f32 %v1357_v51  ;;  %v2634_v54 = vmul.f32 -1.442695, %v1357_v51 }
0x1187   : > { %3125 = vpow2.f32 %v2634_v54 }
0x118f   : > { %v3124_v53 = vpop.eup %3123 }
0x1190   : > { %1367 = vrot.lane.b32.xlu1 %v3124_v53, %s3214_s24 }
0x1191   : > { %v3126_v55 = vpop.eup %3125 }
0x1192   : > { %v1361_v56 = vadd.f32 1.0, %v3126_v55 }
0x1194   : > { %3127 = vrcp.f32 %v1361_v56 }
0x119e   : > { %v3128_v57 = vpop.eup %3127 }
0x119f   : > { %v1365_v60 = vmul.f32 %v3128_v57, %v1268_v44 }
0x1202   : > { %v1368_v58 = vpop.permute.xlu1 %1367 }
0x1203   : > { %v1370_v59 = vmul.f32 %v3128_v57, %v1368_v58 }
0x1205   : > { %1372 = vrot.lane.b32.xlu0 %v1370_v59, %s3215_s25 }
0x1277   : > { %v1373_v61 = vpop.permute.xlu0 %1372 }
0x1278   : > { %v1375_v62 = vadd.f32 %v1373_v61, %v1365_v60  ;;  %v1712_v61 = vld [vmem:[%s1711_s18] sm:$0xff] }
0x127a   : > { %3129 = vtanh.f32 %v1375_v62 }
0x1284   : > { %v3130_v63 = vpop.eup %3129 }
0x1285   : > { %1378 = vrot.lane.b32.xlu1 %v3130_v63, %s3214_s24 }
0x12f7   : > { %v1379_v0 = vpop.permute.xlu1 %1378 }
0x12f8   : > { %v1381_v3 = vmul.f32 %v3128_v57, %v1379_v0 }
0x12fa   : > { %1383 = vrot.lane.b32.xlu0 %v1381_v3, %s3215_s25 }
0x136c   : > { %v1384_v4 = vpop.permute.xlu0 %1383 }
0x136d   : > { %1387 = vst.msk [vmem:[%s1386_s19] sm:$0xff] %vm637_vm2, %v1384_v4  ;;  %2875 = vmatmul.mubr.msk.f32.vlgmr.msra.gmra.mrb[10].mxu1 %vm637_vm2, %v1384_v4  ;;  %s1814_s19 = scalar_lea.vmem %s3405_s11, %s2644_s17  ;;  %s2656_s17 = sshll.u32 %s3646_s16, 3 }
0x136e   : > { %3021 = vmatpush3.bf16.msra.mxu1 %v3297_v9  ;;  %2896 = vmatprep.mubr.msk.f32.mxu1 %vm3212_vm1, %v3213_v2  ;;  %s2139_s18 = scalar_lea.vmem [#allocation2], %s2656_s17 }
0x136f   : > { %3022 = vmatprep.subr.bf16.mxu1 %v3211_v1 }
0x1372   : > { %3024 = vmatpush3.bf16.msra.mxu1 %v3302_v11 }
0x1373   : > { %3031 = vmatprep.subr.bf16.mxu1 %v3211_v1 }
0x1440   : > { %v1460_v6 = vpop.f32.mrb[10].mxu1 }
0x1441   : > { %v1464_v7 = vadd.f32 %v1460_v6, %v1391_v5  ;;  %v2876_v8 = vpop.f32.mrb[11].mxu1 }
0x1443   : > { %3131 = vtanh.f32 %v1464_v7  ;;  %v2637_v12 = vmul.f32 -1.442695, %v1464_v7 }
0x1445   : > { %3133 = vpow2.f32 %v2637_v12 }
0x144d   : > { %v3132_v10 = vpop.eup %3131 }
0x144e   : > { %1474 = vrot.lane.b32.xlu1 %v3132_v10, %s3214_s24 }
0x144f   : > { %v3134_v13 = vpop.eup %3133 }
0x1450   : > { %v1468_v14 = vadd.f32 1.0, %v3134_v13 }
0x1452   : > { %3135 = vrcp.f32 %v1468_v14 }
0x145c   : > { %v3136_v15 = vpop.eup %3135 }
0x145d   : > { %v1472_v18 = vmul.f32 %v3136_v15, %v1375_v62 }
0x14c0   : > { %v1475_v16 = vpop.permute.xlu1 %1474 }
0x14c1   : > { %v1477_v17 = vmul.f32 %v3136_v15, %v1475_v16 }
0x14c3   : > { %1479 = vrot.lane.b32.xlu0 %v1477_v17, %s3215_s25 }
0x1535   : > { %v1480_v19 = vpop.permute.xlu0 %1479 }
0x1536   : > { %v1482_v20 = vadd.f32 %v1480_v19, %v1472_v18  ;;  %v1819_v19 = vld [vmem:[%s1818_s22] sm:$0xff] }
0x1538   : > { %3137 = vtanh.f32 %v1482_v20 }
0x1542   : > { %v3138_v21 = vpop.eup %3137 }
0x1543   : > { %1485 = vrot.lane.b32.xlu1 %v3138_v21, %s3214_s24 }
0x15b5   : > { %v1486_v22 = vpop.permute.xlu1 %1485 }
0x15b6   : > { %v1488_v23 = vmul.f32 %v3136_v15, %v1486_v22 }
0x15b8   : > { %1490 = vrot.lane.b32.xlu0 %v1488_v23, %s3215_s25 }
0x162a   : > { %v1491_v24 = vpop.permute.xlu0 %1490 }
0x162b   : > { %1494 = vst.msk [vmem:[%s1493_s23] sm:$0xff] %vm637_vm2, %v1491_v24  ;;  %2886 = vmatmul.mubr.msk.f32.vlgmr.msra.gmra.mrb[20].mxu0 %vm637_vm2, %v1491_v24  ;;  %s1921_s23 = scalar_lea.vmem %s3405_s11, %s2647_s21  ;;  %s2659_s21 = sshll.u32 %s3658_s20, 3 }
0x162c   : > { %3027 = vmatpush3.bf16.msra.mxu0 %v3297_v9  ;;  %2907 = vmatprep.mubr.msk.f32.mxu0 %vm3212_vm1, %v3213_v2  ;;  %s2246_s22 = scalar_lea.vmem [#allocation2], %s2659_s21 }
0x162d   : > { %3028 = vmatprep.subr.bf16.mxu0 %v3211_v1 }
0x1630   : > { %3030 = vmatpush3.bf16.msra.mxu0 %v3302_v11 }
0x1631   : > { %3037 = vmatprep.subr.bf16.mxu0 %v3211_v1 }
0x16fe   : > { %v1567_v26 = vpop.f32.mrb[20].mxu0 }
0x16ff   : > { %v1571_v27 = vadd.f32 %v1567_v26, %v1498_v25  ;;  %v2887_v28 = vpop.f32.mrb[21].mxu0 }
0x1701   : > { %3139 = vtanh.f32 %v1571_v27  ;;  %v2640_v30 = vmul.f32 -1.442695, %v1571_v27 }
0x1703   : > { %3141 = vpow2.f32 %v2640_v30 }
0x170b   : > { %v3140_v29 = vpop.eup %3139 }
0x170c   : > { %1581 = vrot.lane.b32.xlu1 %v3140_v29, %s3214_s24 }
0x170d   : > { %v3142_v31 = vpop.eup %3141 }
0x170e   : > { %v1575_v32 = vadd.f32 1.0, %v3142_v31 }
0x1710   : > { %3143 = vrcp.f32 %v1575_v32 }
0x171a   : > { %v3144_v33 = vpop.eup %3143 }
0x171b   : > { %v1579_v36 = vmul.f32 %v3144_v33, %v1482_v20 }
0x177e   : > { %v1582_v34 = vpop.permute.xlu1 %1581 }
0x177f   : > { %v1584_v35 = vmul.f32 %v3144_v33, %v1582_v34 }
0x1781   : > { %1586 = vrot.lane.b32.xlu0 %v1584_v35, %s3215_s25 }
0x17f3   : > { %v1587_v37 = vpop.permute.xlu0 %1586 }
0x17f4   : > { %v1589_v38 = vadd.f32 %v1587_v37, %v1579_v36  ;;  %v1926_v37 = vld [vmem:[%s1925_s30] sm:$0xff]  ;;  %s2349_s30 = scalar_lea.vmem %s3405_s11, %s2659_s21 }
0x17f6   : > { %3145 = vtanh.f32 %v1589_v38 }
0x1800   : > { %v3146_v39 = vpop.eup %3145 }
0x1801   : > { %1592 = vrot.lane.b32.xlu1 %v3146_v39, %s3214_s24 }
0x1873   : > { %v1593_v40 = vpop.permute.xlu1 %1592 }
0x1874   : > { %v1595_v41 = vmul.f32 %v3144_v33, %v1593_v40 }
0x1876   : > { %1597 = vrot.lane.b32.xlu0 %v1595_v41, %s3215_s25 }
0x18e8   : > { %v1598_v42 = vpop.permute.xlu0 %1597 }
0x18e9   : > { %1601 = vst.msk [vmem:[%s1600_s12] sm:$0xff] %vm637_vm2, %v1598_v42  ;;  %2897 = vmatmul.mubr.msk.f32.vlgmr.msra.gmra.mrb[12].mxu1 %vm637_vm2, %v1598_v42  ;;  %s2028_s12 = scalar_lea.vmem %s3405_s11, %s2650_s29  ;;  %s391_s29 = scalar_lea.vmem %s3692_s8, %s3284_s10 }
0x18ea   : > { %3033 = vmatpush3.bf16.msra.mxu1 %v3297_v9  ;;  %2918 = vmatprep.mubr.msk.f32.mxu1 %vm3212_vm1, %v3213_v2 }
0x18eb   : > { %3034 = vmatprep.subr.bf16.mxu1 %v3211_v1 }
0x18ee   : > { %3036 = vmatpush3.bf16.msra.mxu1 %v3302_v11 }
0x18ef   : > { %3043 = vmatprep.subr.bf16.mxu1 %v3211_v1 }
0x19bc   : > { %v1674_v44 = vpop.f32.mrb[12].mxu1 }
0x19bd   : > { %v1678_v45 = vadd.f32 %v1674_v44, %v1605_v43  ;;  %v2898_v46 = vpop.f32.mrb[13].mxu1 }
0x19bf   : > { %3147 = vtanh.f32 %v1678_v45  ;;  %v2643_v48 = vmul.f32 -1.442695, %v1678_v45 }
0x19c1   : > { %3149 = vpow2.f32 %v2643_v48 }
0x19c9   : > { %v3148_v47 = vpop.eup %3147 }
0x19ca   : > { %1688 = vrot.lane.b32.xlu1 %v3148_v47, %s3214_s24 }
0x19cb   : > { %v3150_v49 = vpop.eup %3149 }
0x19cc   : > { %v1682_v50 = vadd.f32 1.0, %v3150_v49 }
0x19ce   : > { %3151 = vrcp.f32 %v1682_v50 }
0x19d8   : > { %v3152_v51 = vpop.eup %3151 }
0x19d9   : > { %v1686_v54 = vmul.f32 %v3152_v51, %v1589_v38 }
0x1a3c   : > { %v1689_v52 = vpop.permute.xlu1 %1688 }
0x1a3d   : > { %v1691_v53 = vmul.f32 %v3152_v51, %v1689_v52 }
0x1a3f   : > { %1693 = vrot.lane.b32.xlu0 %v1691_v53, %s3215_s25 }
0x1ab1   : > { %v1694_v55 = vpop.permute.xlu0 %1693 }
0x1ab2   : > { %v1696_v56 = vadd.f32 %v1694_v55, %v1686_v54  ;;  %v2033_v55 = vld [vmem:[%s2032_s14] sm:$0xff] }
0x1ab4   : > { %3153 = vtanh.f32 %v1696_v56 }
0x1abe   : > { %v3154_v57 = vpop.eup %3153 }
0x1abf   : > { %1699 = vrot.lane.b32.xlu1 %v3154_v57, %s3214_s24 }
0x1b31   : > { %v1700_v58 = vpop.permute.xlu1 %1699 }
0x1b32   : > { %v1702_v59 = vmul.f32 %v3152_v51, %v1700_v58 }
0x1b34   : > { %1704 = vrot.lane.b32.xlu0 %v1702_v59, %s3215_s25 }
0x1ba6   : > { %v1705_v60 = vpop.permute.xlu0 %1704 }
0x1ba7   : > { %1708 = vst.msk [vmem:[%s1707_s15] sm:$0xff] %vm637_vm2, %v1705_v60  ;;  %2908 = vmatmul.mubr.msk.f32.vlgmr.msra.gmra.mrb[22].mxu0 %vm637_vm2, %v1705_v60  ;;  %s2135_s15 = scalar_lea.vmem %s3405_s11, %s2653_s13  ;;  %s387_s13 = scalar_lea.vmem %s3691_s7, %s3284_s10 }
0x1ba8   : > { %3039 = vmatpush3.bf16.msra.mxu0 %v3297_v9  ;;  %2929 = vmatprep.mubr.msk.f32.mxu0 %vm3212_vm1, %v3213_v2 }
0x1ba9   : > { %3040 = vmatprep.subr.bf16.mxu0 %v3211_v1 }
0x1bac   : > { %3042 = vmatpush3.bf16.msra.mxu0 %v3302_v11 }
0x1bad   : > { %3049 = vmatprep.subr.bf16.mxu0 %v3211_v1 }
0x1c7a   : > { %v1781_v62 = vpop.f32.mrb[22].mxu0 }
0x1c7b   : > { %v1785_v63 = vadd.f32 %v1781_v62, %v1712_v61  ;;  %v2909_v0 = vpop.f32.mrb[23].mxu0 }
0x1c7d   : > { %3155 = vtanh.f32 %v1785_v63  ;;  %v2646_v4 = vmul.f32 -1.442695, %v1785_v63 }
0x1c7f   : > { %3157 = vpow2.f32 %v2646_v4 }
0x1c87   : > { %v3156_v3 = vpop.eup %3155 }
0x1c88   : > { %1795 = vrot.lane.b32.xlu1 %v3156_v3, %s3214_s24 }
0x1c89   : > { %v3158_v5 = vpop.eup %3157 }
0x1c8a   : > { %v1789_v6 = vadd.f32 1.0, %v3158_v5 }
0x1c8c   : > { %3159 = vrcp.f32 %v1789_v6 }
0x1c96   : > { %v3160_v7 = vpop.eup %3159 }
0x1c97   : > { %v1793_v12 = vmul.f32 %v3160_v7, %v1696_v56 }
0x1cfa   : > { %v1796_v8 = vpop.permute.xlu1 %1795 }
0x1cfb   : > { %v1798_v10 = vmul.f32 %v3160_v7, %v1796_v8 }
0x1cfd   : > { %1800 = vrot.lane.b32.xlu0 %v1798_v10, %s3215_s25 }
0x1d6f   : > { %v1801_v13 = vpop.permute.xlu0 %1800 }
0x1d70   : > { %v1803_v14 = vadd.f32 %v1801_v13, %v1793_v12 }
0x1d72   : > { %3161 = vtanh.f32 %v1803_v14 }
0x1d7c   : > { %v3162_v15 = vpop.eup %3161 }
0x1d7d   : > { %1806 = vrot.lane.b32.xlu1 %v3162_v15, %s3214_s24 }
0x1def   : > { %v1807_v16 = vpop.permute.xlu1 %1806 }
0x1df0   : > { %v1809_v17 = vmul.f32 %v3160_v7, %v1807_v16  ;;  %v2140_v7 = vld [vmem:[%s2139_s18] sm:$0xff] }
0x1df2   : > { %1811 = vrot.lane.b32.xlu0 %v1809_v17, %s3215_s25 }
0x1e64   : > { %v1812_v18 = vpop.permute.xlu0 %1811 }
0x1e65   : > { %1815 = vst.msk [vmem:[%s1814_s19] sm:$0xff] %vm637_vm2, %v1812_v18  ;;  %2919 = vmatmul.mubr.msk.f32.vlgmr.msra.gmra.mrb[14].mxu1 %vm637_vm2, %v1812_v18  ;;  %s2242_s19 = scalar_lea.vmem %s3405_s11, %s2656_s17 }
0x1e66   : > { %3045 = vmatpush3.bf16.msra.mxu1 %v3297_v9  ;;  %2940 = vmatprep.mubr.msk.f32.mxu1 %vm3212_vm1, %v3213_v2 }
0x1e67   : > { %3046 = vmatprep.subr.bf16.mxu1 %v3211_v1 }
0x1e6a   : > { %3048 = vmatpush3.bf16.msra.mxu1 %v3302_v11 }
0x1e6b   : > { %3055 = vmatprep.subr.bf16.mxu1 %v3211_v1 }
0x1f38   : > { %v1888_v20 = vpop.f32.mrb[14].mxu1 }
0x1f39   : > { %v1892_v21 = vadd.f32 %v1888_v20, %v1819_v19  ;;  %v2920_v22 = vpop.f32.mrb[15].mxu1 }
0x1f3b   : > { %3163 = vtanh.f32 %v1892_v21  ;;  %v2649_v24 = vmul.f32 -1.442695, %v1892_v21 }
0x1f3d   : > { %3165 = vpow2.f32 %v2649_v24 }
0x1f45   : > { %v3164_v23 = vpop.eup %3163 }
0x1f46   : > { %1902 = vrot.lane.b32.xlu1 %v3164_v23, %s3214_s24 }
0x1f47   : > { %v3166_v25 = vpop.eup %3165 }
0x1f48   : > { %v1896_v26 = vadd.f32 1.0, %v3166_v25 }
0x1f4a   : > { %3167 = vrcp.f32 %v1896_v26 }
0x1f54   : > { %v3168_v27 = vpop.eup %3167 }
0x1f55   : > { %v1900_v30 = vmul.f32 %v3168_v27, %v1803_v14 }
0x1fb8   : > { %v1903_v28 = vpop.permute.xlu1 %1902 }
0x1fb9   : > { %v1905_v29 = vmul.f32 %v3168_v27, %v1903_v28 }
0x1fbb   : > { %1907 = vrot.lane.b32.xlu0 %v1905_v29, %s3215_s25 }
0x202d   : > { %v1908_v31 = vpop.permute.xlu0 %1907 }
0x202e   : > { %v1910_v32 = vadd.f32 %v1908_v31, %v1900_v30 }
0x2030   : > { %3169 = vtanh.f32 %v1910_v32 }
0x203a   : > { %v3170_v33 = vpop.eup %3169 }
0x203b   : > { %1913 = vrot.lane.b32.xlu1 %v3170_v33, %s3214_s24 }
0x20ad   : > { %v1914_v34 = vpop.permute.xlu1 %1913 }
0x20ae   : > { %v1916_v35 = vmul.f32 %v3168_v27, %v1914_v34  ;;  %v2247_v27 = vld [vmem:[%s2246_s22] sm:$0xff] }
0x20b0   : > { %1918 = vrot.lane.b32.xlu0 %v1916_v35, %s3215_s25 }
0x2122   : > { %v1919_v36 = vpop.permute.xlu0 %1918 }
0x2123   : > { %1922 = vst.msk [vmem:[%s1921_s23] sm:$0xff] %vm637_vm2, %v1919_v36  ;;  %2930 = vmatmul.mubr.msk.f32.vlgmr.msra.gmra.mrb[24].mxu0 %vm637_vm2, %v1919_v36 }
0x2124   : > { %3051 = vmatpush3.bf16.msra.mxu0 %v3297_v9  ;;  %2951 = vmatprep.mubr.msk.f32.mxu0 %vm3212_vm1, %v3213_v2 }
0x2125   : > { %3052 = vmatprep.subr.bf16.mxu0 %v3211_v1 }
0x2128   : > { %3054 = vmatpush3.bf16.msra.mxu0 %v3302_v11 }
0x21f6   : > { %v1995_v38 = vpop.f32.mrb[24].mxu0 }
0x21f7   : > { %v1999_v39 = vadd.f32 %v1995_v38, %v1926_v37  ;;  %v2931_v40 = vpop.f32.mrb[25].mxu0 }
0x21f9   : > { %3171 = vtanh.f32 %v1999_v39  ;;  %v2652_v42 = vmul.f32 -1.442695, %v1999_v39 }
0x21fb   : > { %3173 = vpow2.f32 %v2652_v42 }
0x2203   : > { %v3172_v41 = vpop.eup %3171 }
0x2204   : > { %2009 = vrot.lane.b32.xlu1 %v3172_v41, %s3214_s24 }
0x2205   : > { %v3174_v43 = vpop.eup %3173 }
0x2206   : > { %v2003_v44 = vadd.f32 1.0, %v3174_v43 }
0x2208   : > { %3175 = vrcp.f32 %v2003_v44 }
0x2212   : > { %v3176_v45 = vpop.eup %3175 }
0x2213   : > { %v2007_v48 = vmul.f32 %v3176_v45, %v1910_v32 }
0x2276   : > { %v2010_v46 = vpop.permute.xlu1 %2009 }
0x2277   : > { %v2012_v47 = vmul.f32 %v3176_v45, %v2010_v46 }
0x2279   : > { %2014 = vrot.lane.b32.xlu0 %v2012_v47, %s3215_s25 }
0x22eb   : > { %v2015_v49 = vpop.permute.xlu0 %2014 }
0x22ec   : > { %v2017_v50 = vadd.f32 %v2015_v49, %v2007_v48 }
0x22ee   : > { %3177 = vtanh.f32 %v2017_v50 }
0x22f8   : > { %v3178_v51 = vpop.eup %3177 }
0x22f9   : > { %2020 = vrot.lane.b32.xlu1 %v3178_v51, %s3214_s24 }
0x236b   : > { %v2021_v52 = vpop.permute.xlu1 %2020 }
0x236c   : > { %v2023_v53 = vmul.f32 %v3176_v45, %v2021_v52 }
0x236e   : > { %2025 = vrot.lane.b32.xlu0 %v2023_v53, %s3215_s25 }
0x23e0   : > { %v2026_v54 = vpop.permute.xlu0 %2025 }
0x23e1   : > { %2029 = vst.msk [vmem:[%s2028_s12] sm:$0xff] %vm637_vm2, %v2026_v54  ;;  %2941 = vmatmul.mubr.msk.f32.vlgmr.msra.gmra.mrb[16].mxu1 %vm637_vm2, %v2026_v54 }
0x23e2   : > { %3057 = vmatpush3.bf16.msra.mxu1 %v3297_v9  ;;  %2962 = vmatprep.mubr.msk.f32.mxu1 %vm3212_vm1, %v3213_v2 }
0x23e3   : > { %3058 = vmatprep.subr.bf16.mxu1 %v3211_v1 }
0x23e6   : > { %3060 = vmatpush3.bf16.msra.mxu1 %v3302_v11 }
0x24b4   : > { %v2102_v56 = vpop.f32.mrb[16].mxu1 }
0x24b5   : > { %v2106_v57 = vadd.f32 %v2102_v56, %v2033_v55  ;;  %v2942_v58 = vpop.f32.mrb[17].mxu1 }
0x24b7   : > { %3179 = vtanh.f32 %v2106_v57  ;;  %v2655_v9 = vmul.f32 -1.442695, %v2106_v57 }
0x24b9   : > { %3181 = vpow2.f32 %v2655_v9 }
0x24c1   : > { %v3180_v59 = vpop.eup %3179 }
0x24c2   : > { %2116 = vrot.lane.b32.xlu1 %v3180_v59, %s3214_s24 }
0x24c3   : > { %v3182_v2 = vpop.eup %3181 }
0x24c4   : > { %v2110_v1 = vadd.f32 1.0, %v3182_v2 }
0x24c6   : > { %3183 = vrcp.f32 %v2110_v1 }
0x24d0   : > { %v3184_v11 = vpop.eup %3183 }
0x24d1   : > { %v2114_v62 = vmul.f32 %v3184_v11, %v2017_v50 }
0x2534   : > { %v2117_v60 = vpop.permute.xlu1 %2116 }
0x2535   : > { %v2119_v61 = vmul.f32 %v3184_v11, %v2117_v60 }
0x2537   : > { %2121 = vrot.lane.b32.xlu0 %v2119_v61, %s3215_s25 }
0x25a9   : > { %v2122_v63 = vpop.permute.xlu0 %2121 }
0x25aa   : > { %v2124_v0 = vadd.f32 %v2122_v63, %v2114_v62 }
0x25ac   : > { %3185 = vtanh.f32 %v2124_v0 }
0x25b6   : > { %v3186_v3 = vpop.eup %3185 }
0x25b7   : > { %2127 = vrot.lane.b32.xlu1 %v3186_v3, %s3214_s24 }
0x2629   : > { %v2128_v4 = vpop.permute.xlu1 %2127 }
0x262a   : > { %v2130_v5 = vmul.f32 %v3184_v11, %v2128_v4 }
0x262c   : > { %2132 = vrot.lane.b32.xlu0 %v2130_v5, %s3215_s25 }
0x269e   : > { %v2133_v6 = vpop.permute.xlu0 %2132 }
0x269f   : > { %2136 = vst.msk [vmem:[%s2135_s15] sm:$0xff] %vm637_vm2, %v2133_v6  ;;  %2952 = vmatmul.mubr.msk.f32.vlgmr.msra.gmra.mrb[26].mxu0 %vm637_vm2, %v2133_v6 }
0x2772   : > { %v2209_v8 = vpop.f32.mrb[26].mxu0 }
0x2773   : > { %v2213_v10 = vadd.f32 %v2209_v8, %v2140_v7  ;;  %v2953_v12 = vpop.f32.mrb[27].mxu0 }
0x2775   : > { %3187 = vtanh.f32 %v2213_v10  ;;  %v2658_v14 = vmul.f32 -1.442695, %v2213_v10 }
0x2777   : > { %3189 = vpow2.f32 %v2658_v14 }
0x277f   : > { %v3188_v13 = vpop.eup %3187 }
0x2780   : > { %2223 = vrot.lane.b32.xlu1 %v3188_v13, %s3214_s24 }
0x2781   : > { %v3190_v15 = vpop.eup %3189 }
0x2782   : > { %v2217_v16 = vadd.f32 1.0, %v3190_v15 }
0x2784   : > { %3191 = vrcp.f32 %v2217_v16 }
0x278e   : > { %v3192_v17 = vpop.eup %3191 }
0x278f   : > { %v2221_v20 = vmul.f32 %v3192_v17, %v2124_v0 }
0x27f2   : > { %v2224_v18 = vpop.permute.xlu1 %2223 }
0x27f3   : > { %v2226_v19 = vmul.f32 %v3192_v17, %v2224_v18 }
0x27f5   : > { %2228 = vrot.lane.b32.xlu0 %v2226_v19, %s3215_s25 }
0x2867   : > { %v2229_v21 = vpop.permute.xlu0 %2228 }
0x2868   : > { %v2231_v22 = vadd.f32 %v2229_v21, %v2221_v20 }
0x286a   : > { %3193 = vtanh.f32 %v2231_v22 }
0x2874   : > { %v3194_v23 = vpop.eup %3193 }
0x2875   : > { %2234 = vrot.lane.b32.xlu1 %v3194_v23, %s3214_s24 }
0x28e7   : > { %v2235_v24 = vpop.permute.xlu1 %2234 }
0x28e8   : > { %v2237_v25 = vmul.f32 %v3192_v17, %v2235_v24 }
0x28ea   : > { %2239 = vrot.lane.b32.xlu0 %v2237_v25, %s3215_s25 }
0x295c   : > { %v2240_v26 = vpop.permute.xlu0 %2239 }
0x295d   : > { %2243 = vst.msk [vmem:[%s2242_s19] sm:$0xff] %vm637_vm2, %v2240_v26  ;;  %2963 = vmatmul.mubr.msk.f32.vlgmr.msra.gmra.mrb[18].mxu1 %vm637_vm2, %v2240_v26 }
0x2a30   : > { %v2316_v28 = vpop.f32.mrb[18].mxu1 }
0x2a31   : > { %v2320_v29 = vadd.f32 %v2316_v28, %v2247_v27  ;;  %v2964_v30 = vpop.f32.mrb[19].mxu1 }
0x2a33   : > { %3195 = vtanh.f32 %v2320_v29  ;;  %v2661_v32 = vmul.f32 -1.442695, %v2320_v29 }
0x2a35   : > { %3197 = vpow2.f32 %v2661_v32 }
0x2a3d   : > { %v3196_v31 = vpop.eup %3195 }
0x2a3e   : > { %2330 = vrot.lane.b32.xlu1 %v3196_v31, %s3214_s24 }
0x2a3f   : > { %v3198_v33 = vpop.eup %3197 }
0x2a40   : > { %v2324_v34 = vadd.f32 1.0, %v3198_v33 }
0x2a42   : > { %3199 = vrcp.f32 %v2324_v34 }
0x2a4c   : > { %v3200_v35 = vpop.eup %3199 }
0x2a4d   : > { %v2328_v38 = vmul.f32 %v3200_v35, %v2231_v22 }
0x2ab0   : > { %v2331_v36 = vpop.permute.xlu1 %2330 }
0x2ab1   : > { %v2333_v37 = vmul.f32 %v3200_v35, %v2331_v36 }
0x2ab3   : > { %2335 = vrot.lane.b32.xlu0 %v2333_v37, %s3215_s25 }
0x2b25   : > { %v2336_v39 = vpop.permute.xlu0 %2335 }
0x2b26   : > { %v2338_v40 = vadd.f32 %v2336_v39, %v2328_v38 }
0x2b28   : > { %3201 = vtanh.f32 %v2338_v40 }
0x2b32   : > { %v3202_v41 = vpop.eup %3201 }
0x2b33   : > { %2341 = vrot.lane.b32.xlu1 %v3202_v41, %s3214_s24 }
0x2b37   : > { %2353 = vrot.lane.b32.xlu1 %v2338_v40, %s3216_s28 }
0x2ba5   : > { %v2342_v42 = vpop.permute.xlu1 %2341 }
0x2ba6   : > { %v2344_v43 = vmul.f32 %v3200_v35, %v2342_v42 }
0x2ba8   : > { %2346 = vrot.lane.b32.xlu0 %v2344_v43, %s3215_s25 }
0x2ba9   : > { %v2354_v44 = vpop.permute.xlu1 %2353 }
0x2baa   : > { %2356 = vst.msk [vmem:[%s391_s29] sm:$0xff] %vm637_vm2, %v2354_v44 }
0x2c1a   : > { %v2347_v45 = vpop.permute.xlu0 %2346 }
0x2c1b   : > { %2350 = vst.msk [vmem:[%s2349_s30] sm:$0xff] %vm637_vm2, %v2347_v45  ;;  %2351 = vst.msk [vmem:[%s387_s13] sm:$0xff] %vm637_vm2, %v2347_v45 }
0x2c1c PF: > { %s19_s27 = sadd.s32 1, %s3209_s27  }
0x2c1d   : > { %p16_p5 = scmp.ge.s32.totalorder %s19_s27, 4  }
0x2c1f   :  { %18 = sbr.rel (!%p16_p5) target bundleno = 1 (0x1), region = 142 }

// kernel: spectranet_forward.4
= control target key start
LH: loop header
LB: loop body
LE: loop exit
PB: predicated region body
PF: predicated region fallthrough
CT: control target
= control target key end

     0   :  { %s3311_s27 = smov 0   ;;  %s3733_s0 = inlined_call_operand.vmem [shape: f32[128,64], index: 0, kind: input, shape index: {}]   ;;  %s3734_s1 = inlined_call_operand.vmem [shape: f32[2,64,128], index: 1, kind: input, shape index: {}]   ;;  %s3735_s2 = inlined_call_operand.vmem [shape: f32[2,32,128], index: 2, kind: input, shape index: {}]   ;;  %s3736_s3 = inlined_call_operand.vmem [shape: f32[2,1,128], index: 3, kind: input, shape index: {}]   ;;  %s3737_s4 = inlined_call_operand.vmem [shape: f32[2,8,32], index: 4, kind: input, shape index: {}]   ;;  %s3738_s5 = inlined_call_operand.vmem [shape: f32[2,8,32], index: 5, kind: input, shape index: {}]   ;;  %s3739_s6 = inlined_call_operand.vmem [shape: f32[2,128,32], index: 6, kind: output, shape index: {0}]   ;;  %s3740_s7 = inlined_call_operand.vmem [shape: f32[2,8,32], index: 7, kind: output, shape index: {1}]   ;;  %s3741_s8 = inlined_call_operand.vmem [shape: f32[2,8,32], index: 8, kind: output, shape index: {2}]  }
   0x1 LB: > { %s3317_s28 = sadd.s32 4294967295, %s3258_s27   ;;  %p2597_p0 = scmp.ge.s32.totalorder %s3258_s27, 1  ;;  %s3258_s27 = sphi %s3311_s27, %s19_s27  }
   0x2   : > { %p303_p1 = scmp.lt.s32.totalorder %s3258_s27, 3 }
   0x4   : > { %p304_p2 = pnand %p2597_p0, %p303_p1 }
   0x5   : > { %p361_p3 = scmp.lt.s32.totalorder (!%p304_p2), %s3317_s28, 1  ;;  %v395_v0 = vld [vmem:[%s3733_s0] sm:$0xff] (!%p304_p2)  ;;  %vm426_vm0 = vcmask (!%p304_p2), 523264   ;;  %v3260_v1 = vmov (!%p304_p2), 0.0|0.0   ;;  %vm3261_vm1 = vmmov (!%p304_p2), 0   ;;  %v3262_v2 = vmov (!%p304_p2), 0.0  }
   0x6   : > { %307 = sbr.rel (%p304_p2) target bundleno = 11308 (0x2c2c), region = 44  ;;  %2798 = vmatprep.mubr.msk.f32.mxu0 (!%p304_p2), %vm426_vm0, %v395_v0  ;;  %3014 = vmatprep.subr.bf16.mxu1 (!%p304_p2), %v3260_v1  ;;  %vm647_vm2 = vcmask (!%p304_p2), 261120   ;;  %v396_v22 = vld [vmem:[%s3733_s0 + $0x8] sm:$0xff] (!%p304_p2)  ;;  %v397_v23 = vld [vmem:[%s3733_s0 + $0x10] sm:$0xff] (!%p304_p2)  ;;  %v398_v24 = vld [vmem:[%s3733_s0 + $0x18] sm:$0xff] (!%p304_p2)  ;;  %p642_p4 = scmp.eq.s32.totalorder (!%p304_p2), %s3317_s28, 0 }
   0x7   : > { %2830 = vmatprep.mubr.msk.f32.mxu1 (!%p304_p2), %vm3261_vm1, %v3262_v2  ;;  %v399_v25 = vld [vmem:[%s3733_s0 + $0x20] sm:$0xff] (!%p304_p2)  ;;  %v400_v26 = vld [vmem:[%s3733_s0 + $0x28] sm:$0xff] (!%p304_p2)  ;;  %v401_v27 = vld [vmem:[%s3733_s0 + $0x30] sm:$0xff] (!%p304_p2)  ;;  %s3263_s25 = smov (!%p304_p2), 64   ;;  %s3264_s26 = smov (!%p304_p2), 32  }
   0x8   : > { %v402_v28 = vld [vmem:[%s3733_s0 + $0x38] sm:$0xff] (!%p304_p2)  ;;  %v403_v29 = vld [vmem:[%s3733_s0 + $0x40] sm:$0xff] (!%p304_p2)  ;;  %v404_v30 = vld [vmem:[%s3733_s0 + $0x48] sm:$0xff] (!%p304_p2) }
   0x9   : > { %v405_v31 = vld [vmem:[%s3733_s0 + $0x50] sm:$0xff] (!%p304_p2)  ;;  %v406_v32 = vld [vmem:[%s3733_s0 + $0x58] sm:$0xff] (!%p304_p2)  ;;  %v407_v33 = vld [vmem:[%s3733_s0 + $0x60] sm:$0xff] (!%p304_p2) }
   0xa   : > { %v408_v34 = vld [vmem:[%s3733_s0 + $0x68] sm:$0xff] (!%p304_p2)  ;;  %v409_v35 = vld [vmem:[%s3733_s0 + $0x70] sm:$0xff] (!%p304_p2)  ;;  %v410_v36 = vld [vmem:[%s3733_s0 + $0x78] sm:$0xff] (!%p304_p2) }
   0xd   : > { %s3328_s9 = scalar_select %p361_p3, %s3317_s28, 1 }
   0xe   : > { %s3436_s19 = scalar_select %p642_p4, 0, 15 }
   0xf   : > { %s2675_s10 = sshll.u32 %s3328_s9, 6  ;;  %s2676_s11 = sshll.u32 %s3328_s9, 5 }
  0x10   : > { %s365_s14 = scalar_lea.vmem %s3734_s1, %s2675_s10  ;;  %s370_s17 = scalar_lea.vmem %s3735_s2, %s2676_s11 }
  0x11   : > { %v411_v3 = vld [vmem:[%s365_s14] sm:$0xff]  ;;  %v412_v4 = vld [vmem:[%s365_s14 + $0x8] sm:$0xff]  ;;  %v638_v8 = vld [vmem:[%s370_s17 + $0x10] sm:$0xff]  ;;  %s3343_s18 = sshll.u32 %s3328_s9, 3  ;;  %s2625_s20 = sshll.u32 %s3436_s19, 3 }
  0x12   : > { %v636_v5 = vld [vmem:[%s370_s17] sm:$0xff]  ;;  %v2998_v6 = vpack.c.bf16 %v412_v4, %v411_v3  ;;  %v637_v7 = vld [vmem:[%s370_s17 + $0x8] sm:$0xff]  ;;  %v639_v9 = vld [vmem:[%s370_s17 + $0x18] sm:$0xff]  ;;  %s377_s21 = scalar_lea.vmem %s3737_s4, %s3343_s18  ;;  %s373_s17 = scalar_lea.vmem %s3736_s3, %s3328_s9 }
  0x13   : > { %v3340_v10 = vpack.c.bf16 %v637_v7, %v636_v5  ;;  %v413_v11 = vld [vmem:[%s365_s14 + $0x10] sm:$0xff]  ;;  %v414_v12 = vld [vmem:[%s365_s14 + $0x18] sm:$0xff]  ;;  %v415_v14 = vld [vmem:[%s365_s14 + $0x20] sm:$0xff]  ;;  %v3345_v16 = vpack.c.bf16 %v639_v9, %v638_v8  ;;  %s381_s24 = scalar_lea.vmem %s3738_s5, %s3343_s18  ;;  %s2677_s29 = sshll.u32 %s3328_s9, 7 }
  0x14   : > { %2999 = vmatprep.subr.bf16.mxu0 %v2998_v6  ;;  %v3002_v13 = vpack.c.bf16 %v414_v12, %v413_v11  ;;  %v416_v15 = vld [vmem:[%s365_s14 + $0x28] sm:$0xff]  ;;  %v417_v18 = vld [vmem:[%s365_s14 + $0x30] sm:$0xff]  ;;  %v418_v19 = vld [vmem:[%s365_s14 + $0x38] sm:$0xff]  ;;  %s3454_s11 = scalar_lea.vmem %s3739_s6, %s2677_s29  ;;  %s3265_s28 = smov 96  }
  0x15   : > { %3001 = vmatpush3.bf16.msra.mxu0 %v2998_v6  ;;  %3016 = vmatpush3.bf16.msra.mxu1 %v3340_v10  ;;  %v3006_v17 = vpack.c.bf16 %v416_v15, %v415_v14  ;;  %v640_v20 = vld [vmem:[%s377_s21] sm:$0xff]  ;;  %v3010_v21 = vpack.c.bf16 %v418_v19, %v417_v18  ;;  %s645_s21 = scalar_lea.vmem [#allocation2], %s2625_s20  ;;  %s754_s12 = scalar_lea.vmem %s3454_s11, %s2625_s20 }
  0x16   : > { %3003 = vmatprep.subr.bf16.mxu0 %v3002_v13  ;;  %3017 = vmatprep.subr.bf16.mxu1 %v3260_v1  ;;  %v2608_v39 = vld [vmem:[%s373_s17] ss:$0 sm:$0xff]  ;;  %s3469_s9 = scalar_select %p642_p4, 1, 14 }
  0x17   : > { %v641_v14 = vld [vmem:[%s381_s24] sm:$0xff]  ;;  %s3487_s16 = scalar_select %p642_p4, 2, 13 }
  0x18   : > { %s2628_s13 = sshll.u32 %s3469_s9, 3 }
  0x19   : > { %3005 = vmatpush3.bf16.msra.mxu0 %v3002_v13  ;;  %3019 = vmatpush3.bf16.msra.mxu1 %v3345_v16  ;;  %s758_s14 = scalar_lea.vmem [#allocation2], %s2628_s13  ;;  %s861_s15 = scalar_lea.vmem %s3454_s11, %s2628_s13 }
  0x1a   : > { %3007 = vmatprep.subr.bf16.mxu0 %v3006_v17  ;;  %3020 = vmatprep.subr.bf16.mxu1 %v3260_v1  ;;  %s2631_s17 = sshll.u32 %s3487_s16, 3 }
  0x1b   : > { %s865_s19 = scalar_lea.vmem [#allocation2], %s2631_s17  ;;  %s968_s20 = scalar_lea.vmem %s3454_s11, %s2631_s17 }
  0x1c   : > { %2831 = vmatmul.mubr.msk.f32.vlgmr.msra.gmra.mrb[0].mxu1 %vm647_vm2, %v640_v20  ;;  %s3523_s29 = scalar_select %p642_p4, 4, 11 }
  0x1d   : > { %3009 = vmatpush3.bf16.msra.mxu0 %v3006_v17  ;;  %3022 = vmatpush3.bf16.msra.mxu1 %v3340_v10  ;;  %s3541_s9 = scalar_select %p642_p4, 5, 10 }
  0x1e   : > { %3011 = vmatprep.subr.bf16.mxu0 %v3010_v21  ;;  %3023 = vmatprep.subr.bf16.mxu1 %v3260_v1  ;;  %s2637_s30 = sshll.u32 %s3523_s29, 3 }
  0x1f   : > { %2841 = vmatprep.mubr.msk.f32.mxu1 %vm3261_vm1, %v3262_v2  ;;  %s1079_s10 = scalar_lea.vmem [#allocation2], %s2637_s30  ;;  %s2640_s13 = sshll.u32 %s3541_s9, 3 }
  0x20   : > { %s3559_s16 = scalar_select %p642_p4, 6, 9 }
  0x21   : > { %3013 = vmatpush3.bf16.msra.mxu0 %v3010_v21  ;;  %3025 = vmatpush3.bf16.msra.mxu1 %v3345_v16  ;;  %s3595_s29 = scalar_select %p642_p4, 8, 7 }
  0x22   : > { %3026 = vmatprep.subr.bf16.mxu1 %v3260_v1  ;;  %3044 = vmatprep.subr.bf16.mxu0 %v3260_v1  ;;  %s2643_s17 = sshll.u32 %s3559_s16, 3 }
  0x23   : > { %s3613_s9 = scalar_select %p642_p4, 9, 6 }
  0x24   : > { %2799 = vmatmul.mubr.msk.f32.vlgmr.msra.gmra.mrb[0].mxu0 %vm426_vm0, %v396_v22  ;;  %s3631_s16 = scalar_select %p642_p4, 10, 5 }
  0x25   : > { %2801 = vmatprep.mubr.msk.f32.mxu0 %vm426_vm0, %v397_v23  ;;  %3046 = vmatpush3.bf16.msra.mxu0 %v3340_v10 }
  0x26   : > { %3047 = vmatprep.subr.bf16.mxu0 %v3260_v1 }
  0x28   : > { %2802 = vmatmul.mubr.msk.f32.gmra.mrb[2].mxu0 %vm426_vm0, %v398_v24 }
  0x29   : > { %2804 = vmatprep.mubr.msk.f32.mxu0 %vm426_vm0, %v399_v25  ;;  %3049 = vmatpush3.bf16.msra.mxu0 %v3345_v16 }
  0x2a   : > { %3056 = vmatprep.subr.bf16.mxu0 %v3260_v1 }
  0x2c   : > { %2805 = vmatmul.mubr.msk.f32.gmra.mrb[4].mxu0 %vm426_vm0, %v400_v26 }
  0x2d   : > { %2807 = vmatprep.mubr.msk.f32.mxu0 %vm426_vm0, %v401_v27 }
  0x30   : > { %2808 = vmatmul.mubr.msk.f32.gmra.mrb[6].mxu0 %vm426_vm0, %v402_v28 }
  0x31   : > { %2810 = vmatprep.mubr.msk.f32.mxu0 %vm426_vm0, %v403_v29 }
  0x34   : > { %2811 = vmatmul.mubr.msk.f32.gmra.mrb[8].mxu0 %vm426_vm0, %v404_v30 }
  0x35   : > { %2813 = vmatprep.mubr.msk.f32.mxu0 %vm426_vm0, %v405_v31 }
  0x38   : > { %2814 = vmatmul.mubr.msk.f32.gmra.mrb[10].mxu0 %vm426_vm0, %v406_v32 }
  0x39   : > { %2816 = vmatprep.mubr.msk.f32.mxu0 %vm426_vm0, %v407_v33 }
  0x3c   : > { %2817 = vmatmul.mubr.msk.f32.gmra.mrb[12].mxu0 %vm426_vm0, %v408_v34 }
  0x3d   : > { %2819 = vmatprep.mubr.msk.f32.mxu0 %vm426_vm0, %v409_v35 }
  0x40   : > { %2820 = vmatmul.mubr.msk.f32.gmra.mrb[14].mxu0 %vm426_vm0, %v410_v36 }
  0x41   : > { %2885 = vmatprep.mubr.msk.f32.mxu0 %vm3261_vm1, %v3262_v2 }
  0xef   : > { %v717_v37 = vpop.f32.mrb[0].mxu1 }
  0xf0   : > { %v2832_v38 = vpop.f32.mrb[1].mxu1 }
  0xf7   : > { %v2800_v40 = vpop.f32.mrb[0].mxu0 }
  0xf8   : > { %v547_v41 = vadd.f32 %v2800_v40, %v2608_v39  ;;  %v541_v42 = vpop.f32.mrb[1].mxu0 }
  0xf9   : > { %v542_v43 = vadd.f32 %v2608_v39, %v541_v42 }
  0xfa   : > { %621 = vst [vmem:[#allocation2 + $0x8] sm:$0xff] %v547_v41 }
  0xfb   : > { %620 = vst [vmem:[#allocation2] sm:$0xff] %v542_v43  ;;  %v2803_v44 = vpop.f32.mrb[2].mxu0 }
  0xfc   : > { %v557_v45 = vadd.f32 %v2803_v44, %v2608_v39  ;;  %v551_v46 = vpop.f32.mrb[3].mxu0 }
  0xfd   : > { %v552_v47 = vadd.f32 %v2608_v39, %v551_v46 }
  0xfe   : > { %623 = vst [vmem:[#allocation2 + $0x18] sm:$0xff] %v557_v45 }
  0xff   : > { %622 = vst [vmem:[#allocation2 + $0x10] sm:$0xff] %v552_v47  ;;  %v2806_v48 = vpop.f32.mrb[4].mxu0 }
 0x100   : > { %v567_v49 = vadd.f32 %v2806_v48, %v2608_v39  ;;  %v561_v50 = vpop.f32.mrb[5].mxu0 }
 0x101   : > { %v562_v51 = vadd.f32 %v2608_v39, %v561_v50 }
 0x102   : > { %625 = vst [vmem:[#allocation2 + $0x28] sm:$0xff] %v567_v49 }
 0x103   : > { %624 = vst [vmem:[#allocation2 + $0x20] sm:$0xff] %v562_v51  ;;  %v2809_v52 = vpop.f32.mrb[6].mxu0 }
 0x104   : > { %v577_v53 = vadd.f32 %v2809_v52, %v2608_v39  ;;  %v571_v54 = vpop.f32.mrb[7].mxu0 }
 0x105   : > { %v572_v55 = vadd.f32 %v2608_v39, %v571_v54 }
 0x106   : > { %627 = vst [vmem:[#allocation2 + $0x38] sm:$0xff] %v577_v53 }
 0x107   : > { %626 = vst [vmem:[#allocation2 + $0x30] sm:$0xff] %v572_v55  ;;  %v2812_v56 = vpop.f32.mrb[8].mxu0 }
 0x108   : > { %v587_v57 = vadd.f32 %v2812_v56, %v2608_v39  ;;  %v581_v58 = vpop.f32.mrb[9].mxu0 }
 0x109   : > { %v582_v59 = vadd.f32 %v2608_v39, %v581_v58 }
 0x10a   : > { %629 = vst [vmem:[#allocation2 + $0x48] sm:$0xff] %v587_v57 }
 0x10b   : > { %628 = vst [vmem:[#allocation2 + $0x40] sm:$0xff] %v582_v59  ;;  %v2815_v60 = vpop.f32.mrb[10].mxu0 }
 0x10c   : > { %v597_v61 = vadd.f32 %v2815_v60, %v2608_v39  ;;  %v591_v62 = vpop.f32.mrb[11].mxu0 }
 0x10d   : > { %v592_v63 = vadd.f32 %v2608_v39, %v591_v62 }
 0x10e   : > { %631 = vst [vmem:[#allocation2 + $0x58] sm:$0xff] %v597_v61 }
 0x10f   : > { %630 = vst [vmem:[#allocation2 + $0x50] sm:$0xff] %v592_v63  ;;  %v2818_v0 = vpop.f32.mrb[12].mxu0 }
 0x110   : > { %v607_v3 = vadd.f32 %v2818_v0, %v2608_v39  ;;  %v601_v4 = vpop.f32.mrb[13].mxu0 }
 0x111   : > { %v602_v5 = vadd.f32 %v2608_v39, %v601_v4 }
 0x112   : > { %633 = vst [vmem:[#allocation2 + $0x68] sm:$0xff] %v607_v3 }
 0x113   : > { %632 = vst [vmem:[#allocation2 + $0x60] sm:$0xff] %v602_v5  ;;  %v2821_v6 = vpop.f32.mrb[14].mxu0 }
 0x114   : > { %v617_v7 = vadd.f32 %v2821_v6, %v2608_v39  ;;  %v611_v8 = vpop.f32.mrb[15].mxu0 }
 0x115   : > { %v612_v9 = vadd.f32 %v2608_v39, %v611_v8 }
 0x116   : > { %635 = vst [vmem:[#allocation2 + $0x78] sm:$0xff] %v617_v7 }
 0x117   : > { %634 = vst [vmem:[#allocation2 + $0x70] sm:$0xff] %v612_v9 }
 0x11e   : > { %v646_v11 = vld [vmem:[%s645_s21] sm:$0xff]  ;;  %s3505_s21 = scalar_select %p642_p4, 3, 12 }
 0x11f   : > { %v721_v12 = vadd.f32 %v717_v37, %v646_v11  ;;  %v759_v30 = vld [vmem:[%s758_s14] sm:$0xff]  ;;  %s1186_s14 = scalar_lea.vmem [#allocation2], %s2640_s13 }
 0x120   : > { %v866_v48 = vld [vmem:[%s865_s19] sm:$0xff]  ;;  %s2634_s22 = sshll.u32 %s3505_s21, 3  ;;  %s1293_s19 = scalar_lea.vmem [#allocation2], %s2643_s17 }
 0x121   : > { %3124 = vtanh.f32 %v721_v12  ;;  %v2627_v15 = vmul.f32 -1.442695, %v721_v12  ;;  %s972_s23 = scalar_lea.vmem [#allocation2], %s2634_s22  ;;  %s1075_s24 = scalar_lea.vmem %s3454_s11, %s2634_s22 }
 0x122   : > { %v973_v4 = vld [vmem:[%s972_s23] sm:$0xff]  ;;  %s3577_s21 = scalar_select %p642_p4, 7, 8 }
 0x123   : > { %3126 = vpow2.f32 %v2627_v15 }
 0x124   : > { %s2646_s22 = sshll.u32 %s3577_s21, 3 }
 0x125   : > { %s1400_s23 = scalar_lea.vmem [#allocation2], %s2646_s22 }
 0x126   : > { %s3649_s21 = scalar_select %p642_p4, 11, 4 }
 0x12b   : > { %v3125_v13 = vpop.eup %3124 }
 0x12c   : > { %735 = vrot.lane.b32.xlu0 %v3125_v13, %s3263_s25 }
 0x12d   : > { %v3127_v17 = vpop.eup %3126 }
 0x12e   : > { %v725_v18 = vadd.f32 1.0, %v3127_v17 }
 0x130   : > { %730 = vrot.lane.b32.xlu0 %v641_v14, %s3264_s26  ;;  %3128 = vrcp.f32 %v725_v18 }
 0x13a   : > { %v3129_v19 = vpop.eup %3128 }
 0x19e   : > { %v736_v20 = vpop.permute.xlu0 %735 }
 0x19f   : > { %v738_v21 = vmul.f32 %v3129_v19, %v736_v20 }
 0x1a1   : > { %740 = vrot.lane.b32.xlu1 %v738_v21, %s3264_s26 }
 0x1a2   : > { %v731_v22 = vpop.permute.xlu0 %730 }
 0x1a3   : > { %v733_v23 = vmul.f32 %v3129_v19, %v731_v22 }
 0x213   : > { %v741_v24 = vpop.permute.xlu1 %740 }
 0x214   : > { %v743_v25 = vadd.f32 %v741_v24, %v733_v23  ;;  %v1080_v24 = vld [vmem:[%s1079_s10] sm:$0xff] }
 0x216   : > { %3130 = vtanh.f32 %v743_v25 }
 0x220   : > { %v3131_v26 = vpop.eup %3130 }
 0x221   : > { %746 = vrot.lane.b32.xlu1 %v3131_v26, %s3263_s25 }
 0x293   : > { %v747_v27 = vpop.permute.xlu1 %746 }
 0x294   : > { %v749_v28 = vmul.f32 %v3129_v19, %v747_v27 }
 0x296   : > { %751 = vrot.lane.b32.xlu0 %v749_v28, %s3264_s26 }
 0x308   : > { %v752_v29 = vpop.permute.xlu0 %751 }
 0x309   : > { %755 = vst.msk [vmem:[%s754_s12] sm:$0xff] %vm647_vm2, %v752_v29  ;;  %2842 = vmatmul.mubr.msk.f32.vlgmr.msra.gmra.mrb[2].mxu1 %vm647_vm2, %v752_v29  ;;  %s1182_s12 = scalar_lea.vmem %s3454_s11, %s2637_s30  ;;  %s2649_s30 = sshll.u32 %s3595_s29, 3 }
 0x30a   : > { %3028 = vmatpush3.bf16.msra.mxu1 %v3340_v10  ;;  %2852 = vmatprep.mubr.msk.f32.mxu1 %vm3261_vm1, %v3262_v2  ;;  %s1507_s10 = scalar_lea.vmem [#allocation2], %s2649_s30 }
 0x30b   : > { %3029 = vmatprep.subr.bf16.mxu1 %v3260_v1  ;;  %s3666_s29 = scalar_select %p642_p4, 12, 3 }
 0x30e   : > { %3031 = vmatpush3.bf16.msra.mxu1 %v3345_v16 }
 0x30f   : > { %3032 = vmatprep.subr.bf16.mxu1 %v3260_v1 }
 0x3dc   : > { %v828_v31 = vpop.f32.mrb[2].mxu1 }
 0x3dd   : > { %v832_v32 = vadd.f32 %v828_v31, %v759_v30  ;;  %v2843_v33 = vpop.f32.mrb[3].mxu1 }
 0x3df   : > { %3132 = vtanh.f32 %v832_v32  ;;  %v2630_v35 = vmul.f32 -1.442695, %v832_v32 }
 0x3e1   : > { %3134 = vpow2.f32 %v2630_v35 }
 0x3e9   : > { %v3133_v34 = vpop.eup %3132 }
 0x3ea   : > { %842 = vrot.lane.b32.xlu1 %v3133_v34, %s3263_s25 }
 0x3eb   : > { %v3135_v36 = vpop.eup %3134 }
 0x3ec   : > { %v836_v37 = vadd.f32 1.0, %v3135_v36 }
 0x3ee   : > { %3136 = vrcp.f32 %v836_v37 }
 0x3f8   : > { %v3137_v38 = vpop.eup %3136 }
 0x3f9   : > { %v840_v41 = vmul.f32 %v3137_v38, %v743_v25 }
 0x45c   : > { %v843_v39 = vpop.permute.xlu1 %842 }
 0x45d   : > { %v845_v40 = vmul.f32 %v3137_v38, %v843_v39 }
 0x45f   : > { %847 = vrot.lane.b32.xlu0 %v845_v40, %s3264_s26 }
 0x4d1   : > { %v848_v42 = vpop.permute.xlu0 %847 }
 0x4d2   : > { %v850_v43 = vadd.f32 %v848_v42, %v840_v41  ;;  %v1187_v42 = vld [vmem:[%s1186_s14] sm:$0xff] }
 0x4d4   : > { %3138 = vtanh.f32 %v850_v43 }
 0x4de   : > { %v3139_v44 = vpop.eup %3138 }
 0x4df   : > { %853 = vrot.lane.b32.xlu1 %v3139_v44, %s3263_s25 }
 0x551   : > { %v854_v45 = vpop.permute.xlu1 %853 }
 0x552   : > { %v856_v46 = vmul.f32 %v3137_v38, %v854_v45 }
 0x554   : > { %858 = vrot.lane.b32.xlu0 %v856_v46, %s3264_s26 }
 0x5c6   : > { %v859_v47 = vpop.permute.xlu0 %858 }
 0x5c7   : > { %862 = vst.msk [vmem:[%s861_s15] sm:$0xff] %vm647_vm2, %v859_v47  ;;  %2853 = vmatmul.mubr.msk.f32.vlgmr.msra.gmra.mrb[4].mxu1 %vm647_vm2, %v859_v47  ;;  %s1289_s15 = scalar_lea.vmem %s3454_s11, %s2640_s13  ;;  %s2652_s13 = sshll.u32 %s3613_s9, 3 }
 0x5c8   : > { %3034 = vmatpush3.bf16.msra.mxu1 %v3340_v10  ;;  %2863 = vmatprep.mubr.msk.f32.mxu1 %vm3261_vm1, %v3262_v2  ;;  %s1614_s14 = scalar_lea.vmem [#allocation2], %s2652_s13 }
 0x5c9   : > { %3035 = vmatprep.subr.bf16.mxu1 %v3260_v1  ;;  %s3683_s9 = scalar_select %p642_p4, 13, 2 }
 0x5cc   : > { %3037 = vmatpush3.bf16.msra.mxu1 %v3345_v16 }
 0x5cd   : > { %3038 = vmatprep.subr.bf16.mxu1 %v3260_v1 }
 0x69a   : > { %v935_v49 = vpop.f32.mrb[4].mxu1 }
 0x69b   : > { %v939_v50 = vadd.f32 %v935_v49, %v866_v48  ;;  %v2854_v51 = vpop.f32.mrb[5].mxu1 }
 0x69d   : > { %3140 = vtanh.f32 %v939_v50  ;;  %v2633_v53 = vmul.f32 -1.442695, %v939_v50 }
 0x69f   : > { %3142 = vpow2.f32 %v2633_v53 }
 0x6a7   : > { %v3141_v52 = vpop.eup %3140 }
 0x6a8   : > { %949 = vrot.lane.b32.xlu1 %v3141_v52, %s3263_s25 }
 0x6a9   : > { %v3143_v54 = vpop.eup %3142 }
 0x6aa   : > { %v943_v55 = vadd.f32 1.0, %v3143_v54 }
 0x6ac   : > { %3144 = vrcp.f32 %v943_v55 }
 0x6b6   : > { %v3145_v56 = vpop.eup %3144 }
 0x6b7   : > { %v947_v59 = vmul.f32 %v3145_v56, %v850_v43 }
 0x71a   : > { %v950_v57 = vpop.permute.xlu1 %949 }
 0x71b   : > { %v952_v58 = vmul.f32 %v3145_v56, %v950_v57 }
 0x71d   : > { %954 = vrot.lane.b32.xlu0 %v952_v58, %s3264_s26 }
 0x78f   : > { %v955_v60 = vpop.permute.xlu0 %954 }
 0x790   : > { %v957_v61 = vadd.f32 %v955_v60, %v947_v59  ;;  %v1294_v60 = vld [vmem:[%s1293_s19] sm:$0xff] }
 0x792   : > { %3146 = vtanh.f32 %v957_v61 }
 0x79c   : > { %v3147_v62 = vpop.eup %3146 }
 0x79d   : > { %960 = vrot.lane.b32.xlu1 %v3147_v62, %s3263_s25 }
 0x80f   : > { %v961_v63 = vpop.permute.xlu1 %960 }
 0x810   : > { %v963_v0 = vmul.f32 %v3145_v56, %v961_v63 }
 0x812   : > { %965 = vrot.lane.b32.xlu0 %v963_v0, %s3264_s26 }
 0x884   : > { %v966_v3 = vpop.permute.xlu0 %965 }
 0x885   : > { %969 = vst.msk [vmem:[%s968_s20] sm:$0xff] %vm647_vm2, %v966_v3  ;;  %2864 = vmatmul.mubr.msk.f32.vlgmr.msra.gmra.mrb[6].mxu1 %vm647_vm2, %v966_v3  ;;  %s1396_s20 = scalar_lea.vmem %s3454_s11, %s2643_s17  ;;  %s2655_s17 = sshll.u32 %s3631_s16, 3 }
 0x886   : > { %3040 = vmatpush3.bf16.msra.mxu1 %v3340_v10  ;;  %2874 = vmatprep.mubr.msk.f32.mxu1 %vm3261_vm1, %v3262_v2  ;;  %s1721_s19 = scalar_lea.vmem [#allocation2], %s2655_s17 }
 0x887   : > { %3041 = vmatprep.subr.bf16.mxu1 %v3260_v1  ;;  %s3695_s16 = scalar_select %p642_p4, 14, 1 }
 0x88a   : > { %3043 = vmatpush3.bf16.msra.mxu1 %v3345_v16 }
 0x88b   : > { %3050 = vmatprep.subr.bf16.mxu1 %v3260_v1 }
 0x958   : > { %v1042_v5 = vpop.f32.mrb[6].mxu1 }
 0x959   : > { %v1046_v6 = vadd.f32 %v1042_v5, %v973_v4  ;;  %v2865_v7 = vpop.f32.mrb[7].mxu1 }
 0x95b   : > { %3148 = vtanh.f32 %v1046_v6  ;;  %v2636_v9 = vmul.f32 -1.442695, %v1046_v6 }
 0x95d   : > { %3150 = vpow2.f32 %v2636_v9 }
 0x965   : > { %v3149_v8 = vpop.eup %3148 }
 0x966   : > { %1056 = vrot.lane.b32.xlu1 %v3149_v8, %s3263_s25 }
 0x967   : > { %v3151_v11 = vpop.eup %3150 }
 0x968   : > { %v1050_v12 = vadd.f32 1.0, %v3151_v11 }
 0x96a   : > { %3152 = vrcp.f32 %v1050_v12 }
 0x974   : > { %v3153_v13 = vpop.eup %3152 }
 0x975   : > { %v1054_v17 = vmul.f32 %v3153_v13, %v957_v61 }
 0x9d8   : > { %v1057_v14 = vpop.permute.xlu1 %1056 }
 0x9d9   : > { %v1059_v15 = vmul.f32 %v3153_v13, %v1057_v14 }
 0x9db   : > { %1061 = vrot.lane.b32.xlu0 %v1059_v15, %s3264_s26 }
 0xa4d   : > { %v1062_v18 = vpop.permute.xlu0 %1061 }
 0xa4e   : > { %v1064_v19 = vadd.f32 %v1062_v18, %v1054_v17  ;;  %v1401_v18 = vld [vmem:[%s1400_s23] sm:$0xff] }
 0xa50   : > { %3154 = vtanh.f32 %v1064_v19 }
 0xa5a   : > { %v3155_v20 = vpop.eup %3154 }
 0xa5b   : > { %1067 = vrot.lane.b32.xlu1 %v3155_v20, %s3263_s25 }
 0xacd   : > { %v1068_v21 = vpop.permute.xlu1 %1067 }
 0xace   : > { %v1070_v22 = vmul.f32 %v3153_v13, %v1068_v21 }
 0xad0   : > { %1072 = vrot.lane.b32.xlu0 %v1070_v22, %s3264_s26 }
 0xb42   : > { %v1073_v23 = vpop.permute.xlu0 %1072 }
 0xb43   : > { %1076 = vst.msk [vmem:[%s1075_s24] sm:$0xff] %vm647_vm2, %v1073_v23  ;;  %2875 = vmatmul.mubr.msk.f32.vlgmr.msra.gmra.mrb[8].mxu1 %vm647_vm2, %v1073_v23  ;;  %s1503_s24 = scalar_lea.vmem %s3454_s11, %s2646_s22  ;;  %s2658_s22 = sshll.u32 %s3649_s21, 3 }
 0xb44   : > { %3052 = vmatpush3.bf16.msra.mxu1 %v3340_v10  ;;  %2896 = vmatprep.mubr.msk.f32.mxu1 %vm3261_vm1, %v3262_v2  ;;  %s1828_s23 = scalar_lea.vmem [#allocation2], %s2658_s22 }
 0xb45   : > { %3053 = vmatprep.subr.bf16.mxu1 %v3260_v1  ;;  %s3707_s21 = scalar_select %p642_p4, 15, 0 }
 0xb48   : > { %3055 = vmatpush3.bf16.msra.mxu1 %v3345_v16 }
 0xb49   : > { %3062 = vmatprep.subr.bf16.mxu1 %v3260_v1 }
 0xc16   : > { %v1149_v25 = vpop.f32.mrb[8].mxu1 }
 0xc17   : > { %v1153_v26 = vadd.f32 %v1149_v25, %v1080_v24  ;;  %v2876_v27 = vpop.f32.mrb[9].mxu1 }
 0xc19   : > { %3156 = vtanh.f32 %v1153_v26  ;;  %v2639_v29 = vmul.f32 -1.442695, %v1153_v26 }
 0xc1b   : > { %3158 = vpow2.f32 %v2639_v29 }
 0xc23   : > { %v3157_v28 = vpop.eup %3156 }
 0xc24   : > { %1163 = vrot.lane.b32.xlu1 %v3157_v28, %s3263_s25 }
 0xc25   : > { %v3159_v30 = vpop.eup %3158 }
 0xc26   : > { %v1157_v31 = vadd.f32 1.0, %v3159_v30 }
 0xc28   : > { %3160 = vrcp.f32 %v1157_v31 }
 0xc32   : > { %v3161_v32 = vpop.eup %3160 }
 0xc33   : > { %v1161_v35 = vmul.f32 %v3161_v32, %v1064_v19 }
 0xc96   : > { %v1164_v33 = vpop.permute.xlu1 %1163 }
 0xc97   : > { %v1166_v34 = vmul.f32 %v3161_v32, %v1164_v33 }
 0xc99   : > { %1168 = vrot.lane.b32.xlu0 %v1166_v34, %s3264_s26 }
 0xd0b   : > { %v1169_v36 = vpop.permute.xlu0 %1168 }
 0xd0c   : > { %v1171_v37 = vadd.f32 %v1169_v36, %v1161_v35  ;;  %v1508_v36 = vld [vmem:[%s1507_s10] sm:$0xff] }
 0xd0e   : > { %3162 = vtanh.f32 %v1171_v37 }
 0xd18   : > { %v3163_v38 = vpop.eup %3162 }
 0xd19   : > { %1174 = vrot.lane.b32.xlu1 %v3163_v38, %s3263_s25 }
 0xd8b   : > { %v1175_v39 = vpop.permute.xlu1 %1174 }
 0xd8c   : > { %v1177_v40 = vmul.f32 %v3161_v32, %v1175_v39 }
 0xd8e   : > { %1179 = vrot.lane.b32.xlu0 %v1177_v40, %s3264_s26 }
 0xe00   : > { %v1180_v41 = vpop.permute.xlu0 %1179 }
 0xe01   : > { %1183 = vst.msk [vmem:[%s1182_s12] sm:$0xff] %vm647_vm2, %v1180_v41  ;;  %2886 = vmatmul.mubr.msk.f32.vlgmr.msra.gmra.mrb[16].mxu0 %vm647_vm2, %v1180_v41  ;;  %s1610_s12 = scalar_lea.vmem %s3454_s11, %s2649_s30  ;;  %s2661_s30 = sshll.u32 %s3666_s29, 3 }
 0xe02   : > { %3058 = vmatpush3.bf16.msra.mxu0 %v3340_v10  ;;  %2907 = vmatprep.mubr.msk.f32.mxu0 %vm3261_vm1, %v3262_v2  ;;  %s1935_s10 = scalar_lea.vmem [#allocation2], %s2661_s30 }
 0xe03   : > { %3059 = vmatprep.subr.bf16.mxu0 %v3260_v1 }
 0xe06   : > { %3061 = vmatpush3.bf16.msra.mxu0 %v3345_v16 }
 0xe07   : > { %3068 = vmatprep.subr.bf16.mxu0 %v3260_v1 }
 0xed4   : > { %v1256_v43 = vpop.f32.mrb[16].mxu0 }
 0xed5   : > { %v1260_v44 = vadd.f32 %v1256_v43, %v1187_v42  ;;  %v2887_v45 = vpop.f32.mrb[17].mxu0 }
 0xed7   : > { %3164 = vtanh.f32 %v1260_v44  ;;  %v2642_v47 = vmul.f32 -1.442695, %v1260_v44 }
 0xed9   : > { %3166 = vpow2.f32 %v2642_v47 }
 0xee1   : > { %v3165_v46 = vpop.eup %3164 }
 0xee2   : > { %1270 = vrot.lane.b32.xlu1 %v3165_v46, %s3263_s25 }
 0xee3   : > { %v3167_v48 = vpop.eup %3166 }
 0xee4   : > { %v1264_v49 = vadd.f32 1.0, %v3167_v48 }
 0xee6   : > { %3168 = vrcp.f32 %v1264_v49 }
 0xef0   : > { %v3169_v50 = vpop.eup %3168 }
 0xef1   : > { %v1268_v53 = vmul.f32 %v3169_v50, %v1171_v37 }
 0xf54   : > { %v1271_v51 = vpop.permute.xlu1 %1270 }
 0xf55   : > { %v1273_v52 = vmul.f32 %v3169_v50, %v1271_v51 }
 0xf57   : > { %1275 = vrot.lane.b32.xlu0 %v1273_v52, %s3264_s26 }
 0xfc9   : > { %v1276_v54 = vpop.permute.xlu0 %1275 }
 0xfca   : > { %v1278_v55 = vadd.f32 %v1276_v54, %v1268_v53  ;;  %v1615_v54 = vld [vmem:[%s1614_s14] sm:$0xff] }
 0xfcc   : > { %3170 = vtanh.f32 %v1278_v55 }
 0xfd6   : > { %v3171_v56 = vpop.eup %3170 }
 0xfd7   : > { %1281 = vrot.lane.b32.xlu1 %v3171_v56, %s3263_s25 }
0x1049   : > { %v1282_v57 = vpop.permute.xlu1 %1281 }
0x104a   : > { %v1284_v58 = vmul.f32 %v3169_v50, %v1282_v57 }
0x104c   : > { %1286 = vrot.lane.b32.xlu0 %v1284_v58, %s3264_s26 }
0x10be   : > { %v1287_v59 = vpop.permute.xlu0 %1286 }
0x10bf   : > { %1290 = vst.msk [vmem:[%s1289_s15] sm:$0xff] %vm647_vm2, %v1287_v59  ;;  %2897 = vmatmul.mubr.msk.f32.vlgmr.msra.gmra.mrb[10].mxu1 %vm647_vm2, %v1287_v59  ;;  %s1717_s15 = scalar_lea.vmem %s3454_s11, %s2652_s13  ;;  %s2664_s13 = sshll.u32 %s3683_s9, 3 }
0x10c0   : > { %3064 = vmatpush3.bf16.msra.mxu1 %v3340_v10  ;;  %2918 = vmatprep.mubr.msk.f32.mxu1 %vm3261_vm1, %v3262_v2  ;;  %s2042_s14 = scalar_lea.vmem [#allocation2], %s2664_s13 }
0x10c1   : > { %3065 = vmatprep.subr.bf16.mxu1 %v3260_v1 }
0x10c4   : > { %3067 = vmatpush3.bf16.msra.mxu1 %v3345_v16 }
0x10c5   : > { %3074 = vmatprep.subr.bf16.mxu1 %v3260_v1 }
0x1192   : > { %v1363_v61 = vpop.f32.mrb[10].mxu1 }
0x1193   : > { %v1367_v62 = vadd.f32 %v1363_v61, %v1294_v60  ;;  %v2898_v63 = vpop.f32.mrb[11].mxu1 }
0x1195   : > { %3172 = vtanh.f32 %v1367_v62  ;;  %v2645_v3 = vmul.f32 -1.442695, %v1367_v62 }
0x1197   : > { %3174 = vpow2.f32 %v2645_v3 }
0x119f   : > { %v3173_v0 = vpop.eup %3172 }
0x11a0   : > { %1377 = vrot.lane.b32.xlu1 %v3173_v0, %s3263_s25 }
0x11a1   : > { %v3175_v4 = vpop.eup %3174 }
0x11a2   : > { %v1371_v5 = vadd.f32 1.0, %v3175_v4 }
0x11a4   : > { %3176 = vrcp.f32 %v1371_v5 }
0x11ae   : > { %v3177_v6 = vpop.eup %3176 }
0x11af   : > { %v1375_v9 = vmul.f32 %v3177_v6, %v1278_v55 }
0x1212   : > { %v1378_v7 = vpop.permute.xlu1 %1377 }
0x1213   : > { %v1380_v8 = vmul.f32 %v3177_v6, %v1378_v7 }
0x1215   : > { %1382 = vrot.lane.b32.xlu0 %v1380_v8, %s3264_s26 }
0x1287   : > { %v1383_v11 = vpop.permute.xlu0 %1382 }
0x1288   : > { %v1385_v12 = vadd.f32 %v1383_v11, %v1375_v9  ;;  %v1722_v11 = vld [vmem:[%s1721_s19] sm:$0xff] }
0x128a   : > { %3178 = vtanh.f32 %v1385_v12 }
0x1294   : > { %v3179_v13 = vpop.eup %3178 }
0x1295   : > { %1388 = vrot.lane.b32.xlu1 %v3179_v13, %s3263_s25 }
0x1307   : > { %v1389_v14 = vpop.permute.xlu1 %1388 }
0x1308   : > { %v1391_v15 = vmul.f32 %v3177_v6, %v1389_v14 }
0x130a   : > { %1393 = vrot.lane.b32.xlu0 %v1391_v15, %s3264_s26 }
0x137c   : > { %v1394_v17 = vpop.permute.xlu0 %1393 }
0x137d   : > { %1397 = vst.msk [vmem:[%s1396_s20] sm:$0xff] %vm647_vm2, %v1394_v17  ;;  %2908 = vmatmul.mubr.msk.f32.vlgmr.msra.gmra.mrb[18].mxu0 %vm647_vm2, %v1394_v17  ;;  %s1824_s20 = scalar_lea.vmem %s3454_s11, %s2655_s17  ;;  %s2667_s17 = sshll.u32 %s3695_s16, 3 }
0x137e   : > { %3070 = vmatpush3.bf16.msra.mxu0 %v3340_v10  ;;  %2929 = vmatprep.mubr.msk.f32.mxu0 %vm3261_vm1, %v3262_v2  ;;  %s2149_s19 = scalar_lea.vmem [#allocation2], %s2667_s17 }
0x137f   : > { %3071 = vmatprep.subr.bf16.mxu0 %v3260_v1 }
0x1382   : > { %3073 = vmatpush3.bf16.msra.mxu0 %v3345_v16 }
0x1383   : > { %3080 = vmatprep.subr.bf16.mxu0 %v3260_v1 }
0x1450   : > { %v1470_v19 = vpop.f32.mrb[18].mxu0 }
0x1451   : > { %v1474_v20 = vadd.f32 %v1470_v19, %v1401_v18  ;;  %v2909_v21 = vpop.f32.mrb[19].mxu0 }
0x1453   : > { %3180 = vtanh.f32 %v1474_v20  ;;  %v2648_v23 = vmul.f32 -1.442695, %v1474_v20 }
0x1455   : > { %3182 = vpow2.f32 %v2648_v23 }
0x145d   : > { %v3181_v22 = vpop.eup %3180 }
0x145e   : > { %1484 = vrot.lane.b32.xlu1 %v3181_v22, %s3263_s25 }
0x145f   : > { %v3183_v24 = vpop.eup %3182 }
0x1460   : > { %v1478_v25 = vadd.f32 1.0, %v3183_v24 }
0x1462   : > { %3184 = vrcp.f32 %v1478_v25 }
0x146c   : > { %v3185_v26 = vpop.eup %3184 }
0x146d   : > { %v1482_v29 = vmul.f32 %v3185_v26, %v1385_v12 }
0x14d0   : > { %v1485_v27 = vpop.permute.xlu1 %1484 }
0x14d1   : > { %v1487_v28 = vmul.f32 %v3185_v26, %v1485_v27 }
0x14d3   : > { %1489 = vrot.lane.b32.xlu0 %v1487_v28, %s3264_s26 }
0x1545   : > { %v1490_v30 = vpop.permute.xlu0 %1489 }
0x1546   : > { %v1492_v31 = vadd.f32 %v1490_v30, %v1482_v29  ;;  %v1829_v30 = vld [vmem:[%s1828_s23] sm:$0xff] }
0x1548   : > { %3186 = vtanh.f32 %v1492_v31 }
0x1552   : > { %v3187_v32 = vpop.eup %3186 }
0x1553   : > { %1495 = vrot.lane.b32.xlu1 %v3187_v32, %s3263_s25 }
0x15c5   : > { %v1496_v33 = vpop.permute.xlu1 %1495 }
0x15c6   : > { %v1498_v34 = vmul.f32 %v3185_v26, %v1496_v33 }
0x15c8   : > { %1500 = vrot.lane.b32.xlu0 %v1498_v34, %s3264_s26 }
0x163a   : > { %v1501_v35 = vpop.permute.xlu0 %1500 }
0x163b   : > { %1504 = vst.msk [vmem:[%s1503_s24] sm:$0xff] %vm647_vm2, %v1501_v35  ;;  %2919 = vmatmul.mubr.msk.f32.vlgmr.msra.gmra.mrb[12].mxu1 %vm647_vm2, %v1501_v35  ;;  %s1931_s24 = scalar_lea.vmem %s3454_s11, %s2658_s22  ;;  %s2670_s22 = sshll.u32 %s3707_s21, 3 }
0x163c   : > { %3076 = vmatpush3.bf16.msra.mxu1 %v3340_v10  ;;  %2940 = vmatprep.mubr.msk.f32.mxu1 %vm3261_vm1, %v3262_v2  ;;  %s2256_s23 = scalar_lea.vmem [#allocation2], %s2670_s22 }
0x163d   : > { %3077 = vmatprep.subr.bf16.mxu1 %v3260_v1 }
0x1640   : > { %3079 = vmatpush3.bf16.msra.mxu1 %v3345_v16 }
0x1641   : > { %3086 = vmatprep.subr.bf16.mxu1 %v3260_v1 }
0x170e   : > { %v1577_v37 = vpop.f32.mrb[12].mxu1 }
0x170f   : > { %v1581_v38 = vadd.f32 %v1577_v37, %v1508_v36  ;;  %v2920_v39 = vpop.f32.mrb[13].mxu1 }
0x1711   : > { %3188 = vtanh.f32 %v1581_v38  ;;  %v2651_v41 = vmul.f32 -1.442695, %v1581_v38 }
0x1713   : > { %3190 = vpow2.f32 %v2651_v41 }
0x171b   : > { %v3189_v40 = vpop.eup %3188 }
0x171c   : > { %1591 = vrot.lane.b32.xlu1 %v3189_v40, %s3263_s25 }
0x171d   : > { %v3191_v42 = vpop.eup %3190 }
0x171e   : > { %v1585_v43 = vadd.f32 1.0, %v3191_v42 }
0x1720   : > { %3192 = vrcp.f32 %v1585_v43 }
0x172a   : > { %v3193_v44 = vpop.eup %3192 }
0x172b   : > { %v1589_v47 = vmul.f32 %v3193_v44, %v1492_v31 }
0x178e   : > { %v1592_v45 = vpop.permute.xlu1 %1591 }
0x178f   : > { %v1594_v46 = vmul.f32 %v3193_v44, %v1592_v45 }
0x1791   : > { %1596 = vrot.lane.b32.xlu0 %v1594_v46, %s3264_s26 }
0x1803   : > { %v1597_v48 = vpop.permute.xlu0 %1596 }
0x1804   : > { %v1599_v49 = vadd.f32 %v1597_v48, %v1589_v47  ;;  %v1936_v48 = vld [vmem:[%s1935_s10] sm:$0xff]  ;;  %s2359_s10 = scalar_lea.vmem %s3454_s11, %s2670_s22 }
0x1806   : > { %3194 = vtanh.f32 %v1599_v49 }
0x1810   : > { %v3195_v50 = vpop.eup %3194 }
0x1811   : > { %1602 = vrot.lane.b32.xlu1 %v3195_v50, %s3263_s25 }
0x1883   : > { %v1603_v51 = vpop.permute.xlu1 %1602 }
0x1884   : > { %v1605_v52 = vmul.f32 %v3193_v44, %v1603_v51 }
0x1886   : > { %1607 = vrot.lane.b32.xlu0 %v1605_v52, %s3264_s26 }
0x18f8   : > { %v1608_v53 = vpop.permute.xlu0 %1607 }
0x18f9   : > { %1611 = vst.msk [vmem:[%s1610_s12] sm:$0xff] %vm647_vm2, %v1608_v53  ;;  %2930 = vmatmul.mubr.msk.f32.vlgmr.msra.gmra.mrb[20].mxu0 %vm647_vm2, %v1608_v53  ;;  %s2038_s12 = scalar_lea.vmem %s3454_s11, %s2661_s30  ;;  %s394_s30 = scalar_lea.vmem %s3741_s8, %s3343_s18 }
0x18fa   : > { %3082 = vmatpush3.bf16.msra.mxu0 %v3340_v10  ;;  %2951 = vmatprep.mubr.msk.f32.mxu0 %vm3261_vm1, %v3262_v2 }
0x18fb   : > { %3083 = vmatprep.subr.bf16.mxu0 %v3260_v1 }
0x18fe   : > { %3085 = vmatpush3.bf16.msra.mxu0 %v3345_v16 }
0x18ff   : > { %3092 = vmatprep.subr.bf16.mxu0 %v3260_v1 }
0x19cc   : > { %v1684_v55 = vpop.f32.mrb[20].mxu0 }
0x19cd   : > { %v1688_v56 = vadd.f32 %v1684_v55, %v1615_v54  ;;  %v2931_v57 = vpop.f32.mrb[21].mxu0 }
0x19cf   : > { %3196 = vtanh.f32 %v1688_v56  ;;  %v2654_v59 = vmul.f32 -1.442695, %v1688_v56 }
0x19d1   : > { %3198 = vpow2.f32 %v2654_v59 }
0x19d9   : > { %v3197_v58 = vpop.eup %3196 }
0x19da   : > { %1698 = vrot.lane.b32.xlu1 %v3197_v58, %s3263_s25 }
0x19db   : > { %v3199_v60 = vpop.eup %3198 }
0x19dc   : > { %v1692_v61 = vadd.f32 1.0, %v3199_v60 }
0x19de   : > { %3200 = vrcp.f32 %v1692_v61 }
0x19e8   : > { %v3201_v62 = vpop.eup %3200 }
0x19e9   : > { %v1696_v3 = vmul.f32 %v3201_v62, %v1599_v49 }
0x1a4c   : > { %v1699_v63 = vpop.permute.xlu1 %1698 }
0x1a4d   : > { %v1701_v0 = vmul.f32 %v3201_v62, %v1699_v63 }
0x1a4f   : > { %1703 = vrot.lane.b32.xlu0 %v1701_v0, %s3264_s26 }
0x1ac1   : > { %v1704_v4 = vpop.permute.xlu0 %1703 }
0x1ac2   : > { %v1706_v5 = vadd.f32 %v1704_v4, %v1696_v3  ;;  %v2043_v4 = vld [vmem:[%s2042_s14] sm:$0xff] }
0x1ac4   : > { %3202 = vtanh.f32 %v1706_v5 }
0x1ace   : > { %v3203_v6 = vpop.eup %3202 }
0x1acf   : > { %1709 = vrot.lane.b32.xlu1 %v3203_v6, %s3263_s25 }
0x1b41   : > { %v1710_v7 = vpop.permute.xlu1 %1709 }
0x1b42   : > { %v1712_v8 = vmul.f32 %v3201_v62, %v1710_v7 }
0x1b44   : > { %1714 = vrot.lane.b32.xlu0 %v1712_v8, %s3264_s26 }
0x1bb6   : > { %v1715_v9 = vpop.permute.xlu0 %1714 }
0x1bb7   : > { %1718 = vst.msk [vmem:[%s1717_s15] sm:$0xff] %vm647_vm2, %v1715_v9  ;;  %2941 = vmatmul.mubr.msk.f32.vlgmr.msra.gmra.mrb[14].mxu1 %vm647_vm2, %v1715_v9  ;;  %s2145_s15 = scalar_lea.vmem %s3454_s11, %s2664_s13  ;;  %s390_s13 = scalar_lea.vmem %s3740_s7, %s3343_s18 }
0x1bb8   : > { %3088 = vmatpush3.bf16.msra.mxu1 %v3340_v10  ;;  %2962 = vmatprep.mubr.msk.f32.mxu1 %vm3261_vm1, %v3262_v2 }
0x1bb9   : > { %3089 = vmatprep.subr.bf16.mxu1 %v3260_v1 }
0x1bbc   : > { %3091 = vmatpush3.bf16.msra.mxu1 %v3345_v16 }
0x1bbd   : > { %3098 = vmatprep.subr.bf16.mxu1 %v3260_v1 }
0x1c8a   : > { %v1791_v12 = vpop.f32.mrb[14].mxu1 }
0x1c8b   : > { %v1795_v13 = vadd.f32 %v1791_v12, %v1722_v11  ;;  %v2942_v14 = vpop.f32.mrb[15].mxu1 }
0x1c8d   : > { %3204 = vtanh.f32 %v1795_v13  ;;  %v2657_v17 = vmul.f32 -1.442695, %v1795_v13 }
0x1c8f   : > { %3206 = vpow2.f32 %v2657_v17 }
0x1c97   : > { %v3205_v15 = vpop.eup %3204 }
0x1c98   : > { %1805 = vrot.lane.b32.xlu1 %v3205_v15, %s3263_s25 }
0x1c99   : > { %v3207_v18 = vpop.eup %3206 }
0x1c9a   : > { %v1799_v19 = vadd.f32 1.0, %v3207_v18 }
0x1c9c   : > { %3208 = vrcp.f32 %v1799_v19 }
0x1ca6   : > { %v3209_v20 = vpop.eup %3208 }
0x1ca7   : > { %v1803_v23 = vmul.f32 %v3209_v20, %v1706_v5 }
0x1d0a   : > { %v1806_v21 = vpop.permute.xlu1 %1805 }
0x1d0b   : > { %v1808_v22 = vmul.f32 %v3209_v20, %v1806_v21 }
0x1d0d   : > { %1810 = vrot.lane.b32.xlu0 %v1808_v22, %s3264_s26 }
0x1d7f   : > { %v1811_v24 = vpop.permute.xlu0 %1810 }
0x1d80   : > { %v1813_v25 = vadd.f32 %v1811_v24, %v1803_v23 }
0x1d82   : > { %3210 = vtanh.f32 %v1813_v25 }
0x1d8c   : > { %v3211_v26 = vpop.eup %3210 }
0x1d8d   : > { %1816 = vrot.lane.b32.xlu1 %v3211_v26, %s3263_s25 }
0x1dff   : > { %v1817_v27 = vpop.permute.xlu1 %1816 }
0x1e00   : > { %v1819_v28 = vmul.f32 %v3209_v20, %v1817_v27  ;;  %v2150_v20 = vld [vmem:[%s2149_s19] sm:$0xff] }
0x1e02   : > { %1821 = vrot.lane.b32.xlu0 %v1819_v28, %s3264_s26 }
0x1e74   : > { %v1822_v29 = vpop.permute.xlu0 %1821 }
0x1e75   : > { %1825 = vst.msk [vmem:[%s1824_s20] sm:$0xff] %vm647_vm2, %v1822_v29  ;;  %2952 = vmatmul.mubr.msk.f32.vlgmr.msra.gmra.mrb[22].mxu0 %vm647_vm2, %v1822_v29  ;;  %s2252_s20 = scalar_lea.vmem %s3454_s11, %s2667_s17 }
0x1e76   : > { %3094 = vmatpush3.bf16.msra.mxu0 %v3340_v10  ;;  %2973 = vmatprep.mubr.msk.f32.mxu0 %vm3261_vm1, %v3262_v2 }
0x1e77   : > { %3095 = vmatprep.subr.bf16.mxu0 %v3260_v1 }
0x1e7a   : > { %3097 = vmatpush3.bf16.msra.mxu0 %v3345_v16 }
0x1e7b   : > { %3104 = vmatprep.subr.bf16.mxu0 %v3260_v1 }
0x1f48   : > { %v1898_v31 = vpop.f32.mrb[22].mxu0 }
0x1f49   : > { %v1902_v32 = vadd.f32 %v1898_v31, %v1829_v30  ;;  %v2953_v33 = vpop.f32.mrb[23].mxu0 }
0x1f4b   : > { %3212 = vtanh.f32 %v1902_v32  ;;  %v2660_v35 = vmul.f32 -1.442695, %v1902_v32 }
0x1f4d   : > { %3214 = vpow2.f32 %v2660_v35 }
0x1f55   : > { %v3213_v34 = vpop.eup %3212 }
0x1f56   : > { %1912 = vrot.lane.b32.xlu1 %v3213_v34, %s3263_s25 }
0x1f57   : > { %v3215_v36 = vpop.eup %3214 }
0x1f58   : > { %v1906_v37 = vadd.f32 1.0, %v3215_v36 }
0x1f5a   : > { %3216 = vrcp.f32 %v1906_v37 }
0x1f64   : > { %v3217_v38 = vpop.eup %3216 }
0x1f65   : > { %v1910_v41 = vmul.f32 %v3217_v38, %v1813_v25 }
0x1fc8   : > { %v1913_v39 = vpop.permute.xlu1 %1912 }
0x1fc9   : > { %v1915_v40 = vmul.f32 %v3217_v38, %v1913_v39 }
0x1fcb   : > { %1917 = vrot.lane.b32.xlu0 %v1915_v40, %s3264_s26 }
0x203d   : > { %v1918_v42 = vpop.permute.xlu0 %1917 }
0x203e   : > { %v1920_v43 = vadd.f32 %v1918_v42, %v1910_v41 }
0x2040   : > { %3218 = vtanh.f32 %v1920_v43 }
0x204a   : > { %v3219_v44 = vpop.eup %3218 }
0x204b   : > { %1923 = vrot.lane.b32.xlu1 %v3219_v44, %s3263_s25 }
0x20bd   : > { %v1924_v45 = vpop.permute.xlu1 %1923 }
0x20be   : > { %v1926_v46 = vmul.f32 %v3217_v38, %v1924_v45  ;;  %v2257_v38 = vld [vmem:[%s2256_s23] sm:$0xff] }
0x20c0   : > { %1928 = vrot.lane.b32.xlu0 %v1926_v46, %s3264_s26 }
0x2132   : > { %v1929_v47 = vpop.permute.xlu0 %1928 }
0x2133   : > { %1932 = vst.msk [vmem:[%s1931_s24] sm:$0xff] %vm647_vm2, %v1929_v47  ;;  %2963 = vmatmul.mubr.msk.f32.vlgmr.msra.gmra.mrb[16].mxu1 %vm647_vm2, %v1929_v47 }
0x2134   : > { %3100 = vmatpush3.bf16.msra.mxu1 %v3340_v10  ;;  %2984 = vmatprep.mubr.msk.f32.mxu1 %vm3261_vm1, %v3262_v2 }
0x2135   : > { %3101 = vmatprep.subr.bf16.mxu1 %v3260_v1 }
0x2138   : > { %3103 = vmatpush3.bf16.msra.mxu1 %v3345_v16 }
0x2206   : > { %v2005_v49 = vpop.f32.mrb[16].mxu1 }
0x2207   : > { %v2009_v50 = vadd.f32 %v2005_v49, %v1936_v48  ;;  %v2964_v51 = vpop.f32.mrb[17].mxu1 }
0x2209   : > { %3220 = vtanh.f32 %v2009_v50  ;;  %v2663_v53 = vmul.f32 -1.442695, %v2009_v50 }
0x220b   : > { %3222 = vpow2.f32 %v2663_v53 }
0x2213   : > { %v3221_v52 = vpop.eup %3220 }
0x2214   : > { %2019 = vrot.lane.b32.xlu1 %v3221_v52, %s3263_s25 }
0x2215   : > { %v3223_v54 = vpop.eup %3222 }
0x2216   : > { %v2013_v55 = vadd.f32 1.0, %v3223_v54 }
0x2218   : > { %3224 = vrcp.f32 %v2013_v55 }
0x2222   : > { %v3225_v56 = vpop.eup %3224 }
0x2223   : > { %v2017_v59 = vmul.f32 %v3225_v56, %v1920_v43 }
0x2286   : > { %v2020_v57 = vpop.permute.xlu1 %2019 }
0x2287   : > { %v2022_v58 = vmul.f32 %v3225_v56, %v2020_v57 }
0x2289   : > { %2024 = vrot.lane.b32.xlu0 %v2022_v58, %s3264_s26 }
0x22fb   : > { %v2025_v60 = vpop.permute.xlu0 %2024 }
0x22fc   : > { %v2027_v61 = vadd.f32 %v2025_v60, %v2017_v59 }
0x22fe   : > { %3226 = vtanh.f32 %v2027_v61 }
0x2308   : > { %v3227_v62 = vpop.eup %3226 }
0x2309   : > { %2030 = vrot.lane.b32.xlu1 %v3227_v62, %s3263_s25 }
0x237b   : > { %v2031_v63 = vpop.permute.xlu1 %2030 }
0x237c   : > { %v2033_v0 = vmul.f32 %v3225_v56, %v2031_v63 }
0x237e   : > { %2035 = vrot.lane.b32.xlu0 %v2033_v0, %s3264_s26 }
0x23f0   : > { %v2036_v3 = vpop.permute.xlu0 %2035 }
0x23f1   : > { %2039 = vst.msk [vmem:[%s2038_s12] sm:$0xff] %vm647_vm2, %v2036_v3  ;;  %2974 = vmatmul.mubr.msk.f32.vlgmr.msra.gmra.mrb[24].mxu0 %vm647_vm2, %v2036_v3 }
0x23f2   : > { %3106 = vmatpush3.bf16.msra.mxu0 %v3340_v10  ;;  %2995 = vmatprep.mubr.msk.f32.mxu0 %vm3261_vm1, %v3262_v2 }
0x23f3   : > { %3107 = vmatprep.subr.bf16.mxu0 %v3260_v1 }
0x23f6   : > { %3109 = vmatpush3.bf16.msra.mxu0 %v3345_v16 }
0x24c4   : > { %v2112_v5 = vpop.f32.mrb[24].mxu0 }
0x24c5   : > { %v2116_v6 = vadd.f32 %v2112_v5, %v2043_v4  ;;  %v2975_v7 = vpop.f32.mrb[25].mxu0 }
0x24c7   : > { %3228 = vtanh.f32 %v2116_v6  ;;  %v2666_v10 = vmul.f32 -1.442695, %v2116_v6 }
0x24c9   : > { %3230 = vpow2.f32 %v2666_v10 }
0x24d1   : > { %v3229_v8 = vpop.eup %3228 }
0x24d2   : > { %2126 = vrot.lane.b32.xlu1 %v3229_v8, %s3263_s25 }
0x24d3   : > { %v3231_v2 = vpop.eup %3230 }
0x24d4   : > { %v2120_v1 = vadd.f32 1.0, %v3231_v2 }
0x24d6   : > { %3232 = vrcp.f32 %v2120_v1 }
0x24e0   : > { %v3233_v16 = vpop.eup %3232 }
0x24e1   : > { %v2124_v12 = vmul.f32 %v3233_v16, %v2027_v61 }
0x2544   : > { %v2127_v9 = vpop.permute.xlu1 %2126 }
0x2545   : > { %v2129_v11 = vmul.f32 %v3233_v16, %v2127_v9 }
0x2547   : > { %2131 = vrot.lane.b32.xlu0 %v2129_v11, %s3264_s26 }
0x25b9   : > { %v2132_v13 = vpop.permute.xlu0 %2131 }
0x25ba   : > { %v2134_v14 = vadd.f32 %v2132_v13, %v2124_v12 }
0x25bc   : > { %3234 = vtanh.f32 %v2134_v14 }
0x25c6   : > { %v3235_v15 = vpop.eup %3234 }
0x25c7   : > { %2137 = vrot.lane.b32.xlu1 %v3235_v15, %s3263_s25 }
0x2639   : > { %v2138_v17 = vpop.permute.xlu1 %2137 }
0x263a   : > { %v2140_v18 = vmul.f32 %v3233_v16, %v2138_v17 }
0x263c   : > { %2142 = vrot.lane.b32.xlu0 %v2140_v18, %s3264_s26 }
0x26ae   : > { %v2143_v19 = vpop.permute.xlu0 %2142 }
0x26af   : > { %2146 = vst.msk [vmem:[%s2145_s15] sm:$0xff] %vm647_vm2, %v2143_v19  ;;  %2985 = vmatmul.mubr.msk.f32.vlgmr.msra.gmra.mrb[18].mxu1 %vm647_vm2, %v2143_v19 }
0x2782   : > { %v2219_v21 = vpop.f32.mrb[18].mxu1 }
0x2783   : > { %v2223_v22 = vadd.f32 %v2219_v21, %v2150_v20  ;;  %v2986_v23 = vpop.f32.mrb[19].mxu1 }
0x2785   : > { %3236 = vtanh.f32 %v2223_v22  ;;  %v2669_v25 = vmul.f32 -1.442695, %v2223_v22 }
0x2787   : > { %3238 = vpow2.f32 %v2669_v25 }
0x278f   : > { %v3237_v24 = vpop.eup %3236 }
0x2790   : > { %2233 = vrot.lane.b32.xlu1 %v3237_v24, %s3263_s25 }
0x2791   : > { %v3239_v26 = vpop.eup %3238 }
0x2792   : > { %v2227_v27 = vadd.f32 1.0, %v3239_v26 }
0x2794   : > { %3240 = vrcp.f32 %v2227_v27 }
0x279e   : > { %v3241_v28 = vpop.eup %3240 }
0x279f   : > { %v2231_v31 = vmul.f32 %v3241_v28, %v2134_v14 }
0x2802   : > { %v2234_v29 = vpop.permute.xlu1 %2233 }
0x2803   : > { %v2236_v30 = vmul.f32 %v3241_v28, %v2234_v29 }
0x2805   : > { %2238 = vrot.lane.b32.xlu0 %v2236_v30, %s3264_s26 }
0x2877   : > { %v2239_v32 = vpop.permute.xlu0 %2238 }
0x2878   : > { %v2241_v33 = vadd.f32 %v2239_v32, %v2231_v31 }
0x287a   : > { %3242 = vtanh.f32 %v2241_v33 }
0x2884   : > { %v3243_v34 = vpop.eup %3242 }
0x2885   : > { %2244 = vrot.lane.b32.xlu1 %v3243_v34, %s3263_s25 }
0x28f7   : > { %v2245_v35 = vpop.permute.xlu1 %2244 }
0x28f8   : > { %v2247_v36 = vmul.f32 %v3241_v28, %v2245_v35 }
0x28fa   : > { %2249 = vrot.lane.b32.xlu0 %v2247_v36, %s3264_s26 }
0x296c   : > { %v2250_v37 = vpop.permute.xlu0 %2249 }
0x296d   : > { %2253 = vst.msk [vmem:[%s2252_s20] sm:$0xff] %vm647_vm2, %v2250_v37  ;;  %2996 = vmatmul.mubr.msk.f32.vlgmr.msra.gmra.mrb[26].mxu0 %vm647_vm2, %v2250_v37 }
0x2a40   : > { %v2326_v39 = vpop.f32.mrb[26].mxu0 }
0x2a41   : > { %v2330_v40 = vadd.f32 %v2326_v39, %v2257_v38  ;;  %v2997_v41 = vpop.f32.mrb[27].mxu0 }
0x2a43   : > { %3244 = vtanh.f32 %v2330_v40  ;;  %v2672_v43 = vmul.f32 -1.442695, %v2330_v40 }
0x2a45   : > { %3246 = vpow2.f32 %v2672_v43 }
0x2a4d   : > { %v3245_v42 = vpop.eup %3244 }
0x2a4e   : > { %2340 = vrot.lane.b32.xlu1 %v3245_v42, %s3263_s25 }
0x2a4f   : > { %v3247_v44 = vpop.eup %3246 }
0x2a50   : > { %v2334_v45 = vadd.f32 1.0, %v3247_v44 }
0x2a52   : > { %3248 = vrcp.f32 %v2334_v45 }
0x2a5c   : > { %v3249_v46 = vpop.eup %3248 }
0x2a5d   : > { %v2338_v49 = vmul.f32 %v3249_v46, %v2241_v33 }
0x2ac0   : > { %v2341_v47 = vpop.permute.xlu1 %2340 }
0x2ac1   : > { %v2343_v48 = vmul.f32 %v3249_v46, %v2341_v47 }
0x2ac3   : > { %2345 = vrot.lane.b32.xlu0 %v2343_v48, %s3264_s26 }
0x2b35   : > { %v2346_v50 = vpop.permute.xlu0 %2345 }
0x2b36   : > { %v2348_v51 = vadd.f32 %v2346_v50, %v2338_v49 }
0x2b38   : > { %3250 = vtanh.f32 %v2348_v51 }
0x2b42   : > { %v3251_v52 = vpop.eup %3250 }
0x2b43   : > { %2351 = vrot.lane.b32.xlu1 %v3251_v52, %s3263_s25 }
0x2b47   : > { %2363 = vrot.lane.b32.xlu1 %v2348_v51, %s3265_s28 }
0x2bb5   : > { %v2352_v53 = vpop.permute.xlu1 %2351 }
0x2bb6   : > { %v2354_v54 = vmul.f32 %v3249_v46, %v2352_v53 }
0x2bb8   : > { %2356 = vrot.lane.b32.xlu0 %v2354_v54, %s3264_s26 }
0x2bb9   : > { %v2364_v55 = vpop.permute.xlu1 %2363 }
0x2bba   : > { %2366 = vst.msk [vmem:[%s394_s30] sm:$0xff] %vm647_vm2, %v2364_v55 }
0x2c2a   : > { %v2357_v56 = vpop.permute.xlu0 %2356 }
0x2c2b   : > { %2360 = vst.msk [vmem:[%s2359_s10] sm:$0xff] %vm647_vm2, %v2357_v56  ;;  %2361 = vst.msk [vmem:[%s390_s13] sm:$0xff] %vm647_vm2, %v2357_v56 }
0x2c2c PF: > { %s19_s27 = sadd.s32 1, %s3258_s27  }
0x2c2d   : > { %p16_p5 = scmp.ge.s32.totalorder %s19_s27, 4  }
0x2c2f   :  { %18 = sbr.rel (!%p16_p5) target bundleno = 1 (0x1), region = 142 }

// kernel: spectranet_forward.5
= control target key start
LH: loop header
LB: loop body
LE: loop exit
PB: predicated region body
PF: predicated region fallthrough
CT: control target
= control target key end

     0   :  { %v3082_v3 = vmov 0   ;;  %v3083_v8 = vmov 0.0|0.0   ;;  %vm3084_vm0 = vmmov 0   ;;  %v3085_v22 = vmov 0.0   ;;  %s4378_s0 = inlined_call_operand.vmem [shape: f32[625,128], index: 0, kind: input, shape index: {}]   ;;  %s4379_s1 = inlined_call_operand.vmem [shape: f32[100,625], index: 1, kind: input, shape index: {}]   ;;  %s4380_s2 = inlined_call_operand.vmem [shape: f32[100,1], index: 2, kind: input, shape index: {}]   ;;  %s4381_s4 = inlined_call_operand.vmem [shape: f32[8,1], index: 4, kind: input, shape index: {}]   ;;  %s4382_s5 = inlined_call_operand.vmem [shape: f32[8,128,128], index: 5, kind: input, shape index: {}]   ;;  %s4383_s3 = inlined_call_operand.vmem [shape: f32[8,100], index: 3, kind: input, shape index: {}]   ;;  %s4384_s7 = inlined_call_operand.vmem [shape: f32[128,16], index: 7, kind: input, shape index: {}]   ;;  %s4385_s6 = inlined_call_operand.vmem [shape: f32[1,128], index: 6, kind: input, shape index: {}]   ;;  %s4386_s10 = inlined_call_operand.vmem [shape: f32[16,16], index: 10, kind: input, shape index: {}]   ;;  %s4387_s9 = inlined_call_operand.vmem [shape: f32[128,16], index: 9, kind: input, shape index: {}]   ;;  %s4388_s8 = inlined_call_operand.vmem [shape: f32[1,16], index: 8, kind: input, shape index: {}]   ;;  %s4389_s12 = inlined_call_operand.vmem [shape: f32[2,16], index: 12, kind: output, shape index: {}]   ;;  %s4390_s11 = inlined_call_operand.vmem [shape: f32[1,16], index: 11, kind: input, shape index: {}]  }
   0x1   :  { %v122_v0 = vld [vmem:[%s4378_s0 + $0x80] sm:$0xff]  ;;  %v123_v1 = vld [vmem:[%s4378_s0 + $0x88] sm:$0xff]  ;;  %3080 = vset.pattern.permute.xlu0 %v3082_v3  ;;  %3081 = vset.pattern.permute.xlu1 %v3082_v3  ;;  %v124_v6 = vld [vmem:[%s4378_s0 + $0x90] sm:$0xff]  ;;  %vm303_vm1 = vcmask 1040384   ;;  %vm263_vm2 = vcmask 924672   ;;  %vm721_vm3 = vcmask 1043456  }
   0x2   :  { %v106_v2 = vld [vmem:[%s4378_s0] sm:$0xff]  ;;  %v2715_v4 = vpack.c.bf16 %v123_v1, %v122_v0  ;;  %v107_v5 = vld [vmem:[%s4378_s0 + $0x8] sm:$0xff]  ;;  %v125_v7 = vld [vmem:[%s4378_s0 + $0x98] sm:$0xff]  ;;  %2818 = vmatprep.subr.bf16.mxu1 %v3083_v8  ;;  %2390 = vmatprep.mubr.msk.f32.mxu1 %vm3084_vm0, %v3085_v22  ;;  %vm717_vm4 = vcmask 818176   ;;  %vm1767_vm5 = vcmask 122880   ;;  %vm1621_vm6 = vcmask 130048  }
   0x3   :  { %v2717_v9 = vpack.c.bf16 %v107_v5, %v106_v2  ;;  %v2719_v10 = vpack.c.bf16 %v125_v7, %v124_v6  ;;  %v108_v11 = vld [vmem:[%s4378_s0 + $0x10] sm:$0xff]  ;;  %v109_v12 = vld [vmem:[%s4378_s0 + $0x18] sm:$0xff]  ;;  %v126_v13 = vld [vmem:[%s4378_s0 + $0xa0] sm:$0xff] }
   0x4   :  { %2716 = vmatprep.subr.bf16.mxu0 %v2715_v4  ;;  %v127_v14 = vld [vmem:[%s4378_s0 + $0xa8] sm:$0xff]  ;;  %v2721_v15 = vpack.c.bf16 %v109_v12, %v108_v11  ;;  %v110_v17 = vld [vmem:[%s4378_s0 + $0x20] sm:$0xff]  ;;  %v128_v19 = vld [vmem:[%s4378_s0 + $0xb0] sm:$0xff] }
   0x5   :  { %2718 = vmatpush3.bf16.msra.mxu0 %v2717_v9  ;;  %v2723_v16 = vpack.c.bf16 %v127_v14, %v126_v13  ;;  %v111_v18 = vld [vmem:[%s4378_s0 + $0x28] sm:$0xff]  ;;  %v129_v20 = vld [vmem:[%s4378_s0 + $0xb8] sm:$0xff]  ;;  %v112_v24 = vld [vmem:[%s4378_s0 + $0x30] sm:$0xff] }
   0x6   :  { %2720 = vmatprep.subr.bf16.mxu0 %v2719_v10  ;;  %v2725_v21 = vpack.c.bf16 %v111_v18, %v110_v17  ;;  %v2727_v23 = vpack.c.bf16 %v129_v20, %v128_v19  ;;  %v113_v25 = vld [vmem:[%s4378_s0 + $0x38] sm:$0xff]  ;;  %v130_v26 = vld [vmem:[%s4378_s0 + $0xc0] sm:$0xff]  ;;  %v131_v27 = vld [vmem:[%s4378_s0 + $0xc8] sm:$0xff] }
   0x7   :  { %v42_v28 = vld [vmem:[%s4379_s1 + $0x8] sm:$0xff]  ;;  %v2729_v29 = vpack.c.bf16 %v113_v25, %v112_v24  ;;  %v2731_v30 = vpack.c.bf16 %v131_v27, %v130_v26  ;;  %v114_v31 = vld [vmem:[%s4378_s0 + $0x40] sm:$0xff]  ;;  %v132_v33 = vld [vmem:[%s4378_s0 + $0xd0] sm:$0xff] }
   0x8   :  { %371 = vmatprep.mubr.f32.mxu0 %v42_v28  ;;  %v115_v32 = vld [vmem:[%s4378_s0 + $0x48] sm:$0xff]  ;;  %v133_v34 = vld [vmem:[%s4378_s0 + $0xd8] sm:$0xff]  ;;  %v116_v37 = vld [vmem:[%s4378_s0 + $0x50] sm:$0xff] }
   0x9   :  { %2722 = vmatpush3.bf16.msra.mxu0 %v2721_v15  ;;  %v2733_v35 = vpack.c.bf16 %v115_v32, %v114_v31  ;;  %v2735_v36 = vpack.c.bf16 %v133_v34, %v132_v33  ;;  %v117_v38 = vld [vmem:[%s4378_s0 + $0x58] sm:$0xff]  ;;  %v134_v39 = vld [vmem:[%s4378_s0 + $0xe0] sm:$0xff]  ;;  %v135_v40 = vld [vmem:[%s4378_s0 + $0xe8] sm:$0xff] }
   0xa   :  { %2724 = vmatprep.subr.bf16.mxu0 %v2723_v16  ;;  %v2737_v41 = vpack.c.bf16 %v117_v38, %v116_v37  ;;  %v2739_v42 = vpack.c.bf16 %v135_v40, %v134_v39  ;;  %v118_v43 = vld [vmem:[%s4378_s0 + $0x60] sm:$0xff]  ;;  %v119_v44 = vld [vmem:[%s4378_s0 + $0x68] sm:$0xff]  ;;  %v136_v45 = vld [vmem:[%s4378_s0 + $0xf0] sm:$0xff] }
   0xb   :  { %v137_v46 = vld [vmem:[%s4378_s0 + $0xf8] sm:$0xff]  ;;  %v2741_v47 = vpack.c.bf16 %v119_v44, %v118_v43  ;;  %v120_v49 = vld [vmem:[%s4378_s0 + $0x70] sm:$0xff]  ;;  %v154_v51 = vld [vmem:[%s4378_s0 + $0x180] sm:$0xff] }
   0xc   :  { %v2743_v48 = vpack.c.bf16 %v137_v46, %v136_v45  ;;  %v121_v50 = vld [vmem:[%s4378_s0 + $0x78] sm:$0xff]  ;;  %v155_v52 = vld [vmem:[%s4378_s0 + $0x188] sm:$0xff]  ;;  %v138_v55 = vld [vmem:[%s4378_s0 + $0x100] sm:$0xff] }
   0xd   :  { %2726 = vmatpush3.bf16.msra.mxu0 %v2725_v21  ;;  %v2745_v53 = vpack.c.bf16 %v121_v50, %v120_v49  ;;  %v2747_v54 = vpack.c.bf16 %v155_v52, %v154_v51  ;;  %v139_v56 = vld [vmem:[%s4378_s0 + $0x108] sm:$0xff]  ;;  %v156_v57 = vld [vmem:[%s4378_s0 + $0x190] sm:$0xff]  ;;  %v157_v58 = vld [vmem:[%s4378_s0 + $0x198] sm:$0xff] }
   0xe   :  { %2728 = vmatprep.subr.bf16.mxu0 %v2727_v23  ;;  %v41_v59 = vld [vmem:[%s4379_s1] sm:$0xff]  ;;  %v2749_v60 = vpack.c.bf16 %v139_v56, %v138_v55  ;;  %v47_v61 = vld [vmem:[%s4379_s1 + $0x30] sm:$0xff]  ;;  %v2751_v62 = vpack.c.bf16 %v157_v58, %v156_v57  ;;  %v141_v0 = vld [vmem:[%s4378_s0 + $0x118] sm:$0xff] }
   0xf   :  { %v140_v63 = vld [vmem:[%s4378_s0 + $0x110] sm:$0xff]  ;;  %v158_v1 = vld [vmem:[%s4378_s0 + $0x1a0] sm:$0xff]  ;;  %v159_v2 = vld [vmem:[%s4378_s0 + $0x1a8] sm:$0xff] }
  0x10   :  { %v46_v3 = vld [vmem:[%s4379_s1 + $0x28] sm:$0xff]  ;;  %v2753_v4 = vpack.c.bf16 %v141_v0, %v140_v63  ;;  %v52_v5 = vld [vmem:[%s4379_s1 + $0x58] sm:$0xff]  ;;  %v2755_v6 = vpack.c.bf16 %v159_v2, %v158_v1  ;;  %v142_v7 = vld [vmem:[%s4378_s0 + $0x120] sm:$0xff] }
  0x11   :  { %2730 = vmatpush3.bf16.msra.mxu0 %v2729_v29  ;;  %v143_v9 = vld [vmem:[%s4378_s0 + $0x128] sm:$0xff]  ;;  %v160_v10 = vld [vmem:[%s4378_s0 + $0x1b0] sm:$0xff]  ;;  %v161_v11 = vld [vmem:[%s4378_s0 + $0x1b8] sm:$0xff] }
  0x12   :  { %2732 = vmatprep.subr.bf16.mxu0 %v2731_v30  ;;  %v185_v12 = vld [vmem:[%s4380_s2] sm:$0xff]  ;;  %v51_v13 = vld [vmem:[%s4379_s1 + $0x50] sm:$0xff]  ;;  %v2757_v14 = vpack.c.bf16 %v143_v9, %v142_v7  ;;  %v186_v15 = vld [vmem:[%s4380_s2 + $0x8] sm:$0xff]  ;;  %v2759_v17 = vpack.c.bf16 %v161_v11, %v160_v10 }
  0x13   :  { %200 = vperm.xlu0 %3080, %v185_v12   ;;  %v57_v16 = vld [vmem:[%s4379_s1 + $0x80] sm:$0xff]  ;;  %v144_v18 = vld [vmem:[%s4378_s0 + $0x130] sm:$0xff]  ;;  %v145_v19 = vld [vmem:[%s4378_s0 + $0x138] sm:$0xff] }
  0x14   :  { %v162_v20 = vld [vmem:[%s4378_s0 + $0x1c0] sm:$0xff]  ;;  %v163_v21 = vld [vmem:[%s4378_s0 + $0x1c8] sm:$0xff]  ;;  %v187_v23 = vld [vmem:[%s4380_s2 + $0x10] sm:$0xff]  ;;  %v2761_v25 = vpack.c.bf16 %v145_v19, %v144_v18 }
  0x15   :  { %2734 = vmatpush3.bf16.msra.mxu0 %v2733_v35  ;;  %v56_v24 = vld [vmem:[%s4379_s1 + $0x78] sm:$0xff]  ;;  %v189_v26 = vld [vmem:[%s4380_s2 + $0x20] sm:$0xff]  ;;  %v62_v27 = vld [vmem:[%s4379_s1 + $0xa8] sm:$0xff]  ;;  %v2763_v28 = vpack.c.bf16 %v163_v21, %v162_v20  ;;  %210 = vperm.xlu1 %3081, %v187_v23  }
  0x16   :  { %2736 = vmatprep.subr.bf16.mxu0 %v2735_v36  ;;  %v146_v29 = vld [vmem:[%s4378_s0 + $0x140] sm:$0xff]  ;;  %v147_v30 = vld [vmem:[%s4378_s0 + $0x148] sm:$0xff]  ;;  %v164_v31 = vld [vmem:[%s4378_s0 + $0x1d0] sm:$0xff] }
  0x17   :  { %205 = vperm.xlu0 %3080, %v186_v15   ;;  %v165_v32 = vld [vmem:[%s4378_s0 + $0x1d8] sm:$0xff]  ;;  %v61_v34 = vld [vmem:[%s4379_s1 + $0xa0] sm:$0xff]  ;;  %v2765_v35 = vpack.c.bf16 %v147_v30, %v146_v29  ;;  %v191_v36 = vld [vmem:[%s4380_s2 + $0x30] sm:$0xff] }
  0x18   :  { %v188_v33 = vld [vmem:[%s4380_s2 + $0x18] sm:$0xff]  ;;  %v67_v37 = vld [vmem:[%s4379_s1 + $0xd0] sm:$0xff]  ;;  %v2767_v38 = vpack.c.bf16 %v165_v32, %v164_v31  ;;  %v190_v43 = vld [vmem:[%s4380_s2 + $0x28] sm:$0xff] }
  0x19   :  { %2738 = vmatpush3.bf16.msra.mxu0 %v2737_v41  ;;  %v148_v39 = vld [vmem:[%s4378_s0 + $0x150] sm:$0xff]  ;;  %v149_v40 = vld [vmem:[%s4378_s0 + $0x158] sm:$0xff]  ;;  %215 = vperm.xlu1 %3081, %v188_v33   ;;  %v166_v41 = vld [vmem:[%s4378_s0 + $0x1e0] sm:$0xff] }
  0x1a   :  { %2740 = vmatprep.subr.bf16.mxu0 %v2739_v42  ;;  %v167_v42 = vld [vmem:[%s4378_s0 + $0x1e8] sm:$0xff]  ;;  %v2769_v45 = vpack.c.bf16 %v149_v40, %v148_v39  ;;  %v193_v46 = vld [vmem:[%s4380_s2 + $0x40] sm:$0xff]  ;;  %v168_v51 = vld [vmem:[%s4378_s0 + $0x1f0] sm:$0xff] }
  0x1b   :  { %220 = vperm.xlu0 %3080, %v189_v26   ;;  %v66_v44 = vld [vmem:[%s4379_s1 + $0xc8] sm:$0xff]  ;;  %v150_v49 = vld [vmem:[%s4378_s0 + $0x160] sm:$0xff]  ;;  %v169_v52 = vld [vmem:[%s4378_s0 + $0x1f8] sm:$0xff] }
  0x1c   :  { %v151_v50 = vld [vmem:[%s4378_s0 + $0x168] sm:$0xff]  ;;  %v195_v56 = vld [vmem:[%s4380_s2 + $0x50] sm:$0xff]  ;;  %v77_v57 = vld [vmem:[%s4379_s1 + $0x120] sm:$0xff]  ;;  %v2775_v58 = vpack.c.bf16 %v169_v52, %v168_v51 }
  0x1d   :  { %2742 = vmatpush3.bf16.msra.mxu0 %v2741_v47  ;;  %v72_v47 = vld [vmem:[%s4379_s1 + $0xf8] sm:$0xff]  ;;  %225 = vperm.xlu1 %3081, %v190_v43   ;;  %v2773_v55 = vpack.c.bf16 %v151_v50, %v150_v49  ;;  %v197_v0 = vld [vmem:[%s4380_s2 + $0x60] sm:$0xf]  ;;  %v82_v1 = vld [vmem:[%s4379_s1 + $0x148] sm:$0xff] }
  0x1e   :  { %2744 = vmatprep.subr.bf16.mxu0 %v2743_v48  ;;  %v2771_v48 = vpack.c.bf16 %v167_v42, %v166_v41  ;;  %v196_v2 = vld [vmem:[%s4380_s2 + $0x58] sm:$0xff]  ;;  %v91_v9 = vld [vmem:[%s4379_s1 + $0x190] sm:$0xff]  ;;  %v97_v10 = vld [vmem:[%s4379_s1 + $0x1c0] sm:$0xff] }
  0x1f   :  { %230 = vperm.xlu0 %3080, %v191_v36   ;;  %v92_v7 = vld [vmem:[%s4379_s1 + $0x198] sm:$0xff]  ;;  %v102_v12 = vld [vmem:[%s4379_s1 + $0x1e8] sm:$0xf]  ;;  %v170_v15 = vld [vmem:[%s4378_s0 + $0x200] sm:$0xff] }
  0x20   :  { %v96_v11 = vld [vmem:[%s4379_s1 + $0x1b8] sm:$0xff]  ;;  %v49_v19 = vld [vmem:[%s4379_s1 + $0x40] sm:$0xff]  ;;  %v172_v20 = vld [vmem:[%s4378_s0 + $0x210] sm:$0xff] }
  0x21   :  { %2746 = vmatpush3.bf16.msra.mxu0 %v2745_v53  ;;  %v192_v53 = vld [vmem:[%s4380_s2 + $0x38] sm:$0xff]  ;;  %v174_v26 = vld [vmem:[%s4378_s0 + $0x220] sm:$0xff]  ;;  %v59_v30 = vld [vmem:[%s4379_s1 + $0x90] sm:$0xff] }
  0x22   :  { %2748 = vmatprep.subr.bf16.mxu0 %v2747_v54  ;;  %v71_v54 = vld [vmem:[%s4379_s1 + $0xf0] sm:$0xff]  ;;  %235 = vperm.xlu1 %3081, %v192_v53   ;;  %v173_v21 = vld [vmem:[%s4378_s0 + $0x218] sm:$0xff]  ;;  %v58_v33 = vld [vmem:[%s4379_s1 + $0x88] sm:$0xff] }
  0x23   :  { %240 = vperm.xlu0 %3080, %v193_v46   ;;  %v48_v23 = vld [vmem:[%s4379_s1 + $0x38] sm:$0xff]  ;;  %v176_v31 = vld [vmem:[%s4378_s0 + $0x230] sm:$0xff]  ;;  %v178_v36 = vld [vmem:[%s4378_s0 + $0x240] sm:$0xff] }
  0x24   :  { %372 = vmatmul.mubr.f32.vlgmr.msra.gmra.mrb[0].mxu0 %v41_v59  ;;  %v152_v59 = vld [vmem:[%s4378_s0 + $0x170] sm:$0xff]  ;;  %v177_v32 = vld [vmem:[%s4378_s0 + $0x238] sm:$0xff]  ;;  %v69_v40 = vld [vmem:[%s4379_s1 + $0xe0] sm:$0xff] }
  0x25   :  { %376 = vmatprep.mubr.f32.mxu0 %v47_v61  ;;  %2750 = vmatpush3.bf16.msra.mxu0 %v2749_v60  ;;  %v153_v60 = vld [vmem:[%s4378_s0 + $0x178] sm:$0xff]  ;;  %v194_v61 = vld [vmem:[%s4380_s2 + $0x48] sm:$0xff]  ;;  %v180_v41 = vld [vmem:[%s4378_s0 + $0x250] sm:$0xff] }
  0x26   :  { %2752 = vmatprep.subr.bf16.mxu0 %v2751_v62  ;;  %v76_v62 = vld [vmem:[%s4379_s1 + $0x118] sm:$0xff]  ;;  %v2777_v63 = vpack.c.bf16 %v153_v60, %v152_v59  ;;  %245 = vperm.xlu1 %3081, %v194_v61   ;;  %v182_v46 = vld [vmem:[%s4378_s0 + $0x260] sm:$0xff]  ;;  %v79_v50 = vld [vmem:[%s4379_s1 + $0x130] sm:$0xff] }
  0x27   :  { %250 = vperm.xlu0 %3080, %v195_v56   ;;  %v181_v42 = vld [vmem:[%s4378_s0 + $0x258] sm:$0xff]  ;;  %v78_v51 = vld [vmem:[%s4379_s1 + $0x128] sm:$0xff]  ;;  %v184_v53 = vld [vmem:[%s4378_s0 + $0x270] sm:$0x1] }
  0x28   :  { %377 = vmatmul.mubr.f32.gmra.mrb[2].mxu0 %v46_v3  ;;  %v81_v3 = vld [vmem:[%s4379_s1 + $0x140] sm:$0xff]  ;;  %v68_v43 = vld [vmem:[%s4379_s1 + $0xd8] sm:$0xff]  ;;  %v99_v59 = vld [vmem:[%s4379_s1 + $0x1d0] sm:$0xff] }
  0x29   :  { %381 = vmatprep.mubr.f32.mxu0 %v52_v5  ;;  %2754 = vmatpush3.bf16.msra.mxu0 %v2753_v4  ;;  %v87_v4 = vld [vmem:[%s4379_s1 + $0x170] sm:$0xff]  ;;  %v711_v5 = vld [vmem:[%s4381_s4] sm:$0xff]  ;;  %v84_v52 = vld [vmem:[%s4379_s1 + $0x158] sm:$0xff] }
  0x2a   :  { %2756 = vmatprep.subr.bf16.mxu0 %v2755_v6  ;;  %255 = vperm.xlu1 %3081, %v196_v2   ;;  %v86_v6 = vld [vmem:[%s4379_s1 + $0x168] sm:$0xff]  ;;  %v88_v56 = vld [vmem:[%s4379_s1 + $0x178] sm:$0xff] }
  0x2b   :  { %260 = vperm.xlu0 %3080, %v197_v0   ;;  %v98_v60 = vld [vmem:[%s4379_s1 + $0x1c8] sm:$0xff]  ;;  %v104_v61 = vld [vmem:[%s4379_s1 + $0x1f8] sm:$0xf] }
  0x2c   :  { %382 = vmatmul.mubr.f32.gmra.mrb[4].mxu0 %v51_v13  ;;  %v101_v13 = vld [vmem:[%s4379_s1 + $0x1e0] sm:$0xf]  ;;  %v50_v0 = vld [vmem:[%s4379_s1 + $0x48] sm:$0xff]  ;;  %v60_v2 = vld [vmem:[%s4379_s1 + $0x98] sm:$0xff] }
  0x2d   :  { %386 = vmatprep.mubr.f32.mxu0 %v57_v16  ;;  %2758 = vmatpush3.bf16.msra.mxu0 %v2757_v14  ;;  %v44_v14 = vld [vmem:[%s4379_s1 + $0x18] sm:$0xff]  ;;  %v171_v16 = vld [vmem:[%s4378_s0 + $0x208] sm:$0xff] }
  0x2e   :  { %2760 = vmatprep.subr.bf16.mxu0 %v2759_v17  ;;  %714 = vperm.xlu1 %3081, %v711_v5   ;;  %v43_v17 = vld [vmem:[%s4379_s1 + $0x10] sm:$0xff]  ;;  %v2780_v18 = vpack.c.bf16 %v171_v16, %v170_v15 }
  0x2f   :  { %v75_v5 = vld [vmem:[%s4379_s1 + $0x110] sm:$0xff] }
  0x30   :  { %387 = vmatmul.mubr.f32.gmra.mrb[6].mxu0 %v56_v24  ;;  %v2783_v24 = vpack.c.bf16 %v173_v21, %v172_v20 }
  0x31   :  { %391 = vmatprep.mubr.f32.mxu0 %v62_v27  ;;  %2762 = vmatpush3.bf16.msra.mxu0 %v2761_v25  ;;  %v54_v25 = vld [vmem:[%s4379_s1 + $0x68] sm:$0xff] }
  0x32   :  { %2764 = vmatprep.subr.bf16.mxu0 %v2763_v28  ;;  %v175_v27 = vld [vmem:[%s4378_s0 + $0x228] sm:$0xff]  ;;  %v53_v28 = vld [vmem:[%s4379_s1 + $0x60] sm:$0xff] }
  0x33   :  { %v2786_v29 = vpack.c.bf16 %v175_v27, %v174_v26 }
  0x34   :  { %392 = vmatmul.mubr.f32.gmra.mrb[8].mxu0 %v61_v34  ;;  %v2789_v34 = vpack.c.bf16 %v177_v32, %v176_v31 }
  0x35   :  { %396 = vmatprep.mubr.f32.mxu0 %v67_v37  ;;  %2766 = vmatpush3.bf16.msra.mxu0 %v2765_v35  ;;  %v64_v35 = vld [vmem:[%s4379_s1 + $0xb8] sm:$0xff]  ;;  %v179_v37 = vld [vmem:[%s4378_s0 + $0x248] sm:$0xff] }
  0x36   :  { %2768 = vmatprep.subr.bf16.mxu0 %v2767_v38  ;;  %v63_v38 = vld [vmem:[%s4379_s1 + $0xb0] sm:$0xff]  ;;  %v2792_v39 = vpack.c.bf16 %v179_v37, %v178_v36 }
  0x38   :  { %397 = vmatmul.mubr.f32.gmra.mrb[10].mxu0 %v66_v44  ;;  %v2795_v44 = vpack.c.bf16 %v181_v42, %v180_v41  ;;  %v798_v41 = vld [vmem:[%s4382_s5 + $0x8] sm:$0xff]  ;;  %v799_v42 = vld [vmem:[%s4382_s5 + $0x10] sm:$0xff] }
  0x39   :  { %401 = vmatprep.mubr.f32.mxu0 %v72_v47  ;;  %2770 = vmatpush3.bf16.msra.mxu0 %v2769_v45  ;;  %v74_v45 = vld [vmem:[%s4379_s1 + $0x108] sm:$0xff] }
  0x3a   :  { %2772 = vmatprep.subr.bf16.mxu0 %v2771_v48  ;;  %v183_v47 = vld [vmem:[%s4378_s0 + $0x268] sm:$0xff]  ;;  %v73_v48 = vld [vmem:[%s4379_s1 + $0x100] sm:$0xff] }
  0x3b   :  { %v2798_v49 = vpack.c.bf16 %v183_v47, %v182_v46 }
  0x3c   :  { %402 = vmatmul.mubr.f32.gmra.mrb[12].mxu0 %v71_v54  ;;  %v83_v54 = vld [vmem:[%s4379_s1 + $0x150] sm:$0xff] }
  0x3d   :  { %406 = vmatprep.mubr.f32.mxu0 %v77_v57  ;;  %2774 = vmatpush3.bf16.msra.mxu0 %v2773_v55  ;;  %v89_v55 = vld [vmem:[%s4379_s1 + $0x180] sm:$0xff]  ;;  %v94_v57 = vld [vmem:[%s4379_s1 + $0x1a8] sm:$0xff] }
  0x3e   :  { %2776 = vmatprep.subr.bf16.mxu0 %v2775_v58  ;;  %v93_v58 = vld [vmem:[%s4379_s1 + $0x1a0] sm:$0xff] }
  0x40   :  { %407 = vmatmul.mubr.f32.gmra.mrb[14].mxu0 %v76_v62  ;;  %v103_v62 = vld [vmem:[%s4379_s1 + $0x1f0] sm:$0xf] }
  0x41   :  { %411 = vmatprep.mubr.f32.mxu0 %v82_v1  ;;  %2778 = vmatpush3.bf16.msra.mxu0 %v2777_v63  ;;  %v45_v63 = vld [vmem:[%s4379_s1 + $0x20] sm:$0xff]  ;;  %v55_v1 = vld [vmem:[%s4379_s1 + $0x70] sm:$0xff] }
  0x42   :  { %2779 = vmatprep.subr.bf16.mxu0 %v3083_v8 }
  0x44   :  { %412 = vmatmul.mubr.f32.gmra.mrb[16].mxu0 %v81_v3  ;;  %v65_v3 = vld [vmem:[%s4379_s1 + $0xc0] sm:$0xff] }
  0x45   :  { %416 = vmatprep.mubr.f32.mxu0 %v87_v4  ;;  %v70_v4 = vld [vmem:[%s4379_s1 + $0xe8] sm:$0xff] }
  0x48   :  { %417 = vmatmul.mubr.f32.gmra.mrb[18].mxu0 %v86_v6  ;;  %v80_v6 = vld [vmem:[%s4379_s1 + $0x138] sm:$0xff] }
  0x49   :  { %421 = vmatprep.mubr.f32.mxu0 %v92_v7  ;;  %v85_v7 = vld [vmem:[%s4379_s1 + $0x160] sm:$0xff] }
  0x4c   :  { %422 = vmatmul.mubr.f32.gmra.mrb[20].mxu0 %v91_v9  ;;  %v90_v9 = vld [vmem:[%s4379_s1 + $0x188] sm:$0xff] }
  0x4d   :  { %426 = vmatprep.mubr.f32.mxu0 %v97_v10  ;;  %v95_v10 = vld [vmem:[%s4379_s1 + $0x1b0] sm:$0xff] }
  0x50   :  { %427 = vmatmul.mubr.f32.gmra.mrb[22].mxu0 %v96_v11  ;;  %v100_v11 = vld [vmem:[%s4379_s1 + $0x1d8] sm:$0xff] }
  0x51   :  { %431 = vmatprep.mubr.f32.mxu0 %v102_v12  ;;  %v105_v12 = vld [vmem:[%s4379_s1 + $0x200] sm:$0xf] }
  0x54   :  { %432 = vmatmul.mubr.f32.gmra.mrb[24].mxu0 %v101_v13 }
  0x55   :  { %501 = vmatprep.mubr.f32.mxu0 %v44_v14 }
  0x58   :  { %502 = vmatmul.mubr.f32.vlgmr.msra.gmra.mrb[26].mxu0 %v43_v17 }
  0x59   :  { %506 = vmatprep.mubr.f32.mxu0 %v49_v19  ;;  %2781 = vmatpush3.bf16.msra.mxu0 %v2780_v18 }
  0x5a   :  { %2782 = vmatprep.subr.bf16.mxu0 %v3083_v8 }
  0x5c   :  { %507 = vmatmul.mubr.f32.gmra.mrb[28].mxu0 %v48_v23 }
  0x5d   :  { %511 = vmatprep.mubr.f32.mxu0 %v54_v25  ;;  %2784 = vmatpush3.bf16.msra.mxu0 %v2783_v24 }
  0x5e   :  { %2785 = vmatprep.subr.bf16.mxu0 %v3083_v8 }
  0x60   :  { %512 = vmatmul.mubr.f32.gmra.mrb[30].mxu0 %v53_v28 }
  0x61   :  { %516 = vmatprep.mubr.f32.mxu0 %v59_v30  ;;  %2787 = vmatpush3.bf16.msra.mxu0 %v2786_v29 }
  0x62   :  { %2788 = vmatprep.subr.bf16.mxu0 %v3083_v8 }
  0x64   :  { %517 = vmatmul.mubr.f32.gmra.mrb[32].mxu0 %v58_v33 }
  0x65   :  { %521 = vmatprep.mubr.f32.mxu0 %v64_v35  ;;  %2790 = vmatpush3.bf16.msra.mxu0 %v2789_v34 }
  0x66   :  { %2791 = vmatprep.subr.bf16.mxu0 %v3083_v8 }
  0x68   :  { %522 = vmatmul.mubr.f32.gmra.mrb[34].mxu0 %v63_v38 }
  0x69   :  { %526 = vmatprep.mubr.f32.mxu0 %v69_v40  ;;  %2793 = vmatpush3.bf16.msra.mxu0 %v2792_v39  ;;  %v797_v40 = vld [vmem:[%s4382_s5] sm:$0xff] }
  0x6a   :  { %2794 = vmatprep.subr.bf16.mxu0 %v3083_v8 }
  0x6c   :  { %527 = vmatmul.mubr.f32.gmra.mrb[36].mxu0 %v68_v43 }
  0x6d   :  { %531 = vmatprep.mubr.f32.mxu0 %v74_v45  ;;  %2796 = vmatpush3.bf16.msra.mxu0 %v2795_v44  ;;  %v2819_v44 = vpack.c.bf16 %v798_v41, %v797_v40  ;;  %v800_v45 = vld [vmem:[%s4382_s5 + $0x18] sm:$0xff] }
  0x6e   :  { %2797 = vmatprep.subr.bf16.mxu0 %v3083_v8  ;;  %v2822_v47 = vpack.c.bf16 %v800_v45, %v799_v42 }
  0x6f   :  { %2820 = vmatpush3.bf16.msra.mxu1 %v2819_v44 }
  0x70   :  { %532 = vmatmul.mubr.f32.gmra.mrb[38].mxu0 %v73_v48  ;;  %2821 = vmatprep.subr.bf16.mxu1 %v3083_v8 }
  0x71   :  { %536 = vmatprep.mubr.f32.mxu0 %v79_v50  ;;  %2799 = vmatpush3.bf16.msra.mxu0 %v2798_v49  ;;  %v801_v49 = vld [vmem:[%s4382_s5 + $0x20] sm:$0xff]  ;;  %v802_v50 = vld [vmem:[%s4382_s5 + $0x28] sm:$0xff] }
  0x72   :  { %2288 = vmatprep.subr.mxu0 %v3085_v22 }
  0x73   :  { %2823 = vmatpush3.bf16.msra.mxu1 %v2822_v47 }
  0x74   :  { %537 = vmatmul.mubr.f32.gmra.mrb[40].mxu0 %v78_v51  ;;  %2824 = vmatprep.subr.bf16.mxu1 %v3083_v8 }
  0x75   :  { %541 = vmatprep.mubr.f32.mxu0 %v84_v52  ;;  %2289 = vmatpush3.msk.msra.mxu0 %vm303_vm1, %v184_v53  ;;  %v2825_v53 = vpack.c.bf16 %v802_v50, %v801_v49 }
  0x76   :  { %2800 = vmatprep.subr.bf16.mxu0 %v3083_v8 }
  0x77   :  { %2826 = vmatpush3.bf16.msra.mxu1 %v2825_v53 }
  0x78   :  { %542 = vmatmul.mubr.f32.gmra.mrb[42].mxu0 %v83_v54  ;;  %2827 = vmatprep.subr.bf16.mxu1 %v3083_v8 }
  0x79   :  { %546 = vmatprep.mubr.f32.mxu0 %v89_v55  ;;  %v803_v55 = vld [vmem:[%s4382_s5 + $0x30] sm:$0xff] }
  0x7c   :  { %547 = vmatmul.mubr.f32.gmra.mrb[44].mxu0 %v88_v56  ;;  %v804_v56 = vld [vmem:[%s4382_s5 + $0x38] sm:$0xff] }
  0x7d   :  { %551 = vmatprep.mubr.f32.mxu0 %v94_v57 }
  0x80   :  { %552 = vmatmul.mubr.f32.gmra.mrb[46].mxu0 %v93_v58 }
  0x81   :  { %556 = vmatprep.mubr.f32.mxu0 %v99_v59  ;;  %v2828_v59 = vpack.c.bf16 %v804_v56, %v803_v55 }
  0x83   :  { %2829 = vmatpush3.bf16.msra.mxu1 %v2828_v59 }
  0x84   :  { %557 = vmatmul.mubr.f32.gmra.mrb[48].mxu0 %v98_v60  ;;  %2830 = vmatprep.subr.bf16.mxu1 %v3083_v8 }
  0x85   :  { %561 = vmatprep.mubr.f32.mxu0 %v104_v61  ;;  %v805_v61 = vld [vmem:[%s4382_s5 + $0x40] sm:$0xff] }
  0x88   :  { %562 = vmatmul.mubr.f32.gmra.mrb[50].mxu0 %v103_v62  ;;  %v806_v62 = vld [vmem:[%s4382_s5 + $0x48] sm:$0xff] }
  0x89   :  { %2290 = vmatprep.mubr.msk.f32.mxu0 %vm3084_vm0, %v3085_v22 }
  0x8c   :  { %2291 = vmatmul.mubr.msk.f32.vlgmr.msra.gmra.mrb[52].mxu0 %vm263_vm2, %v45_v63 }
  0x8d   :  { %2293 = vmatprep.mubr.msk.f32.mxu0 %vm3084_vm0, %v3085_v22 }
  0x90   :  { %2294 = vmatmul.mubr.msk.f32.gmra.mrb[54].mxu0 %vm263_vm2, %v50_v0 }
  0x91   :  { %2296 = vmatprep.mubr.msk.f32.mxu0 %vm3084_vm0, %v3085_v22 }
  0x94   :  { %2297 = vmatmul.mubr.msk.f32.gmra.mrb[56].mxu0 %vm263_vm2, %v55_v1  ;;  %v2831_v1 = vpack.c.bf16 %v806_v62, %v805_v61 }
  0x95   :  { %2299 = vmatprep.mubr.msk.f32.mxu0 %vm3084_vm0, %v3085_v22 }
  0x96   :  { %2832 = vmatpush3.bf16.msra.mxu1 %v2831_v1 }
  0x97   :  { %2833 = vmatprep.subr.bf16.mxu1 %v3083_v8 }
  0x98   :  { %2300 = vmatmul.mubr.msk.f32.gmra.mrb[58].mxu0 %vm263_vm2, %v60_v2  ;;  %v201_v2 = vpop.permute.xlu0 %200 }
  0x99   :  { %2302 = vmatprep.mubr.msk.f32.mxu0 %vm3084_vm0, %v3085_v22 }
  0x9c   :  { %2303 = vmatmul.mubr.msk.f32.gmra.mrb[60].mxu0 %vm263_vm2, %v65_v3 }
  0x9d   :  { %2305 = vmatprep.mubr.msk.f32.mxu0 %vm3084_vm0, %v3085_v22 }
  0xa0   :  { %2306 = vmatmul.mubr.msk.f32.gmra.mrb[62].mxu0 %vm263_vm2, %v70_v4  ;;  %v807_v4 = vld [vmem:[%s4382_s5 + $0x50] sm:$0xff] }
  0xa1   :  { %2308 = vmatprep.mubr.msk.f32.mxu0 %vm3084_vm0, %v3085_v22 }
  0xa4   :  { %2309 = vmatmul.mubr.msk.f32.gmra.mrb[64].mxu0 %vm263_vm2, %v75_v5  ;;  %v808_v5 = vld [vmem:[%s4382_s5 + $0x58] sm:$0xff] }
  0xa5   :  { %2311 = vmatprep.mubr.msk.f32.mxu0 %vm3084_vm0, %v3085_v22 }
  0xa8   :  { %2312 = vmatmul.mubr.msk.f32.gmra.mrb[66].mxu0 %vm263_vm2, %v80_v6 }
  0xa9   :  { %2314 = vmatprep.mubr.msk.f32.mxu0 %vm3084_vm0, %v3085_v22 }
  0xac   :  { %2315 = vmatmul.mubr.msk.f32.gmra.mrb[68].mxu0 %vm263_vm2, %v85_v7 }
  0xad   :  { %2317 = vmatprep.mubr.msk.f32.mxu0 %vm3084_vm0, %v3085_v22 }
  0xb0   :  { %2318 = vmatmul.mubr.msk.f32.gmra.mrb[70].mxu0 %vm263_vm2, %v90_v9  ;;  %v2834_v9 = vpack.c.bf16 %v808_v5, %v807_v4 }
  0xb1   :  { %2320 = vmatprep.mubr.msk.f32.mxu0 %vm3084_vm0, %v3085_v22 }
  0xb2   :  { %2835 = vmatpush3.bf16.msra.mxu1 %v2834_v9 }
  0xb3   :  { %2836 = vmatprep.subr.bf16.mxu1 %v3083_v8 }
  0xb4   :  { %2321 = vmatmul.mubr.msk.f32.gmra.mrb[72].mxu0 %vm263_vm2, %v95_v10 }
  0xb5   :  { %2323 = vmatprep.mubr.msk.f32.mxu0 %vm3084_vm0, %v3085_v22 }
  0xb8   :  { %2324 = vmatmul.mubr.msk.f32.gmra.mrb[74].mxu0 %vm263_vm2, %v100_v11  ;;  %v809_v11 = vld [vmem:[%s4382_s5 + $0x60] sm:$0xff] }
  0xb9   :  { %2326 = vmatprep.mubr.msk.f32.mxu0 %vm3084_vm0, %v3085_v22 }
  0xbc   :  { %2327 = vmatmul.mubr.msk.f32.gmra.mrb[76].mxu0 %vm263_vm2, %v105_v12  ;;  %v810_v12 = vld [vmem:[%s4382_s5 + $0x68] sm:$0xff] }
  0xbd   :  { %2355 = vmatprep.mubr.msk.f32.mxu0 %vm3084_vm0, %v3085_v22 }
  0xf7   :  { %v1935_v13 = vpop.f32.mrb[0].mxu0 }
  0xf8   :  { %v1936_v14 = vpop.f32.mrb[1].mxu0 }
  0xf9   :  { %v3678_v15 = vadd.f32 %v1936_v14, %v1935_v13 }
  0xfb   :  { %v1938_v16 = vpop.f32.mrb[2].mxu0  ;;  %v374_v13 = vadd.f32 %v3678_v15, %v201_v2 }
  0xfc   :  { %v1939_v17 = vpop.f32.mrb[3].mxu0 }
  0xfd   :  { %v3680_v18 = vadd.f32 %v1939_v17, %v1938_v16  ;;  %v206_v16 = vpop.permute.xlu0 %205 }
  0xff   :  { %v1941_v19 = vpop.f32.mrb[4].mxu0 }
 0x100   :  { %v1942_v20 = vpop.f32.mrb[5].mxu0 }
 0x101   :  { %v3682_v21 = vadd.f32 %v1942_v20, %v1941_v19  ;;  %v2837_v20 = vpack.c.bf16 %v810_v12, %v809_v11 }
 0x103   :  { %v1944_v23 = vpop.f32.mrb[6].mxu0  ;;  %2838 = vmatpush3.bf16.msra.mxu1 %v2837_v20 }
 0x104   :  { %v1945_v24 = vpop.f32.mrb[7].mxu0  ;;  %2839 = vmatprep.subr.bf16.mxu1 %v3083_v8 }
 0x105   :  { %v3684_v25 = vadd.f32 %v1945_v24, %v1944_v23  ;;  %v211_v23 = vpop.permute.xlu1 %210 }
 0x106   :  { %v384_v15 = vadd.f32 %v3682_v21, %v211_v23 }
 0x107   :  { %v1947_v26 = vpop.f32.mrb[8].mxu0 }
 0x108   :  { %v1948_v27 = vpop.f32.mrb[9].mxu0 }
 0x109   :  { %v3686_v28 = vadd.f32 %v1948_v27, %v1947_v26  ;;  %v379_v26 = vadd.f32 %v3680_v18, %v206_v16  ;;  %v221_v18 = vpop.permute.xlu0 %220 }
 0x10b   :  { %v1950_v29 = vpop.f32.mrb[10].mxu0 }
 0x10c   :  { %v1951_v30 = vpop.f32.mrb[11].mxu0 }
 0x10d   :  { %v3688_v31 = vadd.f32 %v1951_v30, %v1950_v29 }
 0x10f   :  { %v1953_v32 = vpop.f32.mrb[12].mxu0 }
 0x110   :  { %v1954_v33 = vpop.f32.mrb[13].mxu0 }
 0x111   :  { %v3690_v34 = vadd.f32 %v1954_v33, %v1953_v32 }
 0x113   :  { %v1956_v35 = vpop.f32.mrb[14].mxu0 }
 0x114   :  { %v1957_v36 = vpop.f32.mrb[15].mxu0 }
 0x115   :  { %v3692_v37 = vadd.f32 %v1957_v36, %v1956_v35  ;;  %v216_v35 = vpop.permute.xlu1 %215 }
 0x116   :  { %v389_v40 = vadd.f32 %v3684_v25, %v216_v35 }
 0x117   :  { %v1959_v38 = vpop.f32.mrb[16].mxu0 }
 0x118   :  { %v1960_v39 = vpop.f32.mrb[17].mxu0 }
 0x119   :  { %v3703_v43 = vadd.f32 %v1960_v39, %v1959_v38 }
 0x11b   :  { %v1962_v46 = vpop.f32.mrb[18].mxu0 }
 0x11c   :  { %v1963_v48 = vpop.f32.mrb[19].mxu0 }
 0x11d   :  { %v3715_v51 = vadd.f32 %v1963_v48, %v1962_v46  ;;  %v394_v46 = vadd.f32 %v3686_v28, %v221_v18  ;;  %v226_v48 = vpop.permute.xlu1 %225 }
 0x11f   :  { %v1965_v52 = vpop.f32.mrb[20].mxu0 }
 0x120   :  { %v1966_v54 = vpop.f32.mrb[21].mxu0 }
 0x121   :  { %v3724_v57 = vadd.f32 %v1966_v54, %v1965_v52  ;;  %v399_v52 = vadd.f32 %v3688_v31, %v226_v48  ;;  %v231_v54 = vpop.permute.xlu0 %230 }
 0x123   :  { %v1968_v58 = vpop.f32.mrb[22].mxu0 }
 0x124   :  { %v1969_v60 = vpop.f32.mrb[23].mxu0 }
 0x125   :  { %v3733_v63 = vadd.f32 %v1969_v60, %v1968_v58  ;;  %v404_v58 = vadd.f32 %v3690_v34, %v231_v54  ;;  %v236_v60 = vpop.permute.xlu1 %235  ;;  %v241_v2 = vpop.permute.xlu0 %240 }
 0x126   :  { %v414_v5 = vadd.f32 %v3703_v43, %v241_v2 }
 0x127   :  { %v1971_v0 = vpop.f32.mrb[24].mxu0 }
 0x128   :  { %v1972_v3 = vpop.f32.mrb[25].mxu0 }
 0x129   :  { %v3742_v6 = vadd.f32 %v1972_v3, %v1971_v0  ;;  %v409_v0 = vadd.f32 %v3692_v37, %v236_v60  ;;  %v246_v9 = vpop.permute.xlu1 %245 }
 0x12a   :  { %v419_v12 = vadd.f32 %v3715_v51, %v246_v9 }
 0x12b   :  { %v2006_v7 = vpop.f32.mrb[26].mxu0 }
 0x12c   :  { %v2007_v10 = vpop.f32.mrb[27].mxu0 }
 0x12d   :  { %v2008_v14 = vadd.f32 %v2007_v10, %v2006_v7 }
 0x12f   :  { %v2009_v17 = vpop.f32.mrb[28].mxu0  ;;  %v3752_v19 = vadd.f32 %v2008_v14, %v374_v13  ;;  %v251_v14 = vpop.permute.xlu0 %250 }
 0x130   :  { %v2010_v24 = vpop.f32.mrb[29].mxu0  ;;  %v424_v20 = vadd.f32 %v3724_v57, %v251_v14 }
 0x131   :  { %v2011_v27 = vadd.f32 %v2010_v24, %v2009_v17  ;;  %v256_v24 = vpop.permute.xlu1 %255 }
 0x133   :  { %v2012_v29 = vpop.f32.mrb[30].mxu0  ;;  %v3756_v30 = vadd.f32 %v2011_v27, %v379_v26 }
 0x134   :  { %v2013_v32 = vpop.f32.mrb[31].mxu0 }
 0x135   :  { %v2014_v33 = vadd.f32 %v2013_v32, %v2012_v29  ;;  %v429_v29 = vadd.f32 %v3733_v63, %v256_v24 }
 0x137   :  { %v2015_v36 = vpop.f32.mrb[32].mxu0  ;;  %v3760_v38 = vadd.f32 %v2014_v33, %v384_v15  ;;  %v261_v15 = vpop.permute.xlu0 %260 }
 0x138   :  { %v2016_v39 = vpop.f32.mrb[33].mxu0 }
 0x139   :  { %v2017_v41 = vadd.f32 %v2016_v39, %v2015_v36  ;;  %v434_v36 = vadd.f32 %v3742_v6, %v261_v15 }
 0x13b   :  { %v2018_v42 = vpop.f32.mrb[34].mxu0  ;;  %v3763_v44 = vadd.f32 %v2017_v41, %v389_v40 }
 0x13c   :  { %v2019_v45 = vpop.f32.mrb[35].mxu0 }
 0x13d   :  { %v2020_v47 = vadd.f32 %v2019_v45, %v2018_v42 }
 0x13f   :  { %v2021_v49 = vpop.f32.mrb[36].mxu0  ;;  %v3766_v21 = vadd.f32 %v2020_v47, %v394_v46 }
 0x140   :  { %v2022_v50 = vpop.f32.mrb[37].mxu0 }
 0x141   :  { %v2023_v53 = vadd.f32 %v2022_v50, %v2021_v49 }
 0x143   :  { %v2024_v55 = vpop.f32.mrb[38].mxu0  ;;  %v3769_v25 = vadd.f32 %v2023_v53, %v399_v52 }
 0x144   :  { %v2025_v56 = vpop.f32.mrb[39].mxu0 }
 0x145   :  { %v2026_v59 = vadd.f32 %v2025_v56, %v2024_v55 }
 0x147   :  { %v2027_v61 = vpop.f32.mrb[40].mxu0  ;;  %v3772_v28 = vadd.f32 %v2026_v59, %v404_v58 }
 0x148   :  { %v2028_v62 = vpop.f32.mrb[41].mxu0 }
 0x149   :  { %v2029_v1 = vadd.f32 %v2028_v62, %v2027_v61 }
 0x14b   :  { %v2030_v3 = vpop.f32.mrb[42].mxu0  ;;  %v3775_v31 = vadd.f32 %v2029_v1, %v409_v0 }
 0x14c   :  { %v2031_v4 = vpop.f32.mrb[43].mxu0 }
 0x14d   :  { %v2032_v7 = vadd.f32 %v2031_v4, %v2030_v3 }
 0x14f   :  { %v2033_v10 = vpop.f32.mrb[44].mxu0  ;;  %v3778_v34 = vadd.f32 %v2032_v7, %v414_v5 }
 0x150   :  { %v2034_v11 = vpop.f32.mrb[45].mxu0 }
 0x151   :  { %v2035_v13 = vadd.f32 %v2034_v11, %v2033_v10 }
 0x153   :  { %v2036_v16 = vpop.f32.mrb[46].mxu0  ;;  %v3781_v37 = vadd.f32 %v2035_v13, %v419_v12 }
 0x154   :  { %v2037_v17 = vpop.f32.mrb[47].mxu0 }
 0x155   :  { %v2038_v23 = vadd.f32 %v2037_v17, %v2036_v16 }
 0x157   :  { %v2039_v26 = vpop.f32.mrb[48].mxu0  ;;  %v3784_v43 = vadd.f32 %v2038_v23, %v424_v20 }
 0x158   :  { %v2040_v27 = vpop.f32.mrb[49].mxu0 }
 0x159   :  { %v2041_v32 = vadd.f32 %v2040_v27, %v2039_v26 }
 0x15b   :  { %v2042_v33 = vpop.f32.mrb[50].mxu0  ;;  %v3787_v51 = vadd.f32 %v2041_v32, %v429_v29 }
 0x15c   :  { %v2043_v35 = vpop.f32.mrb[51].mxu0 }
 0x15d   :  { %v2044_v39 = vadd.f32 %v2043_v35, %v2042_v33 }
 0x15f   :  { %v633_v40 = vpop.f32.mrb[52].mxu0  ;;  %v3790_v41 = vadd.f32 %v2044_v39, %v434_v36  ;;  %v710_v36 = vld [vmem:[%s4383_s3] sm:$0xff]  ;;  %v812_v39 = vld [vmem:[%s4382_s5 + $0x78] sm:$0xff] }
 0x160   :  { %v634_v57 = vadd.f32 %v633_v40, %v3752_v19  ;;  %v2292_v18 = vpop.f32.mrb[53].mxu0 }
 0x161   :  { %v715_v18 = vpop.permute.xlu1 %714 }
 0x162   :  { %v697_v63 = vmax.f32 %v634_v57, 0.0  ;;  %v1791_v57 = vld [vmem:[%s4382_s5 + $0x88] sm:$0xff] }
 0x163   :  { %v638_v42 = vpop.f32.mrb[54].mxu0 }
 0x164   :  { %v639_v45 = vadd.f32 %v638_v42, %v3756_v30  ;;  %v2295_v46 = vpop.f32.mrb[55].mxu0 }
 0x166   :  { %v698_v47 = vmax.f32 %v639_v45, 0.0 }
 0x167   :  { %v643_v48 = vpop.f32.mrb[56].mxu0 }
 0x168   :  { %v2801_v49 = vpack.c.bf16 %v698_v47, %v697_v63  ;;  %v644_v50 = vadd.f32 %v643_v48, %v3760_v38  ;;  %v2298_v52 = vpop.f32.mrb[57].mxu0  ;;  %v1792_v48 = vld [vmem:[%s4382_s5 + $0x90] sm:$0xff] }
 0x169   :  { %v1794_v52 = vld [vmem:[%s4382_s5 + $0xa0] sm:$0xff] }
 0x16a   :  { %2802 = vmatpush3.bf16.msra.mxu0 %v2801_v49  ;;  %v699_v19 = vmax.f32 %v644_v50, 0.0  ;;  %v1793_v49 = vld [vmem:[%s4382_s5 + $0x98] sm:$0xff] }
 0x16b   :  { %v648_v6 = vpop.f32.mrb[58].mxu0  ;;  %2803 = vmatprep.subr.bf16.mxu0 %v3083_v8  ;;  %v2846_v50 = vpack.c.bf16 %v1793_v49, %v1792_v48  ;;  %v1832_v49 = vld [vmem:[%s4382_s5 + $0x1d0] sm:$0xff] }
 0x16c   :  { %v649_v53 = vadd.f32 %v648_v6, %v3763_v44  ;;  %v2301_v54 = vpop.f32.mrb[59].mxu0  ;;  %v1795_v6 = vld [vmem:[%s4382_s5 + $0xa8] sm:$0xff] }
 0x16d   :  { %v1796_v54 = vld [vmem:[%s4382_s5 + $0xb0] sm:$0xff] }
 0x16e   :  { %v700_v55 = vmax.f32 %v649_v53, 0.0  ;;  %v2849_v53 = vpack.c.bf16 %v1795_v6, %v1794_v52  ;;  %v1834_v6 = vld [vmem:[%s4382_s5 + $0x1e0] sm:$0xff] }
 0x16f   :  { %v653_v56 = vpop.f32.mrb[60].mxu0 }
 0x170   :  { %v2804_v58 = vpack.c.bf16 %v700_v55, %v699_v19  ;;  %v654_v30 = vadd.f32 %v653_v56, %v3766_v21  ;;  %v2304_v59 = vpop.f32.mrb[61].mxu0  ;;  %v1797_v19 = vld [vmem:[%s4382_s5 + $0xb8] sm:$0xff]  ;;  %v1798_v56 = vld [vmem:[%s4382_s5 + $0xc0] sm:$0xff] }
 0x171   :  { %v2852_v55 = vpack.c.bf16 %v1797_v19, %v1796_v54  ;;  %v1800_v59 = vld [vmem:[%s4382_s5 + $0xd0] sm:$0xff] }
 0x172   :  { %2805 = vmatpush3.bf16.msra.mxu0 %v2804_v58  ;;  %v701_v62 = vmax.f32 %v654_v30, 0.0  ;;  %v1799_v58 = vld [vmem:[%s4382_s5 + $0xc8] sm:$0xff]  ;;  %v1836_v19 = vld [vmem:[%s4382_s5 + $0x1f0] sm:$0xff] }
 0x173   :  { %v658_v60 = vpop.f32.mrb[62].mxu0  ;;  %2806 = vmatprep.subr.bf16.mxu0 %v3083_v8  ;;  %v2855_v30 = vpack.c.bf16 %v1799_v58, %v1798_v56  ;;  %v1838_v58 = vld [vmem:[%s4382_s5 + $0x200] sm:$0xff] }
 0x174   :  { %v659_v38 = vadd.f32 %v658_v60, %v3769_v25  ;;  %v2307_v61 = vpop.f32.mrb[63].mxu0  ;;  %v1801_v60 = vld [vmem:[%s4382_s5 + $0xd8] sm:$0xff] }
 0x175   :  { %v1802_v61 = vld [vmem:[%s4382_s5 + $0xe0] sm:$0xff] }
 0x176   :  { %v702_v0 = vmax.f32 %v659_v38, 0.0  ;;  %v2858_v38 = vpack.c.bf16 %v1801_v60, %v1800_v59 }
 0x177   :  { %v663_v1 = vpop.f32.mrb[64].mxu0 }
 0x178   :  { %v2807_v2 = vpack.c.bf16 %v702_v0, %v701_v62  ;;  %v664_v44 = vadd.f32 %v663_v1, %v3772_v28  ;;  %v2310_v3 = vpop.f32.mrb[65].mxu0  ;;  %v1803_v62 = vld [vmem:[%s4382_s5 + $0xe8] sm:$0xff]  ;;  %v1804_v1 = vld [vmem:[%s4382_s5 + $0xf0] sm:$0xff] }
 0x179   :  { %v2861_v0 = vpack.c.bf16 %v1803_v62, %v1802_v61  ;;  %v1806_v3 = vld [vmem:[%s4382_s5 + $0x100] sm:$0xff]  ;;  %v1841_v61 = vld [vmem:[%s4382_s5 + $0x218] sm:$0xff] }
 0x17a   :  { %2808 = vmatpush3.bf16.msra.mxu0 %v2807_v2  ;;  %v703_v7 = vmax.f32 %v664_v44, 0.0  ;;  %v1805_v2 = vld [vmem:[%s4382_s5 + $0xf8] sm:$0xff] }
 0x17b   :  { %v668_v4 = vpop.f32.mrb[66].mxu0  ;;  %2809 = vmatprep.subr.bf16.mxu0 %v3083_v8  ;;  %v2864_v44 = vpack.c.bf16 %v1805_v2, %v1804_v1  ;;  %v1517_v1 = vld [vmem:[%s4384_s7 + $0x8] sm:$0xff]  ;;  %v1518_v2 = vld [vmem:[%s4384_s7 + $0x10] sm:$0xff] }
 0x17c   :  { %v669_v21 = vadd.f32 %v668_v4, %v3775_v31  ;;  %v2313_v5 = vpop.f32.mrb[67].mxu0  ;;  %v1807_v4 = vld [vmem:[%s4382_s5 + $0x108] sm:$0xff] }
 0x17e   :  { %v704_v9 = vmax.f32 %v669_v21, 0.0  ;;  %v2867_v21 = vpack.c.bf16 %v1807_v4, %v1806_v3  ;;  %v1843_v3 = vld [vmem:[%s4382_s5 + $0x228] sm:$0xff] }
 0x17f   :  { %v673_v10 = vpop.f32.mrb[68].mxu0 }
 0x180   :  { %v2810_v11 = vpack.c.bf16 %v704_v9, %v703_v7  ;;  %v674_v25 = vadd.f32 %v673_v10, %v3778_v34  ;;  %v2316_v12 = vpop.f32.mrb[69].mxu0  ;;  %v1808_v7 = vld [vmem:[%s4382_s5 + $0x110] sm:$0xff]  ;;  %v1809_v9 = vld [vmem:[%s4382_s5 + $0x118] sm:$0xff] }
 0x181   :  { %v2870_v10 = vpack.c.bf16 %v1809_v9, %v1808_v7  ;;  %v1520_v9 = vld [vmem:[%s4384_s7 + $0x20] sm:$0xff] }
 0x182   :  { %2811 = vmatpush3.bf16.msra.mxu0 %v2810_v11  ;;  %v705_v16 = vmax.f32 %v674_v25, 0.0  ;;  %v1810_v11 = vld [vmem:[%s4382_s5 + $0x120] sm:$0xff]  ;;  %v1811_v25 = vld [vmem:[%s4382_s5 + $0x128] sm:$0xff] }
 0x183   :  { %v678_v13 = vpop.f32.mrb[70].mxu0  ;;  %2812 = vmatprep.subr.bf16.mxu0 %v3083_v8  ;;  %v2873_v12 = vpack.c.bf16 %v1811_v25, %v1810_v11  ;;  %v1844_v11 = vld [vmem:[%s4382_s5 + $0x230] sm:$0xff]  ;;  %v1845_v25 = vld [vmem:[%s4382_s5 + $0x238] sm:$0xff] }
 0x184   :  { %v679_v28 = vadd.f32 %v678_v13, %v3781_v37  ;;  %v2319_v14 = vpop.f32.mrb[71].mxu0  ;;  %v1812_v13 = vld [vmem:[%s4382_s5 + $0x130] sm:$0xff] }
 0x186   :  { %v706_v17 = vmax.f32 %v679_v28, 0.0  ;;  %v1813_v28 = vld [vmem:[%s4382_s5 + $0x138] sm:$0xff] }
 0x187   :  { %v683_v20 = vpop.f32.mrb[72].mxu0  ;;  %v2876_v14 = vpack.c.bf16 %v1813_v28, %v1812_v13  ;;  %v2924_v13 = vpack.c.bf16 %v1845_v25, %v1844_v11  ;;  %v1522_v28 = vld [vmem:[%s4384_s7 + $0x30] sm:$0xff]  ;;  %v1875_v11 = vld [vmem:[%s4382_s5 + $0x328] sm:$0xff] }
 0x188   :  { %v2813_v23 = vpack.c.bf16 %v706_v17, %v705_v16  ;;  %v684_v31 = vadd.f32 %v683_v20, %v3784_v43  ;;  %v2322_v24 = vpop.f32.mrb[73].mxu0  ;;  %v1814_v16 = vld [vmem:[%s4382_s5 + $0x140] sm:$0xff]  ;;  %v1815_v17 = vld [vmem:[%s4382_s5 + $0x148] sm:$0xff] }
 0x189   :  { %v2879_v20 = vpack.c.bf16 %v1815_v17, %v1814_v16  ;;  %v1846_v16 = vld [vmem:[%s4382_s5 + $0x240] sm:$0xff]  ;;  %v1847_v17 = vld [vmem:[%s4382_s5 + $0x248] sm:$0xff] }
 0x18a   :  { %2814 = vmatpush3.bf16.msra.mxu0 %v2813_v23  ;;  %v707_v29 = vmax.f32 %v684_v31, 0.0  ;;  %v1816_v23 = vld [vmem:[%s4382_s5 + $0x150] sm:$0xff]  ;;  %v1817_v31 = vld [vmem:[%s4382_s5 + $0x158] sm:$0xff] }
 0x18b   :  { %v688_v26 = vpop.f32.mrb[74].mxu0  ;;  %2815 = vmatprep.subr.bf16.mxu0 %v3083_v8  ;;  %v2882_v24 = vpack.c.bf16 %v1817_v31, %v1816_v23  ;;  %v2927_v23 = vpack.c.bf16 %v1847_v17, %v1846_v16  ;;  %v1524_v31 = vld [vmem:[%s4384_s7 + $0x40] sm:$0xff]  ;;  %v1879_v16 = vld [vmem:[%s4382_s5 + $0x348] sm:$0xff] }
 0x18c   :  { %v689_v34 = vadd.f32 %v688_v26, %v3787_v51  ;;  %v2325_v27 = vpop.f32.mrb[75].mxu0  ;;  %v811_v51 = vld [vmem:[%s4382_s5 + $0x70] sm:$0xff]  ;;  %v1818_v26 = vld [vmem:[%s4382_s5 + $0x160] sm:$0xff] }
 0x18d   :  { %v2840_v40 = vpack.c.bf16 %v812_v39, %v811_v51  ;;  %v1825_v51 = vld [vmem:[%s4382_s5 + $0x198] sm:$0xff] }
 0x18e   :  { %v708_v32 = vmax.f32 %v689_v34, 0.0  ;;  %v1819_v34 = vld [vmem:[%s4382_s5 + $0x168] sm:$0xff] }
 0x18f   :  { %v693_v15 = vpop.f32.mrb[76].mxu0  ;;  %2841 = vmatpush3.bf16.msra.mxu1 %v2840_v40  ;;  %v2885_v27 = vpack.c.bf16 %v1819_v34, %v1818_v26  ;;  %v1826_v40 = vld [vmem:[%s4382_s5 + $0x1a0] sm:$0xff]  ;;  %v1848_v26 = vld [vmem:[%s4382_s5 + $0x250] sm:$0xff]  ;;  %v1849_v34 = vld [vmem:[%s4382_s5 + $0x258] sm:$0xff] }
 0x190   :  { %v2816_v33 = vpack.c.bf16 %v708_v32, %v707_v29  ;;  %v694_v37 = vadd.f32 %v693_v15, %v3790_v41  ;;  %v2328_v35 = vpop.f32.mrb[77].mxu0  ;;  %2842 = vmatprep.subr.bf16.mxu1 %v3083_v8  ;;  %v1790_v41 = vld [vmem:[%s4382_s5 + $0x80] sm:$0xff]  ;;  %v1820_v29 = vld [vmem:[%s4382_s5 + $0x170] sm:$0xff]  ;;  %v1821_v32 = vld [vmem:[%s4382_s5 + $0x178] sm:$0xff] }
 0x191   :  { %v2843_v63 = vpack.c.bf16 %v1791_v57, %v1790_v41  ;;  %v2888_v15 = vpack.c.bf16 %v1821_v32, %v1820_v29  ;;  %v1827_v41 = vld [vmem:[%s4382_s5 + $0x1a8] sm:$0xff]  ;;  %v2930_v29 = vpack.c.bf16 %v1849_v34, %v1848_v26  ;;  %v1526_v32 = vld [vmem:[%s4384_s7 + $0x50] sm:$0xff] }
 0x192   :  { %2817 = vmatpush3.bf16.msra.mxu0 %v2816_v33  ;;  %v709_v43 = vmax.f32 %v694_v37, 0.0  ;;  %v1822_v33 = vld [vmem:[%s4382_s5 + $0x180] sm:$0xff]  ;;  %v1823_v37 = vld [vmem:[%s4382_s5 + $0x188] sm:$0xff]  ;;  %v2897_v57 = vpack.c.bf16 %v1827_v41, %v1826_v40  ;;  %v1853_v40 = vld [vmem:[%s4382_s5 + $0x278] sm:$0xff] }
 0x193   :  { %2353 = vmatprep.subr.mxu0 %v3085_v22  ;;  %v2891_v35 = vpack.c.bf16 %v1823_v37, %v1822_v33  ;;  %v1850_v33 = vld [vmem:[%s4382_s5 + $0x260] sm:$0xff]  ;;  %v1851_v37 = vld [vmem:[%s4382_s5 + $0x268] sm:$0xff] }
 0x194   :  { %v1883_v26 = vld [vmem:[%s4382_s5 + $0x368] sm:$0xff] }
 0x196   :  { %2354 = vmatpush3.msk.msra.mxu0 %vm721_vm3, %v709_v43 }
 0x197   :  { %2356 = vmatmul.mubr.msk.f32.vlgmr.msra.gmra.mrb[78].mxu0 %vm717_vm4, %v710_v36  ;;  %3010 = vmatprep.subr.bf16.mxu0 %v3083_v8  ;;  %v1824_v36 = vld [vmem:[%s4382_s5 + $0x190] sm:$0xff] }
 0x198   :  { %2670 = vmatprep.mubr.msk.f32.mxu0 %vm3084_vm0, %v3085_v22  ;;  %v2894_v39 = vpack.c.bf16 %v1825_v51, %v1824_v36  ;;  %v1528_v36 = vld [vmem:[%s4384_s7 + $0x60] sm:$0xff]  ;;  %v1529_v51 = vld [vmem:[%s4384_s7 + $0x68] sm:$0xff] }
 0x199   :  { %v3029_v41 = vpack.c.bf16 %v1529_v51, %v1528_v36  ;;  %v1889_v36 = vld [vmem:[%s4382_s5 + $0x398] sm:$0xff] }
 0x26a   :  { %v791_v42 = vpop.f32.mrb[78].mxu0 }
 0x26b   :  { %v792_v45 = vadd.f32 %v791_v42, %v715_v18  ;;  %v2357_v46 = vpop.f32.mrb[79].mxu0  ;;  %v1828_v18 = vld [vmem:[%s4382_s5 + $0x1b0] sm:$0xff]  ;;  %v1829_v42 = vld [vmem:[%s4382_s5 + $0x1b8] sm:$0xff] }
 0x26c   :  { %v1830_v46 = vld [vmem:[%s4382_s5 + $0x1c0] sm:$0xff] }
 0x26d   :  { %v3830_v47 = vmax.f32 %v792_v45, 0.0  ;;  %v2900_v45 = vpack.c.bf16 %v1829_v42, %v1828_v18  ;;  %v1854_v18 = vld [vmem:[%s4382_s5 + $0x280] sm:$0xff]  ;;  %v1855_v42 = vld [vmem:[%s4382_s5 + $0x288] sm:$0xff] }
 0x26f   :  { %2391 = vmatmul.mubr.f32.vlgmr.msra.gmra.mrb[0].mxu1 %v3830_v47  ;;  %v902_v5 = vrot.slane %v3830_v47, 1  ;;  %v992_v43 = vrot.slane %v3830_v47, 2  ;;  %v1082_v60 = vrot.slane %v3830_v47, 3 }
 0x270   :  { %2844 = vmatpush3.bf16.msra.mxu1 %v2843_v63  ;;  %2425 = vmatprep.mubr.msk.f32.mxu1 %vm3084_vm0, %v3085_v22  ;;  %v1831_v63 = vld [vmem:[%s4382_s5 + $0x1c8] sm:$0xff] }
 0x271   :  { %2845 = vmatprep.subr.bf16.mxu1 %v3083_v8  ;;  %v2903_v48 = vpack.c.bf16 %v1831_v63, %v1830_v46  ;;  %v1172_v46 = vrot.slane %v3830_v47, 4  ;;  %v1856_v63 = vld [vmem:[%s4382_s5 + $0x290] sm:$0xff] }
 0x274   :  { %2847 = vmatpush3.bf16.msra.mxu1 %v2846_v50  ;;  %v1833_v50 = vld [vmem:[%s4382_s5 + $0x1d8] sm:$0xff] }
 0x275   :  { %2848 = vmatprep.subr.bf16.mxu1 %v3083_v8  ;;  %v2906_v52 = vpack.c.bf16 %v1833_v50, %v1832_v49  ;;  %v1858_v50 = vld [vmem:[%s4382_s5 + $0x2a0] sm:$0xff] }
 0x278   :  { %2850 = vmatpush3.bf16.msra.mxu1 %v2849_v53  ;;  %v1835_v53 = vld [vmem:[%s4382_s5 + $0x1e8] sm:$0xff] }
 0x279   :  { %2851 = vmatprep.subr.bf16.mxu1 %v3083_v8  ;;  %v2909_v54 = vpack.c.bf16 %v1835_v53, %v1834_v6  ;;  %v1860_v53 = vld [vmem:[%s4382_s5 + $0x2b0] sm:$0xff] }
 0x27c   :  { %2853 = vmatpush3.bf16.msra.mxu1 %v2852_v55  ;;  %v1837_v55 = vld [vmem:[%s4382_s5 + $0x1f8] sm:$0xff] }
 0x27d   :  { %2854 = vmatprep.subr.bf16.mxu1 %v3083_v8  ;;  %v2912_v56 = vpack.c.bf16 %v1837_v55, %v1836_v19  ;;  %v1862_v55 = vld [vmem:[%s4382_s5 + $0x2c0] sm:$0xff] }
 0x280   :  { %2856 = vmatpush3.bf16.msra.mxu1 %v2855_v30  ;;  %v1839_v30 = vld [vmem:[%s4382_s5 + $0x208] sm:$0xff] }
 0x281   :  { %2857 = vmatprep.subr.bf16.mxu1 %v3083_v8  ;;  %v2915_v59 = vpack.c.bf16 %v1839_v30, %v1838_v58  ;;  %v1864_v30 = vld [vmem:[%s4382_s5 + $0x2d0] sm:$0xff] }
 0x284   :  { %2859 = vmatpush3.bf16.msra.mxu1 %v2858_v38  ;;  %v1840_v38 = vld [vmem:[%s4382_s5 + $0x210] sm:$0xff] }
 0x285   :  { %2860 = vmatprep.subr.bf16.mxu1 %v3083_v8  ;;  %v2918_v62 = vpack.c.bf16 %v1841_v61, %v1840_v38  ;;  %v1866_v38 = vld [vmem:[%s4382_s5 + $0x2e0] sm:$0xff]  ;;  %v1867_v61 = vld [vmem:[%s4382_s5 + $0x2e8] sm:$0xff] }
 0x288   :  { %2862 = vmatpush3.bf16.msra.mxu1 %v2861_v0  ;;  %v1516_v0 = vld [vmem:[%s4384_s7] sm:$0xff] }
 0x289   :  { %2863 = vmatprep.subr.bf16.mxu1 %v3083_v8  ;;  %v3011_v4 = vpack.c.bf16 %v1517_v1, %v1516_v0  ;;  %v1868_v0 = vld [vmem:[%s4382_s5 + $0x2f0] sm:$0xff]  ;;  %v1869_v1 = vld [vmem:[%s4382_s5 + $0x2f8] sm:$0xff] }
 0x28b   :  { %3012 = vmatpush3.bf16.msra.mxu0 %v3011_v4 }
 0x28c   :  { %2865 = vmatpush3.bf16.msra.mxu1 %v2864_v44  ;;  %v1842_v44 = vld [vmem:[%s4382_s5 + $0x220] sm:$0xff]  ;;  %3013 = vmatprep.subr.bf16.mxu0 %v3083_v8 }
 0x28d   :  { %2866 = vmatprep.subr.bf16.mxu1 %v3083_v8  ;;  %v2921_v7 = vpack.c.bf16 %v1843_v3, %v1842_v44  ;;  %v1870_v44 = vld [vmem:[%s4382_s5 + $0x300] sm:$0xff]  ;;  %v1871_v3 = vld [vmem:[%s4382_s5 + $0x308] sm:$0xff] }
 0x28e   :  { %v2963_v4 = vpack.c.bf16 %v1871_v3, %v1870_v44  ;;  %v1603_v44 = vld [vmem:[%s4387_s9] sm:$0xff]  ;;  %v1604_v3 = vld [vmem:[%s4387_s9 + $0x8] sm:$0xff] }
 0x28f   :  { %2426 = vmatmul.mubr.f32.vlgmr.msra.gmra.mrb[0].mxu1 %v902_v5 }
 0x290   :  { %2868 = vmatpush3.bf16.msra.mxu1 %v2867_v21  ;;  %2460 = vmatprep.mubr.msk.f32.mxu1 %vm3084_vm0, %v3085_v22  ;;  %v1519_v21 = vld [vmem:[%s4384_s7 + $0x18] sm:$0xff] }
 0x291   :  { %2869 = vmatprep.subr.bf16.mxu1 %v3083_v8  ;;  %v3014_v5 = vpack.c.bf16 %v1519_v21, %v1518_v2  ;;  %v2960_v2 = vpack.c.bf16 %v1869_v1, %v1868_v0  ;;  %v1262_v21 = vrot.slane %v3830_v47, 5 }
 0x293   :  { %3015 = vmatpush3.bf16.msra.mxu0 %v3014_v5  ;;  %v1872_v5 = vld [vmem:[%s4382_s5 + $0x310] sm:$0xff] }
 0x294   :  { %2871 = vmatpush3.bf16.msra.mxu1 %v2870_v10  ;;  %v1521_v10 = vld [vmem:[%s4384_s7 + $0x28] sm:$0xff]  ;;  %3016 = vmatprep.subr.bf16.mxu0 %v3083_v8 }
 0x295   :  { %2872 = vmatprep.subr.bf16.mxu1 %v3083_v8 }
 0x298   :  { %2874 = vmatpush3.bf16.msra.mxu1 %v2873_v12  ;;  %v3017_v12 = vpack.c.bf16 %v1521_v10, %v1520_v9  ;;  %v1874_v10 = vld [vmem:[%s4382_s5 + $0x320] sm:$0xff] }
 0x299   :  { %2875 = vmatprep.subr.bf16.mxu1 %v3083_v8  ;;  %v2969_v25 = vpack.c.bf16 %v1875_v11, %v1874_v10  ;;  %v1605_v10 = vld [vmem:[%s4387_s9 + $0x10] sm:$0xff]  ;;  %v1606_v11 = vld [vmem:[%s4387_s9 + $0x18] sm:$0xff] }
 0x29a   :  { %3018 = vmatpush3.bf16.msra.mxu0 %v3017_v12  ;;  %v1876_v12 = vld [vmem:[%s4382_s5 + $0x330] sm:$0xff] }
 0x29b   :  { %3019 = vmatprep.subr.bf16.mxu0 %v3083_v8 }
 0x29c   :  { %2877 = vmatpush3.bf16.msra.mxu1 %v2876_v14  ;;  %v1523_v14 = vld [vmem:[%s4384_s7 + $0x38] sm:$0xff] }
 0x29d   :  { %2878 = vmatprep.subr.bf16.mxu1 %v3083_v8 }
 0x2a0   :  { %2880 = vmatpush3.bf16.msra.mxu1 %v2879_v20  ;;  %v3020_v20 = vpack.c.bf16 %v1523_v14, %v1522_v28  ;;  %v1878_v14 = vld [vmem:[%s4382_s5 + $0x340] sm:$0xff] }
 0x2a1   :  { %2881 = vmatprep.subr.bf16.mxu1 %v3083_v8  ;;  %v2975_v17 = vpack.c.bf16 %v1879_v16, %v1878_v14  ;;  %v1609_v14 = vld [vmem:[%s4387_s9 + $0x30] sm:$0xff] }
 0x2a2   :  { %3021 = vmatpush3.bf16.msra.mxu0 %v3020_v20  ;;  %v1880_v20 = vld [vmem:[%s4382_s5 + $0x350] sm:$0xff] }
 0x2a3   :  { %3022 = vmatprep.subr.bf16.mxu0 %v3083_v8 }
 0x2a4   :  { %2883 = vmatpush3.bf16.msra.mxu1 %v2882_v24  ;;  %v1525_v24 = vld [vmem:[%s4384_s7 + $0x48] sm:$0xff] }
 0x2a5   :  { %2884 = vmatprep.subr.bf16.mxu1 %v3083_v8 }
 0x2a8   :  { %2886 = vmatpush3.bf16.msra.mxu1 %v2885_v27  ;;  %v3023_v27 = vpack.c.bf16 %v1525_v24, %v1524_v31  ;;  %v1882_v24 = vld [vmem:[%s4382_s5 + $0x360] sm:$0xff] }
 0x2a9   :  { %2887 = vmatprep.subr.bf16.mxu1 %v3083_v8  ;;  %v2981_v34 = vpack.c.bf16 %v1883_v26, %v1882_v24  ;;  %v1614_v24 = vld [vmem:[%s4387_s9 + $0x58] sm:$0xff] }
 0x2aa   :  { %3024 = vmatpush3.bf16.msra.mxu0 %v3023_v27  ;;  %v1884_v27 = vld [vmem:[%s4382_s5 + $0x370] sm:$0xff] }
 0x2ab   :  { %3025 = vmatprep.subr.bf16.mxu0 %v3083_v8 }
 0x2ac   :  { %2889 = vmatpush3.bf16.msra.mxu1 %v2888_v15  ;;  %v1527_v15 = vld [vmem:[%s4384_s7 + $0x58] sm:$0xff] }
 0x2ad   :  { %2890 = vmatprep.subr.bf16.mxu1 %v3083_v8 }
 0x2af   :  { %2461 = vmatmul.mubr.f32.vlgmr.msra.gmra.mrb[0].mxu1 %v992_v43  ;;  %v2933_v43 = vpack.c.bf16 %v1851_v37, %v1850_v33  ;;  %v1887_v33 = vld [vmem:[%s4382_s5 + $0x388] sm:$0xff] }
 0x2b0   :  { %2892 = vmatpush3.bf16.msra.mxu1 %v2891_v35  ;;  %2495 = vmatprep.mubr.msk.f32.mxu1 %vm3084_vm0, %v3085_v22  ;;  %v3026_v35 = vpack.c.bf16 %v1527_v15, %v1526_v32  ;;  %v1886_v15 = vld [vmem:[%s4382_s5 + $0x380] sm:$0xff] }
 0x2b1   :  { %2893 = vmatprep.subr.bf16.mxu1 %v3083_v8  ;;  %v2987_v37 = vpack.c.bf16 %v1887_v33, %v1886_v15  ;;  %v1618_v15 = vld [vmem:[%s4387_s9 + $0x78] sm:$0xff] }
 0x2b2   :  { %3027 = vmatpush3.bf16.msra.mxu0 %v3026_v35  ;;  %v1352_v35 = vrot.slane %v3830_v47, 6 }
 0x2b3   :  { %3028 = vmatprep.subr.bf16.mxu0 %v3083_v8 }
 0x2b4   :  { %2895 = vmatpush3.bf16.msra.mxu1 %v2894_v39  ;;  %v1852_v39 = vld [vmem:[%s4382_s5 + $0x270] sm:$0xff] }
 0x2b5   :  { %2896 = vmatprep.subr.bf16.mxu1 %v3083_v8 }
 0x2b6   :  { %3030 = vmatpush3.bf16.msra.mxu0 %v3029_v41 }
 0x2b7   :  { %3031 = vmatprep.subr.bf16.mxu0 %v3083_v8 }
 0x2b8   :  { %2898 = vmatpush3.bf16.msra.mxu1 %v2897_v57  ;;  %v2936_v57 = vpack.c.bf16 %v1853_v40, %v1852_v39  ;;  %v1890_v39 = vld [vmem:[%s4382_s5 + $0x3a0] sm:$0xff]  ;;  %v1891_v40 = vld [vmem:[%s4382_s5 + $0x3a8] sm:$0xff] }
 0x2b9   :  { %2899 = vmatprep.subr.bf16.mxu1 %v3083_v8  ;;  %v2993_v41 = vpack.c.bf16 %v1891_v40, %v1890_v39 }
 0x2bc   :  { %2901 = vmatpush3.bf16.msra.mxu1 %v2900_v45  ;;  %v2939_v45 = vpack.c.bf16 %v1855_v42, %v1854_v18  ;;  %v1893_v18 = vld [vmem:[%s4382_s5 + $0x3b8] sm:$0xff] }
 0x2bd   :  { %2902 = vmatprep.subr.bf16.mxu1 %v3083_v8 }
 0x2c0   :  { %2904 = vmatpush3.bf16.msra.mxu1 %v2903_v48  ;;  %v1857_v48 = vld [vmem:[%s4382_s5 + $0x298] sm:$0xff] }
 0x2c1   :  { %2905 = vmatprep.subr.bf16.mxu1 %v3083_v8  ;;  %v2942_v49 = vpack.c.bf16 %v1857_v48, %v1856_v63  ;;  %v1896_v48 = vld [vmem:[%s4382_s5 + $0x3d0] sm:$0xff] }
 0x2c4   :  { %2907 = vmatpush3.bf16.msra.mxu1 %v2906_v52  ;;  %v1859_v52 = vld [vmem:[%s4382_s5 + $0x2a8] sm:$0xff] }
 0x2c5   :  { %2908 = vmatprep.subr.bf16.mxu1 %v3083_v8  ;;  %v2945_v6 = vpack.c.bf16 %v1859_v52, %v1858_v50  ;;  %v1898_v52 = vld [vmem:[%s4382_s5 + $0x3e0] sm:$0xff] }
 0x2c8   :  { %2910 = vmatpush3.bf16.msra.mxu1 %v2909_v54  ;;  %v1861_v54 = vld [vmem:[%s4382_s5 + $0x2b8] sm:$0xff] }
 0x2c9   :  { %2911 = vmatprep.subr.bf16.mxu1 %v3083_v8  ;;  %v2948_v19 = vpack.c.bf16 %v1861_v54, %v1860_v53  ;;  %v1900_v54 = vld [vmem:[%s4382_s5 + $0x3f0] sm:$0xff] }
 0x2cc   :  { %2913 = vmatpush3.bf16.msra.mxu1 %v2912_v56  ;;  %v1863_v56 = vld [vmem:[%s4382_s5 + $0x2c8] sm:$0xff] }
 0x2cd   :  { %2914 = vmatprep.subr.bf16.mxu1 %v3083_v8  ;;  %v2951_v58 = vpack.c.bf16 %v1863_v56, %v1862_v55  ;;  %v1442_v56 = vrot.slane %v3830_v47, 7  ;;  %v1619_v47 = vld [vmem:[%s4386_s10] sm:$0xff] }
 0x2cf   :  { %2496 = vmatmul.mubr.f32.vlgmr.msra.gmra.mrb[0].mxu1 %v1082_v60 }
 0x2d0   :  { %2916 = vmatpush3.bf16.msra.mxu1 %v2915_v59  ;;  %2530 = vmatprep.mubr.msk.f32.mxu1 %vm3084_vm0, %v3085_v22  ;;  %v1865_v59 = vld [vmem:[%s4382_s5 + $0x2d8] sm:$0xff] }
 0x2d1   :  { %2917 = vmatprep.subr.bf16.mxu1 %v3083_v8  ;;  %v2954_v60 = vpack.c.bf16 %v1865_v59, %v1864_v30  ;;  %v1531_v30 = vld [vmem:[%s4384_s7 + $0x78] sm:$0xff] }
 0x2d4   :  { %2919 = vmatpush3.bf16.msra.mxu1 %v2918_v62  ;;  %v2957_v62 = vpack.c.bf16 %v1867_v61, %v1866_v38  ;;  %v1620_v38 = vld [vmem:[%s4386_s10 + $0x8] sm:$0xff] }
 0x2d5   :  { %2920 = vmatprep.subr.bf16.mxu1 %v3083_v8  ;;  %v3035_v1 = vpack.c.bf16 %v1620_v38, %v1619_v47 }
 0x2d8   :  { %2922 = vmatpush3.bf16.msra.mxu1 %v2921_v7  ;;  %v1873_v7 = vld [vmem:[%s4382_s5 + $0x318] sm:$0xff] }
 0x2d9   :  { %2923 = vmatprep.subr.bf16.mxu1 %v3083_v8  ;;  %v2966_v9 = vpack.c.bf16 %v1873_v7, %v1872_v5  ;;  %v3038_v5 = vpack.c.bf16 %v1604_v3, %v1603_v44 }
 0x2dc   :  { %2925 = vmatpush3.bf16.msra.mxu1 %v2924_v13  ;;  %v1877_v13 = vld [vmem:[%s4382_s5 + $0x338] sm:$0xff] }
 0x2dd   :  { %2926 = vmatprep.subr.bf16.mxu1 %v3083_v8  ;;  %v2972_v28 = vpack.c.bf16 %v1877_v13, %v1876_v12  ;;  %v1607_v12 = vld [vmem:[%s4387_s9 + $0x20] sm:$0xff]  ;;  %v1608_v13 = vld [vmem:[%s4387_s9 + $0x28] sm:$0xff] }
 0x2e0   :  { %2928 = vmatpush3.bf16.msra.mxu1 %v2927_v23  ;;  %v1881_v23 = vld [vmem:[%s4382_s5 + $0x358] sm:$0xff] }
 0x2e1   :  { %2929 = vmatprep.subr.bf16.mxu1 %v3083_v8  ;;  %v2978_v31 = vpack.c.bf16 %v1881_v23, %v1880_v20  ;;  %v1612_v20 = vld [vmem:[%s4387_s9 + $0x48] sm:$0xff] }
 0x2e4   :  { %2931 = vmatpush3.bf16.msra.mxu1 %v2930_v29  ;;  %v1885_v29 = vld [vmem:[%s4382_s5 + $0x378] sm:$0xff] }
 0x2e5   :  { %2932 = vmatprep.subr.bf16.mxu1 %v3083_v8  ;;  %v2984_v32 = vpack.c.bf16 %v1885_v29, %v1884_v27  ;;  %v1616_v27 = vld [vmem:[%s4387_s9 + $0x68] sm:$0xff] }
 0x2e8   :  { %2934 = vmatpush3.bf16.msra.mxu1 %v2933_v43  ;;  %v1888_v43 = vld [vmem:[%s4382_s5 + $0x390] sm:$0xff] }
 0x2e9   :  { %2935 = vmatprep.subr.bf16.mxu1 %v3083_v8  ;;  %v2990_v51 = vpack.c.bf16 %v1889_v36, %v1888_v43  ;;  %v1765_v36 = vld [vmem:[%s4390_s11] sm:$0x1] }
 0x2ec   :  { %2937 = vmatpush3.bf16.msra.mxu1 %v2936_v57  ;;  %v1892_v57 = vld [vmem:[%s4382_s5 + $0x3b0] sm:$0xff] }
 0x2ed   :  { %2938 = vmatprep.subr.bf16.mxu1 %v3083_v8  ;;  %v2996_v42 = vpack.c.bf16 %v1893_v18, %v1892_v57 }
 0x2ef   :  { %2531 = vmatmul.mubr.f32.vlgmr.msra.gmra.mrb[0].mxu1 %v1172_v46  ;;  %v1895_v46 = vld [vmem:[%s4382_s5 + $0x3c8] sm:$0xff] }
 0x2f0   :  { %2940 = vmatpush3.bf16.msra.mxu1 %v2939_v45  ;;  %2565 = vmatprep.mubr.msk.f32.mxu1 %vm3084_vm0, %v3085_v22  ;;  %v1894_v45 = vld [vmem:[%s4382_s5 + $0x3c0] sm:$0xff] }
 0x2f1   :  { %2941 = vmatprep.subr.bf16.mxu1 %v3083_v8  ;;  %v2999_v63 = vpack.c.bf16 %v1895_v46, %v1894_v45 }
 0x2f4   :  { %2943 = vmatpush3.bf16.msra.mxu1 %v2942_v49  ;;  %v1897_v49 = vld [vmem:[%s4382_s5 + $0x3d8] sm:$0xff] }
 0x2f5   :  { %2944 = vmatprep.subr.bf16.mxu1 %v3083_v8  ;;  %v3002_v50 = vpack.c.bf16 %v1897_v49, %v1896_v48 }
 0x2f8   :  { %2946 = vmatpush3.bf16.msra.mxu1 %v2945_v6  ;;  %v1899_v6 = vld [vmem:[%s4382_s5 + $0x3e8] sm:$0xff] }
 0x2f9   :  { %2947 = vmatprep.subr.bf16.mxu1 %v3083_v8  ;;  %v3005_v53 = vpack.c.bf16 %v1899_v6, %v1898_v52 }
 0x2fc   :  { %2949 = vmatpush3.bf16.msra.mxu1 %v2948_v19  ;;  %v1901_v19 = vld [vmem:[%s4382_s5 + $0x3f8] sm:$0xff] }
 0x2fd   :  { %2950 = vmatprep.subr.bf16.mxu1 %v3083_v8  ;;  %v3008_v55 = vpack.c.bf16 %v1901_v19, %v1900_v54 }
 0x300   :  { %2952 = vmatpush3.bf16.msra.mxu1 %v2951_v58  ;;  %v1530_v58 = vld [vmem:[%s4384_s7 + $0x70] sm:$0xff] }
 0x301   :  { %2953 = vmatprep.subr.bf16.mxu1 %v3083_v8  ;;  %v3032_v59 = vpack.c.bf16 %v1531_v30, %v1530_v58 }
 0x303   :  { %3033 = vmatpush3.bf16.msra.mxu0 %v3032_v59 }
 0x304   :  { %2955 = vmatpush3.bf16.msra.mxu1 %v2954_v60  ;;  %3034 = vmatprep.subr.bf16.mxu0 %v3083_v8  ;;  %v796_v60 = vld [vmem:[%s4385_s6] sm:$0x1] }
 0x305   :  { %2956 = vmatprep.subr.bf16.mxu1 %v3083_v8 }
 0x308   :  { %2958 = vmatpush3.bf16.msra.mxu1 %v2957_v62 }
 0x309   :  { %2959 = vmatprep.subr.bf16.mxu1 %v3083_v8 }
 0x30c   :  { %2961 = vmatpush3.bf16.msra.mxu1 %v2960_v2 }
 0x30d   :  { %2962 = vmatprep.subr.bf16.mxu1 %v3083_v8 }
 0x30f   :  { %2566 = vmatmul.mubr.f32.vlgmr.msra.gmra.mrb[0].mxu1 %v1262_v21 }
 0x310   :  { %2964 = vmatpush3.bf16.msra.mxu1 %v2963_v4  ;;  %2600 = vmatprep.mubr.msk.f32.mxu1 %vm3084_vm0, %v3085_v22  ;;  %v1532_v4 = vld [vmem:[%s4388_s8] sm:$0x1] }
 0x311   :  { %2965 = vmatprep.subr.bf16.mxu1 %v3083_v8 }
 0x314   :  { %2967 = vmatpush3.bf16.msra.mxu1 %v2966_v9 }
 0x315   :  { %2968 = vmatprep.subr.bf16.mxu1 %v3083_v8 }
 0x318   :  { %2970 = vmatpush3.bf16.msra.mxu1 %v2969_v25  ;;  %v3041_v25 = vpack.c.bf16 %v1606_v11, %v1605_v10 }
 0x319   :  { %2971 = vmatprep.subr.bf16.mxu1 %v3083_v8 }
 0x31c   :  { %2973 = vmatpush3.bf16.msra.mxu1 %v2972_v28  ;;  %v3044_v28 = vpack.c.bf16 %v1608_v13, %v1607_v12 }
 0x31d   :  { %2974 = vmatprep.subr.bf16.mxu1 %v3083_v8 }
 0x320   :  { %2976 = vmatpush3.bf16.msra.mxu1 %v2975_v17  ;;  %v1611_v17 = vld [vmem:[%s4387_s9 + $0x40] sm:$0xff] }
 0x321   :  { %2977 = vmatprep.subr.bf16.mxu1 %v3083_v8  ;;  %v3050_v23 = vpack.c.bf16 %v1612_v20, %v1611_v17 }
 0x324   :  { %2979 = vmatpush3.bf16.msra.mxu1 %v2978_v31  ;;  %v1613_v31 = vld [vmem:[%s4387_s9 + $0x50] sm:$0xff] }
 0x325   :  { %2980 = vmatprep.subr.bf16.mxu1 %v3083_v8  ;;  %v3053_v26 = vpack.c.bf16 %v1614_v24, %v1613_v31 }
 0x328   :  { %2982 = vmatpush3.bf16.msra.mxu1 %v2981_v34  ;;  %v1615_v34 = vld [vmem:[%s4387_s9 + $0x60] sm:$0xff] }
 0x329   :  { %2983 = vmatprep.subr.bf16.mxu1 %v3083_v8  ;;  %v3056_v29 = vpack.c.bf16 %v1616_v27, %v1615_v34 }
 0x32c   :  { %2985 = vmatpush3.bf16.msra.mxu1 %v2984_v32  ;;  %v1617_v32 = vld [vmem:[%s4387_s9 + $0x70] sm:$0xff] }
 0x32d   :  { %2986 = vmatprep.subr.bf16.mxu1 %v3083_v8  ;;  %v3059_v33 = vpack.c.bf16 %v1618_v15, %v1617_v32 }
 0x32f   :  { %2601 = vmatmul.mubr.f32.vlgmr.msra.gmra.mrb[0].mxu1 %v1352_v35 }
 0x330   :  { %2988 = vmatpush3.bf16.msra.mxu1 %v2987_v37  ;;  %2635 = vmatprep.mubr.msk.f32.mxu1 %vm3084_vm0, %v3085_v22 }
 0x331   :  { %2989 = vmatprep.subr.bf16.mxu1 %v3083_v8 }
 0x334   :  { %2991 = vmatpush3.bf16.msra.mxu1 %v2990_v51 }
 0x335   :  { %2992 = vmatprep.subr.bf16.mxu1 %v3083_v8 }
 0x338   :  { %2994 = vmatpush3.bf16.msra.mxu1 %v2993_v41 }
 0x339   :  { %2995 = vmatprep.subr.bf16.mxu1 %v3083_v8 }
 0x33c   :  { %2997 = vmatpush3.bf16.msra.mxu1 %v2996_v42 }
 0x33d   :  { %2998 = vmatprep.subr.bf16.mxu1 %v3083_v8 }
 0x340   :  { %3000 = vmatpush3.bf16.msra.mxu1 %v2999_v63 }
 0x341   :  { %3001 = vmatprep.subr.bf16.mxu1 %v3083_v8 }
 0x344   :  { %3003 = vmatpush3.bf16.msra.mxu1 %v3002_v50 }
 0x345   :  { %3004 = vmatprep.subr.bf16.mxu1 %v3083_v8 }
 0x348   :  { %3006 = vmatpush3.bf16.msra.mxu1 %v3005_v53 }
 0x349   :  { %3007 = vmatprep.subr.bf16.mxu1 %v3083_v8 }
 0x34c   :  { %3009 = vmatpush3.bf16.msra.mxu1 %v3008_v55 }
 0x34f   :  { %2636 = vmatmul.mubr.f32.vlgmr.msra.gmra.mrb[0].mxu1 %v1442_v56 }
 0x422   :  { %v1510_v61 = vpop.f32.mrb[0].mxu1 }
 0x423   :  { %v3061_v62 = vadd.f32 %v1510_v61, %v796_v60  ;;  %v2637_v0 = vpop.f32.mrb[1].mxu1 }
 0x425   :  { %v1515_v2 = vmax.f32 %v3061_v62, 0.0 }
 0x427   :  { %2671 = vmatmul.mubr.f32.vlgmr.msra.gmra.mrb[80].mxu0 %v1515_v2 }
 0x428   :  { %3036 = vmatpush3.bf16.msra.mxu0 %v3035_v1  ;;  %2677 = vmatprep.mubr.msk.f32.mxu0 %vm3084_vm0, %v3085_v22 }
 0x429   :  { %3037 = vmatprep.subr.bf16.mxu0 %v3083_v8 }
 0x4fa   :  { %v1599_v21 = vpop.f32.mrb[80].mxu0 }
 0x4fb   :  { %v1600_v7 = vadd.f32 %v1599_v21, %v1532_v4  ;;  %v2672_v9 = vpop.f32.mrb[81].mxu0 }
 0x4fd   :  { %1768 = vst.msk [vmem:[%s4389_s12] sm:$0x1] %vm1767_vm5, %v1600_v7  ;;  %2678 = vmatmul.mubr.msk.f32.vlgmr.msra.gmra.mrb[82].mxu0 %vm1621_vm6, %v1600_v7 }
 0x4fe   :  { %3039 = vmatpush3.bf16.msra.mxu0 %v3038_v5  ;;  %2712 = vmatprep.mubr.msk.f32.mxu0 %vm3084_vm0, %v3085_v22  ;;  %v1610_v22 = vld [vmem:[%s4387_s9 + $0x38] sm:$0xff] }
 0x4ff   :  { %3040 = vmatprep.subr.bf16.mxu0 %v3083_v8  ;;  %v3047_v16 = vpack.c.bf16 %v1610_v22, %v1609_v14 }
 0x502   :  { %3042 = vmatpush3.bf16.msra.mxu0 %v3041_v25 }
 0x503   :  { %3043 = vmatprep.subr.bf16.mxu0 %v3083_v8 }
 0x506   :  { %3045 = vmatpush3.bf16.msra.mxu0 %v3044_v28 }
 0x507   :  { %3046 = vmatprep.subr.bf16.mxu0 %v3083_v8 }
 0x50a   :  { %3048 = vmatpush3.bf16.msra.mxu0 %v3047_v16 }
 0x50b   :  { %3049 = vmatprep.subr.bf16.mxu0 %v3083_v8 }
 0x50e   :  { %3051 = vmatpush3.bf16.msra.mxu0 %v3050_v23 }
 0x50f   :  { %3052 = vmatprep.subr.bf16.mxu0 %v3083_v8 }
 0x512   :  { %3054 = vmatpush3.bf16.msra.mxu0 %v3053_v26 }
 0x513   :  { %3055 = vmatprep.subr.bf16.mxu0 %v3083_v8 }
 0x516   :  { %3057 = vmatpush3.bf16.msra.mxu0 %v3056_v29 }
 0x517   :  { %3058 = vmatprep.subr.bf16.mxu0 %v3083_v8 }
 0x51a   :  { %3060 = vmatpush3.bf16.msra.mxu0 %v3059_v33 }
 0x51d   :  { %2713 = vmatmul.mubr.f32.vlgmr.msra.gmra.mrb[84].mxu0 %v1515_v2 }
 0x5d0   :  { %v1691_v37 = vpop.f32.mrb[82].mxu0 }
 0x5d1   :  { %v2679_v35 = vpop.f32.mrb[83].mxu0 }
 0x5f0   :  { %v1761_v43 = vpop.f32.mrb[84].mxu0 }
 0x5f1   :  { %v1762_v51 = vadd.f32 %v1761_v43, %v1691_v37  ;;  %v2714_v39 = vpop.f32.mrb[85].mxu0 }
 0x5f3   :  { %v1766_v40 = vadd.f32 %v1765_v36, %v1762_v51 }
 0x5f5   :  { %1769 = vst.msk [vmem:[%s4389_s12 + $0x1] sm:$0x1] %vm1767_vm5, %v1766_v40 }

</bundles_post_ra>
